<compile_context>
chip_gen: v5e
topology: v5e:2x2
jax: 0.10.0
libtpu: 0.0.40
codegen_flags: <defaults>
</compile_context>

<pallas_src>
import functools

import numpy as np
import jax
import jax.numpy as jnp
from jax import lax
from jax.experimental import pallas as pl
from jax.experimental.pallas import tpu as pltpu

BN_EPS = 1e-5


def _interp_matrix(in_size, out_size):
    """(out_size, in_size) linear-interpolation matrix, align_corners=True."""
    a = np.zeros((out_size, in_size), np.float32)
    for i in range(out_size):
        if out_size == 1 or in_size == 1:
            src = 0.0
        else:
            src = i * (in_size - 1) / (out_size - 1)
        lo = int(np.floor(src))
        lo = min(max(lo, 0), in_size - 1)
        hi = min(lo + 1, in_size - 1)
        frac = src - lo
        a[i, lo] += 1.0 - frac
        a[i, hi] += frac
    return a


def _crop_up_kernel(x_ref, sam_ref, upop_ref, w1_ref, s1_ref, b1_ref,
                    g1_ref, e2_ref, w2_ref, s2_ref, b2_ref, f_ref,
                    o_ref, *, dims):
    """Fused upsample -> conv1+BN+ReLU -> crop -> concat -> conv2+BN+ReLU."""
    cl, cs, cm, cout, th, tw, wp1, wp2, p0 = dims
    f32 = jnp.float32
    hi = lax.Precision.HIGHEST
    span1 = th * wp1      # conv1 evaluated on a contiguous flat output range
    span2 = th * wp2

    def mm(a, b):
        return jnp.dot(a, b, precision=hi, preferred_element_type=f32)

    # 1) Bilinear upsample (align_corners=True) of all low-res channels, with
    #    conv1's zero padding and the row-major flatten folded into a single
    #    constant operator -> one MXU matmul, result (cl, hp1*wp1) flat planes.
    ups = mm(x_ref[0].astype(f32), upop_ref[...])

    # 2) conv1 (3x3, pad=1), restricted to the center-crop window: the (dy,dx)
    #    window shift is a constant offset in the flat layout, so im2col is 9
    #    contiguous slices stacked on the sublane axis, then one matmul.
    p1 = jnp.concatenate(
        [ups[:, p0 + dy * wp1 + dx: p0 + dy * wp1 + dx + span1]
         for dy in range(3) for dx in range(3)], axis=0)            # (9*cl, span1)
    r1 = mm(w1_ref[...], p1)                                        # (cm, span1)
    r1 = jnp.maximum(r1 * s1_ref[...] + b1_ref[...], 0.0)           # folded BN + ReLU

    # 3) Zero-padded concat([cropped conv1 branch, samlayer]) in flat layout,
    #    built with constant 0/1 scatter matrices (drops the wrap-around
    #    garbage columns of r1 and inserts the conv2 zero border).
    cat = jnp.concatenate(
        [mm(r1, g1_ref[...]),                                       # (cm, cat_len)
         mm(sam_ref[0].astype(f32), e2_ref[...])], axis=0)          # (cs, cat_len)

    # 4) conv2 (3x3, pad=1) over the channel concat: same flat im2col + matmul.
    p2 = jnp.concatenate(
        [cat[:, dy * wp2 + dx: dy * wp2 + dx + span2]
         for dy in range(3) for dx in range(3)], axis=0)            # (9*(cm+cs), span2)
    r2 = mm(w2_ref[...], p2)                                        # (cout, span2)
    r2 = jnp.maximum(r2 * s2_ref[...] + b2_ref[...], 0.0)

    # 5) Drop garbage columns and store lane-dense (cout, th*tw).
    o_ref[0] = mm(r2, f_ref[...]).astype(o_ref.dtype)


def crop_up_forward(uplayer, samlayer, params):
    """Pallas forward of crop_up (transpose=False, eval-mode BN). NCHW in/out."""
    n, cl, h, w = uplayer.shape
    ns, cs, th, tw = samlayer.shape
    assert n == ns
    w1, w2 = params["w1"], params["w2"]
    cm, cout = w1.shape[0], w2.shape[0]
    ccat = cm + cs
    assert w1.shape == (cm, cl, 3, 3)
    assert w2.shape == (cout, ccat, 3, 3)

    hup, wup = 2 * h, 2 * w                    # nn.Upsample(scale_factor=2)
    i0 = int(round((hup - th) / 2.0))          # module's own center_crop offsets
    j0 = int(round((wup - tw) / 2.0))
    assert 0 <= i0 and i0 + th <= hup, "target taller than upsampled image"
    assert 0 <= j0 and j0 + tw <= wup, "target wider than upsampled image"

    wp1 = wup + 2                              # conv1 padded plane width
    hp1 = hup + 3                              # 1 top zero row + 2 slack zero rows
    total1 = hp1 * wp1
    span1 = th * wp1
    p0 = i0 * wp1 + j0

    wp2 = tw + 2                               # conv2 padded plane width
    cat_len = (th + 3) * wp2                   # 1 top zero row + 2 slack zero rows
    span2 = th * wp2

    # --- constant operators (host numpy) ---------------------------------
    # Upsample + zero pad + row-major flatten of every channel, as one matmul.
    ah = np.zeros((hp1, h), np.float32)
    ah[1:1 + hup] = _interp_matrix(h, hup)
    aw = np.zeros((w, wp1), np.float32)
    aw[:, 1:1 + wup] = _interp_matrix(w, wup).T
    upop = np.kron(ah.T, aw)                                   # (h*w, total1)

    # 0/1 scatter matrices: place valid conv1 outputs / samlayer pixels at the
    # interior of the zero-padded flat conv2 input, and extract valid conv2
    # output columns into the dense (th*tw) layout.
    g1 = np.zeros((span1, cat_len), np.float32)
    e2 = np.zeros((th * tw, cat_len), np.float32)
    fmat = np.zeros((span2, th * tw), np.float32)
    for y in range(th):
        for x in range(tw):
            g1[y * wp1 + x, (y + 1) * wp2 + (x + 1)] = 1.0
            e2[y * tw + x, (y + 1) * wp2 + (x + 1)] = 1.0
            fmat[y * wp2 + x, y * tw + x] = 1.0

    # --- fold conv bias + eval-mode BatchNorm into per-channel scale/bias ---
    def fold(conv_b, gamma, beta, mean, var):
        scale = gamma.astype(jnp.float32) / jnp.sqrt(var.astype(jnp.float32) + BN_EPS)
        bias = (conv_b.astype(jnp.float32) - mean.astype(jnp.float32)) * scale \
            + beta.astype(jnp.float32)
        return scale, bias

    s1, b1 = fold(params["b1"], params["g1"], params["be1"], params["m1"], params["v1"])
    s2, b2 = fold(params["b2"], params["g2"], params["be2"], params["m2"], params["v2"])
    s1 = s1.reshape(cm, 1)
    b1 = b1.reshape(cm, 1)
    s2 = s2.reshape(cout, 1)
    b2 = b2.reshape(cout, 1)

    # Weight matrices for the im2col matmuls: column order (dy, dx, ci).
    w1m = jnp.asarray(w1, jnp.float32).transpose(0, 2, 3, 1).reshape(cm, 9 * cl)
    w2m = jnp.asarray(w2, jnp.float32).transpose(0, 2, 3, 1).reshape(cout, 9 * ccat)

    # Free (contiguous) reshapes on the wrapper side.
    x_flat = uplayer.reshape(n, cl, h * w)
    sam_flat = samlayer.reshape(n, cs, th * tw)

    dims = (cl, cs, cm, cout, th, tw, wp1, wp2, p0)
    kernel = functools.partial(_crop_up_kernel, dims=dims)

    grid_spec = pltpu.PrefetchScalarGridSpec(
        num_scalar_prefetch=0,
        grid=(n,),
        in_specs=[
            pl.BlockSpec((1, cl, h * w), lambda b: (b, 0, 0)),        # uplayer (flat)
            pl.BlockSpec((1, cs, th * tw), lambda b: (b, 0, 0)),      # samlayer (flat)
            pl.BlockSpec((h * w, total1), lambda b: (0, 0)),          # upsample operator
            pl.BlockSpec((cm, 9 * cl), lambda b: (0, 0)),             # w1 matrix
            pl.BlockSpec((cm, 1), lambda b: (0, 0)),                  # scale1
            pl.BlockSpec((cm, 1), lambda b: (0, 0)),                  # bias1
            pl.BlockSpec((span1, cat_len), lambda b: (0, 0)),         # crop/pad scatter
            pl.BlockSpec((th * tw, cat_len), lambda b: (0, 0)),       # samlayer pad scatter
            pl.BlockSpec((cout, 9 * ccat), lambda b: (0, 0)),         # w2 matrix
            pl.BlockSpec((cout, 1), lambda b: (0, 0)),                # scale2
            pl.BlockSpec((cout, 1), lambda b: (0, 0)),                # bias2
            pl.BlockSpec((span2, th * tw), lambda b: (0, 0)),         # output gather
        ],
        out_specs=pl.BlockSpec((1, cout, th * tw), lambda b: (b, 0, 0)),
    )

    out_flat = pl.pallas_call(
        kernel,
        out_shape=jax.ShapeDtypeStruct((n, cout, th * tw), jnp.float32),
        grid_spec=grid_spec,
        compiler_params=pltpu.CompilerParams(
            dimension_semantics=("parallel",)),
    )(x_flat, sam_flat, jnp.asarray(upop), w1m, s1, b1,
      jnp.asarray(g1), jnp.asarray(e2), w2m, s2, b2, jnp.asarray(fmat))

    # (n, cout, th*tw) -> (n, cout, th, tw) is a contiguous (free) reshape.
    return out_flat.reshape(n, cout, th, tw)


def _reference_crop_up(uplayer, samlayer, params):
    """Pure-JAX reference (einsum upsample + lax.conv) matching the PyTorch module."""
    n, cl, h, w = uplayer.shape
    _, cs, th, tw = samlayer.shape
    hup, wup = 2 * h, 2 * w
    ah = jnp.asarray(_interp_matrix(h, hup))
    aw = jnp.asarray(_interp_matrix(w, wup))
    x = uplayer.astype(jnp.float32)
    up = jnp.einsum("oh,nchw->ncow", ah, x, precision=lax.Precision.HIGHEST)
    up = jnp.einsum("pw,ncow->ncop", aw, up, precision=lax.Precision.HIGHEST)

    def conv_bn_relu(x, wgt, b, g, be, m, v):
        y = lax.conv_general_dilated(
            x, wgt.astype(jnp.float32), window_strides=(1, 1),
            padding=((1, 1), (1, 1)),
            dimension_numbers=("NCHW", "OIHW", "NCHW"),
            precision=lax.Precision.HIGHEST)
        y = y + b[None, :, None, None]
        y = (y - m[None, :, None, None]) / jnp.sqrt(v[None, :, None, None] + BN_EPS)
        y = y * g[None, :, None, None] + be[None, :, None, None]
        return jnp.maximum(y, 0.0)

    t = conv_bn_relu(up, params["w1"], params["b1"], params["g1"],
                     params["be1"], params["m1"], params["v1"])
    i0 = int(round((hup - th) / 2.0))
    j0 = int(round((wup - tw) / 2.0))
    t = t[:, :, i0:i0 + th, j0:j0 + tw]
    cat = jnp.concatenate([t, samlayer.astype(jnp.float32)], axis=1)
    return conv_bn_relu(cat, params["w2"], params["b2"], params["g2"],
                        params["be2"], params["m2"], params["v2"])


if __name__ == "__main__":
    key = jax.random.PRNGKey(0)
    ks = jax.random.split(key, 14)

    # Small UNet decoder-block shapes: 9x9 low-res upsamples to 18x18 and is
    # center-cropped to the 16x16 skip connection (exercises center_crop).
    n, cl, h, w = 2, 4, 9, 9          # uplayer  (inchannel_low = 4)
    cs, th, tw = 4, 16, 16            # samlayer (inchannel_same = 4)
    cm, cout = 8, 8                   # middlechannel, outchannel

    uplayer = jax.random.normal(ks[0], (n, cl, h, w), jnp.float32)
    samlayer = jax.random.normal(ks[1], (n, cs, th, tw), jnp.float32)

    params = {
        "w1": 0.3 * jax.random.normal(ks[2], (cm, cl, 3, 3), jnp.float32),
        "b1": 0.1 * jax.random.normal(ks[3], (cm,), jnp.float32),
        "g1": 1.0 + 0.1 * jax.random.normal(ks[4], (cm,), jnp.float32),
        "be1": 0.1 * jax.random.normal(ks[5], (cm,), jnp.float32),
        "m1": 0.1 * jax.random.normal(ks[6], (cm,), jnp.float32),
        "v1": jax.random.uniform(ks[7], (cm,), jnp.float32, 0.5, 1.5),
        "w2": 0.3 * jax.random.normal(ks[8], (cout, cm + cs, 3, 3), jnp.float32),
        "b2": 0.1 * jax.random.normal(ks[9], (cout,), jnp.float32),
        "g2": 1.0 + 0.1 * jax.random.normal(ks[10], (cout,), jnp.float32),
        "be2": 0.1 * jax.random.normal(ks[11], (cout,), jnp.float32),
        "m2": 0.1 * jax.random.normal(ks[12], (cout,), jnp.float32),
        "v2": jax.random.uniform(ks[13], (cout,), jnp.float32, 0.5, 1.5),
    }

    out = crop_up_forward(uplayer, samlayer, params)
    out = jax.block_until_ready(out)
    assert out.shape == (n, cout, th, tw), out.shape

    ref = _reference_crop_up(uplayer, samlayer, params)
    max_err = float(jnp.max(jnp.abs(out - ref)))
    assert jnp.allclose(out, ref, rtol=2e-3, atol=2e-3), max_err

    print("KERNEL_OK")
</pallas_src>

<mosaic_0001>
module attributes {stable_mosaic.version = 11 : i64} {
  func.func @_crop_up_kernel(%arg0: i32, %arg1: memref<1x4x81xf32, #tpu.memory_space<vmem>>, %arg2: memref<1x4x256xf32, #tpu.memory_space<vmem>>, %arg3: memref<81x420xf32, #tpu.memory_space<vmem>>, %arg4: memref<8x36xf32, #tpu.memory_space<vmem>>, %arg5: memref<8x1xf32, #tpu.memory_space<vmem>>, %arg6: memref<8x1xf32, #tpu.memory_space<vmem>>, %arg7: memref<320x342xf32, #tpu.memory_space<vmem>>, %arg8: memref<256x342xf32, #tpu.memory_space<vmem>>, %arg9: memref<8x108xf32, #tpu.memory_space<vmem>>, %arg10: memref<8x1xf32, #tpu.memory_space<vmem>>, %arg11: memref<8x1xf32, #tpu.memory_space<vmem>>, %arg12: memref<288x256xf32, #tpu.memory_space<vmem>>, %arg13: memref<1x8x256xf32, #tpu.memory_space<vmem>>) attributes {dimension_semantics = [#tpu.dimension_semantics<parallel>], iteration_bounds = array<i64: 2>, scalar_prefetch = 0 : i64, scratch_operands = 0 : i64, tpu.core_type = #tpu.core_type<tc>, window_params = [{transform_indices = @transform_0, window_bounds = array<i64: 1, 4, 81>}, {transform_indices = @transform_1, window_bounds = array<i64: 1, 4, 256>}, {pipeline_mode = #tpu.pipeline_mode<synchronous>, transform_indices = @transform_2, window_bounds = array<i64: 81, 420>}, {pipeline_mode = #tpu.pipeline_mode<synchronous>, transform_indices = @transform_3, window_bounds = array<i64: 8, 36>}, {pipeline_mode = #tpu.pipeline_mode<synchronous>, transform_indices = @transform_4, window_bounds = array<i64: 8, 1>}, {pipeline_mode = #tpu.pipeline_mode<synchronous>, transform_indices = @transform_5, window_bounds = array<i64: 8, 1>}, {pipeline_mode = #tpu.pipeline_mode<synchronous>, transform_indices = @transform_6, window_bounds = array<i64: 320, 342>}, {pipeline_mode = #tpu.pipeline_mode<synchronous>, transform_indices = @transform_7, window_bounds = array<i64: 256, 342>}, {pipeline_mode = #tpu.pipeline_mode<synchronous>, transform_indices = @transform_8, window_bounds = array<i64: 8, 108>}, {pipeline_mode = #tpu.pipeline_mode<synchronous>, transform_indices = @transform_9, window_bounds = array<i64: 8, 1>}, {pipeline_mode = #tpu.pipeline_mode<synchronous>, transform_indices = @transform_10, window_bounds = array<i64: 8, 1>}, {pipeline_mode = #tpu.pipeline_mode<synchronous>, transform_indices = @transform_11, window_bounds = array<i64: 288, 256>}, {transform_indices = @transform_12, window_bounds = array<i64: 1, 8, 256>}]} {
    %c0 = arith.constant 0 : index
    %c0_0 = arith.constant 0 : index
    %c0_1 = arith.constant 0 : index
    %0 = vector.load %arg1[%c0, %c0_0, %c0_1] : memref<1x4x81xf32, #tpu.memory_space<vmem>>, vector<1x4x81xf32>
    %1 = vector.shape_cast %0 : vector<1x4x81xf32> to vector<4x81xf32>
    %c0_2 = arith.constant 0 : index
    %c0_3 = arith.constant 0 : index
    %2 = vector.load %arg3[%c0_2, %c0_3] : memref<81x420xf32, #tpu.memory_space<vmem>>, vector<81x420xf32>
    %cst = arith.constant dense<0.000000e+00> : vector<4x420xf32>
    %3 = tpu.matmul %1, %2, %cst {dimension_numbers = #tpu.dot_dimension_numbers<[1], [0], [0], [1], [0, 0, 1, 1], [], []>, precision = #tpu.contract_precision<fp32>} : vector<4x81xf32>, vector<81x420xf32>, vector<4x420xf32> -> vector<4x420xf32>
    %4 = vector.extract_strided_slice %3 {offsets = [0, 21], sizes = [4, 320], strides = [1, 1]} : vector<4x420xf32> to vector<4x320xf32>
    %5 = vector.extract_strided_slice %3 {offsets = [0, 22], sizes = [4, 320], strides = [1, 1]} : vector<4x420xf32> to vector<4x320xf32>
    %6 = vector.extract_strided_slice %3 {offsets = [0, 23], sizes = [4, 320], strides = [1, 1]} : vector<4x420xf32> to vector<4x320xf32>
    %7 = vector.extract_strided_slice %3 {offsets = [0, 41], sizes = [4, 320], strides = [1, 1]} : vector<4x420xf32> to vector<4x320xf32>
    %8 = vector.extract_strided_slice %3 {offsets = [0, 42], sizes = [4, 320], strides = [1, 1]} : vector<4x420xf32> to vector<4x320xf32>
    %9 = vector.extract_strided_slice %3 {offsets = [0, 43], sizes = [4, 320], strides = [1, 1]} : vector<4x420xf32> to vector<4x320xf32>
    %10 = vector.extract_strided_slice %3 {offsets = [0, 61], sizes = [4, 320], strides = [1, 1]} : vector<4x420xf32> to vector<4x320xf32>
    %11 = vector.extract_strided_slice %3 {offsets = [0, 62], sizes = [4, 320], strides = [1, 1]} : vector<4x420xf32> to vector<4x320xf32>
    %12 = vector.extract_strided_slice %3 {offsets = [0, 63], sizes = [4, 320], strides = [1, 1]} : vector<4x420xf32> to vector<4x320xf32>
    %13 = tpu.concatenate %4, %5, %6, %7, %8, %9, %10, %11, %12 in 0 : vector<4x320xf32>, vector<4x320xf32>, vector<4x320xf32>, vector<4x320xf32>, vector<4x320xf32>, vector<4x320xf32>, vector<4x320xf32>, vector<4x320xf32>, vector<4x320xf32> -> vector<36x320xf32>
    %c0_4 = arith.constant 0 : index
    %c0_5 = arith.constant 0 : index
    %14 = vector.load %arg4[%c0_4, %c0_5] : memref<8x36xf32, #tpu.memory_space<vmem>>, vector<8x36xf32>
    %cst_6 = arith.constant dense<0.000000e+00> : vector<8x320xf32>
    %15 = tpu.matmul %14, %13, %cst_6 {dimension_numbers = #tpu.dot_dimension_numbers<[1], [0], [0], [1], [0, 0, 1, 1], [], []>, precision = #tpu.contract_precision<fp32>} : vector<8x36xf32>, vector<36x320xf32>, vector<8x320xf32> -> vector<8x320xf32>
    %c0_7 = arith.constant 0 : index
    %c0_8 = arith.constant 0 : index
    %16 = vector.load %arg5[%c0_7, %c0_8] : memref<8x1xf32, #tpu.memory_space<vmem>>, vector<8x1xf32>
    %17 = vector.broadcast %16 : vector<8x1xf32> to vector<8x320xf32>
    %18 = arith.mulf %15, %17 : vector<8x320xf32>
    %c0_9 = arith.constant 0 : index
    %c0_10 = arith.constant 0 : index
    %19 = vector.load %arg6[%c0_9, %c0_10] : memref<8x1xf32, #tpu.memory_space<vmem>>, vector<8x1xf32>
    %20 = vector.broadcast %19 : vector<8x1xf32> to vector<8x320xf32>
    %21 = arith.addf %18, %20 : vector<8x320xf32>
    %cst_11 = arith.constant 0.000000e+00 : f32
    %22 = vector.broadcast %cst_11 : f32 to vector<8x320xf32>
    %23 = arith.maximumf %21, %22 : vector<8x320xf32>
    %c0_12 = arith.constant 0 : index
    %c0_13 = arith.constant 0 : index
    %24 = vector.load %arg7[%c0_12, %c0_13] : memref<320x342xf32, #tpu.memory_space<vmem>>, vector<320x342xf32>
    %cst_14 = arith.constant dense<0.000000e+00> : vector<8x342xf32>
    %25 = tpu.matmul %23, %24, %cst_14 {dimension_numbers = #tpu.dot_dimension_numbers<[1], [0], [0], [1], [0, 0, 1, 1], [], []>, precision = #tpu.contract_precision<fp32>} : vector<8x320xf32>, vector<320x342xf32>, vector<8x342xf32> -> vector<8x342xf32>
    %c0_15 = arith.constant 0 : index
    %c0_16 = arith.constant 0 : index
    %c0_17 = arith.constant 0 : index
    %26 = vector.load %arg2[%c0_15, %c0_16, %c0_17] : memref<1x4x256xf32, #tpu.memory_space<vmem>>, vector<1x4x256xf32>
    %27 = vector.shape_cast %26 : vector<1x4x256xf32> to vector<4x256xf32>
    %c0_18 = arith.constant 0 : index
    %c0_19 = arith.constant 0 : index
    %28 = vector.load %arg8[%c0_18, %c0_19] : memref<256x342xf32, #tpu.memory_space<vmem>>, vector<256x342xf32>
    %cst_20 = arith.constant dense<0.000000e+00> : vector<4x342xf32>
    %29 = tpu.matmul %27, %28, %cst_20 {dimension_numbers = #tpu.dot_dimension_numbers<[1], [0], [0], [1], [0, 0, 1, 1], [], []>, precision = #tpu.contract_precision<fp32>} : vector<4x256xf32>, vector<256x342xf32>, vector<4x342xf32> -> vector<4x342xf32>
    %30 = tpu.concatenate %25, %29 in 0 : vector<8x342xf32>, vector<4x342xf32> -> vector<12x342xf32>
    %31 = vector.extract_strided_slice %30 {offsets = [0, 0], sizes = [12, 288], strides = [1, 1]} : vector<12x342xf32> to vector<12x288xf32>
    %32 = vector.extract_strided_slice %30 {offsets = [0, 1], sizes = [12, 288], strides = [1, 1]} : vector<12x342xf32> to vector<12x288xf32>
    %33 = vector.extract_strided_slice %30 {offsets = [0, 2], sizes = [12, 288], strides = [1, 1]} : vector<12x342xf32> to vector<12x288xf32>
    %34 = vector.extract_strided_slice %30 {offsets = [0, 18], sizes = [12, 288], strides = [1, 1]} : vector<12x342xf32> to vector<12x288xf32>
    %35 = vector.extract_strided_slice %30 {offsets = [0, 19], sizes = [12, 288], strides = [1, 1]} : vector<12x342xf32> to vector<12x288xf32>
    %36 = vector.extract_strided_slice %30 {offsets = [0, 20], sizes = [12, 288], strides = [1, 1]} : vector<12x342xf32> to vector<12x288xf32>
    %37 = vector.extract_strided_slice %30 {offsets = [0, 36], sizes = [12, 288], strides = [1, 1]} : vector<12x342xf32> to vector<12x288xf32>
    %38 = vector.extract_strided_slice %30 {offsets = [0, 37], sizes = [12, 288], strides = [1, 1]} : vector<12x342xf32> to vector<12x288xf32>
    %39 = vector.extract_strided_slice %30 {offsets = [0, 38], sizes = [12, 288], strides = [1, 1]} : vector<12x342xf32> to vector<12x288xf32>
    %40 = tpu.concatenate %31, %32, %33, %34, %35, %36, %37, %38, %39 in 0 : vector<12x288xf32>, vector<12x288xf32>, vector<12x288xf32>, vector<12x288xf32>, vector<12x288xf32>, vector<12x288xf32>, vector<12x288xf32>, vector<12x288xf32>, vector<12x288xf32> -> vector<108x288xf32>
    %c0_21 = arith.constant 0 : index
    %c0_22 = arith.constant 0 : index
    %41 = vector.load %arg9[%c0_21, %c0_22] : memref<8x108xf32, #tpu.memory_space<vmem>>, vector<8x108xf32>
    %cst_23 = arith.constant dense<0.000000e+00> : vector<8x288xf32>
    %42 = tpu.matmul %41, %40, %cst_23 {dimension_numbers = #tpu.dot_dimension_numbers<[1], [0], [0], [1], [0, 0, 1, 1], [], []>, precision = #tpu.contract_precision<fp32>} : vector<8x108xf32>, vector<108x288xf32>, vector<8x288xf32> -> vector<8x288xf32>
    %c0_24 = arith.constant 0 : index
    %c0_25 = arith.constant 0 : index
    %43 = vector.load %arg10[%c0_24, %c0_25] : memref<8x1xf32, #tpu.memory_space<vmem>>, vector<8x1xf32>
    %44 = vector.broadcast %43 : vector<8x1xf32> to vector<8x288xf32>
    %45 = arith.mulf %42, %44 : vector<8x288xf32>
    %c0_26 = arith.constant 0 : index
    %c0_27 = arith.constant 0 : index
    %46 = vector.load %arg11[%c0_26, %c0_27] : memref<8x1xf32, #tpu.memory_space<vmem>>, vector<8x1xf32>
    %47 = vector.broadcast %46 : vector<8x1xf32> to vector<8x288xf32>
    %48 = arith.addf %45, %47 : vector<8x288xf32>
    %cst_28 = arith.constant 0.000000e+00 : f32
    %49 = vector.broadcast %cst_28 : f32 to vector<8x288xf32>
    %50 = arith.maximumf %48, %49 : vector<8x288xf32>
    %c0_29 = arith.constant 0 : index
    %c0_30 = arith.constant 0 : index
    %51 = vector.load %arg12[%c0_29, %c0_30] : memref<288x256xf32, #tpu.memory_space<vmem>>, vector<288x256xf32>
    %cst_31 = arith.constant dense<0.000000e+00> : vector<8x256xf32>
    %52 = tpu.matmul %50, %51, %cst_31 {dimension_numbers = #tpu.dot_dimension_numbers<[1], [0], [0], [1], [0, 0, 1, 1], [], []>, precision = #tpu.contract_precision<fp32>} : vector<8x288xf32>, vector<288x256xf32>, vector<8x256xf32> -> vector<8x256xf32>
    %c0_32 = arith.constant 0 : index
    %c0_33 = arith.constant 0 : index
    %c0_34 = arith.constant 0 : index
    %53 = vector.load %arg13[%c0_32, %c0_33, %c0_34] : memref<1x8x256xf32, #tpu.memory_space<vmem>>, vector<1x8x256xf32>
    %54 = vector.shape_cast %53 : vector<1x8x256xf32> to vector<8x256xf32>
    %55 = vector.shape_cast %52 : vector<8x256xf32> to vector<1x8x256xf32>
    tpu.vector_store %arg13[%c0_32, %c0_33, %c0_34], %55 {strides = array<i32>} : memref<1x8x256xf32, #tpu.memory_space<vmem>>, vector<1x8x256xf32>,
    return
  }
  func.func @transform_0(%arg0: i32) -> (i32, i32, i32) {
    %c0_i32 = arith.constant 0 : i32
    %c0_i32_0 = arith.constant 0 : i32
    %c0_i32_1 = arith.constant 0 : i32
    return %arg0, %c0_i32, %c0_i32_0 : i32, i32, i32
  }
  func.func @transform_1(%arg0: i32) -> (i32, i32, i32) {
    %c0_i32 = arith.constant 0 : i32
    %c0_i32_0 = arith.constant 0 : i32
    %c0_i32_1 = arith.constant 0 : i32
    return %arg0, %c0_i32, %c0_i32_0 : i32, i32, i32
  }
  func.func @transform_2(%arg0: i32) -> (i32, i32) {
    %c0_i32 = arith.constant 0 : i32
    %c0_i32_0 = arith.constant 0 : i32
    %c0_i32_1 = arith.constant 0 : i32
    return %c0_i32, %c0_i32_0 : i32, i32
  }
  func.func @transform_3(%arg0: i32) -> (i32, i32) {
    %c0_i32 = arith.constant 0 : i32
    %c0_i32_0 = arith.constant 0 : i32
    %c0_i32_1 = arith.constant 0 : i32
    return %c0_i32, %c0_i32_0 : i32, i32
  }
  func.func @transform_4(%arg0: i32) -> (i32, i32) {
    %c0_i32 = arith.constant 0 : i32
    %c0_i32_0 = arith.constant 0 : i32
    %c0_i32_1 = arith.constant 0 : i32
    return %c0_i32, %c0_i32_0 : i32, i32
  }
  func.func @transform_5(%arg0: i32) -> (i32, i32) {
    %c0_i32 = arith.constant 0 : i32
    %c0_i32_0 = arith.constant 0 : i32
    %c0_i32_1 = arith.constant 0 : i32
    return %c0_i32, %c0_i32_0 : i32, i32
  }
  func.func @transform_6(%arg0: i32) -> (i32, i32) {
    %c0_i32 = arith.constant 0 : i32
    %c0_i32_0 = arith.constant 0 : i32
    %c0_i32_1 = arith.constant 0 : i32
    return %c0_i32, %c0_i32_0 : i32, i32
  }
  func.func @transform_7(%arg0: i32) -> (i32, i32) {
    %c0_i32 = arith.constant 0 : i32
    %c0_i32_0 = arith.constant 0 : i32
    %c0_i32_1 = arith.constant 0 : i32
    return %c0_i32, %c0_i32_0 : i32, i32
  }
  func.func @transform_8(%arg0: i32) -> (i32, i32) {
    %c0_i32 = arith.constant 0 : i32
    %c0_i32_0 = arith.constant 0 : i32
    %c0_i32_1 = arith.constant 0 : i32
    return %c0_i32, %c0_i32_0 : i32, i32
  }
  func.func @transform_9(%arg0: i32) -> (i32, i32) {
    %c0_i32 = arith.constant 0 : i32
    %c0_i32_0 = arith.constant 0 : i32
    %c0_i32_1 = arith.constant 0 : i32
    return %c0_i32, %c0_i32_0 : i32, i32
  }
  func.func @transform_10(%arg0: i32) -> (i32, i32) {
    %c0_i32 = arith.constant 0 : i32
    %c0_i32_0 = arith.constant 0 : i32
    %c0_i32_1 = arith.constant 0 : i32
    return %c0_i32, %c0_i32_0 : i32, i32
  }
  func.func @transform_11(%arg0: i32) -> (i32, i32) {
    %c0_i32 = arith.constant 0 : i32
    %c0_i32_0 = arith.constant 0 : i32
    %c0_i32_1 = arith.constant 0 : i32
    return %c0_i32, %c0_i32_0 : i32, i32
  }
  func.func @transform_12(%arg0: i32) -> (i32, i32, i32) {
    %c0_i32 = arith.constant 0 : i32
    %c0_i32_0 = arith.constant 0 : i32
    %c0_i32_1 = arith.constant 0 : i32
    return %arg0, %c0_i32, %c0_i32_0 : i32, i32, i32
  }
}

</mosaic_0001>

<bundles_post_ra>
// kernel: tpu_custom_call.1
= control target key start
LH: loop header
LB: loop body
LE: loop exit
PB: predicated region body
PF: predicated region fallthrough
CT: control target
= control target key end

     0   :  { %s17800_s0 = inlined_call_operand.vmem [shape: f32[2,4,81], index: 0, kind: input, shape index: {}]   ;;  %s17801_s1 = inlined_call_operand.vmem [shape: f32[2,4,256], index: 1, kind: input, shape index: {}]   ;;  %s17802_s2 = inlined_call_operand.vmem [shape: f32[81,420], index: 2, kind: input, shape index: {}]   ;;  %s17803_s3 = inlined_call_operand.vmem [shape: f32[8,36], index: 3, kind: input, shape index: {}]   ;;  %s17804_s4 = inlined_call_operand.vmem [shape: f32[8,1], index: 4, kind: input, shape index: {}]   ;;  %s17805_s5 = inlined_call_operand.vmem [shape: f32[8,1], index: 5, kind: input, shape index: {}]   ;;  %s17806_s6 = inlined_call_operand.vmem [shape: f32[320,342], index: 6, kind: input, shape index: {}]   ;;  %s17807_s7 = inlined_call_operand.vmem [shape: f32[256,342], index: 7, kind: input, shape index: {}]   ;;  %s17808_s8 = inlined_call_operand.vmem [shape: f32[8,108], index: 8, kind: input, shape index: {}]   ;;  %s17809_s9 = inlined_call_operand.vmem [shape: f32[8,1], index: 9, kind: input, shape index: {}]   ;;  %s17810_s10 = inlined_call_operand.vmem [shape: f32[8,1], index: 10, kind: input, shape index: {}]   ;;  %s17811_s11 = inlined_call_operand.hbm [shape: f32[288,256], index: 11, kind: input, shape index: {}]   ;;  %s17812_s12 = inlined_call_operand.hbm [shape: f32[2,8,256], index: 12, kind: output, shape index: {}]  }
   0x1   :  { %18022 = sst [smem:[#allocation17_spill]] %s17800_s0 }
   0x2   :  { %18023 = sst [smem:[#allocation18_spill]] %s17801_s1 }
   0x3   :  { %17 = vsyncpa [#allocation3], 0 }
   0x4   :  { %18 = vsyncpa [#allocation4], 0 }
   0x5   :  { %20 = vsyncpa [#allocation4 + $0x1], 0  ;;  %s10512_s21 = smov 0   ;;  %s10514_s22 = smov 0  }
   0x6   :  { %s10516_s23 = smov 0   ;;  %s10518_s24 = smov 0  }
   0x7 LB: > { %s10533_s25 = sadd.s32 4294967295, %s10428_s24   ;;  %s10247_s26 = sadd.s32 4294967294, %s10428_s24   ;;  %s10428_s24 = sphi %s10518_s24, %s18305_s24   ;;  %s10424_s23 = sphi %s10516_s23, %s18304_s23   ;;  %s10420_s22 = sphi %s10514_s22, %s18303_s22   ;;  %s10416_s21 = sphi %s10512_s21, %s18302_s21  }
   0x8   : > { %s10537_s27 = sadd.s32 1, %s10428_s24   ;;  %s295_s28 = sadd.s32 1, %s10424_s23 }
   0x9   : > { %s292_s29 = ssub.s32 %s10428_s24, %s10537_s27  ;;  %p305_p0 = scmp.ne.s32.totalorder %s10424_s23, %s10420_s22 }
   0xa   : > { %p293_p1 = scmp.eq.s32.totalorder %s292_s29, 0  ;;  %p306_p2 = scmp.eq.s32.totalorder %s10533_s25, 1 }
   0xb   : > { %p311_p3 = scmp.ne.s32.totalorder %s10420_s22, %s10416_s21  ;;  %p312_p4 = scmp.eq.s32.totalorder %s10247_s26, 1 }
   0xc   : > { %s10548_s30 = scalar_select %p293_p1, %s10424_s23, %s295_s28  }
   0xd   : > { %p10550_p5 = por %p306_p2, %p305_p0  ;;  %p10554_p6 = por %p312_p4, %p311_p3 }
   0xe   : > { %p10248_p7 = scmp.ge.s32.totalorder %s10428_s24, 1  ;;  %p319_p8 = scmp.lt.s32.totalorder %s10428_s24, 3 }
   0xf   : > { %p10278_p9 = scmp.eq.s32.totalorder %s10533_s25, 0  ;;  %s357_s17 = sshll.u32 %s17811_s11, 4  ;;  %s358_s17 = int_to_ptr.hbm [resolvable:$true] %s357_s17 }
  0x10   : > { %p320_p10 = pnand %p10248_p7, %p319_p8  ;;  %s10430_s18 = smov [#allocation2]  }
  0x11   : > { %s359_s19 = sshll.u32 %s10430_s18, 4  ;;  %s10431_s20 = smov 256   ;;  %s360_s19 = int_to_ptr.vmem [resolvable:$true] %s359_s19 }
  0x12   : > { %p10270_p11 = pneg %p320_p10  ;;  %s10432_s26 = smov 16  }
  0x13   : > { %390 = sbr.rel (%p320_p10) target bundleno = 2112 (0x840), region = 68 }
  0x14   : > { %p10271_p12 = pnand %p10278_p9, %p10270_p11 }
  0x16   : > { %10273 = dma.hbm_to_vmem [thread:$0]  (!%p10271_p12), %s358_s17, 9216, %s360_s19, [#allocation3], %s10431_s20, %s10431_s20, %s10432_s26  }
  0x18   : > { %10407 = dma.done.wait (%p10278_p9), [#allocation3], 9216  }
  0x19   : > { %10409 = vsyncadd (%p10278_p9), [#allocation3], 4294958080  ;;  %p437_p13 = scmp.lt.s32.totalorder %s10533_s25, 1  ;;  %vm484_vm0 = vcmask 1040384   ;;  %v477_v0 = vld [vmem:[%s17802_s2 + $0x140] sm:$0x1] }
  0x1a   : > { %v474_v1 = vld [vmem:[%s17802_s2 + $0x120] sm:$0xff]  ;;  %v486_v3 = vsel %vm484_vm0, %v477_v0, 0  ;;  %s18026_s1 = sld [smem:[#allocation18_spill]]  ;;  %v478_v38 = vld [vmem:[%s17802_s2 + $0x148] sm:$0x1]  ;;  %vm480_vm1 = vcmask 662528  }
  0x1b   : > { %v471_v2 = vld [vmem:[%s17802_s2 + $0x100] sm:$0xff]  ;;  %s10581_s19 = scalar_select %p437_p13, %s10533_s25, 1  ;;  %v10584_v4 = vand.u32 4294901760, %v474_v1  ;;  %v10597_v9 = vand.u32 4294901760, %v486_v3  ;;  %v475_v39 = vld [vmem:[%s17802_s2 + $0x128] sm:$0xff]  ;;  %v489_v52 = vsel %vm484_vm0, %v478_v38, 0 }
  0x1c   : > { %v10586_v5 = vand.u32 4294901760, %v471_v2  ;;  %v468_v6 = vld [vmem:[%s17802_s2 + $0xe0] sm:$0xff]  ;;  %v472_v45 = vld [vmem:[%s17802_s2 + $0x108] sm:$0xff]  ;;  %v10708_v53 = vand.u32 4294901760, %v475_v39  ;;  %v10719_v56 = vand.u32 4294901760, %v489_v52  ;;  %s18027_s0 = sld [smem:[#allocation17_spill]] }
  0x1d   : > { %v465_v7 = vld [vmem:[%s17802_s2 + $0xc0] sm:$0xff]  ;;  %v10599_v10 = vand.u32 4294901760, %v468_v6  ;;  %v10609_v14 = vsub.f32 %v474_v1, %v10584_v4  ;;  %s10262_s28 = sshll.u32 %s10581_s19, 3  ;;  %500 = vmatpush.msra.mxu0 %v10597_v9  ;;  %v10622_v18 = vsub.f32 %v486_v3, %v10597_v9  ;;  %656 = vmatpush.msra.mxu3 %v10597_v9  ;;  %v469_v49 = vld [vmem:[%s17802_s2 + $0xe8] sm:$0xff]  ;;  %s10254_s15 = sshll.u32 %s10581_s19, 2  ;;  %v10721_v57 = vand.u32 4294901760, %v472_v45 }
  0x1e   : > { %v462_v8 = vld [vmem:[%s17802_s2 + $0xa0] sm:$0xff]  ;;  %v10601_v11 = vand.u32 4294901760, %v465_v7  ;;  %v10612_v15 = vsub.f32 %v471_v2, %v10586_v5  ;;  %v466_v58 = vld [vmem:[%s17802_s2 + $0xc8] sm:$0xff]  ;;  %v10729_v61 = vsub.f32 %v475_v39, %v10708_v53  ;;  %v10731_v62 = vand.u32 4294901760, %v469_v49  ;;  %s10433_s18 = smov 86   ;;  %s10434_s20 = smov 88  }
  0x1f   : > { %v10603_v12 = vand.u32 4294901760, %v462_v8  ;;  %v459_v13 = vld [vmem:[%s17802_s2 + $0x80] sm:$0xff]  ;;  %v10626_v19 = vsub.f32 %v468_v6, %v10599_v10  ;;  %v543_v22 = vand.u32 4294901760, %v10609_v14  ;;  %613 = vmatpush.msra.mxu2 %v10622_v18  ;;  %502 = vmatpush.msra.mxu0 %v10584_v4  ;;  %v537_v25 = vand.u32 4294901760, %v10622_v18  ;;  %v463_v3 = vld [vmem:[%s17802_s2 + $0xa8] sm:$0xff]  ;;  %s10437_s29 = smov 87  }
  0x20   : > { %v10614_v16 = vand.u32 4294901760, %v459_v13  ;;  %v456_v17 = vld [vmem:[%s17802_s2 + $0x60] sm:$0xff]  ;;  %v10629_v20 = vsub.f32 %v465_v7, %v10601_v11  ;;  %v549_v23 = vand.u32 4294901760, %v10612_v15  ;;  %s445_s26 = scalar_lea.vmem %s18026_s1, %s10262_s28  ;;  %658 = vmatpush.msra.mxu3 %v10584_v4  ;;  %v10743_v2 = vsub.f32 %v489_v52, %v10719_v56  ;;  %s10435_s28 = smov 107  }
  0x21   : > { %v453_v21 = vld [vmem:[%s17802_s2 + $0x40] sm:$0xff]  ;;  %v10637_v24 = vsub.f32 %v462_v8, %v10603_v12  ;;  %v555_v26 = vand.u32 4294901760, %v10626_v19  ;;  %v10643_v27 = vand.u32 4294901760, %v456_v17  ;;  %v544_v29 = vsub.f32 %v10609_v14, %v543_v22  ;;  %616 = vmatpush.msra.mxu2 %v10609_v14  ;;  %504 = vmatpush.msra.mxu0 %v10586_v5  ;;  %s17883_s16 = smov 108   ;;  %s17886_s17 = smov 127  }
  0x22   : > { %v450_v28 = vld [vmem:[%s17802_s2 + $0x20] sm:$0xff]  ;;  %v561_v30 = vand.u32 4294901760, %v10629_v20  ;;  %v10657_v31 = vsub.f32 %v459_v13, %v10614_v16  ;;  %v10659_v32 = vand.u32 4294901760, %v453_v21  ;;  %v538_v33 = vsub.f32 %v10622_v18, %v537_v25  ;;  %660 = vmatpush.msra.mxu3 %v10586_v5  ;;  %s17893_s19 = smov 109  }
  0x23   : > { %v550_v34 = vsub.f32 %v10612_v15, %v549_v23  ;;  %v447_v35 = vld [vmem:[%s17802_s2] sm:$0xff]  ;;  %v567_v36 = vand.u32 4294901760, %v10637_v24  ;;  %v10674_v37 = vand.u32 4294901760, %v450_v28  ;;  %619 = vmatpush.msra.mxu2 %v10612_v15  ;;  %506 = vmatpush.msra.mxu0 %v10599_v10  ;;  %v545_v42 = vand.u32 4294901760, %v544_v29 }
  0x24   : > { %v5005_v40 = vld [vmem:[%s445_s26] sm:$0xff]  ;;  %v539_v41 = vand.u32 4294901760, %v538_v33  ;;  %v556_v43 = vsub.f32 %v10626_v19, %v555_v26  ;;  %v10688_v44 = vsub.f32 %v456_v17, %v10643_v27  ;;  %662 = vmatpush.msra.mxu3 %v10599_v10  ;;  %v562_v46 = vsub.f32 %v10629_v20, %v561_v30  ;;  %s440_s26 = scalar_lea.vmem %s18027_s0, %s10254_s15  ;;  %s10438_s15 = smov 106  }
  0x25   : > { %5103 = vst [vmem:[#allocation1] ss:$2 sm:$0xff] %v5005_v40  ;;  %v573_v47 = vand.u32 4294901760, %v10657_v31  ;;  %v10699_v48 = vsub.f32 %v453_v21, %v10659_v32  ;;  %622 = vmatpush.msra.mxu2 %v10626_v19  ;;  %v551_v50 = vand.u32 4294901760, %v550_v34  ;;  %v10705_v51 = vand.u32 4294901760, %v447_v35  ;;  %508 = vmatpush.msra.mxu0 %v10601_v11 }
  0x26   : > { %540 = vmatpush.msra.mxu1 %v539_v41  ;;  %664 = vmatpush.msra.mxu3 %v10601_v11  ;;  %v568_v54 = vsub.f32 %v10637_v24, %v567_v36  ;;  %v10717_v55 = vsub.f32 %v450_v28, %v10674_v37  ;;  %v557_v59 = vand.u32 4294901760, %v556_v43  ;;  %v579_v60 = vand.u32 4294901760, %v10688_v44  ;;  %v460_v28 = vld [vmem:[%s17802_s2 + $0x88] sm:$0xff]  ;;  %v446_v38 = vld [vmem:[%s440_s26] sm:$0xf]  ;;  %s17929_s26 = smov 126  }
  0x27   : > { %625 = vmatpush.msra.mxu2 %v10629_v20  ;;  %510 = vmatpush.msra.mxu0 %v10603_v12  ;;  %v574_v63 = vsub.f32 %v10657_v31, %v573_v47  ;;  %v585_v0 = vand.u32 4294901760, %v10699_v48  ;;  %v10740_v1 = vsub.f32 %v447_v35, %v10705_v51  ;;  %v563_v6 = vand.u32 4294901760, %v562_v46 }
  0x28   : > { %546 = vmatpush.msra.mxu1 %v545_v42  ;;  %666 = vmatpush.msra.mxu3 %v10603_v12  ;;  %v10753_v7 = vsub.f32 %v472_v45, %v10721_v57  ;;  %v10755_v8 = vand.u32 4294901760, %v466_v58  ;;  %v569_v13 = vand.u32 4294901760, %v568_v54  ;;  %v17817_v17 = vand.u32 4294901760, %v10717_v55 }
  0x29   : > { %628 = vmatpush.msra.mxu2 %v10637_v24  ;;  %512 = vmatpush.msra.mxu0 %v10614_v16  ;;  %v17814_v21 = vand.u32 4294901760, %v10743_v2  ;;  %v580_v29 = vsub.f32 %v10688_v44, %v579_v60  ;;  %v17813_v33 = vand.u32 4294901760, %v10729_v61  ;;  %v10770_v34 = vsub.f32 %v469_v49, %v10731_v62 }
  0x2a   : > { %552 = vmatpush.msra.mxu1 %v551_v50  ;;  %668 = vmatpush.msra.mxu3 %v10614_v16  ;;  %v10772_v35 = vand.u32 4294901760, %v463_v3  ;;  %v575_v39 = vand.u32 4294901760, %v574_v63  ;;  %v586_v40 = vsub.f32 %v10699_v48, %v585_v0  ;;  %v17816_v41 = vand.u32 4294901760, %v10740_v1 }
  0x2b   : > { %631 = vmatpush.msra.mxu2 %v10657_v31  ;;  %514 = vmatpush.msra.mxu0 %v10643_v27  ;;  %v814_v42 = vsub.f32 %v10743_v2, %v17814_v21  ;;  %v17815_v43 = vand.u32 4294901760, %v10753_v7  ;;  %v10786_v45 = vsub.f32 %v466_v58, %v10755_v8  ;;  %v10788_v46 = vand.u32 4294901760, %v460_v28 }
  0x2c   : > { %558 = vmatpush.msra.mxu1 %v557_v59  ;;  %670 = vmatpush.msra.mxu3 %v10643_v27  ;;  %v592_v49 = vsub.f32 %v10717_v55, %v17817_v17  ;;  %v482_v50 = vsel %vm480_vm1, %v446_v38, 0  ;;  %v581_v52 = vand.u32 4294901760, %v580_v29  ;;  %v820_v54 = vsub.f32 %v10729_v61, %v17813_v33  ;;  %v457_v29 = vld [vmem:[%s17802_s2 + $0x68] sm:$0xff] }
  0x2d   : > { %634 = vmatpush.msra.mxu2 %v10688_v44  ;;  %516 = vmatpush.msra.mxu0 %v10659_v32  ;;  %v17818_v58 = vand.u32 4294901760, %v10770_v34  ;;  %v10802_v59 = vsub.f32 %v463_v3, %v10772_v35  ;;  %v587_v63 = vand.u32 4294901760, %v586_v40  ;;  %v815_v3 = vand.u32 4294901760, %v814_v42 }
  0x2e   : > { %564 = vmatpush.msra.mxu1 %v563_v6  ;;  %672 = vmatpush.msra.mxu3 %v10659_v32  ;;  %v598_v6 = vsub.f32 %v10740_v1, %v17816_v41  ;;  %v826_v38 = vsub.f32 %v10753_v7, %v17815_v43  ;;  %v837_v40 = vand.u32 4294901760, %v10786_v45  ;;  %v10820_v33 = vsub.f32 %v460_v28, %v10788_v46 }
  0x2f   : > { %637 = vmatpush.msra.mxu2 %v10699_v48  ;;  %518 = vmatpush.msra.mxu0 %v10674_v37  ;;  %v593_v21 = vand.u32 4294901760, %v592_v49  ;;  %v821_v42 = vand.u32 4294901760, %v820_v54  ;;  %v832_v43 = vsub.f32 %v10770_v34, %v17818_v58  ;;  %v843_v28 = vand.u32 4294901760, %v10802_v59 }
  0x30   : > { %570 = vmatpush.msra.mxu1 %v569_v13  ;;  %674 = vmatpush.msra.mxu3 %v10674_v37  ;;  %v10809_v13 = vand.u32 4294901760, %v482_v50  ;;  %v10832_v41 = vand.u32 4294901760, %v457_v29  ;;  %v599_v49 = vand.u32 4294901760, %v598_v6  ;;  %v827_v54 = vand.u32 4294901760, %v826_v38 }
  0x31   : > { %640 = vmatpush.msra.mxu2 %v10717_v55  ;;  %520 = vmatpush.msra.mxu0 %v10705_v51  ;;  %v838_v58 = vsub.f32 %v10786_v45, %v837_v40  ;;  %v849_v18 = vand.u32 4294901760, %v10820_v33  ;;  %v844_v6 = vsub.f32 %v10802_v59, %v843_v28  ;;  %v18028_v44 = vand.u32 4294901760, %v10717_v55 }
  0x32   : > { %576 = vmatpush.msra.mxu1 %v575_v39  ;;  %676 = vmatpush.msra.mxu3 %v10705_v51  ;;  %v454_v39 = vld [vmem:[%s17802_s2 + $0x48] sm:$0xff]  ;;  %v10838_v17 = vsub.f32 %v482_v50, %v10809_v13  ;;  %v18029_v48 = vand.u32 4294901760, %v10740_v1  ;;  %v18032_v55 = vand.u32 4294901760, %v10753_v7  ;;  %vm1394_vm2 = vcmask 719872  }
  0x33   : > { %643 = vmatpush.msra.mxu2 %v10740_v1  ;;  %692 = vmatpush.msrb.mxu0 %v537_v25  ;;  %v10847_v25 = vand.u32 4294901760, %v454_v39  ;;  %v448_v50 = vld [vmem:[%s17802_s2 + $0x8] sm:$0xff]  ;;  %v845_v15 = vand.u32 4294901760, %v844_v6  ;;  %v470_v1 = vld [vmem:[%s17802_s2 + $0xf0] sm:$0xff]  ;;  %vm1406_vm3 = vcmask 711680   ;;  %vm1421_vm4 = vcmask 1043456  }
  0x34   : > { %582 = vmatpush.msra.mxu1 %v581_v52  ;;  %v451_v52 = vld [vmem:[%s17802_s2 + $0x28] sm:$0xff]  ;;  %816 = vmatpush.msrb.mxu3 %v815_v3  ;;  %v10859_v3 = vsub.f32 %v457_v29, %v10832_v41  ;;  %v10867_v14 = vand.u32 4294901760, %v10838_v17  ;;  %v10875_v29 = vand.u32 4294901760, %v448_v50  ;;  %vm1418_vm5 = vcmask 703488  }
  0x35   : > { %776 = vmatpush.msrb.mxu2 %v10719_v56  ;;  %696 = vmatpush.msrb.mxu0 %v543_v22  ;;  %v10861_v38 = vand.u32 4294901760, %v451_v52  ;;  %v839_v22 = vand.u32 4294901760, %v838_v58  ;;  %vm1370_vm6 = vcmask 875520   ;;  %vm1382_vm7 = vcmask 867328  }
  0x36   : > { %588 = vmatpush.msra.mxu1 %v587_v63  ;;  %822 = vmatpush.msrb.mxu3 %v821_v42  ;;  %v833_v63 = vand.u32 4294901760, %v832_v43  ;;  %v10873_v43 = vsub.f32 %v454_v39, %v10847_v25  ;;  %v10893_v39 = vsub.f32 %v448_v50, %v10875_v29  ;;  %vm1346_vm8 = vcmask 1031168  }
  0x37   : > { %778 = vmatpush.msrb.mxu2 %v10708_v53  ;;  %700 = vmatpush.msrb.mxu0 %v549_v23  ;;  %v855_v23 = vand.u32 4294901760, %v10859_v3  ;;  %v10883_v58 = vsub.f32 %v451_v52, %v10861_v38  ;;  %vm1358_vm9 = vcmask 883712   ;;  %vm1334_vm10 = vcmask 1039360  }
  0x38   : > { %594 = vmatpush.msra.mxu1 %v593_v21  ;;  %828 = vmatpush.msrb.mxu3 %v827_v54  ;;  %v850_v21 = vsub.f32 %v10820_v33, %v849_v18  ;;  %v873_v24 = vand.u32 4294901760, %v10893_v39  ;;  %vm1499_vm11 = vcmask 293888   ;;  %vm2244_vm12 = vcmask 523264  }
  0x39   : > { %780 = vmatpush.msrb.mxu2 %v10721_v57  ;;  %704 = vmatpush.msrb.mxu0 %v555_v26  ;;  %v861_v26 = vand.u32 4294901760, %v10873_v43  ;;  %v867_v20 = vand.u32 4294901760, %v10883_v58  ;;  %vm7339_vm13 = vcmask 736256   ;;  %vm7316_vm14 = vcmask 744448  }
  0x3a   : > { %600 = vmatpush.msra.mxu1 %v599_v49  ;;  %834 = vmatpush.msrb.mxu3 %v833_v63  ;;  %v851_v19 = vand.u32 4294901760, %v850_v21  ;;  %vm7293_vm15 = vcmask 752640   ;;  %vm7225_vm1 = vcmask 900096  }
  0x3b   : > { %782 = vmatpush.msrb.mxu2 %v10731_v62  ;;  %708 = vmatpush.msrb.mxu0 %v561_v30  ;;  %v868_v31 = vsub.f32 %v10883_v58, %v867_v20 }
  0x3c   : > { %744 = vmatpush.msrb.mxu1 %v10597_v9  ;;  %v524_v9 = vsub.f32 %v10838_v17, %v10867_v14  ;;  %840 = vmatpush.msrb.mxu3 %v839_v22 }
  0x3d   : > { %784 = vmatpush.msrb.mxu2 %v10755_v8  ;;  %712 = vmatpush.msrb.mxu0 %v567_v36  ;;  %v874_v36 = vsub.f32 %v10893_v39, %v873_v24 }
  0x3e   : > { %746 = vmatpush.msrb.mxu1 %v10584_v4  ;;  %846 = vmatpush.msrb.mxu3 %v845_v15  ;;  %v856_v4 = vsub.f32 %v10859_v3, %v855_v23  ;;  %v10906_v30 = vand.u32 4294901760, %v524_v9 }
  0x3f   : > { %786 = vmatpush.msrb.mxu2 %v10772_v35  ;;  %716 = vmatpush.msrb.mxu0 %v573_v47  ;;  %v875_v47 = vand.u32 4294901760, %v874_v36 }
  0x40   : > { %748 = vmatpush.msrb.mxu1 %v10586_v5  ;;  %852 = vmatpush.msrb.mxu3 %v851_v19  ;;  %v862_v5 = vsub.f32 %v10873_v43, %v861_v26 }
  0x41   : > { %788 = vmatpush.msrb.mxu2 %v10788_v46  ;;  %720 = vmatpush.msrb.mxu0 %v579_v60  ;;  %v18033_v60 = vand.u32 4294901760, %v10770_v34 }
  0x42   : > { %750 = vmatpush.msrb.mxu1 %v10599_v10  ;;  %646 = vmatmul.f32.vlgmr.msra.gmra.mxu2 %v10838_v17  ;;  %v857_v10 = vand.u32 4294901760, %v856_v4 }
  0x43   : > { %790 = vmatpush.msrb.mxu2 %v10832_v41  ;;  %526 = vmatmul.f32.vlgmr.msra.gmra.mxu0 %v10906_v30 }
  0x44   : > { %752 = vmatpush.msrb.mxu1 %v10601_v11  ;;  %680 = vmatmul.f32.vlgmr.msra.gmra.mxu3 %v10867_v14  ;;  %v863_v11 = vand.u32 4294901760, %v862_v5 }
  0x45   : > { %724 = vmatpush.msrb.mxu0 %v585_v0  ;;  %792 = vmatpush.msrb.mxu2 %v10847_v25 }
  0x46   : > { %754 = vmatpush.msrb.mxu1 %v10603_v12  ;;  %858 = vmatpush.msrb.mxu3 %v857_v10  ;;  %v869_v12 = vand.u32 4294901760, %v868_v31 }
  0x47   : > { %602 = vmatmul.f32.vlgmr.msra.gmra.mxu1 %v10809_v13  ;;  %728 = vmatpush.msrb.mxu0 %v18028_v44 }
  0x48   : > { %756 = vmatpush.msrb.mxu1 %v10614_v16  ;;  %794 = vmatpush.msrb.mxu2 %v10861_v38  ;;  %v18030_v16 = vand.u32 4294901760, %v10743_v2 }
  0x49   : > { %864 = vmatpush.msrb.mxu3 %v863_v11  ;;  %732 = vmatpush.msrb.mxu0 %v18029_v48 }
  0x4a   : > { %758 = vmatpush.msrb.mxu1 %v10643_v27  ;;  %796 = vmatpush.msrb.mxu2 %v10875_v29  ;;  %v18031_v27 = vand.u32 4294901760, %v10729_v61 }
  0x4b   : > { %870 = vmatpush.msrb.mxu3 %v869_v12  ;;  %889 = vmatpush.msra.mxu0 %v10743_v2  ;;  %v467_v2 = vld [vmem:[%s17802_s2 + $0xd0] sm:$0xff] }
  0x4c   : > { %760 = vmatpush.msrb.mxu1 %v10659_v32  ;;  %968 = vmatpush.msra.mxu2 %v18030_v16  ;;  %v479_v32 = vld [vmem:[%s17802_s2 + $0x150] sm:$0x1] }
  0x4d   : > { %876 = vmatpush.msrb.mxu3 %v875_v47  ;;  %734 = vmatmul.f32.vlgmr.msrb.gmra.mxu0 %v10809_v13 }
  0x4e   : > { %762 = vmatpush.msrb.mxu1 %v10674_v37  ;;  %972 = vmatpush.msra.mxu2 %v18031_v27  ;;  %v492_v37 = vsel %vm484_vm0, %v479_v32, 0  ;;  %vm7248_vm0 = vcmask 891904  }
  0x4f   : > { %892 = vmatpush.msra.mxu0 %v10729_v61  ;;  %1020 = vmatpush.msra.mxu3 %v10719_v56  ;;  %v473_v61 = vld [vmem:[%s17802_s2 + $0x110] sm:$0xff] }
  0x50   : > { %764 = vmatpush.msrb.mxu1 %v10705_v51  ;;  %976 = vmatpush.msra.mxu2 %v18032_v55  ;;  %v476_v51 = vld [vmem:[%s17802_s2 + $0x130] sm:$0xff] }
  0x51   : > { %766 = vmatmul.f32.vlgmr.msrb.gmra.mxu1 %v10809_v13  ;;  %895 = vmatpush.msra.mxu0 %v10753_v7  ;;  %v10978_v0 = vand.u32 4294901760, %v476_v51  ;;  %v11006_v7 = vand.u32 4294901760, %v470_v1 }
  0x52   : > { %932 = vmatpush.msra.mxu1 %v10719_v56  ;;  %1022 = vmatpush.msra.mxu3 %v10708_v53  ;;  %v10971_v56 = vand.u32 4294901760, %v492_v37 }
  0x53   : > { %898 = vmatpush.msra.mxu0 %v10770_v34  ;;  %980 = vmatpush.msra.mxu2 %v18033_v60  ;;  %v11034_v42 = vsub.f32 %v470_v1, %v11006_v7 }
  0x54   : > { %934 = vmatpush.msra.mxu1 %v10708_v53  ;;  %1024 = vmatpush.msra.mxu3 %v10721_v57  ;;  %v10985_v53 = vand.u32 4294901760, %v473_v61 }
  0x55   : > { %901 = vmatpush.msra.mxu0 %v10786_v45  ;;  %984 = vmatpush.msra.mxu2 %v837_v40  ;;  %v11020_v45 = vand.u32 4294901760, %v467_v2  ;;  %v1107_v50 = vand.u32 4294901760, %v11034_v42 }
  0x56   : > { %936 = vmatpush.msra.mxu1 %v10721_v57  ;;  %1026 = vmatpush.msra.mxu3 %v10731_v62  ;;  %v10994_v57 = vsub.f32 %v492_v37, %v10971_v56 }
  0x57   : > { %904 = vmatpush.msra.mxu0 %v10802_v59  ;;  %988 = vmatpush.msra.mxu2 %v843_v28  ;;  %v461_v59 = vld [vmem:[%s17802_s2 + $0x90] sm:$0xff]  ;;  %v11051_v54 = vsub.f32 %v467_v2, %v11020_v45 }
  0x58   : > { %938 = vmatpush.msra.mxu1 %v10731_v62  ;;  %1028 = vmatpush.msra.mxu3 %v10755_v8  ;;  %v10999_v62 = vsub.f32 %v476_v51, %v10978_v0  ;;  %v1089_v34 = vand.u32 4294901760, %v10994_v57  ;;  %v458_v28 = vld [vmem:[%s17802_s2 + $0x70] sm:$0xff]  ;;  %v11048_v52 = vand.u32 4294901760, %v461_v59 }
  0x59   : > { %907 = vmatpush.msra.mxu0 %v10820_v33  ;;  %992 = vmatpush.msra.mxu2 %v849_v18  ;;  %v464_v33 = vld [vmem:[%s17802_s2 + $0xb0] sm:$0xff]  ;;  %v11065_v63 = vand.u32 4294901760, %v458_v28  ;;  %v1113_v21 = vand.u32 4294901760, %v11051_v54 }
  0x5a   : > { %940 = vmatpush.msra.mxu1 %v10755_v8  ;;  %1030 = vmatpush.msra.mxu3 %v10772_v35  ;;  %v11012_v8 = vsub.f32 %v473_v61, %v10985_v53  ;;  %v11031_v40 = vand.u32 4294901760, %v464_v33  ;;  %v1090_v49 = vsub.f32 %v10994_v57, %v1089_v34  ;;  %v455_v18 = vld [vmem:[%s17802_s2 + $0x50] sm:$0xff]  ;;  %v11084_v15 = vsub.f32 %v461_v59, %v11048_v52 }
  0x5b   : > { %802 = vmatmul.f32.vlgmr.msrb.gmra.mxu2 %v10906_v30  ;;  %910 = vmatpush.msra.mxu0 %v10859_v3  ;;  %v452_v3 = vld [vmem:[%s17802_s2 + $0x30] sm:$0xff] }
  0x5c   : > { %942 = vmatpush.msra.mxu1 %v10772_v35  ;;  %996 = vmatpush.msra.mxu2 %v855_v23  ;;  %v1095_v35 = vand.u32 4294901760, %v10999_v62  ;;  %v11068_v6 = vsub.f32 %v464_v33, %v11031_v40  ;;  %v1091_v22 = vand.u32 4294901760, %v1090_v49  ;;  %v11097_v19 = vand.u32 4294901760, %v452_v3 }
  0x5d   : > { %1032 = vmatpush.msra.mxu3 %v10788_v46  ;;  %913 = vmatpush.msra.mxu0 %v10873_v43  ;;  %v11081_v43 = vand.u32 4294901760, %v455_v18  ;;  %v1125_v4 = vand.u32 4294901760, %v11084_v15 }
  0x5e   : > { %878 = vmatmul.f32.vlgmr.msrb.gmra.mxu3 %v10809_v13  ;;  %944 = vmatpush.msra.mxu1 %v10788_v46  ;;  %v1101_v46 = vand.u32 4294901760, %v11012_v8  ;;  %v1119_v9 = vand.u32 4294901760, %v11068_v6  ;;  %v11122_v11 = vsub.f32 %v452_v3, %v11097_v19 }
  0x5f   : > { %1000 = vmatpush.msra.mxu2 %v861_v26  ;;  %1034 = vmatpush.msra.mxu3 %v10832_v41  ;;  %v11100_v26 = vsub.f32 %v458_v28, %v11065_v63  ;;  %v11112_v5 = vsub.f32 %v455_v18, %v11081_v43  ;;  %v1126_v12 = vsub.f32 %v11084_v15, %v1125_v4 }
  0x60   : > { %916 = vmatpush.msra.mxu0 %v10883_v58  ;;  %946 = vmatpush.msra.mxu1 %v10832_v41  ;;  %v1096_v41 = vsub.f32 %v10999_v62, %v1095_v35  ;;  %v449_v58 = vld [vmem:[%s17802_s2 + $0x10] sm:$0xff]  ;;  %v1120_v10 = vsub.f32 %v11068_v6, %v1119_v9  ;;  %v1143_v27 = vand.u32 4294901760, %v11122_v11 }
  0x61   : > { %1004 = vmatpush.msra.mxu2 %v867_v20  ;;  %1036 = vmatpush.msra.mxu3 %v10847_v25  ;;  %v11109_v20 = vand.u32 4294901760, %v449_v58  ;;  %v1131_v31 = vand.u32 4294901760, %v11100_v26  ;;  %v1137_v44 = vand.u32 4294901760, %v11112_v5  ;;  %v1127_v32 = vand.u32 4294901760, %v1126_v12 }
  0x62   : > { %919 = vmatpush.msra.mxu0 %v10893_v39  ;;  %948 = vmatpush.msra.mxu1 %v10847_v25  ;;  %v1102_v25 = vsub.f32 %v11012_v8, %v1101_v46  ;;  %v1097_v23 = vand.u32 4294901760, %v1096_v41  ;;  %v1121_v48 = vand.u32 4294901760, %v1120_v10  ;;  %v1144_v51 = vsub.f32 %v11122_v11, %v1143_v27 }
  0x63   : > { %1008 = vmatpush.msra.mxu2 %v873_v24  ;;  %1038 = vmatpush.msra.mxu3 %v10861_v38  ;;  %v11132_v47 = vsub.f32 %v449_v58, %v11109_v20  ;;  %v1132_v16 = vsub.f32 %v11100_v26, %v1131_v31  ;;  %v1138_v55 = vsub.f32 %v11112_v5, %v1137_v44 }
  0x64   : > { %1010 = vmatmul.f32.vlgmr.msra.gmra.mxu2 %v10809_v13  ;;  %1052 = vmatpush.msrb.mxu0 %v10971_v56  ;;  %v1103_v39 = vand.u32 4294901760, %v1102_v25  ;;  %v1145_v2 = vand.u32 4294901760, %v1144_v51 }
  0x65   : > { %950 = vmatpush.msra.mxu1 %v10861_v38  ;;  %1040 = vmatpush.msra.mxu3 %v10875_v29  ;;  %v1108_v38 = vsub.f32 %v11034_v42, %v1107_v50  ;;  %v1149_v37 = vand.u32 4294901760, %v11132_v47  ;;  %v1133_v60 = vand.u32 4294901760, %v1132_v16  ;;  %v1139_v61 = vand.u32 4294901760, %v1138_v55 }
  0x66   : > { %922 = vmatmul.f32.vlgmr.msra.gmra.mxu0 %v10838_v17  ;;  %1042 = vmatmul.f32.vlgmr.msra.gmra.mxu3 %v10809_v13 }
  0x67   : > { %1054 = vmatpush.msrb.mxu0 %v10978_v0  ;;  %952 = vmatpush.msra.mxu1 %v10875_v29  ;;  %v1114_v29 = vsub.f32 %v11051_v54, %v1113_v21  ;;  %v1109_v24 = vand.u32 4294901760, %v1108_v38  ;;  %v1150_v1 = vsub.f32 %v11132_v47, %v1149_v37 }
  0x68   : > { %956 = vmatmul.f32.vlgmr.msra.gmra.mxu1 %v10867_v14  ;;  %1165 = vmatpush.msrb.mxu2 %v10994_v57 }
  0x69   : > { %1056 = vmatpush.msrb.mxu0 %v10985_v53  ;;  %1092 = vmatpush.msrb.mxu1 %v1091_v22  ;;  %v1115_v36 = vand.u32 4294901760, %v1114_v29  ;;  %v1151_v33 = vand.u32 4294901760, %v1150_v1 }
  0x6a   : > { %1168 = vmatpush.msrb.mxu2 %v10999_v62  ;;  %1208 = vmatpush.msrb.mxu3 %v10971_v56 }
  0x6b   : > { %1058 = vmatpush.msrb.mxu0 %v11006_v7  ;;  %1098 = vmatpush.msrb.mxu1 %v1097_v23 }
  0x6c   : > { %1171 = vmatpush.msrb.mxu2 %v11012_v8  ;;  %1210 = vmatpush.msrb.mxu3 %v10978_v0 }
  0x6d   : > { %1060 = vmatpush.msrb.mxu0 %v11020_v45  ;;  %1104 = vmatpush.msrb.mxu1 %v1103_v39 }
  0x6e   : > { %1174 = vmatpush.msrb.mxu2 %v11034_v42  ;;  %1212 = vmatpush.msrb.mxu3 %v10985_v53 }
  0x6f   : > { %1062 = vmatpush.msrb.mxu0 %v11031_v40  ;;  %1110 = vmatpush.msrb.mxu1 %v1109_v24 }
  0x70   : > { %1177 = vmatpush.msrb.mxu2 %v11051_v54  ;;  %1214 = vmatpush.msrb.mxu3 %v11006_v7 }
  0x71   : > { %1064 = vmatpush.msrb.mxu0 %v11048_v52  ;;  %1116 = vmatpush.msrb.mxu1 %v1115_v36 }
  0x72   : > { %1180 = vmatpush.msrb.mxu2 %v11068_v6  ;;  %1216 = vmatpush.msrb.mxu3 %v11020_v45 }
  0x73   : > { %1066 = vmatpush.msrb.mxu0 %v11065_v63  ;;  %1122 = vmatpush.msrb.mxu1 %v1121_v48 }
  0x74   : > { %1183 = vmatpush.msrb.mxu2 %v11084_v15  ;;  %1218 = vmatpush.msrb.mxu3 %v11031_v40 }
  0x75   : > { %1068 = vmatpush.msrb.mxu0 %v11081_v43  ;;  %1128 = vmatpush.msrb.mxu1 %v1127_v32 }
  0x76   : > { %1186 = vmatpush.msrb.mxu2 %v11100_v26  ;;  %1220 = vmatpush.msrb.mxu3 %v11048_v52 }
  0x77   : > { %1070 = vmatpush.msrb.mxu0 %v11097_v19  ;;  %1134 = vmatpush.msrb.mxu1 %v1133_v60 }
  0x78   : > { %1189 = vmatpush.msrb.mxu2 %v11112_v5  ;;  %1222 = vmatpush.msrb.mxu3 %v11065_v63 }
  0x79   : > { %1072 = vmatpush.msrb.mxu0 %v11109_v20  ;;  %1140 = vmatpush.msrb.mxu1 %v1139_v61 }
  0x7a   : > { %1192 = vmatpush.msrb.mxu2 %v11122_v11  ;;  %1224 = vmatpush.msrb.mxu3 %v11081_v43 }
  0x7b   : > { %1244 = vmatpush.msra.mxu0 %v1089_v34  ;;  %1146 = vmatpush.msrb.mxu1 %v1145_v2 }
  0x7c   : > { %1195 = vmatpush.msrb.mxu2 %v11132_v47  ;;  %1226 = vmatpush.msrb.mxu3 %v11097_v19 }
  0x7d   : > { %1248 = vmatpush.msra.mxu0 %v1095_v35  ;;  %1152 = vmatpush.msrb.mxu1 %v1151_v33 }
  0x7e   : > { %1198 = vmatmul.f32.vlgmr.msrb.gmra.mxu2 %v10838_v17  ;;  %1228 = vmatpush.msrb.mxu3 %v11109_v20 }
  0x7f   : > { %1252 = vmatpush.msra.mxu0 %v1101_v46  ;;  %1296 = vmatpush.msra.mxu1 %v10971_v56 }
  0x80   : > { %1078 = vmatmul.f32.vlgmr.msrb.gmra.mxu0 %v10906_v30  ;;  %1232 = vmatmul.f32.vlgmr.msrb.gmra.mxu3 %v10867_v14 }
  0x81   : > { %1256 = vmatpush.msra.mxu0 %v1107_v50  ;;  %1298 = vmatpush.msra.mxu1 %v10978_v0 }
  0x82   : > { %1154 = vmatmul.f32.vlgmr.msrb.gmra.mxu1 %v10809_v13 }
  0x83   : > { %1260 = vmatpush.msra.mxu0 %v1113_v21  ;;  %1300 = vmatpush.msra.mxu1 %v10985_v53 }
  0x85   : > { %1264 = vmatpush.msra.mxu0 %v1119_v9  ;;  %1302 = vmatpush.msra.mxu1 %v11006_v7 }
  0x87   : > { %1268 = vmatpush.msra.mxu0 %v1125_v4  ;;  %1304 = vmatpush.msra.mxu1 %v11020_v45 }
  0x89   : > { %1272 = vmatpush.msra.mxu0 %v1131_v31  ;;  %1306 = vmatpush.msra.mxu1 %v11031_v40 }
  0x8b   : > { %1276 = vmatpush.msra.mxu0 %v1137_v44  ;;  %1308 = vmatpush.msra.mxu1 %v11048_v52 }
  0x8d   : > { %1280 = vmatpush.msra.mxu0 %v1143_v27  ;;  %1310 = vmatpush.msra.mxu1 %v11065_v63 }
  0x8f   : > { %1284 = vmatpush.msra.mxu0 %v1149_v37  ;;  %1312 = vmatpush.msra.mxu1 %v11081_v43 }
  0x90   : > { %1286 = vmatmul.f32.vlgmr.msra.gmra.mxu0 %v10809_v13 }
  0x91   : > { %1314 = vmatpush.msra.mxu1 %v11097_v19 }
  0x93   : > { %1316 = vmatpush.msra.mxu1 %v11109_v20 }
  0x94   : > { %1318 = vmatmul.f32.vlgmr.msra.gmra.mxu1 %v10809_v13 }
  0xc0   : > { %v527_v17 = vpop.f32.mrf.mxu0 }
  0xc4   : > { %v603_v14 = vpop.f32.mrf.mxu1 }
  0xc5   : > { %v604_v30 = vadd.f32 %v603_v14, %v527_v17  ;;  %v647_v56 = vpop.f32.mrf.mxu2 }
  0xc7   : > { %v648_v0 = vadd.f32 %v647_v56, %v604_v30  ;;  %v681_v53 = vpop.f32.mrf.mxu3 }
  0xc9   : > { %v682_v57 = vadd.f32 %v681_v53, %v648_v0 }
  0xca   : > { %v735_v62 = vpop.f32.mrf.mxu0 }
  0xcb   : > { %v736_v7 = vadd.f32 %v735_v62, %v682_v57 }
  0xce   : > { %v767_v8 = vpop.f32.mrf.mxu1 }
  0xcf   : > { %v11198_v34 = vadd.f32 %v767_v8, %v736_v7 }
  0xd1   : > { %1412 = vrot.lane.b32.xlu0 %v11198_v34, %s10433_s18  ;;  %1388 = vrot.lane.b32.xlu1 %v11198_v34, %s10434_s20  ;;  %v1325_v49 = vrot.slane %v11198_v34, 4 }
  0xd9   : > { %1364 = vrot.lane.b32.xlu0 %v11198_v34, %s10435_s28 }
  0xde   : > { %v803_v13 = vpop.f32.mrf.mxu2 }
  0xe1   : > { %v879_v45 = vpop.f32.mrf.mxu3  ;;  %1340 = vrot.lane.b32.xlu0 %v11198_v34, %s17929_s26 }
  0xe2   : > { %v880_v35 = vadd.f32 %v879_v45, %v803_v13 }
  0xe3   : > { %v923_v59 = vpop.f32.mrf.mxu0 }
  0xe4   : > { %v924_v40 = vadd.f32 %v923_v59, %v880_v35 }
  0xe5   : > { %v957_v42 = vpop.f32.mrf.mxu1 }
  0xe6   : > { %v958_v46 = vadd.f32 %v957_v42, %v924_v40 }
  0xe7   : > { %v1011_v28 = vpop.f32.mrf.mxu2 }
  0xe8   : > { %v1012_v52 = vadd.f32 %v1011_v28, %v958_v46 }
  0xe9   : > { %v1043_v54 = vpop.f32.mrf.mxu3  ;;  %1400 = vrot.lane.b32.xlu0 %v1325_v49, %s10437_s29 }
  0xea   : > { %v11210_v41 = vadd.f32 %v1043_v54, %v1012_v52 }
  0xec   : > { %1366 = vrot.lane.b32.xlu1 %v11210_v41, %s10435_s28  ;;  %1390 = vrot.lane.b32.xlu2 %v11210_v41, %s10434_s20  ;;  %v1326_v18 = vrot.slane %v11210_v41, 4 }
  0xf1   : > { %1376 = vrot.lane.b32.xlu0 %v1325_v49, %s10438_s15 }
  0xf4   : > { %1342 = vrot.lane.b32.xlu1 %v11210_v41, %s17929_s26 }
  0xf9   : > { %1352 = vrot.lane.b32.xlu0 %v1325_v49, %s17883_s16 }
  0xfc   : > { %1402 = vrot.lane.b32.xlu1 %v1326_v18, %s10437_s29 }
  0xfd   : > { %v1079_v63 = vpop.f32.mrf.mxu0 }
  0xff   : > { %v1155_v50 = vpop.f32.mrf.mxu1 }
 0x100   : > { %v1156_v6 = vadd.f32 %v1155_v50, %v1079_v63 }
 0x101   : > { %1414 = vrot.lane.b32.xlu0 %v11210_v41, %s10433_s18  ;;  %v1199_v25 = vpop.f32.mrf.mxu2 }
 0x102   : > { %v1200_v3 = vadd.f32 %v1199_v25, %v1156_v6 }
 0x103   : > { %v1233_v22 = vpop.f32.mrf.mxu3 }
 0x104   : > { %1378 = vrot.lane.b32.xlu1 %v1326_v18, %s10438_s15  ;;  %v1234_v21 = vadd.f32 %v1233_v22, %v1200_v3 }
 0x109   : > { %1328 = vrot.lane.b32.xlu0 %v1325_v49, %s17886_s17 }
 0x10c   : > { %1354 = vrot.lane.b32.xlu1 %v1326_v18, %s17883_s16 }
 0x10d   : > { %v1287_v43 = vpop.f32.mrf.mxu0 }
 0x10e   : > { %v1288_v15 = vadd.f32 %v1287_v43, %v1234_v21 }
 0x111   : > { %v1319_v23 = vpop.f32.mrf.mxu1 }
 0x112   : > { %v11227_v58 = vadd.f32 %v1319_v23, %v1288_v15 }
 0x114   : > { %1392 = vrot.lane.b32.xlu2 %v11227_v58, %s10434_s20  ;;  %1416 = vrot.lane.b32.xlu1 %v11227_v58, %s10433_s18  ;;  %v1327_v38 = vrot.slane %v11227_v58, 4  ;;  %s17868_s18 = smov 92   ;;  %s10445_s20 = smov 110  }
 0x11c   : > { %1368 = vrot.lane.b32.xlu2 %v11227_v58, %s10435_s28  ;;  %1330 = vrot.lane.b32.xlu1 %v1326_v18, %s17886_s17 }
 0x124   : > { %1344 = vrot.lane.b32.xlu2 %v11227_v58, %s17929_s26 }
 0x12c   : > { %1404 = vrot.lane.b32.xlu2 %v1327_v38, %s10437_s29  ;;  %s17895_s29 = smov 90  }
 0x134   : > { %1380 = vrot.lane.b32.xlu2 %v1327_v38, %s10438_s15  ;;  %s18124_s15 = smov 108  }
 0x13c   : > { %1356 = vrot.lane.b32.xlu2 %v1327_v38, %s17883_s16 }
 0x143   : > { %v1413_v9 = vpop.permute.xlu0 %1412  ;;  %v1389_v39 = vpop.permute.xlu1 %1388 }
 0x144   : > { %1332 = vrot.lane.b32.xlu2 %v1327_v38, %s17886_s17 }
 0x146   : > { %v1391_v5 = vpop.permute.xlu2 %1390 }
 0x147   : > { %v1395_v36 = vsel %vm1394_vm2, %v1389_v39, %v1391_v5  ;;  %v1434_v39 = vld [vmem:[%s17803_s3] sm:$0xff] }
 0x14b   : > { %v1365_v19 = vpop.permute.xlu0 %1364 }
 0x153   : > { %v1341_v26 = vpop.permute.xlu0 %1340 }
 0x15b   : > { %v1401_v29 = vpop.permute.xlu0 %1400 }
 0x15e   : > { %v1367_v4 = vpop.permute.xlu1 %1366 }
 0x15f   : > { %v1371_v32 = vsel %vm1370_vm6, %v1365_v19, %v1367_v4 }
 0x163   : > { %v1377_v20 = vpop.permute.xlu0 %1376 }
 0x166   : > { %v1343_v24 = vpop.permute.xlu1 %1342 }
 0x167   : > { %v1347_v61 = vsel %vm1346_vm8, %v1341_v26, %v1343_v24 }
 0x16b   : > { %v1353_v10 = vpop.permute.xlu0 %1352 }
 0x16e   : > { %v1393_v31 = vpop.permute.xlu2 %1392  ;;  %v1403_v11 = vpop.permute.xlu1 %1402 }
 0x16f   : > { %v1407_v12 = vsel %vm1406_vm3, %v1401_v29, %v1403_v11  ;;  %v1396_v30 = vsel %vm1394_vm2, %v1391_v5, %v1393_v31  ;;  %vm8407_vm2 = vcmask 261120  }
 0x170   : > { %v1431_v44 = vsel %vm1421_vm4, %v1395_v36, %v1407_v12 }
 0x171   : > { %1465 = vrot.lane.b32.xlu2 %v1431_v44, %s10435_s28 }
 0x173   : > { %v1415_v47 = vpop.permute.xlu0 %1414 }
 0x174   : > { %v1419_v48 = vsel %vm1418_vm5, %v1413_v9, %v1415_v47 }
 0x175   : > { %1471 = vrot.lane.b32.xlu0 %v1419_v48, %s10435_s28 }
 0x176   : > { %v1369_v16 = vpop.permute.xlu2 %1368  ;;  %v1379_v27 = vpop.permute.xlu1 %1378 }
 0x177   : > { %v1383_v55 = vsel %vm1382_vm7, %v1377_v20, %v1379_v27  ;;  %v1372_v57 = vsel %vm1370_vm6, %v1367_v4, %v1369_v16 }
 0x178   : > { %v1428_v37 = vsel %vm1421_vm4, %v1371_v32, %v1383_v55 }
 0x179   : > { %1459 = vrot.lane.b32.xlu1 %v1428_v37, %s10435_s28 }
 0x17b   : > { %v1329_v13 = vpop.permute.xlu0 %1328 }
 0x17e   : > { %v1345_v60 = vpop.permute.xlu2 %1344  ;;  %v1355_v51 = vpop.permute.xlu1 %1354 }
 0x17f   : > { %v1359_v1 = vsel %vm1358_vm9, %v1353_v10, %v1355_v51  ;;  %v1348_v59 = vsel %vm1346_vm8, %v1343_v24, %v1345_v60  ;;  %v1501_v10 = vsel %vm1499_vm11, %v1434_v39, 0 }
 0x180   : > { %v1425_v2 = vsel %vm1421_vm4, %v1347_v61, %v1359_v1  ;;  %v11326_v12 = vand.u32 4294901760, %v1501_v10 }
 0x181   : > { %1453 = vrot.lane.b32.xlu0 %v1425_v2, %s10435_s28 }
 0x186   : > { %v1405_v33 = vpop.permute.xlu2 %1404  ;;  %v1417_v14 = vpop.permute.xlu1 %1416 }
 0x187   : > { %v1408_v17 = vsel %vm1406_vm3, %v1403_v11, %v1405_v33  ;;  %v1420_v56 = vsel %vm1418_vm5, %v1415_v47, %v1417_v14  ;;  %v1433_v54 = vsel %vm1421_vm4, %v1393_v31, %v1405_v33 }
 0x188   : > { %1473 = vrot.lane.b32.xlu1 %v1420_v56, %s10435_s28  ;;  %v1432_v0 = vsel %vm1421_vm4, %v1396_v30, %v1408_v17 }
 0x189   : > { %1467 = vrot.lane.b32.xlu0 %v1432_v0, %s10435_s28 }
 0x18e   : > { %v1381_v53 = vpop.permute.xlu2 %1380  ;;  %v1331_v8 = vpop.permute.xlu1 %1330 }
 0x18f   : > { %v1384_v62 = vsel %vm1382_vm7, %v1379_v27, %v1381_v53  ;;  %v1335_v45 = vsel %vm1334_vm10, %v1329_v13, %v1331_v8  ;;  %v1430_v18 = vsel %vm1421_vm4, %v1369_v16, %v1381_v53  ;;  %v11332_v16 = vsub.f32 %v1501_v10, %v11326_v12 }
 0x190   : > { %v1429_v7 = vsel %vm1421_vm4, %v1372_v57, %v1384_v62  ;;  %v1422_v46 = vsel %vm1421_vm4, %v11198_v34, %v1335_v45 }
 0x191   : > { %1461 = vrot.lane.b32.xlu2 %v1429_v7, %s10435_s28 }
 0x196   : > { %v1357_v35 = vpop.permute.xlu2 %1356 }
 0x197   : > { %v1360_v40 = vsel %vm1358_vm9, %v1355_v51, %v1357_v35  ;;  %v1427_v34 = vsel %vm1421_vm4, %v1345_v60, %v1357_v35  ;;  %v11338_v60 = vand.u32 4294901760, %v11332_v16 }
 0x198   : > { %v1426_v42 = vsel %vm1421_vm4, %v1348_v59, %v1360_v40 }
 0x199   : > { %1455 = vrot.lane.b32.xlu1 %v1426_v42, %s10435_s28  ;;  %1447 = vrot.lane.b32.xlu2 %v1422_v46, %s10435_s28  ;;  %v1533_v33 = vsub.f32 %v11332_v16, %v11338_v60 }
 0x19b   : > { %v11364_v7 = vand.u32 4294901760, %v1533_v33 }
 0x19e   : > { %v1333_v28 = vpop.permute.xlu2 %1332 }
 0x19f   : > { %v1336_v49 = vsel %vm1334_vm10, %v1331_v8, %v1333_v28  ;;  %v1424_v50 = vsel %vm1421_vm4, %v11227_v58, %v1333_v28 }
 0x1a0   : > { %v1423_v52 = vsel %vm1421_vm4, %v11210_v41, %v1336_v49 }
 0x1a1   : > { %1475 = vrot.lane.b32.xlu1 %v1417_v14, %s10435_s28  ;;  %1449 = vrot.lane.b32.xlu0 %v1423_v52, %s10435_s28 }
 0x1a2   : > { %1469 = vrot.lane.b32.xlu2 %v1433_v54, %s10435_s28 }
 0x1a9   : > { %1457 = vrot.lane.b32.xlu1 %v1427_v34, %s10435_s28  ;;  %1463 = vrot.lane.b32.xlu0 %v1430_v18, %s10435_s28 }
 0x1aa   : > { %1451 = vrot.lane.b32.xlu2 %v1424_v50, %s10435_s28  ;;  %s18120_s28 = smov 92  }
 0x1cb   : > { %v1466_v63 = vpop.permute.xlu2 %1465 }
 0x1e7   : > { %v1472_v41 = vpop.permute.xlu0 %1471 }
 0x1eb   : > { %v1460_v6 = vpop.permute.xlu1 %1459  ;;  %v11289_v3 = vpop.permute.xlu2 %1461 }
 0x1ec   : > { %v1481_v22 = vsel %vm1370_vm6, %v1460_v6, %v11289_v3 }
 0x1ed   : > { %v11293_v21 = vand.u32 4294901760, %v1481_v22 }
 0x1ef   : > { %v11299_v9 = vsub.f32 %v1481_v22, %v11293_v21 }
 0x1f1   : > { %v1564_v24 = vand.u32 4294901760, %v11299_v9 }
 0x1f3   : > { %v1454_v25 = vpop.permute.xlu0 %1453  ;;  %v1448_v31 = vpop.permute.xlu2 %1447  ;;  %v1565_v47 = vsub.f32 %v11299_v9, %v1564_v24 }
 0x1f5   : > { %v1566_v27 = vand.u32 4294901760, %v1565_v47 }
 0x1fa   : > { %v1474_v43 = vpop.permute.xlu1 %1473 }
 0x1fb   : > { %v1485_v15 = vsel %vm1370_vm6, %v1472_v41, %v1474_v43  ;;  %v1468_v23 = vpop.permute.xlu0 %1467 }
 0x1fc   : > { %v1503_v38 = vsel %vm1421_vm4, %v1485_v15, 0  ;;  %v1483_v58 = vsel %vm1370_vm6, %v1466_v63, %v1468_v23  ;;  %v11340_v51 = vpop.permute.xlu2 %1469 }
 0x1fd   : > { %v11301_v19 = vand.u32 4294901760, %v1503_v38  ;;  %v11303_v26 = vand.u32 4294901760, %v1483_v58  ;;  %v1484_v61 = vsel %vm1370_vm6, %v1468_v23, %v11340_v51 }
 0x1fe   : > { %v11351_v17 = vand.u32 4294901760, %v1484_v61 }
 0x1ff   : > { %v11309_v29 = vsub.f32 %v1503_v38, %v11301_v19  ;;  %v11312_v4 = vsub.f32 %v1483_v58, %v11303_v26  ;;  %1521 = vmatpush.msra.mxu2 %v11301_v19 }
 0x200   : > { %v11367_v8 = vsub.f32 %v1484_v61, %v11351_v17 }
 0x201   : > { %v1552_v20 = vand.u32 4294901760, %v11309_v29  ;;  %1523 = vmatpush.msra.mxu2 %v11303_v26  ;;  %v1558_v5 = vand.u32 4294901760, %v11312_v4 }
 0x202   : > { %v1756_v49 = vand.u32 4294901760, %v11367_v8 }
 0x203   : > { %1525 = vmatpush.msra.mxu2 %v11293_v21  ;;  %v1553_v11 = vsub.f32 %v11309_v29, %v1552_v20  ;;  %v1559_v36 = vsub.f32 %v11312_v4, %v1558_v5 }
 0x204   : > { %v11375_v59 = vpop.permute.xlu2 %1451 }
 0x205   : > { %v1554_v44 = vand.u32 4294901760, %v1553_v11  ;;  %v1560_v48 = vand.u32 4294901760, %v1559_v36 }
 0x207   : > { %1555 = vmatpush.msra.mxu3 %v1554_v44 }
 0x209   : > { %1561 = vmatpush.msra.mxu3 %v1560_v48 }
 0x20b   : > { %v1456_v32 = vpop.permute.xlu1 %1455  ;;  %1567 = vmatpush.msra.mxu3 %v1566_v27 }
 0x20c   : > { %v1479_v55 = vsel %vm1370_vm6, %v1454_v25, %v1456_v32 }
 0x20d   : > { %v11335_v37 = vand.u32 4294901760, %v1479_v55 }
 0x20f   : > { %v11345_v1 = vsub.f32 %v1479_v55, %v11335_v37  ;;  %1527 = vmatpush.msra.mxu2 %v11335_v37 }
 0x211   : > { %v1570_v2 = vand.u32 4294901760, %v11345_v1 }
 0x213   : > { %v11353_v14 = vpop.permute.xlu1 %1475  ;;  %v1450_v30 = vpop.permute.xlu0 %1449  ;;  %v1571_v56 = vsub.f32 %v11345_v1, %v1570_v2 }
 0x214   : > { %v1486_v0 = vsel %vm1370_vm6, %v1474_v43, %v11353_v14  ;;  %v1477_v53 = vsel %vm1370_vm6, %v1448_v31, %v1450_v30  ;;  %v1478_v42 = vsel %vm1370_vm6, %v1450_v30, %v11375_v59  ;;  %v1757_v43 = vsub.f32 %v11367_v8, %v1756_v49 }
 0x215   : > { %v1505_v57 = vsel %vm1421_vm4, %v1486_v0, 0  ;;  %v11362_v62 = vand.u32 4294901760, %v1477_v53  ;;  %v1572_v45 = vand.u32 4294901760, %v1571_v56  ;;  %v11395_v18 = vand.u32 4294901760, %v1478_v42 }
 0x216   : > { %v11369_v13 = vand.u32 4294901760, %v1505_v57  ;;  %v1758_v10 = vand.u32 4294901760, %v1757_v43  ;;  %v1507_v44 = vsel %vm1421_vm4, %v11353_v14, 0  ;;  %v2163_v14 = vld [vmem:[%s17806_s6 + $0x138] sm:$0xff]  ;;  %v2148_v43 = vld [vmem:[%s17806_s6 + $0xc0] sm:$0xff] }
 0x217   : > { %v11372_v35 = vsub.f32 %v1477_v53, %v11362_v62  ;;  %1529 = vmatpush.msra.mxu2 %v11362_v62  ;;  %1573 = vmatpush.msra.mxu3 %v1572_v45  ;;  %v11414_v38 = vsub.f32 %v1478_v42, %v11395_v18  ;;  %v11525_v53 = vand.u32 4294901760, %v2163_v14  ;;  %v2154_v42 = vld [vmem:[%s17806_s6 + $0xf0] sm:$0xff] }
 0x218   : > { %v11378_v40 = vsub.f32 %v1505_v57, %v11369_v13  ;;  %1719 = vmatpush.msrb.mxu0 %v11369_v13  ;;  %1535 = vmatmul.f32.vlgmr.msra.gmra.mxu2 %v11364_v7  ;;  %v2157_v57 = vld [vmem:[%s17806_s6 + $0x108] sm:$0xff] }
 0x219   : > { %1598 = vmatpush.msrb.mxu2 %v11309_v29  ;;  %v1576_v46 = vand.u32 4294901760, %v11372_v35  ;;  %v1774_v36 = vand.u32 4294901760, %v11414_v38 }
 0x21a   : > { %v1750_v28 = vand.u32 4294901760, %v11378_v40  ;;  %1721 = vmatpush.msrb.mxu0 %v11351_v17 }
 0x21b   : > { %1601 = vmatpush.msrb.mxu2 %v11312_v4  ;;  %v11390_v52 = vpop.permute.xlu1 %1457  ;;  %v11392_v54 = vpop.permute.xlu0 %1463  ;;  %v1577_v34 = vsub.f32 %v11372_v35, %v1576_v46  ;;  %v1775_v4 = vsub.f32 %v11414_v38, %v1774_v36 }
 0x21c   : > { %v1480_v50 = vsel %vm1370_vm6, %v1456_v32, %v11390_v52  ;;  %v1482_v41 = vsel %vm1370_vm6, %v11289_v3, %v11392_v54  ;;  %v1751_v22 = vsub.f32 %v11378_v40, %v1750_v28  ;;  %v11453_v48 = vand.u32 4294901760, %v11392_v54  ;;  %v2169_v32 = vld [vmem:[%s17806_s6 + $0x168] sm:$0xff] }
 0x21d   : > { %1604 = vmatpush.msrb.mxu2 %v11299_v9  ;;  %v11403_v63 = vand.u32 4294901760, %v1480_v50  ;;  %v11405_v6 = vand.u32 4294901760, %v1482_v41  ;;  %v1578_v25 = vand.u32 4294901760, %v1577_v34  ;;  %v11439_v9 = vand.u32 4294901760, %v1507_v44 }
 0x21e   : > { %v1752_v3 = vand.u32 4294901760, %v1751_v22  ;;  %v11470_v27 = vsub.f32 %v11392_v54, %v11453_v48  ;;  %v11483_v55 = vand.u32 4294901760, %v2169_v32  ;;  %v11555_v54 = vsub.f32 %v2163_v14, %v11525_v53  ;;  %v2136_v14 = vld [vmem:[%s17806_s6 + $0x60] sm:$0xff] }
 0x21f   : > { %1607 = vmatpush.msrb.mxu2 %v11345_v1  ;;  %v1767_v15 = vsub.f32 %v1480_v50, %v11403_v63  ;;  %v1761_v23 = vsub.f32 %v1482_v41, %v11405_v6  ;;  %1579 = vmatpush.msra.mxu3 %v1578_v25  ;;  %v11450_v47 = vsub.f32 %v1507_v44, %v11439_v9  ;;  %v2151_v41 = vld [vmem:[%s17806_s6 + $0xd8] sm:$0xff] }
 0x220   : > { %1723 = vmatpush.msrb.mxu0 %v11405_v6  ;;  %1581 = vmatmul.f32.vlgmr.msra.gmra.mxu3 %v11326_v12  ;;  %v1960_v0 = vand.u32 4294901760, %v11470_v27 }
 0x221   : > { %1610 = vmatpush.msrb.mxu2 %v11372_v35  ;;  %1629 = vmatpush.msrb.mxu3 %v11301_v19  ;;  %v1762_v58 = vand.u32 4294901760, %v1761_v23  ;;  %v1768_v39 = vand.u32 4294901760, %v1767_v15  ;;  %v1948_v1 = vand.u32 4294901760, %v11450_v47 }
 0x222   : > { %1753 = vmatpush.msrb.mxu1 %v1752_v3  ;;  %1725 = vmatpush.msrb.mxu0 %v11403_v63  ;;  %v2112_v3 = vld [vmem:[%s17805_s5] sm:$0xff] }
 0x223   : > { %1659 = vmatpush.msra.mxu2 %v1552_v20  ;;  %1631 = vmatpush.msrb.mxu3 %v11303_v26  ;;  %v1763_v31 = vsub.f32 %v1761_v23, %v1762_v58  ;;  %v1769_v11 = vsub.f32 %v1767_v15, %v1768_v39  ;;  %v1949_v56 = vsub.f32 %v11450_v47, %v1948_v1 }
 0x224   : > { %1613 = vmatmul.f32.vlgmr.msrb.gmra.mxu2 %v11332_v16  ;;  %1759 = vmatpush.msrb.mxu1 %v1758_v10 }
 0x225   : > { %1663 = vmatpush.msra.mxu2 %v1558_v5  ;;  %1727 = vmatpush.msrb.mxu0 %v11395_v18  ;;  %v1764_v29 = vand.u32 4294901760, %v1763_v31  ;;  %v1770_v20 = vand.u32 4294901760, %v1769_v11  ;;  %v1776_v5 = vand.u32 4294901760, %v1775_v4  ;;  %v2145_v11 = vld [vmem:[%s17806_s6 + $0xa8] sm:$0xff]  ;;  %v2142_v4 = vld [vmem:[%s17806_s6 + $0x90] sm:$0xff] }
 0x226   : > { %1633 = vmatpush.msrb.mxu3 %v11293_v21  ;;  %1733 = vmatmul.f32.vlgmr.msrb.gmra.mxu0 %v11364_v7 }
 0x227   : > { %1857 = vmatpush.msra.mxu0 %v1750_v28  ;;  %1667 = vmatpush.msra.mxu2 %v1564_v24  ;;  %v11444_v24 = vand.u32 4294901760, %v11340_v51  ;;  %v1950_v28 = vand.u32 4294901760, %v1949_v56 }
 0x228   : > { %1635 = vmatpush.msrb.mxu3 %v11335_v37  ;;  %1765 = vmatpush.msrb.mxu1 %v1764_v29 }
 0x229   : > { %1861 = vmatpush.msra.mxu0 %v1756_v49  ;;  %1671 = vmatpush.msra.mxu2 %v1570_v2  ;;  %v11506_v2 = vsub.f32 %v2169_v32, %v11483_v55  ;;  %v1961_v49 = vsub.f32 %v11470_v27, %v1960_v0 }
 0x22a   : > { %1637 = vmatpush.msrb.mxu3 %v11362_v62  ;;  %1771 = vmatpush.msrb.mxu1 %v1770_v20  ;;  %v11599_v20 = vand.u32 4294901760, %v2148_v43 }
 0x22b   : > { %1865 = vmatpush.msra.mxu0 %v1762_v58  ;;  %1641 = vmatmul.f32.vlgmr.msrb.gmra.mxu3 %v11338_v60  ;;  %v11586_v58 = vand.u32 4294901760, %v2151_v41 }
 0x22c   : > { %1675 = vmatpush.msra.mxu2 %v1576_v46  ;;  %1693 = vmatpush.msra.mxu3 %v11301_v19  ;;  %v11460_v19 = vsub.f32 %v11340_v51, %v11444_v24  ;;  %v2166_v51 = vld [vmem:[%s17806_s6 + $0x150] sm:$0xff]  ;;  %v11549_v46 = vand.u32 4294901760, %v2157_v57 }
 0x22d   : > { %1869 = vmatpush.msra.mxu0 %v1768_v39  ;;  %1677 = vmatmul.f32.vlgmr.msra.gmra.mxu2 %v11326_v12  ;;  %v11508_v33 = vand.u32 4294901760, %v2166_v51 }
 0x22e   : > { %1796 = vmatpush.msrb.mxu2 %v11378_v40  ;;  %1695 = vmatpush.msra.mxu3 %v11303_v26  ;;  %v11464_v26 = vand.u32 4294901760, %v11390_v52  ;;  %v1954_v30 = vand.u32 4294901760, %v11460_v19  ;;  %v11575_v22 = vsub.f32 %v2157_v57, %v11549_v46  ;;  %v2133_v57 = vld [vmem:[%s17806_s6 + $0x48] sm:$0xff] }
 0x22f   : > { %1777 = vmatpush.msrb.mxu1 %v1776_v5  ;;  %1873 = vmatpush.msra.mxu0 %v1774_v36 }
 0x230   : > { %1799 = vmatpush.msrb.mxu2 %v11367_v8  ;;  %1697 = vmatpush.msra.mxu3 %v11293_v21  ;;  %v11474_v21 = vand.u32 4294901760, %v11375_v59  ;;  %v2291_v8 = vand.u32 4294901760, %v11506_v2  ;;  %v1955_v45 = vsub.f32 %v11460_v19, %v1954_v30  ;;  %v2315_v44 = vand.u32 4294901760, %v11575_v22 }
 0x231   : > { %1891 = vmatpush.msra.mxu1 %v11369_v13  ;;  %1994 = vmatpush.msrb.mxu0 %v11450_v47  ;;  %v11610_v47 = vsub.f32 %v2151_v41, %v11586_v58 }
 0x232   : > { %1802 = vmatpush.msrb.mxu2 %v1761_v23  ;;  %1699 = vmatpush.msra.mxu3 %v11335_v37  ;;  %v11487_v37 = vsub.f32 %v11390_v52, %v11464_v26  ;;  %v11498_v61 = vsub.f32 %v11375_v59, %v11474_v21  ;;  %v10441_v59 = vmov 0   ;;  %v2292_v34 = vsub.f32 %v11506_v2, %v2291_v8 }
 0x233   : > { %1893 = vmatpush.msra.mxu1 %v11351_v17  ;;  %1997 = vmatpush.msrb.mxu0 %v11460_v19  ;;  %v11612_v19 = vand.u32 4294901760, %v2145_v11 }
 0x234   : > { %1805 = vmatpush.msrb.mxu2 %v1767_v15  ;;  %1701 = vmatpush.msra.mxu3 %v11362_v62  ;;  %v2103_v62 = vld [vmem:[%s17804_s4] sm:$0xff]  ;;  %v1966_v35 = vand.u32 4294901760, %v11487_v37  ;;  %v1972_v52 = vand.u32 4294901760, %v11498_v61  ;;  %v1962_v15 = vand.u32 4294901760, %v1961_v49  ;;  %v2293_v39 = vand.u32 4294901760, %v2292_v34 }
 0x235   : > { %1895 = vmatpush.msra.mxu1 %v11405_v6  ;;  %2000 = vmatpush.msrb.mxu0 %v11470_v27  ;;  %v11638_v56 = vsub.f32 %v2145_v11, %v11612_v19 }
 0x236   : > { %1703 = vmatmul.f32.vlgmr.msra.gmra.mxu3 %v11326_v12  ;;  %1808 = vmatpush.msrb.mxu2 %v11414_v38  ;;  %v1973_v23 = vsub.f32 %v11498_v61, %v1972_v52  ;;  %v2303_v38 = vand.u32 4294901760, %v11555_v54 }
 0x237   : > { %1827 = vmatpush.msrb.mxu3 %v11369_v13  ;;  %1897 = vmatpush.msra.mxu1 %v11403_v63  ;;  %v11537_v13 = vsub.f32 %v2166_v51, %v11508_v33  ;;  %v11623_v51 = vsub.f32 %v2148_v43, %v11599_v20 }
 0x238   : > { %1917 = vmatpush.msra.mxu2 %v11439_v9  ;;  %2003 = vmatpush.msrb.mxu0 %v11487_v37  ;;  %v1974_v5 = vand.u32 4294901760, %v1973_v23 }
 0x239   : > { %1829 = vmatpush.msrb.mxu3 %v11351_v17  ;;  %1899 = vmatpush.msra.mxu1 %v11395_v18  ;;  %v2160_v17 = vld [vmem:[%s17806_s6 + $0x120] sm:$0xff]  ;;  %v2297_v50 = vand.u32 4294901760, %v11537_v13 }
 0x23a   : > { %1919 = vmatpush.msra.mxu2 %v11444_v24  ;;  %1779 = vmatmul.f32.vlgmr.msrb.gmra.mxu1 %v11326_v12  ;;  %v11542_v40 = vand.u32 4294901760, %v2160_v17 }
 0x23b   : > { %2006 = vmatpush.msrb.mxu0 %v11498_v61  ;;  %2025 = vmatpush.msrb.mxu1 %v11439_v9  ;;  %v2298_v10 = vsub.f32 %v11537_v13, %v2297_v50  ;;  %v11625_v61 = vand.u32 4294901760, %v2142_v4 }
 0x23c   : > { %1831 = vmatpush.msrb.mxu3 %v11405_v6  ;;  %1921 = vmatpush.msra.mxu2 %v11453_v48  ;;  %v1967_v6 = vsub.f32 %v11487_v37, %v1966_v35  ;;  %v11571_v25 = vsub.f32 %v2160_v17, %v11542_v40  ;;  %v2139_v37 = vld [vmem:[%s17806_s6 + $0x78] sm:$0xff]  ;;  %v2327_v17 = vand.u32 4294901760, %v11610_v47 }
 0x23d   : > { %1875 = vmatmul.f32.vlgmr.msra.gmra.mxu0 %v11326_v12  ;;  %2027 = vmatpush.msrb.mxu1 %v11444_v24  ;;  %v2299_v27 = vand.u32 4294901760, %v2298_v10 }
 0x23e   : > { %1833 = vmatpush.msrb.mxu3 %v11403_v63  ;;  %1811 = vmatmul.f32.vlgmr.msrb.gmra.mxu2 %v11332_v16  ;;  %v1956_v63 = vand.u32 4294901760, %v1955_v45  ;;  %v1968_v36 = vand.u32 4294901760, %v1967_v6  ;;  %v2309_v29 = vand.u32 4294901760, %v11571_v25  ;;  %v11653_v45 = vsub.f32 %v2142_v4, %v11625_v61 }
 0x23f   : > { %10330 = vset.pattern.permute.xlu0 %v10441_v59  ;;  %1923 = vmatpush.msra.mxu2 %v11464_v26 }
 0x240   : > { %2029 = vmatpush.msrb.mxu1 %v11453_v48  ;;  %1835 = vmatpush.msrb.mxu3 %v11395_v18  ;;  %v11563_v18 = vand.u32 4294901760, %v2154_v42  ;;  %v2345_v41 = vand.u32 4294901760, %v11653_v45 }
 0x241   : > { %2106 = vperm.xlu0 %10330, %v2103_v62   ;;  %1839 = vmatmul.f32.vlgmr.msrb.gmra.mxu3 %v11338_v60  ;;  %v2333_v62 = vand.u32 4294901760, %v11623_v51 }
 0x242   : > { %1925 = vmatpush.msra.mxu2 %v11474_v21  ;;  %1951 = vmatpush.msra.mxu3 %v1950_v28  ;;  %v11592_v31 = vsub.f32 %v2154_v42, %v11563_v18  ;;  %v2328_v42 = vsub.f32 %v11610_v47, %v2327_v17  ;;  %v2339_v28 = vand.u32 4294901760, %v11638_v56 }
 0x243   : > { %2031 = vmatpush.msrb.mxu1 %v11464_v26  ;;  %10331 = vset.pattern.permute.xlu1 %v10441_v59  ;;  %v2130_v59 = vld [vmem:[%s17806_s6 + $0x30] sm:$0xff]  ;;  %v2334_v34 = vsub.f32 %v11623_v51, %v2333_v62 }
 0x244   : > { %2055 = vmatpush.msrb.mxu2 %v1948_v1  ;;  %1901 = vmatmul.f32.vlgmr.msra.gmra.mxu1 %v11326_v12  ;;  %v2321_v32 = vand.u32 4294901760, %v11592_v31  ;;  %v2316_v1 = vsub.f32 %v11575_v22, %v2315_v44  ;;  %v11682_v6 = vand.u32 4294901760, %v2130_v59  ;;  %v2340_v43 = vsub.f32 %v11638_v56, %v2339_v28 }
 0x245   : > { %1957 = vmatpush.msra.mxu3 %v1956_v63  ;;  %2033 = vmatpush.msrb.mxu1 %v11474_v21 }
 0x246   : > { %2059 = vmatpush.msrb.mxu2 %v1954_v30  ;;  %2115 = vperm.xlu1 %10331, %v2112_v3   ;;  %v2341_v10 = vand.u32 4294901760, %v2340_v43  ;;  %v2217_v43 = vld [vmem:[%s17806_s6 + $0x2e8] sm:$0xff] }
 0x247   : > { %1963 = vmatpush.msra.mxu3 %v1962_v15  ;;  %1931 = vmatmul.f32.vlgmr.msra.gmra.mxu2 %v11364_v7  ;;  %v2304_v7 = vsub.f32 %v11555_v54, %v2303_v38 }
 0x248   : > { %2063 = vmatpush.msrb.mxu2 %v1960_v0  ;;  %2009 = vmatmul.f32.vlgmr.msrb.gmra.mxu0 %v11332_v16  ;;  %v2310_v16 = vsub.f32 %v11571_v25, %v2309_v29  ;;  %v11640_v0 = vand.u32 4294901760, %v2139_v37 }
 0x249   : > { %1969 = vmatpush.msra.mxu3 %v1968_v36  ;;  %2294 = vmatpush.msra.mxu1 %v2293_v39  ;;  %v2305_v30 = vand.u32 4294901760, %v2304_v7  ;;  %v11702_v39 = vsub.f32 %v2130_v59, %v11682_v6 }
 0x24a   : > { %2067 = vmatpush.msrb.mxu2 %v1966_v35  ;;  %2249 = vmatpush.msra.mxu0 %v11483_v55  ;;  %v2317_v35 = vand.u32 4294901760, %v2316_v1  ;;  %v11668_v49 = vsub.f32 %v2139_v37, %v11640_v0 }
 0x24b   : > { %1975 = vmatpush.msra.mxu3 %v1974_v5  ;;  %2300 = vmatpush.msra.mxu1 %v2299_v27  ;;  %v2369_v7 = vand.u32 4294901760, %v11702_v39 }
 0x24c   : > { %2071 = vmatpush.msrb.mxu2 %v1972_v52  ;;  %1977 = vmatmul.f32.vlgmr.msra.gmra.mxu3 %v11326_v12  ;;  %v2351_v15 = vand.u32 4294901760, %v11668_v49 }
 0x24d   : > { %2089 = vmatpush.msrb.mxu3 %v11439_v9  ;;  %2037 = vmatmul.f32.vlgmr.msrb.gmra.mxu1 %v11338_v60  ;;  %v2322_v9 = vsub.f32 %v11592_v31, %v2321_v32  ;;  %v2311_v60 = vand.u32 4294901760, %v2310_v16  ;;  %v2370_v1 = vsub.f32 %v11702_v39, %v2369_v7 }
 0x24e   : > { %2251 = vmatpush.msra.mxu0 %v11508_v33  ;;  %2392 = vmatpush.msra.mxu2 %v11506_v2  ;;  %v2352_v11 = vsub.f32 %v11668_v49, %v2351_v15 }
 0x24f   : > { %2091 = vmatpush.msrb.mxu3 %v11444_v24  ;;  %2073 = vmatmul.f32.vlgmr.msrb.gmra.mxu2 %v11326_v12  ;;  %v11655_v24 = vand.u32 4294901760, %v2136_v14  ;;  %v2323_v52 = vand.u32 4294901760, %v2322_v9  ;;  %v2127_v9 = vld [vmem:[%s17806_s6 + $0x18] sm:$0xff] }
 0x250   : > { %2306 = vmatpush.msra.mxu1 %v2305_v30  ;;  %2253 = vmatpush.msra.mxu0 %v11525_v53  ;;  %v2353_v27 = vand.u32 4294901760, %v2352_v11  ;;  %v2371_v30 = vand.u32 4294901760, %v2370_v1  ;;  %v2214_v11 = vld [vmem:[%s17806_s6 + $0x2d0] sm:$0xff] }
 0x251   : > { %2093 = vmatpush.msrb.mxu3 %v11453_v48  ;;  %v11670_v48 = vand.u32 4294901760, %v2133_v57  ;;  %2395 = vmatpush.msra.mxu2 %v11537_v13  ;;  %v11680_v63 = vsub.f32 %v2136_v14, %v11655_v24  ;;  %v11796_v2 = vand.u32 4294901760, %v2214_v11 }
 0x252   : > { %2312 = vmatpush.msra.mxu1 %v2311_v60  ;;  %2255 = vmatpush.msra.mxu0 %v11542_v40  ;;  %v2124_v60 = vld [vmem:[%s17806_s6] sm:$0xff] }
 0x253   : > { %2095 = vmatpush.msrb.mxu3 %v11464_v26  ;;  %2398 = vmatpush.msra.mxu2 %v11555_v54  ;;  %v2329_v26 = vand.u32 4294901760, %v2328_v42  ;;  %v11692_v23 = vsub.f32 %v2133_v57, %v11670_v48  ;;  %v2357_v3 = vand.u32 4294901760, %v11680_v63  ;;  %v11753_v57 = vand.u32 4294901760, %v2127_v9 }
 0x254   : > { %2318 = vmatpush.msra.mxu1 %v2317_v35  ;;  %2257 = vmatpush.msra.mxu0 %v11549_v46  ;;  %v11761_v59 = vand.u32 4294901760, %v2124_v60 }
 0x255   : > { %2097 = vmatpush.msrb.mxu3 %v11474_v21  ;;  %2401 = vmatpush.msra.mxu2 %v11571_v25  ;;  %v2335_v21 = vand.u32 4294901760, %v2334_v34  ;;  %v2363_v36 = vand.u32 4294901760, %v11692_v23  ;;  %v2358_v5 = vsub.f32 %v11680_v63, %v2357_v3  ;;  %v11759_v35 = vsub.f32 %v2127_v9, %v11753_v57 }
 0x256   : > { %2099 = vmatmul.f32.vlgmr.msrb.gmra.mxu3 %v11326_v12  ;;  %2324 = vmatpush.msra.mxu1 %v2323_v52  ;;  %v2346_v12 = vsub.f32 %v11653_v45, %v2345_v41  ;;  %v11767_v52 = vsub.f32 %v2124_v60, %v11761_v59  ;;  %v2202_v60 = vld [vmem:[%s17806_s6 + $0x270] sm:$0xff] }
 0x257   : > { %2445 = vmatpush.msra.mxu3 %v11483_v55  ;;  %2404 = vmatpush.msra.mxu2 %v11575_v22  ;;  %v2364_v37 = vsub.f32 %v11692_v23, %v2363_v36  ;;  %v2359_v16 = vand.u32 4294901760, %v2358_v5  ;;  %v2375_v42 = vand.u32 4294901760, %v11759_v35  ;;  %v2211_v5 = vld [vmem:[%s17806_s6 + $0x2b8] sm:$0xff] }
 0x258   : > { %2330 = vmatpush.msra.mxu1 %v2329_v26  ;;  %2259 = vmatpush.msra.mxu0 %v11563_v18  ;;  %v2347_v4 = vand.u32 4294901760, %v2346_v12  ;;  %v2381_v26 = vand.u32 4294901760, %v11767_v52 }
 0x259   : > { %2447 = vmatpush.msra.mxu3 %v11508_v33  ;;  %2407 = vmatpush.msra.mxu2 %v11592_v31  ;;  %v2365_v14 = vand.u32 4294901760, %v2364_v37  ;;  %v2376_v34 = vsub.f32 %v11759_v35, %v2375_v42  ;;  %v2208_v37 = vld [vmem:[%s17806_s6 + $0x2a0] sm:$0xff]  ;;  %v2199_v31 = vld [vmem:[%s17806_s6 + $0x258] sm:$0xff] }
 0x25a   : > { %2336 = vmatpush.msra.mxu1 %v2335_v21  ;;  %2261 = vmatpush.msra.mxu0 %v11586_v58  ;;  %v11782_v21 = vand.u32 4294901760, %v2217_v43  ;;  %v11824_v1 = vand.u32 4294901760, %v2208_v37 }
 0x25b   : > { %2449 = vmatpush.msra.mxu3 %v11525_v53  ;;  %2410 = vmatpush.msra.mxu2 %v11610_v47  ;;  %v2377_v12 = vand.u32 4294901760, %v2376_v34  ;;  %v11852_v34 = vand.u32 4294901760, %v2202_v60  ;;  %v2196_v47 = vld [vmem:[%s17806_s6 + $0x240] sm:$0xff] }
 0x25c   : > { %2342 = vmatpush.msra.mxu1 %v2341_v10  ;;  %2263 = vmatpush.msra.mxu0 %v11599_v20  ;;  %v2382_v10 = vsub.f32 %v11767_v52, %v2381_v26  ;;  %v11840_v9 = vsub.f32 %v2208_v37, %v11824_v1 }
 0x25d   : > { %2451 = vmatpush.msra.mxu3 %v11542_v40  ;;  %2413 = vmatpush.msra.mxu2 %v11623_v51  ;;  %v2193_v51 = vld [vmem:[%s17806_s6 + $0x228] sm:$0xff] }
 0x25e   : > { %2348 = vmatpush.msra.mxu1 %v2347_v4  ;;  %2265 = vmatpush.msra.mxu0 %v11612_v19  ;;  %v11794_v4 = vsub.f32 %v2217_v43, %v11782_v21 }
 0x25f   : > { %2453 = vmatpush.msra.mxu3 %v11549_v46  ;;  %2416 = vmatpush.msra.mxu2 %v11638_v56  ;;  %v2190_v56 = vld [vmem:[%s17806_s6 + $0x210] sm:$0xff] }
 0x260   : > { %2354 = vmatpush.msra.mxu1 %v2353_v27  ;;  %2267 = vmatpush.msra.mxu0 %v11625_v61  ;;  %v2632_v13 = vand.u32 4294901760, %v11794_v4  ;;  %v11808_v27 = vsub.f32 %v2214_v11, %v11796_v2 }
 0x261   : > { %2455 = vmatpush.msra.mxu3 %v11563_v18  ;;  %2419 = vmatpush.msra.mxu2 %v11653_v45  ;;  %v2187_v45 = vld [vmem:[%s17806_s6 + $0x1f8] sm:$0xff] }
 0x262   : > { %2360 = vmatpush.msra.mxu1 %v2359_v16  ;;  %2269 = vmatpush.msra.mxu0 %v11640_v0  ;;  %v2205_v16 = vld [vmem:[%s17806_s6 + $0x288] sm:$0xff]  ;;  %v2633_v54 = vsub.f32 %v11794_v4, %v2632_v13 }
 0x263   : > { %2457 = vmatpush.msra.mxu3 %v11586_v58  ;;  %2422 = vmatpush.msra.mxu2 %v11668_v49 }
 0x264   : > { %2366 = vmatpush.msra.mxu1 %v2365_v14  ;;  %2271 = vmatpush.msra.mxu0 %v11655_v24 }
 0x265   : > { %2459 = vmatpush.msra.mxu3 %v11599_v20  ;;  %2425 = vmatpush.msra.mxu2 %v11680_v63 }
 0x266   : > { %2372 = vmatpush.msra.mxu1 %v2371_v30  ;;  %2273 = vmatpush.msra.mxu0 %v11670_v48  ;;  %v11829_v30 = vand.u32 4294901760, %v2205_v16 }
 0x267   : > { %2461 = vmatpush.msra.mxu3 %v11612_v19  ;;  %2428 = vmatpush.msra.mxu2 %v11692_v23 }
 0x268   : > { %2275 = vmatpush.msra.mxu0 %v11682_v6  ;;  %2378 = vmatpush.msra.mxu1 %v2377_v12  ;;  %v11856_v43 = vsub.f32 %v2205_v16, %v11829_v30  ;;  %v11867_v12 = vand.u32 4294901760, %v2199_v31  ;;  %v11900_v16 = vand.u32 4294901760, %v2193_v51 }
 0x269   : > { %2463 = vmatpush.msra.mxu3 %v11625_v61  ;;  %2431 = vmatpush.msra.mxu2 %v11702_v39 }
 0x26a   : > { %2277 = vmatpush.msra.mxu0 %v11753_v57  ;;  %v2656_v11 = vand.u32 4294901760, %v11856_v43 }
 0x26b   : > { %2465 = vmatpush.msra.mxu3 %v11640_v0  ;;  %2434 = vmatpush.msra.mxu2 %v11759_v35 }
 0x26c   : > { %2279 = vmatpush.msra.mxu0 %v11761_v59  ;;  %v2657_v37 = vsub.f32 %v11856_v43, %v2656_v11 }
 0x26d   : > { %2467 = vmatpush.msra.mxu3 %v11655_v24  ;;  %2437 = vmatpush.msra.mxu2 %v11767_v52 }
 0x26e   : > { %2486 = vmatpush.msrb.mxu0 %v2291_v8  ;;  %v2383_v8 = vand.u32 4294901760, %v2382_v10  ;;  %v11870_v10 = vsub.f32 %v2202_v60, %v11852_v34  ;;  %v11916_v60 = vand.u32 4294901760, %v2190_v56 }
 0x26f   : > { %2469 = vmatpush.msra.mxu3 %v11670_v48  ;;  %2590 = vmatpush.msrb.mxu2 %v11782_v21 }
 0x270   : > { %2490 = vmatpush.msrb.mxu0 %v2297_v50  ;;  %v11805_v50 = vand.u32 4294901760, %v2211_v5  ;;  %2384 = vmatpush.msra.mxu1 %v2383_v8  ;;  %v11881_v8 = vand.u32 4294901760, %v2196_v47 }
 0x271   : > { %2471 = vmatpush.msra.mxu3 %v11682_v6  ;;  %2592 = vmatpush.msrb.mxu2 %v11796_v2 }
 0x272   : > { %2494 = vmatpush.msrb.mxu0 %v2303_v38  ;;  %2553 = vmatpush.msrb.mxu1 %v11483_v55  ;;  %v2638_v38 = vand.u32 4294901760, %v11808_v27  ;;  %v11827_v14 = vsub.f32 %v2211_v5, %v11805_v50  ;;  %v2634_v55 = vand.u32 4294901760, %v2633_v54  ;;  %v11884_v5 = vsub.f32 %v2199_v31, %v11867_v12 }
 0x273   : > { %2473 = vmatpush.msra.mxu3 %v11753_v57  ;;  %2594 = vmatpush.msrb.mxu2 %v11805_v50  ;;  %v11903_v54 = vsub.f32 %v2196_v47, %v11881_v8  ;;  %v11932_v31 = vsub.f32 %v2190_v56, %v11916_v60 }
 0x274   : > { %2498 = vmatpush.msrb.mxu0 %v2309_v29  ;;  %2555 = vmatpush.msrb.mxu1 %v11508_v33  ;;  %v2639_v25 = vsub.f32 %v11808_v27, %v2638_v38  ;;  %v2644_v29 = vand.u32 4294901760, %v11827_v14 }
 0x275   : > { %2475 = vmatpush.msra.mxu3 %v11761_v59  ;;  %2596 = vmatpush.msrb.mxu2 %v11824_v1  ;;  %v2686_v47 = vand.u32 4294901760, %v11932_v31 }
 0x276   : > { %2502 = vmatpush.msrb.mxu0 %v2315_v44  ;;  %2557 = vmatpush.msrb.mxu1 %v11525_v53  ;;  %v2640_v33 = vand.u32 4294901760, %v2639_v25  ;;  %v2645_v22 = vsub.f32 %v11827_v14, %v2644_v29  ;;  %v2650_v44 = vand.u32 4294901760, %v11840_v9  ;;  %v2674_v25 = vand.u32 4294901760, %v11903_v54 }
 0x277   : > { %2635 = vmatpush.msrb.mxu3 %v2634_v55  ;;  %2598 = vmatpush.msrb.mxu2 %v11829_v30  ;;  %v2658_v55 = vand.u32 4294901760, %v2657_v37 }
 0x278   : > { %2506 = vmatpush.msrb.mxu0 %v2321_v32  ;;  %2559 = vmatpush.msrb.mxu1 %v11542_v40  ;;  %v2646_v53 = vand.u32 4294901760, %v2645_v22  ;;  %v2651_v32 = vsub.f32 %v11840_v9, %v2650_v44  ;;  %v11929_v22 = vand.u32 4294901760, %v2187_v45 }
 0x279   : > { %2641 = vmatpush.msrb.mxu3 %v2640_v33  ;;  %2600 = vmatpush.msrb.mxu2 %v11852_v34  ;;  %v11920_v33 = vsub.f32 %v2193_v51, %v11900_v16 }
 0x27a   : > { %2510 = vmatpush.msrb.mxu0 %v2327_v17  ;;  %2561 = vmatpush.msrb.mxu1 %v11549_v46  ;;  %v2652_v40 = vand.u32 4294901760, %v2651_v32  ;;  %v2662_v17 = vand.u32 4294901760, %v11870_v10  ;;  %v11946_v37 = vsub.f32 %v2187_v45, %v11929_v22 }
 0x27b   : > { %2647 = vmatpush.msrb.mxu3 %v2646_v53  ;;  %2602 = vmatpush.msrb.mxu2 %v11867_v12  ;;  %v2680_v53 = vand.u32 4294901760, %v11920_v33 }
 0x27c   : > { %2514 = vmatpush.msrb.mxu0 %v2333_v62  ;;  %2563 = vmatpush.msrb.mxu1 %v11563_v18  ;;  %v2663_v46 = vsub.f32 %v11870_v10, %v2662_v17  ;;  %v2668_v62 = vand.u32 4294901760, %v11884_v5  ;;  %v2692_v63 = vand.u32 4294901760, %v11946_v37 }
 0x27d   : > { %2653 = vmatpush.msrb.mxu3 %v2652_v40  ;;  %2604 = vmatpush.msrb.mxu2 %v11881_v8  ;;  %v2681_v49 = vsub.f32 %v11920_v33, %v2680_v53 }
 0x27e   : > { %2518 = vmatpush.msrb.mxu0 %v2339_v28  ;;  %2565 = vmatpush.msrb.mxu1 %v11586_v58  ;;  %v2664_v18 = vand.u32 4294901760, %v2663_v46  ;;  %v2669_v28 = vsub.f32 %v11884_v5, %v2668_v62  ;;  %v2693_v56 = vsub.f32 %v11946_v37, %v2692_v63 }
 0x27f   : > { %2659 = vmatpush.msrb.mxu3 %v2658_v55  ;;  %2606 = vmatpush.msrb.mxu2 %v11900_v16  ;;  %v2682_v46 = vand.u32 4294901760, %v2681_v49 }
 0x280   : > { %2522 = vmatpush.msrb.mxu0 %v2345_v41  ;;  %2567 = vmatpush.msrb.mxu1 %v11599_v20  ;;  %v2670_v58 = vand.u32 4294901760, %v2669_v28  ;;  %v2675_v41 = vsub.f32 %v11903_v54, %v2674_v25  ;;  %v2184_v20 = vld [vmem:[%s17806_s6 + $0x1e0] sm:$0xff] }
 0x281   : > { %2665 = vmatpush.msrb.mxu3 %v2664_v18  ;;  %2608 = vmatpush.msrb.mxu2 %v11916_v60  ;;  %v11943_v40 = vand.u32 4294901760, %v2184_v20 }
 0x282   : > { %2526 = vmatpush.msrb.mxu0 %v2351_v15  ;;  %2569 = vmatpush.msrb.mxu1 %v11612_v19  ;;  %v2676_v32 = vand.u32 4294901760, %v2675_v41  ;;  %v2181_v19 = vld [vmem:[%s17806_s6 + $0x1c8] sm:$0xff]  ;;  %v2687_v15 = vsub.f32 %v11932_v31, %v2686_v47 }
 0x283   : > { %2671 = vmatpush.msrb.mxu3 %v2670_v58  ;;  %2610 = vmatpush.msrb.mxu2 %v11929_v22  ;;  %v11965_v51 = vsub.f32 %v2184_v20, %v11943_v40 }
 0x284   : > { %2530 = vmatpush.msrb.mxu0 %v2357_v3  ;;  %2571 = vmatpush.msrb.mxu1 %v11625_v61  ;;  %v11962_v3 = vand.u32 4294901760, %v2181_v19  ;;  %v2178_v61 = vld [vmem:[%s17806_s6 + $0x1b0] sm:$0xff]  ;;  %v2688_v55 = vand.u32 4294901760, %v2687_v15 }
 0x285   : > { %2677 = vmatpush.msrb.mxu3 %v2676_v32  ;;  %2612 = vmatpush.msrb.mxu2 %v11943_v40  ;;  %v2698_v18 = vand.u32 4294901760, %v11965_v51  ;;  %v11978_v28 = vand.u32 4294901760, %v2178_v61 }
 0x286   : > { %2534 = vmatpush.msrb.mxu0 %v2363_v36  ;;  %2573 = vmatpush.msrb.mxu1 %v11640_v0  ;;  %v11984_v23 = vsub.f32 %v2181_v19, %v11962_v3  ;;  %v2175_v0 = vld [vmem:[%s17806_s6 + $0x198] sm:$0xff]  ;;  %v2694_v36 = vand.u32 4294901760, %v2693_v56 }
 0x287   : > { %2683 = vmatpush.msrb.mxu3 %v2682_v46  ;;  %2614 = vmatpush.msrb.mxu2 %v11962_v3  ;;  %v2699_v45 = vsub.f32 %v11965_v51, %v2698_v18  ;;  %v11993_v58 = vand.u32 4294901760, %v2175_v0  ;;  %v11996_v39 = vsub.f32 %v2178_v61, %v11978_v28 }
 0x288   : > { %2538 = vmatpush.msrb.mxu0 %v2369_v7  ;;  %2575 = vmatpush.msrb.mxu1 %v11655_v24  ;;  %v2704_v7 = vand.u32 4294901760, %v11984_v23  ;;  %v2172_v24 = vld [vmem:[%s17806_s6 + $0x180] sm:$0xff] }
 0x289   : > { %2689 = vmatpush.msrb.mxu3 %v2688_v55  ;;  %2616 = vmatpush.msrb.mxu2 %v11978_v28  ;;  %v2700_v20 = vand.u32 4294901760, %v2699_v45  ;;  %v17820_v32 = vand.u32 4294901760, %v11996_v39  ;;  %v12007_v49 = vand.u32 4294901760, %v2172_v24  ;;  %v12010_v35 = vsub.f32 %v2175_v0, %v11993_v58 }
 0x28a   : > { %2542 = vmatpush.msrb.mxu0 %v2375_v42  ;;  %2577 = vmatpush.msrb.mxu1 %v11670_v48  ;;  %v2705_v42 = vsub.f32 %v11984_v23, %v2704_v7 }
 0x28b   : > { %2695 = vmatpush.msrb.mxu3 %v2694_v36  ;;  %2618 = vmatpush.msrb.mxu2 %v11993_v58  ;;  %v2711_v48 = vsub.f32 %v11996_v39, %v17820_v32  ;;  %v17819_v19 = vand.u32 4294901760, %v12010_v35  ;;  %v12024_v15 = vsub.f32 %v2172_v24, %v12007_v49 }
 0x28c   : > { %2546 = vmatpush.msrb.mxu0 %v2381_v26  ;;  %2579 = vmatpush.msrb.mxu1 %v11682_v6  ;;  %v2706_v52 = vand.u32 4294901760, %v2705_v42 }
 0x28d   : > { %2701 = vmatpush.msrb.mxu3 %v2700_v20  ;;  %2620 = vmatpush.msrb.mxu2 %v12007_v49  ;;  %v2712_v46 = vand.u32 4294901760, %v2711_v48  ;;  %v2717_v6 = vsub.f32 %v12010_v35, %v17819_v19  ;;  %v17821_v61 = vand.u32 4294901760, %v12024_v15 }
 0x28e   : > { %2581 = vmatpush.msrb.mxu1 %v11753_v57 }
 0x28f   : > { %2707 = vmatpush.msrb.mxu3 %v2706_v52  ;;  %v2718_v55 = vand.u32 4294901760, %v2717_v6  ;;  %v2723_v56 = vsub.f32 %v12024_v15, %v17821_v61 }
 0x290   : > { %2583 = vmatpush.msrb.mxu1 %v11761_v59 }
 0x291   : > { %2713 = vmatpush.msrb.mxu3 %v2712_v46  ;;  %v2724_v0 = vand.u32 4294901760, %v2723_v56 }
 0x293   : > { %2719 = vmatpush.msrb.mxu3 %v2718_v55 }
 0x295   : > { %2725 = vmatpush.msrb.mxu3 %v2724_v0 }
 0x29b   : > { %v1536_v41 = vpop.f32.mrf.mxu2 }
 0x2a3   : > { %v1582_v26 = vpop.f32.mrf.mxu3  ;;  %v1734_v6 = vpop.f32.mrf.mxu0 }
 0x2a4   : > { %v1583_v57 = vadd.f32 %v1582_v26, %v1536_v41 }
 0x2a7   : > { %v1614_v36 = vpop.f32.mrf.mxu2 }
 0x2a8   : > { %v1615_v24 = vadd.f32 %v1614_v36, %v1583_v57 }
 0x2ae   : > { %v1642_v45 = vpop.f32.mrf.mxu3 }
 0x2af   : > { %v1643_v20 = vadd.f32 %v1642_v45, %v1615_v24 }
 0x2b0   : > { %v1678_v42 = vpop.f32.mrf.mxu2 }
 0x2b1   : > { %v1679_v48 = vadd.f32 %v1678_v42, %v1643_v20 }
 0x2b3   : > { %v12036_v52 = vpop.permute.xlu0 %2106 }
 0x2b7   : > { %v1780_v46 = vpop.f32.mrf.mxu1 }
 0x2b8   : > { %v12038_v32 = vpop.permute.xlu1 %2115  ;;  %v1781_v56 = vadd.f32 %v1780_v46, %v1734_v6 }
 0x2b9   : > { %v1704_v19 = vpop.f32.mrf.mxu3 }
 0x2ba   : > { %v1705_v59 = vadd.f32 %v1704_v19, %v1679_v48  ;;  %v1876_v45 = vpop.f32.mrf.mxu0 }
 0x2bc   : > { %v2109_v61 = vmul.f32 %v12036_v52, %v1705_v59 }
 0x2be   : > { %v2118_v55 = vadd.f32 %v12038_v32, %v2109_v61 }
 0x2c0   : > { %v2121_v0 = vmax.f32 %v2118_v55, 0.0 }
 0x2c1   : > { %v1812_v26 = vpop.f32.mrf.mxu2  ;;  %v1902_v20 = vpop.f32.mrf.mxu1 }
 0x2c2   : > { %v12042_v41 = vand.u32 4294901760, %v2121_v0  ;;  %v1813_v36 = vadd.f32 %v1812_v26, %v1781_v56 }
 0x2c4   : > { %v12045_v57 = vsub.f32 %v2121_v0, %v12042_v41  ;;  %2386 = vmatmul.f32.vlgmr.msra.gmra.mxu1 %v12042_v41  ;;  %v1840_v19 = vpop.f32.mrf.mxu3 }
 0x2c5   : > { %2786 = vmatpush.msra.mxu1 %v11782_v21  ;;  %v1841_v24 = vadd.f32 %v1840_v19, %v1813_v36 }
 0x2c6   : > { %2440 = vmatmul.f32.vlgmr.msra.gmra.mxu2 %v12045_v57  ;;  %v12051_v61 = vand.u32 4294901760, %v12045_v57 }
 0x2c7   : > { %2788 = vmatpush.msra.mxu1 %v11796_v2  ;;  %2827 = vmatpush.msra.mxu2 %v2632_v13  ;;  %v1877_v42 = vadd.f32 %v1876_v45, %v1841_v24 }
 0x2c8   : > { %2479 = vmatmul.f32.vlgmr.msra.gmra.mxu3 %v12051_v61  ;;  %v2283_v48 = vsub.f32 %v12045_v57, %v12051_v61 }
 0x2c9   : > { %2790 = vmatpush.msra.mxu1 %v11805_v50  ;;  %2831 = vmatpush.msra.mxu2 %v2638_v38  ;;  %v1903_v59 = vadd.f32 %v1902_v20, %v1877_v42  ;;  %v2226_v20 = vld [vmem:[%s17806_s6 + $0x330] sm:$0xff]  ;;  %v2223_v42 = vld [vmem:[%s17806_s6 + $0x318] sm:$0xff] }
 0x2ca   : > { %2894 = vmatpush.msra.mxu3 %v11782_v21  ;;  %v12063_v6 = vand.u32 4294901760, %v2283_v48  ;;  %v1932_v46 = vpop.f32.mrf.mxu2  ;;  %v2038_v55 = vpop.f32.mrf.mxu1 }
 0x2cb   : > { %2792 = vmatpush.msra.mxu1 %v11824_v1  ;;  %2835 = vmatpush.msra.mxu2 %v2644_v29  ;;  %v2110_v13 = vmul.f32 %v12036_v52, %v1903_v59  ;;  %v2010_v29 = vpop.f32.mrf.mxu0 }
 0x2cc   : > { %2896 = vmatpush.msra.mxu3 %v11796_v2  ;;  %2285 = vmatmul.f32.vlgmr.msra.gmra.mxu0 %v12063_v6 }
 0x2cd   : > { %2585 = vmatmul.f32.vlgmr.msrb.gmra.mxu1 %v12042_v41  ;;  %2733 = vmatpush.msra.mxu0 %v11794_v4  ;;  %v2119_v21 = vadd.f32 %v12038_v32, %v2110_v13 }
 0x2ce   : > { %2794 = vmatpush.msra.mxu1 %v11829_v30  ;;  %2839 = vmatpush.msra.mxu2 %v2650_v44  ;;  %v2241_v44 = vld [vmem:[%s17806_s6 + $0x3a8] sm:$0xff] }
 0x2cf   : > { %2898 = vmatpush.msra.mxu3 %v11805_v50  ;;  %2736 = vmatpush.msra.mxu0 %v11808_v27  ;;  %v2122_v38 = vmax.f32 %v2119_v21, 0.0  ;;  %v1978_v2 = vpop.f32.mrf.mxu3 }
 0x2d0   : > { %2796 = vmatpush.msra.mxu1 %v11852_v34  ;;  %2843 = vmatpush.msra.mxu2 %v2656_v11  ;;  %v1979_v4 = vadd.f32 %v1978_v2, %v1932_v46  ;;  %v12102_v11 = vand.u32 4294901760, %v2241_v44  ;;  %v18037_v2 = vand.u32 4294901760, %v12010_v35 }
 0x2d1   : > { %2900 = vmatpush.msra.mxu3 %v11824_v1  ;;  %2739 = vmatpush.msra.mxu0 %v11827_v14  ;;  %v12087_v50 = vand.u32 4294901760, %v2122_v38  ;;  %v2238_v1 = vld [vmem:[%s17806_s6 + $0x390] sm:$0xff] }
 0x2d2   : > { %2798 = vmatpush.msra.mxu1 %v11867_v12  ;;  %2847 = vmatpush.msra.mxu2 %v2662_v17  ;;  %v2011_v27 = vadd.f32 %v2010_v29, %v1979_v4  ;;  %v12115_v56 = vand.u32 4294901760, %v2238_v1  ;;  %v2074_v0 = vpop.f32.mrf.mxu2  ;;  %v12128_v26 = vsub.f32 %v2241_v44, %v12102_v11 }
 0x2d3   : > { %2902 = vmatpush.msra.mxu3 %v11829_v30  ;;  %2742 = vmatpush.msra.mxu0 %v11840_v9  ;;  %v12098_v14 = vsub.f32 %v2122_v38, %v12087_v50  ;;  %v2235_v30 = vld [vmem:[%s17806_s6 + $0x378] sm:$0xff] }
 0x2d4   : > { %2727 = vmatmul.f32.vlgmr.msrb.gmra.mxu3 %v12087_v50  ;;  %2800 = vmatpush.msra.mxu1 %v11881_v8  ;;  %v2039_v9 = vadd.f32 %v2038_v55, %v2011_v27  ;;  %v12130_v36 = vand.u32 4294901760, %v2235_v30  ;;  %v12143_v19 = vsub.f32 %v2238_v1, %v12115_v56  ;;  %v2170_v27 = vld [vmem:[%s17806_s6 + $0x170] sm:$0xff] }
 0x2d5   : > { %18034 = vst [vmem:[#allocation8_spill] sm:$0xff] %v12098_v14  ;;  %2851 = vmatpush.msra.mxu2 %v2668_v62  ;;  %2904 = vmatpush.msra.mxu3 %v11852_v34  ;;  %v12113_v17 = vand.u32 4294901760, %v12098_v14  ;;  %v2232_v34 = vld [vmem:[%s17806_s6 + $0x360] sm:$0xff] }
 0x2d6   : > { %2548 = vmatmul.f32.vlgmr.msrb.gmra.mxu0 %v12042_v41  ;;  %2802 = vmatpush.msra.mxu1 %v11900_v16  ;;  %v12145_v45 = vand.u32 4294901760, %v2232_v34 }
 0x2d7   : > { %18035 = vst [vmem:[#allocation9_spill] sm:$0xff] %v12113_v17  ;;  %2745 = vmatpush.msra.mxu0 %v11856_v43  ;;  %2855 = vmatpush.msra.mxu2 %v2674_v25  ;;  %v2624_v62 = vsub.f32 %v12098_v14, %v12113_v17  ;;  %v2229_v43 = vld [vmem:[%s17806_s6 + $0x348] sm:$0xff] }
 0x2d8   : > { %2906 = vmatpush.msra.mxu3 %v11867_v12  ;;  %2804 = vmatpush.msra.mxu1 %v11916_v60  ;;  %v2075_v12 = vadd.f32 %v2074_v0, %v2039_v9  ;;  %v12156_v24 = vand.u32 4294901760, %v2229_v43  ;;  %v12255_v0 = vand.u32 4294901760, %v2170_v27 }
 0x2d9   : > { %2748 = vmatpush.msra.mxu0 %v11870_v10  ;;  %2859 = vmatpush.msra.mxu2 %v2680_v53  ;;  %v12140_v25 = vand.u32 4294901760, %v2624_v62  ;;  %v2100_v10 = vpop.f32.mrf.mxu3  ;;  %v12154_v53 = vsub.f32 %v2235_v30, %v12130_v36  ;;  %v2167_v30 = vld [vmem:[%s17806_s6 + $0x158] sm:$0xff]  ;;  %v2164_v62 = vld [vmem:[%s17806_s6 + $0x140] sm:$0xff] }
 0x2da   : > { %2908 = vmatpush.msra.mxu3 %v11881_v8  ;;  %2806 = vmatpush.msra.mxu1 %v11929_v22  ;;  %v2973_v8 = vand.u32 4294901760, %v12128_v26  ;;  %v12185_v48 = vsub.f32 %v2229_v43, %v12156_v24 }
 0x2db   : > { %2751 = vmatpush.msra.mxu0 %v11884_v5  ;;  %2863 = vmatpush.msra.mxu2 %v2686_v47  ;;  %v2101_v5 = vadd.f32 %v2100_v10, %v2075_v12  ;;  %v12168_v47 = vsub.f32 %v2232_v34, %v12145_v45 }
 0x2dc   : > { %2910 = vmatpush.msra.mxu3 %v11900_v16  ;;  %2626 = vmatmul.f32.vlgmr.msrb.gmra.mxu2 %v12140_v25  ;;  %v2979_v16 = vand.u32 4294901760, %v12143_v19  ;;  %v2997_v21 = vand.u32 4294901760, %v12185_v48 }
 0x2dd   : > { %2754 = vmatpush.msra.mxu0 %v11903_v54  ;;  %2808 = vmatpush.msra.mxu1 %v11943_v40  ;;  %v12175_v54 = vand.u32 4294901760, %v2226_v20  ;;  %v2991_v13 = vand.u32 4294901760, %v12168_v47 }
 0x2de   : > { %2867 = vmatpush.msra.mxu2 %v2692_v63  ;;  %2912 = vmatpush.msra.mxu3 %v11916_v60  ;;  %v2974_v60 = vsub.f32 %v12128_v26, %v2973_v8  ;;  %v2985_v63 = vand.u32 4294901760, %v12154_v53  ;;  %v2980_v59 = vsub.f32 %v12143_v19, %v2979_v16 }
 0x2df   : > { %2757 = vmatpush.msra.mxu0 %v11920_v33  ;;  %2810 = vmatpush.msra.mxu1 %v11962_v3  ;;  %v2220_v33 = vld [vmem:[%s17806_s6 + $0x300] sm:$0xff]  ;;  %v2992_v29 = vsub.f32 %v12168_v47, %v2991_v13 }
 0x2e0   : > { %2871 = vmatpush.msra.mxu2 %v2698_v18  ;;  %2914 = vmatpush.msra.mxu3 %v11929_v22  ;;  %v12192_v18 = vand.u32 4294901760, %v2223_v42  ;;  %v2111_v22 = vmul.f32 %v12036_v52, %v2101_v5  ;;  %v12207_v46 = vand.u32 4294901760, %v2220_v33  ;;  %v18036_v52 = vand.u32 4294901760, %v11996_v39  ;;  %v2161_v5 = vld [vmem:[%s17806_s6 + $0x128] sm:$0xff] }
 0x2e1   : > { %2760 = vmatpush.msra.mxu0 %v11932_v31  ;;  %2812 = vmatpush.msra.mxu1 %v11978_v28  ;;  %v12205_v31 = vsub.f32 %v2226_v20, %v12175_v54  ;;  %v2993_v1 = vand.u32 4294901760, %v2992_v29  ;;  %v12275_v20 = vsub.f32 %v2170_v27, %v12255_v0  ;;  %v2152_v29 = vld [vmem:[%s17806_s6 + $0xe0] sm:$0xff] }
 0x2e2   : > { %2875 = vmatpush.msra.mxu2 %v2704_v7  ;;  %2916 = vmatpush.msra.mxu3 %v11943_v40  ;;  %v2975_v40 = vand.u32 4294901760, %v2974_v60  ;;  %v2986_v7 = vsub.f32 %v12154_v53, %v2985_v63  ;;  %v2120_v38 = vadd.f32 %v12038_v32, %v2111_v22  ;;  %v12232_v4 = vsub.f32 %v2220_v33, %v12207_v46  ;;  %v2158_v22 = vld [vmem:[%s17806_s6 + $0x110] sm:$0xff] }
 0x2e3   : > { %2763 = vmatpush.msra.mxu0 %v11946_v37  ;;  %2814 = vmatpush.msra.mxu1 %v11993_v58  ;;  %v12219_v37 = vsub.f32 %v2223_v42, %v12192_v18  ;;  %v18038_v32 = vand.u32 4294901760, %v12024_v15 }
 0x2e4   : > { %2879 = vmatpush.msra.mxu2 %v18036_v52  ;;  %2918 = vmatpush.msra.mxu3 %v11962_v3  ;;  %v2981_v3 = vand.u32 4294901760, %v2980_v59  ;;  %v2987_v44 = vand.u32 4294901760, %v2986_v7  ;;  %v2123_v55 = vmax.f32 %v2120_v38, 0.0  ;;  %v17826_v9 = vand.u32 4294901760, %v12232_v4 }
 0x2e5   : > { %2766 = vmatpush.msra.mxu0 %v11965_v51  ;;  %2816 = vmatpush.msra.mxu1 %v12007_v49  ;;  %v17830_v51 = vand.u32 4294901760, %v12205_v31  ;;  %v17825_v52 = vand.u32 4294901760, %v12275_v20  ;;  %v12307_v38 = vand.u32 4294901760, %v2158_v22 }
 0x2e6   : > { %2883 = vmatpush.msra.mxu2 %v18037_v2  ;;  %2920 = vmatpush.msra.mxu3 %v11978_v28  ;;  %v2998_v28 = vsub.f32 %v12185_v48, %v2997_v21  ;;  %v2246_v43 = vsel %vm2244_vm12, %v2123_v55, 0  ;;  %v3016_v10 = vsub.f32 %v12232_v4, %v17826_v9 }
 0x2e7   : > { %2820 = vmatmul.f32.vlgmr.msra.gmra.mxu1 %v12113_v17  ;;  %2769 = vmatpush.msra.mxu0 %v11984_v23  ;;  %v17828_v23 = vand.u32 4294901760, %v12219_v37  ;;  %v12283_v42 = vand.u32 4294901760, %v2246_v43  ;;  %v12332_v55 = vsub.f32 %v2158_v22, %v12307_v38  ;;  %v2143_v22 = vld [vmem:[%s17806_s6 + $0x98] sm:$0xff] }
 0x2e8   : > { %2976 = vmatpush.msrb.mxu1 %v2975_v40  ;;  %2887 = vmatpush.msra.mxu2 %v18038_v32  ;;  %v2999_v34 = vand.u32 4294901760, %v2998_v28  ;;  %v3017_v59 = vand.u32 4294901760, %v3016_v10  ;;  %v2155_v40 = vld [vmem:[%s17806_s6 + $0xf8] sm:$0xff]  ;;  %v3211_v28 = vsub.f32 %v12275_v20, %v17825_v52 }
 0x2e9   : > { %2922 = vmatpush.msra.mxu3 %v11993_v58  ;;  %2889 = vmatmul.f32.vlgmr.msra.gmra.mxu2 %v12087_v50  ;;  %v3004_v58 = vsub.f32 %v12205_v31, %v17830_v51  ;;  %18039 = vst [vmem:[#allocation10_spill] sm:$0xff] %v12283_v42  ;;  %v12310_v2 = vsub.f32 %v2246_v43, %v12283_v42  ;;  %v2146_v43 = vld [vmem:[%s17806_s6 + $0xb0] sm:$0xff] }
 0x2ea   : > { %2982 = vmatpush.msrb.mxu1 %v2981_v3  ;;  %3034 = vmatpush.msrb.mxu2 %v12128_v26 }
 0x2eb   : > { %2772 = vmatpush.msra.mxu0 %v11996_v39  ;;  %2924 = vmatpush.msra.mxu3 %v12007_v49  ;;  %v3010_v39 = vsub.f32 %v12219_v37, %v17828_v23  ;;  %v12263_v49 = vand.u32 4294901760, %v2167_v30  ;;  %v3005_v12 = vand.u32 4294901760, %v3004_v58  ;;  %18040 = vst [vmem:[#allocation11_spill] sm:$0xff] %v12310_v2  ;;  %v12342_v58 = vand.u32 4294901760, %v12310_v2 }
 0x2ec   : > { %2926 = vmatmul.f32.vlgmr.msra.gmra.mxu3 %v12087_v50  ;;  %2988 = vmatpush.msrb.mxu1 %v2987_v44  ;;  %v12322_v44 = vand.u32 4294901760, %v2155_v40 }
 0x2ed   : > { %3037 = vmatpush.msrb.mxu2 %v12143_v19  ;;  %3071 = vmatpush.msrb.mxu3 %v12102_v11  ;;  %v3011_v60 = vand.u32 4294901760, %v3010_v39  ;;  %v12288_v33 = vsub.f32 %v2167_v30, %v12263_v49  ;;  %v2149_v30 = vld [vmem:[%s17806_s6 + $0xc8] sm:$0xff]  ;;  %18041 = vst [vmem:[#allocation12_spill] sm:$0xff] %v12342_v58 }
 0x2ee   : > { %2775 = vmatpush.msra.mxu0 %v12010_v35  ;;  %2994 = vmatpush.msrb.mxu1 %v2993_v1  ;;  %v12281_v35 = vand.u32 4294901760, %v2164_v62  ;;  %v12334_v1 = vand.u32 4294901760, %v2152_v29  ;;  %v12358_v10 = vand.u32 4294901760, %v2149_v30 }
 0x2ef   : > { %3040 = vmatpush.msrb.mxu2 %v12154_v53  ;;  %3073 = vmatpush.msrb.mxu3 %v12115_v56  ;;  %v17823_v3 = vand.u32 4294901760, %v12288_v33  ;;  %v2125_v53 = vld [vmem:[%s17806_s6 + $0x8] sm:$0xff] }
 0x2f0   : > { %2778 = vmatpush.msra.mxu0 %v12024_v15  ;;  %3000 = vmatpush.msrb.mxu1 %v2999_v34  ;;  %v12295_v15 = vand.u32 4294901760, %v2161_v5  ;;  %v12305_v7 = vsub.f32 %v2164_v62, %v12281_v35  ;;  %v12351_v62 = vsub.f32 %v2155_v40, %v12322_v44  ;;  %v12376_v40 = vand.u32 4294901760, %v2146_v43 }
 0x2f1   : > { %2781 = vmatmul.f32.vlgmr.msra.gmra.mxu0 %v12098_v14  ;;  %3043 = vmatpush.msrb.mxu2 %v12168_v47  ;;  %v3217_v34 = vsub.f32 %v12288_v33, %v17823_v3  ;;  %v12391_v3 = vand.u32 4294901760, %v2143_v22  ;;  %v12488_v47 = vand.u32 4294901760, %v2125_v53 }
 0x2f2   : > { %2939 = vmatpush.msrb.mxu0 %v12102_v11  ;;  %3075 = vmatpush.msrb.mxu3 %v12130_v36  ;;  %v12320_v32 = vsub.f32 %v2161_v5, %v12295_v15  ;;  %v17822_v27 = vand.u32 4294901760, %v12305_v7  ;;  %v17827_v5 = vand.u32 4294901760, %v12332_v55  ;;  %v12406_v9 = vsub.f32 %v2146_v43, %v12376_v40 }
 0x2f3   : > { %3006 = vmatpush.msrb.mxu1 %v3005_v12  ;;  %3046 = vmatpush.msrb.mxu2 %v12185_v48  ;;  %v3212_v12 = vand.u32 4294901760, %v3211_v28  ;;  %v17829_v28 = vand.u32 4294901760, %v12351_v62  ;;  %v18043_v48 = vand.u32 4294901760, %v12205_v31 }
 0x2f4   : > { %2941 = vmatpush.msrb.mxu0 %v12115_v56  ;;  %3077 = vmatpush.msrb.mxu3 %v12145_v45  ;;  %v17824_v39 = vand.u32 4294901760, %v12320_v32 }
 0x2f5   : > { %3012 = vmatpush.msrb.mxu1 %v3011_v60  ;;  %3049 = vmatpush.msrb.mxu2 %v12205_v31  ;;  %v12367_v60 = vsub.f32 %v2152_v29, %v12334_v1 }
 0x2f6   : > { %2943 = vmatpush.msrb.mxu0 %v12130_v36  ;;  %3079 = vmatpush.msrb.mxu3 %v12156_v24  ;;  %v3229_v29 = vsub.f32 %v12320_v32, %v17824_v39  ;;  %v3235_v39 = vsub.f32 %v12332_v55, %v17827_v5  ;;  %v3241_v5 = vsub.f32 %v12351_v62, %v17829_v28  ;;  %v2131_v28 = vld [vmem:[%s17806_s6 + $0x38] sm:$0xff] }
 0x2f7   : > { %3018 = vmatpush.msrb.mxu1 %v3017_v59  ;;  %3052 = vmatpush.msrb.mxu2 %v12219_v37  ;;  %v2957_v59 = vsub.f32 %v12310_v2, %v12342_v58  ;;  %v3246_v52 = vand.u32 4294901760, %v12367_v60  ;;  %v12456_v19 = vand.u32 4294901760, %v2131_v28 }
 0x2f8   : > { %2945 = vmatpush.msrb.mxu0 %v12145_v45  ;;  %3081 = vmatpush.msrb.mxu3 %v12175_v54 }
 0x2f9   : > { %3020 = vmatmul.f32.vlgmr.msrb.gmra.mxu1 %v12283_v42  ;;  %3055 = vmatpush.msrb.mxu2 %v12232_v4 }
 0x2fa   : > { %3147 = vmatpush.msra.mxu1 %v12102_v11  ;;  %2947 = vmatpush.msrb.mxu0 %v12156_v24  ;;  %v3223_v11 = vsub.f32 %v12305_v7, %v17822_v27  ;;  %v2140_v27 = vld [vmem:[%s17806_s6 + $0x80] sm:$0xff] }
 0x2fb   : > { %3083 = vmatpush.msrb.mxu3 %v12192_v18  ;;  %3058 = vmatmul.f32.vlgmr.msrb.gmra.mxu2 %v12310_v2 }
 0x2fc   : > { %3149 = vmatpush.msra.mxu1 %v12115_v56  ;;  %3168 = vmatpush.msra.mxu2 %v12255_v0  ;;  %v3218_v56 = vand.u32 4294901760, %v3217_v34  ;;  %v12389_v34 = vsub.f32 %v2149_v30, %v12358_v10  ;;  %v12403_v30 = vand.u32 4294901760, %v2957_v59  ;;  %v12422_v59 = vsub.f32 %v2143_v22, %v12391_v3 }
 0x2fd   : > { %2949 = vmatpush.msrb.mxu0 %v12175_v54  ;;  %3085 = vmatpush.msrb.mxu3 %v12207_v46  ;;  %v17839_v22 = vand.u32 4294901760, %v12406_v9 }
 0x2fe   : > { %3089 = vmatmul.f32.vlgmr.msrb.gmra.mxu3 %v12342_v58  ;;  %3151 = vmatpush.msra.mxu1 %v12130_v36  ;;  %v3224_v36 = vand.u32 4294901760, %v3223_v11  ;;  %18042 = vst [vmem:[#allocation13_spill] sm:$0xff] %v12403_v30  ;;  %v3230_v11 = vand.u32 4294901760, %v3229_v29  ;;  %v3252_v43 = vand.u32 4294901760, %v12389_v34  ;;  %v3247_v29 = vsub.f32 %v12367_v60, %v3246_v52 }
 0x2ff   : > { %3170 = vmatpush.msra.mxu2 %v12263_v49  ;;  %3213 = vmatpush.msra.mxu3 %v3212_v12  ;;  %v2137_v12 = vld [vmem:[%s17806_s6 + $0x68] sm:$0xff] }
 0x300   : > { %2951 = vmatpush.msrb.mxu0 %v12192_v18  ;;  %3153 = vmatpush.msra.mxu1 %v12145_v45  ;;  %v12408_v45 = vand.u32 4294901760, %v2140_v27  ;;  %v12424_v23 = vand.u32 4294901760, %v2137_v12 }
 0x301   : > { %3172 = vmatpush.msra.mxu2 %v12281_v35  ;;  %3219 = vmatpush.msra.mxu3 %v3218_v56  ;;  %v2134_v56 = vld [vmem:[%s17806_s6 + $0x50] sm:$0xff] }
 0x302   : > { %2953 = vmatpush.msrb.mxu0 %v12207_v46  ;;  %3155 = vmatpush.msra.mxu1 %v12156_v24  ;;  %v3236_v24 = vand.u32 4294901760, %v3235_v39  ;;  %v12438_v51 = vsub.f32 %v2140_v27, %v12408_v45  ;;  %v12440_v26 = vand.u32 4294901760, %v2134_v56  ;;  %v2128_v39 = vld [vmem:[%s17806_s6 + $0x20] sm:$0xff]  ;;  %v17838_v27 = vand.u32 4294901760, %v12422_v59 }
 0x303   : > { %2959 = vmatmul.f32.vlgmr.msrb.gmra.mxu0 %v12403_v30  ;;  %3174 = vmatpush.msra.mxu2 %v12295_v15 }
 0x304   : > { %3104 = vmatpush.msra.mxu0 %v2973_v8  ;;  %3225 = vmatpush.msra.mxu3 %v3224_v36  ;;  %v3242_v8 = vand.u32 4294901760, %v3241_v5  ;;  %v12454_v36 = vsub.f32 %v2137_v12, %v12424_v23  ;;  %v17836_v5 = vand.u32 4294901760, %v12438_v51  ;;  %v12467_v12 = vsub.f32 %v2134_v56, %v12440_v26 }
 0x305   : > { %3157 = vmatpush.msra.mxu1 %v12175_v54  ;;  %3176 = vmatpush.msra.mxu2 %v12307_v38  ;;  %v3253_v54 = vsub.f32 %v12389_v34, %v3252_v43 }
 0x306   : > { %3108 = vmatpush.msra.mxu0 %v2979_v16  ;;  %3231 = vmatpush.msra.mxu3 %v3230_v11  ;;  %v3248_v16 = vand.u32 4294901760, %v3247_v29  ;;  %v12469_v11 = vand.u32 4294901760, %v2128_v39  ;;  %v17835_v56 = vand.u32 4294901760, %v12454_v36  ;;  %v3271_v29 = vsub.f32 %v12438_v51, %v17836_v5 }
 0x307   : > { %3159 = vmatpush.msra.mxu1 %v12192_v18  ;;  %3178 = vmatpush.msra.mxu2 %v12322_v44  ;;  %v3259_v18 = vsub.f32 %v12406_v9, %v17839_v22 }
 0x308   : > { %3112 = vmatpush.msra.mxu0 %v2985_v63  ;;  %3237 = vmatpush.msra.mxu3 %v3236_v24  ;;  %v3254_v63 = vand.u32 4294901760, %v3253_v54  ;;  %v12483_v24 = vsub.f32 %v2131_v28, %v12456_v19  ;;  %v12496_v28 = vsub.f32 %v2128_v39, %v12469_v11  ;;  %v3277_v54 = vsub.f32 %v12454_v36, %v17835_v56 }
 0x309   : > { %3161 = vmatpush.msra.mxu1 %v12207_v46  ;;  %3180 = vmatpush.msra.mxu2 %v12334_v1  ;;  %v3265_v46 = vsub.f32 %v12422_v59, %v17838_v27  ;;  %v18044_v39 = vand.u32 4294901760, %v12219_v37  ;;  %v3272_v31 = vand.u32 4294901760, %v3271_v29  ;;  %v18048_v56 = vand.u32 4294901760, %v12305_v7 }
 0x30a   : > { %3116 = vmatpush.msra.mxu0 %v2991_v13  ;;  %3243 = vmatpush.msra.mxu3 %v3242_v8  ;;  %v3260_v13 = vand.u32 4294901760, %v3259_v18  ;;  %v17834_v8 = vand.u32 4294901760, %v12467_v12  ;;  %v12510_v18 = vsub.f32 %v2125_v53, %v12488_v47  ;;  %v3278_v37 = vand.u32 4294901760, %v3277_v54 }
 0x30b   : > { %3163 = vmatmul.f32.vlgmr.msra.gmra.mxu1 %v12283_v42  ;;  %3182 = vmatpush.msra.mxu2 %v12358_v10 }
 0x30c   : > { %3364 = vmatpush.msrb.mxu1 %v12255_v0  ;;  %3120 = vmatpush.msra.mxu0 %v2997_v21  ;;  %v3266_v21 = vand.u32 4294901760, %v3265_v46  ;;  %v17832_v46 = vand.u32 4294901760, %v12496_v28 }
 0x30d   : > { %3249 = vmatpush.msra.mxu3 %v3248_v16  ;;  %3184 = vmatpush.msra.mxu2 %v12376_v40  ;;  %v17833_v16 = vand.u32 4294901760, %v12483_v24 }
 0x30e   : > { %3366 = vmatpush.msrb.mxu1 %v12263_v49  ;;  %3124 = vmatpush.msra.mxu0 %v18043_v48  ;;  %v18045_v48 = vand.u32 4294901760, %v12232_v4  ;;  %v3295_v4 = vsub.f32 %v12496_v28, %v17832_v46 }
 0x30f   : > { %3255 = vmatpush.msra.mxu3 %v3254_v63  ;;  %3186 = vmatpush.msra.mxu2 %v12391_v3  ;;  %v3283_v63 = vsub.f32 %v12467_v12, %v17834_v8  ;;  %v3289_v53 = vsub.f32 %v12483_v24, %v17833_v16  ;;  %v2200_v8 = vld [vmem:[%s17806_s6 + $0x260] sm:$0xff] }
 0x310   : > { %3368 = vmatpush.msrb.mxu1 %v12281_v35  ;;  %3128 = vmatpush.msra.mxu0 %v18044_v39  ;;  %v12624_v5 = vand.u32 4294901760, %v2200_v8 }
 0x311   : > { %3261 = vmatpush.msra.mxu3 %v3260_v13  ;;  %3188 = vmatpush.msra.mxu2 %v12408_v45  ;;  %v17831_v13 = vand.u32 4294901760, %v12510_v18  ;;  %v3284_v29 = vand.u32 4294901760, %v3283_v63  ;;  %v3290_v54 = vand.u32 4294901760, %v3289_v53 }
 0x312   : > { %3370 = vmatpush.msrb.mxu1 %v12295_v15  ;;  %3132 = vmatpush.msra.mxu0 %v18045_v48  ;;  %v2215_v48 = vld [vmem:[%s17806_s6 + $0x2d8] sm:$0xff] }
 0x313   : > { %3267 = vmatpush.msra.mxu3 %v3266_v21  ;;  %3134 = vmatmul.f32.vlgmr.msra.gmra.mxu0 %v12283_v42  ;;  %v2218_v21 = vld [vmem:[%s17806_s6 + $0x2f0] sm:$0xff]  ;;  %v3301_v39 = vsub.f32 %v12510_v18, %v17831_v13 }
 0x314   : > { %3311 = vmatpush.msrb.mxu0 %v12275_v20  ;;  %3372 = vmatpush.msrb.mxu1 %v12307_v38  ;;  %v12543_v63 = vand.u32 4294901760, %v2218_v21 }
 0x315   : > { %3190 = vmatpush.msra.mxu2 %v12424_v23  ;;  %3273 = vmatpush.msra.mxu3 %v3272_v31  ;;  %v3296_v31 = vand.u32 4294901760, %v3295_v4  ;;  %v3302_v53 = vand.u32 4294901760, %v3301_v39  ;;  %v18046_v39 = vand.u32 4294901760, %v12275_v20  ;;  %v2203_v20 = vld [vmem:[%s17806_s6 + $0x278] sm:$0xff] }
 0x316   : > { %3314 = vmatpush.msrb.mxu0 %v12288_v33  ;;  %3374 = vmatpush.msrb.mxu1 %v12322_v44  ;;  %v12560_v4 = vsub.f32 %v2218_v21, %v12543_v63  ;;  %v2206_v21 = vld [vmem:[%s17806_s6 + $0x290] sm:$0xff] }
 0x317   : > { %3192 = vmatpush.msra.mxu2 %v12440_v26  ;;  %3279 = vmatpush.msra.mxu3 %v3278_v37  ;;  %v2212_v37 = vld [vmem:[%s17806_s6 + $0x2c0] sm:$0xff] }
 0x318   : > { %3317 = vmatpush.msrb.mxu0 %v12305_v7  ;;  %3376 = vmatpush.msrb.mxu1 %v12334_v1  ;;  %v12567_v13 = vand.u32 4294901760, %v2212_v37  ;;  %v17837_v16 = vand.u32 4294901760, %v12560_v4  ;;  %v2197_v7 = vld [vmem:[%s17806_s6 + $0x248] sm:$0xff] }
 0x319   : > { %3194 = vmatpush.msra.mxu2 %v12456_v19  ;;  %3285 = vmatpush.msra.mxu3 %v3284_v29  ;;  %v12556_v29 = vand.u32 4294901760, %v2215_v48  ;;  %v12641_v27 = vand.u32 4294901760, %v2197_v7 }
 0x31a   : > { %3320 = vmatpush.msrb.mxu0 %v12320_v32  ;;  %3378 = vmatpush.msrb.mxu1 %v12358_v10 }
 0x31b   : > { %3196 = vmatpush.msra.mxu2 %v12469_v11  ;;  %3291 = vmatpush.msra.mxu3 %v3290_v54  ;;  %v2209_v54 = vld [vmem:[%s17806_s6 + $0x2a8] sm:$0xff] }
 0x31c   : > { %3323 = vmatpush.msrb.mxu0 %v12332_v55  ;;  %3380 = vmatpush.msrb.mxu1 %v12376_v40  ;;  %v12579_v46 = vand.u32 4294901760, %v2209_v54 }
 0x31d   : > { %3198 = vmatpush.msra.mxu2 %v12488_v47  ;;  %3297 = vmatpush.msra.mxu3 %v3296_v31  ;;  %v12577_v31 = vsub.f32 %v2215_v48, %v12556_v29  ;;  %v12591_v48 = vsub.f32 %v2212_v37, %v12567_v13  ;;  %v12607_v37 = vand.u32 4294901760, %v2203_v20 }
 0x31e   : > { %3204 = vmatmul.f32.vlgmr.msra.gmra.mxu2 %v12063_v6  ;;  %3326 = vmatpush.msrb.mxu0 %v12351_v62 }
 0x31f   : > { %3382 = vmatpush.msrb.mxu1 %v12391_v3  ;;  %3405 = vmatpush.msrb.mxu2 %v18046_v39  ;;  %v18047_v39 = vand.u32 4294901760, %v12288_v33  ;;  %v12605_v33 = vsub.f32 %v2209_v54, %v12579_v46 }
 0x320   : > { %3303 = vmatpush.msra.mxu3 %v3302_v53  ;;  %3329 = vmatpush.msrb.mxu0 %v12367_v60  ;;  %v12593_v53 = vand.u32 4294901760, %v2206_v21 }
 0x321   : > { %3305 = vmatmul.f32.vlgmr.msra.gmra.mxu3 %v12042_v41  ;;  %3384 = vmatpush.msrb.mxu1 %v12408_v45 }
 0x322   : > { %3409 = vmatpush.msrb.mxu2 %v18047_v39  ;;  %3472 = vmatpush.msrb.mxu3 %v12255_v0  ;;  %v17840_v0 = vand.u32 4294901760, %v12577_v31  ;;  %v3552_v39 = vsub.f32 %v12560_v4, %v17837_v16  ;;  %v12622_v54 = vsub.f32 %v2206_v21, %v12593_v53  ;;  %v2194_v16 = vld [vmem:[%s17806_s6 + $0x230] sm:$0xff]  ;;  %v17842_v21 = vand.u32 4294901760, %v12605_v33 }
 0x323   : > { %3332 = vmatpush.msrb.mxu0 %v12389_v34  ;;  %3386 = vmatpush.msrb.mxu1 %v12424_v23 }
 0x324   : > { %3413 = vmatpush.msrb.mxu2 %v18048_v56  ;;  %3474 = vmatpush.msrb.mxu3 %v12263_v49  ;;  %v18049_v49 = vand.u32 4294901760, %v12320_v32  ;;  %v17841_v56 = vand.u32 4294901760, %v12591_v48  ;;  %v18050_v32 = vand.u32 4294901760, %v12332_v55  ;;  %v3553_v22 = vand.u32 4294901760, %v3552_v39  ;;  %v2191_v39 = vld [vmem:[%s17806_s6 + $0x218] sm:$0xff] }
 0x325   : > { %3335 = vmatpush.msrb.mxu0 %v12406_v9  ;;  %3388 = vmatpush.msrb.mxu1 %v12440_v26  ;;  %v18051_v55 = vand.u32 4294901760, %v12351_v62  ;;  %v3570_v62 = vsub.f32 %v12605_v33, %v17842_v21  ;;  %v2185_v21 = vld [vmem:[%s17806_s6 + $0x1e8] sm:$0xff] }
 0x326   : > { %3417 = vmatpush.msrb.mxu2 %v18049_v49  ;;  %3476 = vmatpush.msrb.mxu3 %v12281_v35  ;;  %v3558_v35 = vsub.f32 %v12577_v31, %v17840_v0  ;;  %v12639_v49 = vsub.f32 %v2203_v20, %v12607_v37  ;;  %v12653_v20 = vsub.f32 %v2200_v8, %v12624_v5  ;;  %v12655_v0 = vand.u32 4294901760, %v2194_v16 }
 0x327   : > { %3338 = vmatpush.msrb.mxu0 %v12422_v59  ;;  %3390 = vmatpush.msrb.mxu1 %v12456_v19 }
 0x328   : > { %3421 = vmatpush.msrb.mxu2 %v18050_v32  ;;  %3478 = vmatpush.msrb.mxu3 %v12295_v15  ;;  %v3564_v15 = vsub.f32 %v12591_v48, %v17841_v56  ;;  %v17843_v32 = vand.u32 4294901760, %v12622_v54  ;;  %v17844_v8 = vand.u32 4294901760, %v12639_v49  ;;  %v2188_v56 = vld [vmem:[%s17806_s6 + $0x200] sm:$0xff] }
 0x329   : > { %3341 = vmatpush.msrb.mxu0 %v12438_v51  ;;  %3392 = vmatpush.msrb.mxu1 %v12469_v11  ;;  %v12693_v34 = vand.u32 4294901760, %v2188_v56 }
 0x32a   : > { %3425 = vmatpush.msrb.mxu2 %v18051_v55  ;;  %3480 = vmatpush.msrb.mxu3 %v12307_v38  ;;  %v3559_v38 = vand.u32 4294901760, %v3558_v35  ;;  %v12670_v55 = vsub.f32 %v2197_v7, %v12641_v27  ;;  %v3576_v60 = vsub.f32 %v12622_v54, %v17843_v32  ;;  %v17846_v7 = vand.u32 4294901760, %v12653_v20  ;;  %v2182_v32 = vld [vmem:[%s17806_s6 + $0x1d0] sm:$0xff] }
 0x32b   : > { %3344 = vmatpush.msrb.mxu0 %v12454_v36  ;;  %3394 = vmatpush.msrb.mxu1 %v12488_v47  ;;  %v12686_v35 = vsub.f32 %v2194_v16, %v12655_v0  ;;  %v3582_v16 = vsub.f32 %v12639_v49, %v17844_v8 }
 0x32c   : > { %3429 = vmatpush.msrb.mxu2 %v3246_v52  ;;  %3482 = vmatpush.msrb.mxu3 %v12322_v44  ;;  %v12677_v52 = vand.u32 4294901760, %v2191_v39  ;;  %v3565_v44 = vand.u32 4294901760, %v3564_v15  ;;  %v17845_v15 = vand.u32 4294901760, %v12670_v55 }
 0x32d   : > { %3398 = vmatmul.f32.vlgmr.msrb.gmra.mxu1 %v12051_v61  ;;  %3347 = vmatpush.msrb.mxu0 %v12467_v12  ;;  %v17847_v8 = vand.u32 4294901760, %v12686_v35 }
 0x32e   : > { %3554 = vmatpush.msra.mxu1 %v3553_v22  ;;  %3433 = vmatpush.msrb.mxu2 %v3252_v43  ;;  %v18052_v43 = vand.u32 4294901760, %v12406_v9  ;;  %v3571_v22 = vand.u32 4294901760, %v3570_v62  ;;  %v12709_v9 = vand.u32 4294901760, %v2185_v21  ;;  %v3577_v62 = vand.u32 4294901760, %v3576_v60 }
 0x32f   : > { %3484 = vmatpush.msrb.mxu3 %v12334_v1  ;;  %3350 = vmatpush.msrb.mxu0 %v12483_v24  ;;  %v12707_v1 = vsub.f32 %v2191_v39, %v12677_v52  ;;  %v12723_v39 = vsub.f32 %v2188_v56, %v12693_v34  ;;  %v3583_v60 = vand.u32 4294901760, %v3582_v16 }
 0x330   : > { %3560 = vmatpush.msra.mxu1 %v3559_v38  ;;  %3437 = vmatpush.msrb.mxu2 %v18052_v43  ;;  %v18053_v38 = vand.u32 4294901760, %v12422_v59  ;;  %v3588_v43 = vsub.f32 %v12653_v20, %v17846_v7  ;;  %v12725_v59 = vand.u32 4294901760, %v2182_v32 }
 0x331   : > { %3486 = vmatpush.msrb.mxu3 %v12358_v10  ;;  %3353 = vmatpush.msrb.mxu0 %v12496_v28  ;;  %v2179_v10 = vld [vmem:[%s17806_s6 + $0x1b8] sm:$0xff]  ;;  %v3605_v56 = vand.u32 4294901760, %v12707_v1 }
 0x332   : > { %3566 = vmatpush.msra.mxu1 %v3565_v44  ;;  %3441 = vmatpush.msrb.mxu2 %v18053_v38  ;;  %v18054_v44 = vand.u32 4294901760, %v12438_v51  ;;  %v3594_v38 = vsub.f32 %v12670_v55, %v17845_v15  ;;  %v12741_v51 = vand.u32 4294901760, %v2179_v10  ;;  %v3589_v16 = vand.u32 4294901760, %v3588_v43 }
 0x333   : > { %3488 = vmatpush.msrb.mxu3 %v12376_v40  ;;  %3356 = vmatpush.msrb.mxu0 %v12510_v18  ;;  %v2176_v40 = vld [vmem:[%s17806_s6 + $0x1a0] sm:$0xff]  ;;  %v18055_v15 = vand.u32 4294901760, %v12454_v36  ;;  %v12755_v7 = vsub.f32 %v2182_v32, %v12725_v59 }
 0x334   : > { %3572 = vmatpush.msra.mxu1 %v3571_v22  ;;  %3445 = vmatpush.msrb.mxu2 %v18054_v44  ;;  %v12739_v22 = vsub.f32 %v2185_v21, %v12709_v9  ;;  %v3600_v44 = vsub.f32 %v12686_v35, %v17847_v8  ;;  %v3611_v21 = vand.u32 4294901760, %v12723_v39  ;;  %v3595_v43 = vand.u32 4294901760, %v3594_v38 }
 0x335   : > { %3490 = vmatpush.msrb.mxu3 %v12391_v3  ;;  %3359 = vmatmul.f32.vlgmr.msrb.gmra.mxu0 %v12045_v57  ;;  %v2173_v3 = vld [vmem:[%s17806_s6 + $0x188] sm:$0xff]  ;;  %v18056_v8 = vand.u32 4294901760, %v12467_v12  ;;  %v12768_v32 = vsub.f32 %v2179_v10, %v12741_v51  ;;  %v18057_v12 = vand.u32 4294901760, %v12483_v24  ;;  %v18058_v38 = vand.u32 4294901760, %v12496_v28 }
 0x336   : > { %3509 = vmatpush.msra.mxu0 %v12543_v63  ;;  %3578 = vmatpush.msra.mxu1 %v3577_v62  ;;  %v12757_v62 = vand.u32 4294901760, %v2176_v40  ;;  %v3617_v36 = vand.u32 4294901760, %v12739_v22 }
 0x337   : > { %3449 = vmatpush.msrb.mxu2 %v18055_v15  ;;  %3492 = vmatpush.msrb.mxu3 %v12408_v45  ;;  %v3606_v45 = vsub.f32 %v12707_v1, %v3605_v56  ;;  %v12770_v15 = vand.u32 4294901760, %v2173_v3 }
 0x338   : > { %3511 = vmatpush.msra.mxu0 %v12556_v29  ;;  %3584 = vmatpush.msra.mxu1 %v3583_v60  ;;  %v3601_v60 = vand.u32 4294901760, %v3600_v44  ;;  %v12781_v10 = vsub.f32 %v2176_v40, %v12757_v62  ;;  %v18059_v40 = vand.u32 4294901760, %v12510_v18 }
 0x339   : > { %3453 = vmatpush.msrb.mxu2 %v18056_v8  ;;  %3494 = vmatpush.msrb.mxu3 %v12424_v23  ;;  %v3612_v23 = vsub.f32 %v12723_v39, %v3611_v21  ;;  %v3623_v8 = vand.u32 4294901760, %v12755_v7  ;;  %v3607_v24 = vand.u32 4294901760, %v3606_v45  ;;  %v12792_v44 = vsub.f32 %v2173_v3, %v12770_v15 }
 0x33a   : > { %3513 = vmatpush.msra.mxu0 %v12567_v13  ;;  %3590 = vmatpush.msra.mxu1 %v3589_v16  ;;  %v3629_v16 = vand.u32 4294901760, %v12768_v32 }
 0x33b   : > { %3457 = vmatpush.msrb.mxu2 %v18057_v12  ;;  %3496 = vmatpush.msrb.mxu3 %v12440_v26  ;;  %v3618_v26 = vsub.f32 %v12739_v22, %v3617_v36  ;;  %v3613_v28 = vand.u32 4294901760, %v3612_v23 }
 0x33c   : > { %3515 = vmatpush.msra.mxu0 %v12579_v46  ;;  %3596 = vmatpush.msra.mxu1 %v3595_v43  ;;  %v3635_v43 = vand.u32 4294901760, %v12781_v10  ;;  %v3630_v18 = vsub.f32 %v12768_v32, %v3629_v16 }
 0x33d   : > { %3461 = vmatpush.msrb.mxu2 %v18058_v38  ;;  %3498 = vmatpush.msrb.mxu3 %v12456_v19  ;;  %v3624_v19 = vsub.f32 %v12755_v7, %v3623_v8  ;;  %v3619_v3 = vand.u32 4294901760, %v3618_v26  ;;  %v2239_v26 = vld [vmem:[%s17806_s6 + $0x398] sm:$0xff] }
 0x33e   : > { %3517 = vmatpush.msra.mxu0 %v12593_v53  ;;  %3602 = vmatpush.msra.mxu1 %v3601_v60  ;;  %v3636_v60 = vsub.f32 %v12781_v10, %v3635_v43  ;;  %v3631_v12 = vand.u32 4294901760, %v3630_v18  ;;  %v18060_v18 = vand.u32 4294901760, %v12560_v4 }
 0x33f   : > { %3465 = vmatpush.msrb.mxu2 %v18059_v40  ;;  %3500 = vmatpush.msrb.mxu3 %v12469_v11  ;;  %v17848_v11 = vand.u32 4294901760, %v12792_v44  ;;  %v3625_v45 = vand.u32 4294901760, %v3624_v19 }
 0x340   : > { %3467 = vmatmul.f32.vlgmr.msrb.gmra.mxu2 %v12042_v41  ;;  %3519 = vmatpush.msra.mxu0 %v12607_v37  ;;  %v3637_v23 = vand.u32 4294901760, %v3636_v60  ;;  %v2227_v60 = vld [vmem:[%s17806_s6 + $0x338] sm:$0xff] }
 0x341   : > { %3608 = vmatpush.msra.mxu1 %v3607_v24  ;;  %3652 = vmatpush.msra.mxu2 %v12560_v4  ;;  %v2242_v24 = vld [vmem:[%s17806_s6 + $0x3b0] sm:$0xff] }
 0x342   : > { %3502 = vmatpush.msrb.mxu3 %v12488_v47  ;;  %3521 = vmatpush.msra.mxu0 %v12624_v5  ;;  %v3642_v47 = vsub.f32 %v12792_v44, %v17848_v11  ;;  %v12849_v40 = vand.u32 4294901760, %v2242_v24  ;;  %v18066_v11 = vand.u32 4294901760, %v12653_v20 }
 0x343   : > { %3504 = vmatmul.f32.vlgmr.msrb.gmra.mxu3 %v12042_v41  ;;  %3614 = vmatpush.msra.mxu1 %v3613_v28  ;;  %v12858_v28 = vand.u32 4294901760, %v2239_v26 }
 0x344   : > { %3655 = vmatpush.msra.mxu2 %v12577_v31  ;;  %3705 = vmatpush.msra.mxu3 %v12543_v63  ;;  %v3643_v38 = vand.u32 4294901760, %v3642_v47  ;;  %v12868_v19 = vsub.f32 %v2242_v24, %v12849_v40  ;;  %v2224_v24 = vld [vmem:[%s17806_s6 + $0x320] sm:$0xff] }
 0x345   : > { %3523 = vmatpush.msra.mxu0 %v12641_v27  ;;  %3620 = vmatpush.msra.mxu1 %v3619_v3  ;;  %v2230_v3 = vld [vmem:[%s17806_s6 + $0x350] sm:$0xff] }
 0x346   : > { %3658 = vmatpush.msra.mxu2 %v12591_v48  ;;  %3707 = vmatpush.msra.mxu3 %v12556_v29  ;;  %v3892_v4 = vand.u32 4294901760, %v12868_v19  ;;  %v12897_v47 = vand.u32 4294901760, %v2230_v3 }
 0x347   : > { %3525 = vmatpush.msra.mxu0 %v12655_v0  ;;  %3626 = vmatpush.msra.mxu1 %v3625_v45 }
 0x348   : > { %3661 = vmatpush.msra.mxu2 %v12605_v33  ;;  %3709 = vmatpush.msra.mxu3 %v12567_v13 }
 0x349   : > { %3527 = vmatpush.msra.mxu0 %v12677_v52  ;;  %3632 = vmatpush.msra.mxu1 %v3631_v12  ;;  %v18061_v12 = vand.u32 4294901760, %v12577_v31 }
 0x34a   : > { %3664 = vmatpush.msra.mxu2 %v12622_v54  ;;  %3711 = vmatpush.msra.mxu3 %v12579_v46 }
 0x34b   : > { %3529 = vmatpush.msra.mxu0 %v12693_v34  ;;  %3638 = vmatpush.msra.mxu1 %v3637_v23  ;;  %v18062_v23 = vand.u32 4294901760, %v12591_v48  ;;  %v18063_v48 = vand.u32 4294901760, %v12605_v33  ;;  %v12930_v33 = vand.u32 4294901760, %v2224_v24 }
 0x34c   : > { %3667 = vmatpush.msra.mxu2 %v12639_v49  ;;  %3713 = vmatpush.msra.mxu3 %v12593_v53 }
 0x34d   : > { %3531 = vmatpush.msra.mxu0 %v12709_v9  ;;  %3644 = vmatpush.msra.mxu1 %v3643_v38  ;;  %v12908_v38 = vand.u32 4294901760, %v2227_v60 }
 0x34e   : > { %3670 = vmatpush.msra.mxu2 %v12653_v20  ;;  %3715 = vmatpush.msra.mxu3 %v12607_v37 }
 0x34f   : > { %3646 = vmatmul.f32.vlgmr.msra.gmra.mxu1 %v12087_v50  ;;  %3533 = vmatpush.msra.mxu0 %v12725_v59 }
 0x350   : > { %3813 = vmatpush.msrb.mxu1 %v12543_v63  ;;  %3673 = vmatpush.msra.mxu2 %v12670_v55  ;;  %v2236_v63 = vld [vmem:[%s17806_s6 + $0x380] sm:$0xff] }
 0x351   : > { %3717 = vmatpush.msra.mxu3 %v12624_v5  ;;  %3535 = vmatpush.msra.mxu0 %v12741_v51 }
 0x352   : > { %3815 = vmatpush.msrb.mxu1 %v12556_v29  ;;  %3676 = vmatpush.msra.mxu2 %v12686_v35  ;;  %v2233_v29 = vld [vmem:[%s17806_s6 + $0x368] sm:$0xff] }
 0x353   : > { %3719 = vmatpush.msra.mxu3 %v12641_v27  ;;  %3537 = vmatpush.msra.mxu0 %v12757_v62  ;;  %v12883_v45 = vand.u32 4294901760, %v2233_v29 }
 0x354   : > { %3817 = vmatpush.msrb.mxu1 %v12567_v13  ;;  %3679 = vmatpush.msra.mxu2 %v12707_v1  ;;  %v12870_v13 = vand.u32 4294901760, %v2236_v63 }
 0x355   : > { %3721 = vmatpush.msra.mxu3 %v12655_v0  ;;  %3539 = vmatpush.msra.mxu0 %v12770_v15 }
 0x356   : > { %3819 = vmatpush.msrb.mxu1 %v12579_v46  ;;  %3682 = vmatpush.msra.mxu2 %v12723_v39  ;;  %v12881_v46 = vsub.f32 %v2239_v26, %v12858_v28  ;;  %v2168_v39 = vld [vmem:[%s17806_s6 + $0x160] sm:$0xff] }
 0x357   : > { %3723 = vmatpush.msra.mxu3 %v12677_v52  ;;  %3545 = vmatmul.f32.vlgmr.msra.gmra.mxu0 %v12140_v25 }
 0x358   : > { %3746 = vmatpush.msrb.mxu0 %v18060_v18  ;;  %3821 = vmatpush.msrb.mxu1 %v12593_v53  ;;  %v12895_v53 = vsub.f32 %v2236_v63, %v12870_v13  ;;  %v3898_v31 = vand.u32 4294901760, %v12881_v46  ;;  %v12923_v63 = vsub.f32 %v2230_v3, %v12897_v47 }
 0x359   : > { %3685 = vmatpush.msra.mxu2 %v12739_v22  ;;  %3725 = vmatpush.msra.mxu3 %v12693_v34  ;;  %v2165_v22 = vld [vmem:[%s17806_s6 + $0x148] sm:$0xff] }
 0x35a   : > { %3750 = vmatpush.msrb.mxu0 %v18061_v12  ;;  %3823 = vmatpush.msrb.mxu1 %v12607_v37  ;;  %v12906_v37 = vsub.f32 %v2233_v29, %v12883_v45  ;;  %v3904_v26 = vand.u32 4294901760, %v12895_v53  ;;  %v2221_v29 = vld [vmem:[%s17806_s6 + $0x308] sm:$0xff]  ;;  %v3899_v3 = vsub.f32 %v12881_v46, %v3898_v31  ;;  %v12940_v12 = vsub.f32 %v2227_v60, %v12908_v38 }
 0x35b   : > { %3688 = vmatpush.msra.mxu2 %v12755_v7  ;;  %3727 = vmatpush.msra.mxu3 %v12709_v9  ;;  %v12956_v60 = vsub.f32 %v2224_v24, %v12930_v33 }
 0x35c   : > { %3754 = vmatpush.msrb.mxu0 %v18062_v23  ;;  %3825 = vmatpush.msrb.mxu1 %v12624_v5  ;;  %v3893_v5 = vsub.f32 %v12868_v19, %v3892_v4  ;;  %v17849_v18 = vand.u32 4294901760, %v12906_v37  ;;  %v12944_v23 = vand.u32 4294901760, %v2221_v29 }
 0x35d   : > { %3691 = vmatpush.msra.mxu2 %v12768_v32  ;;  %3729 = vmatpush.msra.mxu3 %v12725_v59 }
 0x35e   : > { %3758 = vmatpush.msrb.mxu0 %v18063_v48  ;;  %3827 = vmatpush.msrb.mxu1 %v12641_v27  ;;  %v18064_v27 = vand.u32 4294901760, %v12622_v54  ;;  %v18065_v54 = vand.u32 4294901760, %v12639_v49  ;;  %v3905_v48 = vsub.f32 %v12895_v53, %v3904_v26  ;;  %v3900_v49 = vand.u32 4294901760, %v3899_v3 }
 0x35f   : > { %3694 = vmatpush.msra.mxu2 %v12781_v10  ;;  %3731 = vmatpush.msra.mxu3 %v12741_v51  ;;  %v3928_v3 = vand.u32 4294901760, %v12956_v60  ;;  %v2153_v10 = vld [vmem:[%s17806_s6 + $0xe8] sm:$0xff] }
 0x360   : > { %3762 = vmatpush.msrb.mxu0 %v18064_v27  ;;  %3829 = vmatpush.msrb.mxu1 %v12655_v0  ;;  %v3894_v0 = vand.u32 4294901760, %v3893_v5  ;;  %v3916_v27 = vand.u32 4294901760, %v12923_v63  ;;  %v3911_v5 = vsub.f32 %v12906_v37, %v17849_v18  ;;  %v3906_v24 = vand.u32 4294901760, %v3905_v48  ;;  %v2286_v18 = vpop.f32.mrf.mxu0  ;;  %v2387_v48 = vpop.f32.mrf.mxu1 }
 0x361   : > { %3697 = vmatpush.msra.mxu2 %v12792_v44  ;;  %3733 = vmatpush.msra.mxu3 %v12757_v62 }
 0x362   : > { %3700 = vmatmul.f32.vlgmr.msra.gmra.mxu2 %v12098_v14  ;;  %3766 = vmatpush.msrb.mxu0 %v18065_v54  ;;  %v3922_v54 = vand.u32 4294901760, %v12940_v12  ;;  %v3917_v20 = vsub.f32 %v12923_v63, %v3916_v27 }
 0x363   : > { %3831 = vmatpush.msrb.mxu1 %v12677_v52  ;;  %3858 = vmatpush.msrb.mxu2 %v12849_v40  ;;  %v12968_v52 = vsub.f32 %v2221_v29, %v12944_v23 }
 0x364   : > { %3735 = vmatpush.msra.mxu3 %v12770_v15  ;;  %3770 = vmatpush.msrb.mxu0 %v18066_v11  ;;  %v18067_v11 = vand.u32 4294901760, %v12670_v55  ;;  %v3923_v29 = vsub.f32 %v12940_v12, %v3922_v54 }
 0x365   : > { %3739 = vmatmul.f32.vlgmr.msra.gmra.mxu3 %v12113_v17  ;;  %3833 = vmatpush.msrb.mxu1 %v12693_v34  ;;  %v3912_v34 = vand.u32 4294901760, %v3911_v5  ;;  %v3934_v55 = vand.u32 4294901760, %v12968_v52 }
 0x366   : > { %3860 = vmatpush.msrb.mxu2 %v12858_v28  ;;  %3895 = vmatpush.msrb.mxu3 %v3894_v0  ;;  %v18068_v0 = vand.u32 4294901760, %v12686_v35  ;;  %v3929_v35 = vsub.f32 %v12956_v60, %v3928_v3 }
 0x367   : > { %3774 = vmatpush.msrb.mxu0 %v18067_v11  ;;  %3835 = vmatpush.msrb.mxu1 %v12709_v9  ;;  %v3918_v9 = vand.u32 4294901760, %v3917_v20  ;;  %v2388_v11 = vadd.f32 %v2387_v48, %v2286_v18  ;;  %v3935_v1 = vsub.f32 %v12968_v52, %v3934_v55  ;;  %v13033_v20 = vand.u32 4294901760, %v2165_v22 }
 0x368   : > { %3862 = vmatpush.msrb.mxu2 %v12870_v13  ;;  %3901 = vmatpush.msrb.mxu3 %v3900_v49  ;;  %v2171_v49 = vld [vmem:[%s17806_s6 + $0x178] sm:$0xff]  ;;  %v3930_v18 = vand.u32 4294901760, %v3929_v35 }
 0x369   : > { %3778 = vmatpush.msrb.mxu0 %v18068_v0  ;;  %3837 = vmatpush.msrb.mxu1 %v12725_v59  ;;  %v3924_v59 = vand.u32 4294901760, %v3923_v29  ;;  %v13007_v5 = vand.u32 4294901760, %v2171_v49  ;;  %v2159_v29 = vld [vmem:[%s17806_s6 + $0x118] sm:$0xff] }
 0x36a   : > { %3864 = vmatpush.msrb.mxu2 %v12883_v45  ;;  %3907 = vmatpush.msrb.mxu3 %v3906_v24 }
 0x36b   : > { %3782 = vmatpush.msrb.mxu0 %v3605_v56  ;;  %3839 = vmatpush.msrb.mxu1 %v12741_v51  ;;  %v2441_v56 = vpop.f32.mrf.mxu2  ;;  %v13025_v7 = vsub.f32 %v2171_v49, %v13007_v5 }
 0x36c   : > { %3866 = vmatpush.msrb.mxu2 %v12897_v47  ;;  %3913 = vmatpush.msrb.mxu3 %v3912_v34  ;;  %v2442_v51 = vadd.f32 %v2441_v56, %v2388_v11  ;;  %v13057_v11 = vand.u32 4294901760, %v2159_v29 }
 0x36d   : > { %3786 = vmatpush.msrb.mxu0 %v3611_v21  ;;  %3841 = vmatpush.msrb.mxu1 %v12757_v62  ;;  %v3936_v21 = vand.u32 4294901760, %v3935_v1  ;;  %v2480_v62 = vpop.f32.mrf.mxu3  ;;  %v17866_v32 = vand.u32 4294901760, %v13025_v7 }
 0x36e   : > { %3868 = vmatpush.msrb.mxu2 %v12908_v38  ;;  %3919 = vmatpush.msrb.mxu3 %v3918_v9  ;;  %v2481_v24 = vadd.f32 %v2480_v62, %v2442_v51  ;;  %v13055_v9 = vsub.f32 %v2165_v22, %v13033_v20  ;;  %v13090_v51 = vsub.f32 %v2159_v29, %v13057_v11 }
 0x36f   : > { %3790 = vmatpush.msrb.mxu0 %v3617_v36  ;;  %3843 = vmatpush.msrb.mxu1 %v12770_v15  ;;  %v2549_v36 = vpop.f32.mrf.mxu0  ;;  %v13021_v15 = vand.u32 4294901760, %v2168_v39 }
 0x370   : > { %3870 = vmatpush.msrb.mxu2 %v12930_v33  ;;  %3925 = vmatpush.msrb.mxu3 %v3924_v59  ;;  %v2550_v34 = vadd.f32 %v2549_v36, %v2481_v24  ;;  %v17863_v56 = vand.u32 4294901760, %v13055_v9 }
 0x371   : > { %3845 = vmatmul.f32.vlgmr.msrb.gmra.mxu1 %v12087_v50  ;;  %3794 = vmatpush.msrb.mxu0 %v3623_v8  ;;  %v2162_v8 = vld [vmem:[%s17806_s6 + $0x130] sm:$0xff]  ;;  %v13043_v0 = vsub.f32 %v2168_v39, %v13021_v15  ;;  %v2147_v39 = vld [vmem:[%s17806_s6 + $0xb8] sm:$0xff] }
 0x372   : > { %3990 = vmatpush.msra.mxu1 %v12849_v40  ;;  %3872 = vmatpush.msrb.mxu2 %v12944_v23  ;;  %v13045_v48 = vand.u32 4294901760, %v2162_v8 }
 0x373   : > { %3931 = vmatpush.msrb.mxu3 %v3930_v18  ;;  %3878 = vmatmul.f32.vlgmr.msrb.gmra.mxu2 %v12403_v30  ;;  %v13092_v18 = vand.u32 4294901760, %v2153_v10  ;;  %v2195_v30 = vld [vmem:[%s17806_s6 + $0x238] sm:$0xff] }
 0x374   : > { %3992 = vmatpush.msra.mxu1 %v12858_v28  ;;  %4023 = vmatpush.msra.mxu2 %v3892_v4  ;;  %v2627_v4 = vpop.f32.mrf.mxu2  ;;  %v13073_v59 = vsub.f32 %v2162_v8, %v13045_v48  ;;  %v17859_v8 = vand.u32 4294901760, %v13090_v51 }
 0x375   : > { %3798 = vmatpush.msrb.mxu0 %v3629_v16  ;;  %3937 = vmatpush.msrb.mxu3 %v3936_v21  ;;  %v2586_v16 = vpop.f32.mrf.mxu1  ;;  %v2728_v21 = vpop.f32.mrf.mxu3 }
 0x376   : > { %3939 = vmatmul.f32.vlgmr.msrb.gmra.mxu3 %v12283_v42  ;;  %3994 = vmatpush.msra.mxu1 %v12870_v13  ;;  %v2587_v35 = vadd.f32 %v2586_v16, %v2550_v34  ;;  %v17862_v22 = vand.u32 4294901760, %v13073_v59  ;;  %v13126_v34 = vand.u32 4294901760, %v2147_v39 }
 0x377   : > { %4027 = vmatpush.msra.mxu2 %v3898_v31  ;;  %4066 = vmatpush.msra.mxu3 %v12849_v40  ;;  %v2156_v31 = vld [vmem:[%s17806_s6 + $0x100] sm:$0xff]  ;;  %v17865_v40 = vand.u32 4294901760, %v13043_v0 }
 0x378   : > { %3802 = vmatpush.msrb.mxu0 %v3635_v43  ;;  %3996 = vmatpush.msra.mxu1 %v12883_v45  ;;  %v18069_v43 = vand.u32 4294901760, %v12792_v44  ;;  %v2628_v49 = vadd.f32 %v2627_v4, %v2587_v35  ;;  %v13081_v1 = vand.u32 4294901760, %v2156_v31  ;;  %v2150_v44 = vld [vmem:[%s17806_s6 + $0xd0] sm:$0xff]  ;;  %v4154_v35 = vsub.f32 %v13090_v51, %v17859_v8 }
 0x379   : > { %4031 = vmatpush.msra.mxu2 %v3904_v26  ;;  %4068 = vmatpush.msra.mxu3 %v12858_v28  ;;  %v18070_v26 = vand.u32 4294901760, %v12906_v37  ;;  %v4130_v28 = vsub.f32 %v13025_v7, %v17866_v32  ;;  %v13106_v62 = vand.u32 4294901760, %v2150_v44  ;;  %v2198_v32 = vld [vmem:[%s17806_s6 + $0x250] sm:$0xff] }
 0x37a   : > { %3806 = vmatpush.msrb.mxu0 %v18069_v43  ;;  %3998 = vmatpush.msra.mxu1 %v12897_v47  ;;  %v2729_v36 = vadd.f32 %v2728_v21, %v2628_v49  ;;  %v13112_v24 = vsub.f32 %v2156_v31, %v13081_v1  ;;  %v2141_v31 = vld [vmem:[%s17806_s6 + $0x88] sm:$0xff]  ;;  %v13154_v43 = vsub.f32 %v2147_v39, %v13126_v34  ;;  %v2135_v39 = vld [vmem:[%s17806_s6 + $0x58] sm:$0xff] }
 0x37b   : > { %3808 = vmatmul.f32.vlgmr.msrb.gmra.mxu0 %v12087_v50  ;;  %4035 = vmatpush.msra.mxu2 %v18070_v26  ;;  %v13137_v16 = vsub.f32 %v2150_v44, %v13106_v62 }
 0x37c   : > { %3953 = vmatpush.msra.mxu0 %v12868_v19  ;;  %4070 = vmatpush.msra.mxu3 %v12870_v13  ;;  %v2782_v19 = vpop.f32.mrf.mxu0  ;;  %v4136_v13 = vsub.f32 %v13043_v0, %v17865_v40 }
 0x37d   : > { %4000 = vmatpush.msra.mxu1 %v12908_v38  ;;  %4039 = vmatpush.msra.mxu2 %v3916_v27  ;;  %v4131_v27 = vand.u32 4294901760, %v4130_v28  ;;  %v2783_v29 = vadd.f32 %v2782_v19, %v2729_v36  ;;  %v17851_v28 = vand.u32 4294901760, %v13137_v16  ;;  %v2890_v19 = vpop.f32.mrf.mxu2 }
 0x37e   : > { %3956 = vmatpush.msra.mxu0 %v12881_v46  ;;  %4072 = vmatpush.msra.mxu3 %v12883_v45  ;;  %v2144_v46 = vld [vmem:[%s17806_s6 + $0xa0] sm:$0xff]  ;;  %v4142_v45 = vsub.f32 %v13055_v9, %v17863_v56  ;;  %v2201_v56 = vld [vmem:[%s17806_s6 + $0x268] sm:$0xff] }
 0x37f   : > { %4002 = vmatpush.msra.mxu1 %v12930_v33  ;;  %4043 = vmatpush.msra.mxu2 %v3922_v54  ;;  %v13124_v54 = vsub.f32 %v2153_v10, %v13092_v18  ;;  %v13139_v4 = vand.u32 4294901760, %v2144_v46 }
 0x380   : > { %3959 = vmatpush.msra.mxu0 %v12895_v53  ;;  %4074 = vmatpush.msra.mxu3 %v12897_v47  ;;  %v4137_v53 = vand.u32 4294901760, %v4136_v13  ;;  %v4148_v47 = vsub.f32 %v13073_v59, %v17862_v22  ;;  %v4155_v13 = vand.u32 4294901760, %v4154_v35 }
 0x381   : > { %4004 = vmatpush.msra.mxu1 %v12944_v23  ;;  %4047 = vmatpush.msra.mxu2 %v3928_v3  ;;  %v4143_v3 = vand.u32 4294901760, %v4142_v45  ;;  %v17853_v10 = vand.u32 4294901760, %v13124_v54  ;;  %v13166_v44 = vsub.f32 %v2144_v46, %v13139_v4  ;;  %v13191_v45 = vand.u32 4294901760, %v2135_v39 }
 0x382   : > { %3962 = vmatpush.msra.mxu0 %v12906_v37  ;;  %4076 = vmatpush.msra.mxu3 %v12908_v38  ;;  %v17858_v37 = vand.u32 4294901760, %v13112_v24  ;;  %v2821_v38 = vpop.f32.mrf.mxu1  ;;  %v4149_v26 = vand.u32 4294901760, %v4148_v47  ;;  %v2129_v47 = vld [vmem:[%s17806_s6 + $0x28] sm:$0xff] }
 0x383   : > { %4008 = vmatmul.f32.vlgmr.msra.gmra.mxu1 %v12342_v58  ;;  %4051 = vmatpush.msra.mxu2 %v3934_v55  ;;  %v2138_v55 = vld [vmem:[%s17806_s6 + $0x70] sm:$0xff]  ;;  %v2822_v49 = vadd.f32 %v2821_v38, %v2783_v29  ;;  %v4166_v36 = vsub.f32 %v13124_v54, %v17853_v10  ;;  %v4172_v29 = vsub.f32 %v13137_v16, %v17851_v28  ;;  %v13381_v58 = vand.u32 4294901760, %v2198_v32 }
 0x384   : > { %4132 = vmatpush.msrb.mxu1 %v4131_v27  ;;  %3965 = vmatpush.msra.mxu0 %v12923_v63  ;;  %v13161_v63 = vand.u32 4294901760, %v2141_v31  ;;  %v13176_v21 = vand.u32 4294901760, %v2138_v55  ;;  %v17850_v27 = vand.u32 4294901760, %v13154_v43  ;;  %v2960_v35 = vpop.f32.mrf.mxu0 }
 0x385   : > { %4078 = vmatpush.msra.mxu3 %v12930_v33  ;;  %4053 = vmatmul.f32.vlgmr.msra.gmra.mxu2 %v12283_v42  ;;  %v4160_v33 = vsub.f32 %v13112_v24, %v17858_v37 }
 0x386   : > { %4138 = vmatpush.msrb.mxu1 %v4137_v53  ;;  %4230 = vmatpush.msrb.mxu2 %v13025_v7  ;;  %v13189_v46 = vsub.f32 %v2141_v31, %v13161_v63  ;;  %v17852_v53 = vand.u32 4294901760, %v13166_v44  ;;  %v13204_v38 = vsub.f32 %v2138_v55, %v13176_v21 }
 0x387   : > { %3968 = vmatpush.msra.mxu0 %v12940_v12  ;;  %4080 = vmatpush.msra.mxu3 %v12944_v23  ;;  %v2132_v12 = vld [vmem:[%s17806_s6 + $0x40] sm:$0xff]  ;;  %v2891_v23 = vadd.f32 %v2890_v19, %v2822_v49  ;;  %v4161_v31 = vand.u32 4294901760, %v4160_v33  ;;  %v4167_v49 = vand.u32 4294901760, %v4166_v36  ;;  %v2126_v19 = vld [vmem:[%s17806_s6 + $0x10] sm:$0xff]  ;;  %v4173_v36 = vand.u32 4294901760, %v4172_v29 }
 0x388   : > { %4082 = vmatmul.f32.vlgmr.msra.gmra.mxu3 %v12283_v42  ;;  %4144 = vmatpush.msrb.mxu1 %v4143_v3  ;;  %v2927_v3 = vpop.f32.mrf.mxu3  ;;  %v17854_v55 = vand.u32 4294901760, %v13189_v46  ;;  %v13233_v28 = vand.u32 4294901760, %v2126_v19  ;;  %v13397_v42 = vand.u32 4294901760, %v2195_v30 }
 0x389   : > { %4233 = vmatpush.msrb.mxu2 %v13043_v0  ;;  %4283 = vmatpush.msrb.mxu3 %v13007_v5  ;;  %v2928_v33 = vadd.f32 %v2927_v3, %v2891_v23  ;;  %v4184_v23 = vsub.f32 %v13166_v44, %v17852_v53 }
 0x38a   : > { %3971 = vmatpush.msra.mxu0 %v12956_v60  ;;  %4150 = vmatpush.msrb.mxu1 %v4149_v26  ;;  %v13206_v60 = vand.u32 4294901760, %v2132_v12  ;;  %v4178_v26 = vsub.f32 %v13154_v43, %v17850_v27  ;;  %v17856_v27 = vand.u32 4294901760, %v13204_v38 }
 0x38b   : > { %4236 = vmatpush.msrb.mxu2 %v13055_v9  ;;  %4285 = vmatpush.msrb.mxu3 %v13021_v15  ;;  %v2961_v3 = vadd.f32 %v2960_v35, %v2928_v33  ;;  %v4185_v53 = vand.u32 4294901760, %v4184_v23 }
 0x38c   : > { %3974 = vmatpush.msra.mxu0 %v12968_v52  ;;  %4156 = vmatpush.msrb.mxu1 %v4155_v13  ;;  %v13219_v52 = vsub.f32 %v2135_v39, %v13191_v45  ;;  %v13221_v13 = vand.u32 4294901760, %v2129_v47  ;;  %v13231_v39 = vsub.f32 %v2132_v12, %v13206_v60  ;;  %v4179_v29 = vand.u32 4294901760, %v4178_v26  ;;  %v3021_v12 = vpop.f32.mrf.mxu1 }
 0x38d   : > { %3977 = vmatmul.f32.vlgmr.msra.gmra.mxu0 %v12310_v2  ;;  %4239 = vmatpush.msrb.mxu2 %v13073_v59  ;;  %v3022_v10 = vadd.f32 %v3021_v12, %v2961_v3  ;;  %v3059_v3 = vpop.f32.mrf.mxu2 }
 0x38e   : > { %4087 = vmatpush.msrb.mxu0 %v13007_v5  ;;  %4287 = vmatpush.msrb.mxu3 %v13033_v20  ;;  %v17855_v35 = vand.u32 4294901760, %v13219_v52  ;;  %v13243_v33 = vsub.f32 %v2129_v47, %v13221_v13  ;;  %v17857_v26 = vand.u32 4294901760, %v13231_v39 }
 0x38f   : > { %4162 = vmatpush.msrb.mxu1 %v4161_v31  ;;  %4242 = vmatpush.msrb.mxu2 %v13090_v51  ;;  %v4190_v31 = vsub.f32 %v13189_v46, %v17854_v55  ;;  %v13253_v55 = vsub.f32 %v2126_v19, %v13233_v28  ;;  %v2219_v19 = vld [vmem:[%s17806_s6 + $0x2f8] sm:$0xff]  ;;  %v3060_v12 = vadd.f32 %v3059_v3, %v3022_v10 }
 0x390   : > { %4089 = vmatpush.msrb.mxu0 %v13021_v15  ;;  %4289 = vmatpush.msrb.mxu3 %v13045_v48  ;;  %v17860_v23 = vand.u32 4294901760, %v13243_v33  ;;  %v3090_v3 = vpop.f32.mrf.mxu3 }
 0x391   : > { %4168 = vmatpush.msrb.mxu1 %v4167_v49  ;;  %4245 = vmatpush.msrb.mxu2 %v13112_v24  ;;  %v4196_v49 = vsub.f32 %v13204_v38, %v17856_v27  ;;  %v4191_v47 = vand.u32 4294901760, %v4190_v31  ;;  %v4208_v31 = vsub.f32 %v13231_v39, %v17857_v26  ;;  %v2216_v27 = vld [vmem:[%s17806_s6 + $0x2e0] sm:$0xff]  ;;  %v3135_v26 = vpop.f32.mrf.mxu0  ;;  %v3091_v37 = vadd.f32 %v3090_v3, %v3060_v12  ;;  %v2210_v3 = vld [vmem:[%s17806_s6 + $0x2b0] sm:$0xff] }
 0x392   : > { %4091 = vmatpush.msrb.mxu0 %v13033_v20  ;;  %4291 = vmatpush.msrb.mxu3 %v13057_v11  ;;  %v13289_v8 = vand.u32 4294901760, %v2216_v27 }
 0x393   : > { %4174 = vmatpush.msrb.mxu1 %v4173_v36  ;;  %4248 = vmatpush.msrb.mxu2 %v13124_v54  ;;  %v4202_v36 = vsub.f32 %v13219_v52, %v17855_v35  ;;  %v17861_v35 = vand.u32 4294901760, %v13253_v55  ;;  %v3136_v12 = vadd.f32 %v3135_v26, %v3091_v37 }
 0x394   : > { %4093 = vmatpush.msrb.mxu0 %v13045_v48  ;;  %4293 = vmatpush.msrb.mxu3 %v13081_v1  ;;  %v13309_v37 = vsub.f32 %v2216_v27, %v13289_v8  ;;  %v3164_v26 = vpop.f32.mrf.mxu1  ;;  %v2204_v27 = vld [vmem:[%s17806_s6 + $0x280] sm:$0xff] }
 0x395   : > { %4180 = vmatpush.msrb.mxu1 %v4179_v29  ;;  %4251 = vmatpush.msrb.mxu2 %v13137_v16  ;;  %v4197_v29 = vand.u32 4294901760, %v4196_v49  ;;  %v4203_v10 = vand.u32 4294901760, %v4202_v36  ;;  %v13281_v49 = vand.u32 4294901760, %v2219_v19  ;;  %v4220_v36 = vsub.f32 %v13253_v55, %v17861_v35 }
 0x396   : > { %4095 = vmatpush.msrb.mxu0 %v13057_v11  ;;  %4295 = vmatpush.msrb.mxu3 %v13092_v18  ;;  %v13346_v22 = vand.u32 4294901760, %v2204_v27 }
 0x397   : > { %4186 = vmatpush.msrb.mxu1 %v4185_v53  ;;  %4254 = vmatpush.msrb.mxu2 %v13154_v43  ;;  %v4214_v53 = vsub.f32 %v13243_v33, %v17860_v23  ;;  %v2213_v23 = vld [vmem:[%s17806_s6 + $0x2c8] sm:$0xff]  ;;  %v4221_v35 = vand.u32 4294901760, %v4220_v36  ;;  %v13320_v36 = vand.u32 4294901760, %v2210_v3 }
 0x398   : > { %4097 = vmatpush.msrb.mxu0 %v13081_v1  ;;  %4297 = vmatpush.msrb.mxu3 %v13106_v62 }
 0x399   : > { %4192 = vmatpush.msrb.mxu1 %v4191_v47  ;;  %4257 = vmatpush.msrb.mxu2 %v13166_v44  ;;  %v4209_v47 = vand.u32 4294901760, %v4208_v31  ;;  %v13298_v31 = vsub.f32 %v2219_v19, %v13281_v49  ;;  %v2207_v19 = vld [vmem:[%s17806_s6 + $0x298] sm:$0xff] }
 0x39a   : > { %4099 = vmatpush.msrb.mxu0 %v13092_v18  ;;  %4299 = vmatpush.msrb.mxu3 %v13126_v34 }
 0x39b   : > { %4198 = vmatpush.msrb.mxu1 %v4197_v29  ;;  %4260 = vmatpush.msrb.mxu2 %v13189_v46  ;;  %v4215_v29 = vand.u32 4294901760, %v4214_v53  ;;  %v13316_v53 = vadd.f32 %v3164_v26, %v3136_v12  ;;  %v17867_v12 = vand.u32 4294901760, %v13309_v37  ;;  %v13332_v26 = vand.u32 4294901760, %v2207_v19 }
 0x39c   : > { %4101 = vmatpush.msrb.mxu0 %v13106_v62  ;;  %4301 = vmatpush.msrb.mxu3 %v13139_v4 }
 0x39d   : > { %4204 = vmatpush.msrb.mxu1 %v4203_v10  ;;  %4263 = vmatpush.msrb.mxu2 %v13204_v38  ;;  %v13306_v10 = vand.u32 4294901760, %v2213_v23  ;;  %18071 = vst [vmem:[#allocation14_spill] sm:$0xff] %v13316_v53  ;;  %v13361_v40 = vsub.f32 %v2207_v19, %v13332_v26  ;;  %v13374_v19 = vsub.f32 %v2204_v27, %v13346_v22 }
 0x39e   : > { %4103 = vmatpush.msrb.mxu0 %v13126_v34  ;;  %4303 = vmatpush.msrb.mxu3 %v13161_v63 }
 0x39f   : > { %4210 = vmatpush.msrb.mxu1 %v4209_v47  ;;  %4266 = vmatpush.msrb.mxu2 %v13219_v52  ;;  %v17864_v47 = vand.u32 4294901760, %v13298_v31  ;;  %18073 = vst [vmem:[#allocation16_spill] sm:$0xff] %v13361_v40  ;;  %v18077_v17 = vand.u32 4294901760, %v13374_v19 }
 0x3a0   : > { %4105 = vmatpush.msrb.mxu0 %v13139_v4  ;;  %4305 = vmatpush.msrb.mxu3 %v13176_v21 }
 0x3a1   : > { %4216 = vmatpush.msrb.mxu1 %v4215_v29  ;;  %4269 = vmatpush.msrb.mxu2 %v13231_v39  ;;  %v13330_v29 = vsub.f32 %v2213_v23, %v13306_v10  ;;  %v13344_v23 = vsub.f32 %v2210_v3, %v13320_v36  ;;  %v4477_v3 = vsub.f32 %v13309_v37, %v17867_v12 }
 0x3a2   : > { %4107 = vmatpush.msrb.mxu0 %v13161_v63  ;;  %4307 = vmatpush.msrb.mxu3 %v13191_v45 }
 0x3a3   : > { %4222 = vmatpush.msrb.mxu1 %v4221_v35  ;;  %4272 = vmatpush.msrb.mxu2 %v13243_v33  ;;  %v4471_v35 = vsub.f32 %v13298_v31, %v17864_v47  ;;  %18072 = vst [vmem:[#allocation15_spill] sm:$0xff] %v13344_v23  ;;  %v2192_v47 = vld [vmem:[%s17806_s6 + $0x220] sm:$0xff] }
 0x3a4   : > { %4109 = vmatpush.msrb.mxu0 %v13176_v21  ;;  %4309 = vmatpush.msrb.mxu3 %v13206_v60 }
 0x3a5   : > { %7236 = vrot.lane.b32.xlu0 %v13316_v53, %s17893_s19  ;;  %7281 = vrot.lane.b32.xlu1 %v13316_v53, %s17868_s18  ;;  %v4472_v12 = vand.u32 4294901760, %v4471_v35  ;;  %v13415_v35 = vand.u32 4294901760, %v2192_v47  ;;  %s18168_s18 = smov 90  }
 0x3a6   : > { %7327 = vrot.lane.b32.xlu2 %v13316_v53, %s17895_s29  ;;  %4224 = vmatmul.f32.vlgmr.msrb.gmra.mxu1 %v12042_v41 }
 0x3a7   : > { %4391 = vmatpush.msra.mxu1 %v13007_v5  ;;  %4111 = vmatpush.msrb.mxu0 %v13191_v45  ;;  %v13368_v5 = vand.u32 4294901760, %v2201_v56 }
 0x3a8   : > { %4275 = vmatpush.msrb.mxu2 %v13253_v55  ;;  %4311 = vmatpush.msrb.mxu3 %v13221_v13 }
 0x3a9   : > { %4278 = vmatmul.f32.vlgmr.msrb.gmra.mxu2 %v12045_v57  ;;  %4393 = vmatpush.msra.mxu1 %v13021_v15  ;;  %v4478_v57 = vand.u32 4294901760, %v4477_v3  ;;  %v18074_v15 = vand.u32 4294901760, %v13330_v29  ;;  %v13395_v2 = vsub.f32 %v2201_v56, %v13368_v5  ;;  %v13410_v56 = vrot.slane %v13316_v53, 4 }
 0x3aa   : > { %4428 = vmatpush.msra.mxu2 %v13281_v49  ;;  %4113 = vmatpush.msrb.mxu0 %v13206_v60 }
 0x3ab   : > { %4313 = vmatpush.msrb.mxu3 %v13233_v28  ;;  %4395 = vmatpush.msra.mxu1 %v13033_v20  ;;  %v4483_v27 = vsub.f32 %v13330_v29, %v18074_v15  ;;  %v18075_v20 = vand.u32 4294901760, %v13344_v23  ;;  %v18076_v15 = vand.u32 4294901760, %v13361_v40 }
 0x3ac   : > { %4317 = vmatmul.f32.vlgmr.msrb.gmra.mxu3 %v12051_v61  ;;  %4430 = vmatpush.msra.mxu2 %v13289_v8  ;;  %v2189_v61 = vld [vmem:[%s17806_s6 + $0x208] sm:$0xff] }
 0x3ad   : > { %4473 = vmatpush.msra.mxu3 %v4472_v12  ;;  %4115 = vmatpush.msrb.mxu0 %v13221_v13  ;;  %v4489_v3 = vsub.f32 %v13344_v23, %v18075_v20  ;;  %v13413_v12 = vsub.f32 %v2198_v32, %v13381_v58  ;;  %v4484_v20 = vand.u32 4294901760, %v4483_v27  ;;  %v4495_v14 = vsub.f32 %v13361_v40, %v18076_v15  ;;  %v2183_v40 = vld [vmem:[%s17806_s6 + $0x1d8] sm:$0xff] }
 0x3ae   : > { %4397 = vmatpush.msra.mxu1 %v13045_v48  ;;  %4432 = vmatpush.msra.mxu2 %v13306_v10  ;;  %v2186_v48 = vld [vmem:[%s17806_s6 + $0x1f0] sm:$0xff]  ;;  %v13432_v27 = vand.u32 4294901760, %v2189_v61  ;;  %v18078_v32 = vand.u32 4294901760, %v13025_v7  ;;  %v13448_v23 = vsub.f32 %v2192_v47, %v13415_v35  ;;  %v18079_v7 = vand.u32 4294901760, %v13043_v0 }
 0x3af   : > { %4479 = vmatpush.msra.mxu3 %v4478_v57  ;;  %4117 = vmatpush.msrb.mxu0 %v13233_v28  ;;  %v13430_v57 = vsub.f32 %v2195_v30, %v13397_v42  ;;  %v4490_v15 = vand.u32 4294901760, %v4489_v3  ;;  %v2180_v3 = vld [vmem:[%s17806_s6 + $0x1c0] sm:$0xff]  ;;  %v18081_v0 = vand.u32 4294901760, %v13055_v9  ;;  %v18083_v9 = vand.u32 4294901760, %v13073_v59 }
 0x3b0   : > { %7191 = vrot.lane.b32.xlu2 %v13316_v53, %s17929_s26  ;;  %7213 = vrot.lane.b32.xlu0 %v13410_v56, %s10445_s20  ;;  %v4501_v53 = vsub.f32 %v13374_v19, %v18077_v17  ;;  %v4496_v17 = vand.u32 4294901760, %v4495_v14  ;;  %v13464_v30 = vsub.f32 %v2189_v61, %v13432_v27 }
 0x3b1   : > { %7259 = vrot.lane.b32.xlu1 %v13410_v56, %s17883_s16  ;;  %4123 = vmatmul.f32.vlgmr.msrb.gmra.mxu0 %v12063_v6  ;;  %v13450_v6 = vand.u32 4294901760, %v2186_v48  ;;  %s10446_s16 = smov 91  }
 0x3b2   : > { %4324 = vmatpush.msra.mxu0 %v18078_v32  ;;  %4399 = vmatpush.msra.mxu1 %v13057_v11  ;;  %v18080_v11 = vand.u32 4294901760, %v13395_v2  ;;  %v4502_v14 = vand.u32 4294901760, %v4501_v53  ;;  %v13479_v32 = vand.u32 4294901760, %v2180_v3  ;;  %v2177_v53 = vld [vmem:[%s17806_s6 + $0x1a8] sm:$0xff] }
 0x3b3   : > { %4434 = vmatpush.msra.mxu2 %v13320_v36  ;;  %4485 = vmatpush.msra.mxu3 %v4484_v20  ;;  %v13466_v20 = vand.u32 4294901760, %v2183_v40  ;;  %v13477_v61 = vsub.f32 %v2186_v48, %v13450_v6  ;;  %v13499_v59 = vand.u32 4294901760, %v2177_v53 }
 0x3b4   : > { %4328 = vmatpush.msra.mxu0 %v18079_v7  ;;  %4401 = vmatpush.msra.mxu1 %v13081_v1  ;;  %v4507_v47 = vsub.f32 %v13395_v2, %v18080_v11  ;;  %v18082_v1 = vand.u32 4294901760, %v13413_v12  ;;  %v2174_v11 = vld [vmem:[%s17806_s6 + $0x190] sm:$0xff] }
 0x3b5   : > { %4436 = vmatpush.msra.mxu2 %v13332_v26  ;;  %4491 = vmatpush.msra.mxu3 %v4490_v15  ;;  %v18084_v15 = vand.u32 4294901760, %v13430_v57 }
 0x3b6   : > { %4332 = vmatpush.msra.mxu0 %v18081_v0  ;;  %4403 = vmatpush.msra.mxu1 %v13092_v18  ;;  %v4513_v7 = vsub.f32 %v13413_v12, %v18082_v1  ;;  %v4508_v18 = vand.u32 4294901760, %v4507_v47  ;;  %v17885_v0 = vand.u32 4294901760, %v13464_v30  ;;  %v13493_v1 = vsub.f32 %v2183_v40, %v13466_v20 }
 0x3b7   : > { %4438 = vmatpush.msra.mxu2 %v13346_v22  ;;  %4497 = vmatpush.msra.mxu3 %v4496_v17  ;;  %v4519_v48 = vsub.f32 %v13430_v57, %v18084_v15  ;;  %v18085_v40 = vand.u32 4294901760, %v13448_v23  ;;  %v13515_v15 = vand.u32 4294901760, %v2174_v11 }
 0x3b8   : > { %4336 = vmatpush.msra.mxu0 %v18083_v9  ;;  %4405 = vmatpush.msra.mxu1 %v13106_v62  ;;  %v4514_v62 = vand.u32 4294901760, %v4513_v7  ;;  %v13510_v9 = vsub.f32 %v2180_v3, %v13479_v32  ;;  %v4542_v47 = vand.u32 4294901760, %v13493_v1  ;;  %v18087_v3 = vand.u32 4294901760, %v13112_v24 }
 0x3b9   : > { %4440 = vmatpush.msra.mxu2 %v13368_v5  ;;  %4503 = vmatpush.msra.mxu3 %v4502_v14  ;;  %v4525_v17 = vsub.f32 %v13448_v23, %v18085_v40  ;;  %v18086_v14 = vand.u32 4294901760, %v13090_v51  ;;  %v4520_v7 = vand.u32 4294901760, %v4519_v48  ;;  %v4531_v40 = vsub.f32 %v13464_v30, %v17885_v0 }
 0x3ba   : > { %7169 = vrot.lane.b32.xlu0 %v13410_v56, %s17886_s17  ;;  %7304 = vrot.lane.b32.xlu2 %v13410_v56, %s10446_s16  ;;  %v13526_v51 = vsub.f32 %v2177_v53, %v13499_v59  ;;  %v18089_v0 = vand.u32 4294901760, %v13124_v54  ;;  %v13537_v24 = vsub.f32 %v2174_v11, %v13515_v15  ;;  %v4543_v53 = vsub.f32 %v13493_v1, %v4542_v47 }
 0x3bb   : > { %4340 = vmatpush.msra.mxu0 %v18086_v14  ;;  %4407 = vmatpush.msra.mxu1 %v13126_v34  ;;  %v4526_v34 = vand.u32 4294901760, %v4525_v17  ;;  %v4548_v14 = vand.u32 4294901760, %v13510_v9  ;;  %v18092_v17 = vand.u32 4294901760, %v13166_v44 }
 0x3bc   : > { %4442 = vmatpush.msra.mxu2 %v13381_v58  ;;  %4509 = vmatpush.msra.mxu3 %v4508_v18  ;;  %v18088_v18 = vand.u32 4294901760, %v13477_v61  ;;  %v4554_v54 = vand.u32 4294901760, %v13526_v51 }
 0x3bd   : > { %4344 = vmatpush.msra.mxu0 %v18087_v3  ;;  %4409 = vmatpush.msra.mxu1 %v13139_v4  ;;  %v4532_v4 = vand.u32 4294901760, %v4531_v40  ;;  %v4549_v11 = vsub.f32 %v13510_v9, %v4548_v14  ;;  %v18100_v3 = vand.u32 4294901760, %v13330_v29 }
 0x3be   : > { %4444 = vmatpush.msra.mxu2 %v13397_v42  ;;  %4515 = vmatpush.msra.mxu3 %v4514_v62  ;;  %v4537_v48 = vsub.f32 %v13477_v61, %v18088_v18  ;;  %v18090_v62 = vand.u32 4294901760, %v13137_v16  ;;  %v4560_v16 = vand.u32 4294901760, %v13537_v24 }
 0x3bf   : > { %4348 = vmatpush.msra.mxu0 %v18089_v0  ;;  %4411 = vmatpush.msra.mxu1 %v13161_v63  ;;  %v18091_v0 = vand.u32 4294901760, %v13154_v43  ;;  %v4550_v43 = vand.u32 4294901760, %v4549_v11 }
 0x3c0   : > { %4446 = vmatpush.msra.mxu2 %v13415_v35  ;;  %4521 = vmatpush.msra.mxu3 %v4520_v7  ;;  %v4538_v63 = vand.u32 4294901760, %v4537_v48  ;;  %v4555_v7 = vsub.f32 %v13526_v51, %v4554_v54  ;;  %v4561_v44 = vsub.f32 %v13537_v24, %v4560_v16 }
 0x3c1   : > { %4352 = vmatpush.msra.mxu0 %v18090_v62  ;;  %4413 = vmatpush.msra.mxu1 %v13176_v21  ;;  %v4544_v21 = vand.u32 4294901760, %v4543_v53  ;;  %v2231_v53 = vld [vmem:[%s17806_s6 + $0x358] sm:$0xff] }
 0x3c2   : > { %4448 = vmatpush.msra.mxu2 %v13432_v27  ;;  %4527 = vmatpush.msra.mxu3 %v4526_v34  ;;  %v4556_v40 = vand.u32 4294901760, %v4555_v7  ;;  %v18102_v34 = vld [vmem:[#allocation15_spill] sm:$0xff] }
 0x3c3   : > { %4356 = vmatpush.msra.mxu0 %v18091_v0  ;;  %4415 = vmatpush.msra.mxu1 %v13191_v45  ;;  %v18093_v45 = vand.u32 4294901760, %v13189_v46  ;;  %v18095_v46 = vand.u32 4294901760, %v13219_v52  ;;  %v18098_v52 = vand.u32 4294901760, %v13309_v37  ;;  %v18103_v18 = vand.u32 4294901760, %v18102_v34  ;;  %v2228_v0 = vld [vmem:[%s17806_s6 + $0x340] sm:$0xff] }
 0x3c4   : > { %4450 = vmatpush.msra.mxu2 %v13450_v6  ;;  %4533 = vmatpush.msra.mxu3 %v4532_v4 }
 0x3c5   : > { %4360 = vmatpush.msra.mxu0 %v18092_v17  ;;  %4417 = vmatpush.msra.mxu1 %v13206_v60  ;;  %v18094_v60 = vand.u32 4294901760, %v13204_v38  ;;  %v18097_v38 = vand.u32 4294901760, %v13231_v39  ;;  %v18101_v39 = vand.u32 4294901760, %v13253_v55  ;;  %v2240_v55 = vld [vmem:[%s17806_s6 + $0x3a0] sm:$0xff]  ;;  %v3205_v17 = vpop.f32.mrf.mxu2 }
 0x3c6   : > { %4452 = vmatpush.msra.mxu2 %v13466_v20  ;;  %4539 = vmatpush.msra.mxu3 %v4538_v63  ;;  %v18110_v63 = vand.u32 4294901760, %v13448_v23 }
 0x3c7   : > { %4364 = vmatpush.msra.mxu0 %v18093_v45  ;;  %4419 = vmatpush.msra.mxu1 %v13221_v13  ;;  %v4562_v13 = vand.u32 4294901760, %v4561_v44  ;;  %v18112_v45 = vand.u32 4294901760, %v13477_v61  ;;  %v13687_v44 = vand.u32 4294901760, %v2228_v0 }
 0x3c8   : > { %4454 = vmatpush.msra.mxu2 %v13479_v32  ;;  %4545 = vmatpush.msra.mxu3 %v4544_v21  ;;  %v18111_v21 = vand.u32 4294901760, %v13464_v30 }
 0x3c9   : > { %4368 = vmatpush.msra.mxu0 %v18094_v60  ;;  %4421 = vmatpush.msra.mxu1 %v13233_v28  ;;  %v18096_v28 = vand.u32 4294901760, %v13298_v31  ;;  %v3360_v60 = vpop.f32.mrf.mxu0 }
 0x3ca   : > { %4456 = vmatpush.msra.mxu2 %v13499_v59  ;;  %4551 = vmatpush.msra.mxu3 %v4550_v43  ;;  %v2225_v43 = vld [vmem:[%s17806_s6 + $0x328] sm:$0xff] }
 0x3cb   : > { %4423 = vmatmul.f32.vlgmr.msra.gmra.mxu1 %v12042_v41  ;;  %4372 = vmatpush.msra.mxu0 %v18095_v46  ;;  %v2222_v46 = vld [vmem:[%s17806_s6 + $0x310] sm:$0xff] }
 0x3cc   : > { %4624 = vmatpush.msrb.mxu1 %v13281_v49  ;;  %4458 = vmatpush.msra.mxu2 %v13515_v15 }
 0x3cd   : > { %4557 = vmatpush.msra.mxu3 %v4556_v40  ;;  %4464 = vmatmul.f32.vlgmr.msra.gmra.mxu2 %v12140_v25  ;;  %v18099_v25 = vand.u32 4294901760, %v13243_v33  ;;  %v18104_v33 = vld [vmem:[#allocation16_spill] sm:$0xff] }
 0x3ce   : > { %4626 = vmatpush.msrb.mxu1 %v13289_v8  ;;  %4665 = vmatpush.msrb.mxu2 %v18096_v28 }
 0x3cf   : > { %4376 = vmatpush.msra.mxu0 %v18097_v38  ;;  %4563 = vmatpush.msra.mxu3 %v4562_v13 }
 0x3d0   : > { %4565 = vmatmul.f32.vlgmr.msra.gmra.mxu3 %v12087_v50  ;;  %4628 = vmatpush.msrb.mxu1 %v13306_v10 }
 0x3d1   : > { %4669 = vmatpush.msrb.mxu2 %v18098_v52  ;;  %4732 = vmatpush.msrb.mxu3 %v13281_v49  ;;  %v18105_v49 = vand.u32 4294901760, %v18104_v33  ;;  %v13718_v52 = vand.u32 4294901760, %v2222_v46 }
 0x3d2   : > { %4380 = vmatpush.msra.mxu0 %v18099_v25  ;;  %4630 = vmatpush.msrb.mxu1 %v13320_v36 }
 0x3d3   : > { %4673 = vmatpush.msrb.mxu2 %v18100_v3  ;;  %4734 = vmatpush.msrb.mxu3 %v13289_v8  ;;  %v2243_v8 = vld [vmem:[%s17806_s6 + $0x3b8] sm:$0xff]  ;;  %v3399_v3 = vpop.f32.mrf.mxu1 }
 0x3d4   : > { %4384 = vmatpush.msra.mxu0 %v18101_v39  ;;  %4632 = vmatpush.msrb.mxu1 %v13332_v26  ;;  %v3468_v39 = vpop.f32.mrf.mxu2 }
 0x3d5   : > { %4386 = vmatmul.f32.vlgmr.msra.gmra.mxu0 %v12042_v41  ;;  %4677 = vmatpush.msrb.mxu2 %v18103_v18  ;;  %v18106_v41 = vand.u32 4294901760, %v13374_v19  ;;  %v18113_v18 = vld [vmem:[#allocation9_spill] sm:$0xff] }
 0x3d6   : > { %4571 = vmatpush.msrb.mxu0 %v13298_v31  ;;  %4736 = vmatpush.msrb.mxu3 %v13306_v10  ;;  %v13620_v31 = vand.u32 4294901760, %v2243_v8  ;;  %v18107_v10 = vand.u32 4294901760, %v13395_v2 }
 0x3d7   : > { %4634 = vmatpush.msrb.mxu1 %v13346_v22  ;;  %4681 = vmatpush.msrb.mxu2 %v18105_v49  ;;  %v5051_v49 = vld [vmem:[%s17807_s7 + $0x168] sm:$0xff] }
 0x3d8   : > { %4574 = vmatpush.msrb.mxu0 %v13309_v37  ;;  %4738 = vmatpush.msrb.mxu3 %v13320_v36  ;;  %v2237_v37 = vld [vmem:[%s17806_s6 + $0x388] sm:$0xff]  ;;  %v13630_v36 = vand.u32 4294901760, %v2240_v55  ;;  %v13641_v48 = vsub.f32 %v2243_v8, %v13620_v31 }
 0x3d9   : > { %4636 = vmatpush.msrb.mxu1 %v13368_v5  ;;  %4685 = vmatpush.msrb.mxu2 %v18106_v41  ;;  %v13643_v4 = vand.u32 4294901760, %v2237_v37 }
 0x3da   : > { %4577 = vmatpush.msrb.mxu0 %v13330_v29  ;;  %4740 = vmatpush.msrb.mxu3 %v13332_v26  ;;  %v18108_v29 = vand.u32 4294901760, %v13413_v12  ;;  %v2234_v26 = vld [vmem:[%s17806_s6 + $0x370] sm:$0xff]  ;;  %v4811_v11 = vand.u32 4294901760, %v13641_v48 }
 0x3db   : > { %4638 = vmatpush.msrb.mxu1 %v13381_v58  ;;  %4689 = vmatpush.msrb.mxu2 %v18107_v10  ;;  %v13656_v62 = vand.u32 4294901760, %v2234_v26 }
 0x3dc   : > { %4580 = vmatpush.msrb.mxu0 %v18102_v34  ;;  %4742 = vmatpush.msrb.mxu3 %v13346_v22  ;;  %v18109_v22 = vand.u32 4294901760, %v13430_v57 }
 0x3dd   : > { %4640 = vmatpush.msrb.mxu1 %v13397_v42  ;;  %4693 = vmatpush.msrb.mxu2 %v18108_v29  ;;  %v13679_v7 = vsub.f32 %v2234_v26, %v13656_v62  ;;  %v3546_v29 = vpop.f32.mrf.mxu0 }
 0x3de   : > { %4583 = vmatpush.msrb.mxu0 %v18104_v33  ;;  %4744 = vmatpush.msrb.mxu3 %v13368_v5  ;;  %v13654_v5 = vsub.f32 %v2240_v55, %v13630_v36  ;;  %v13742_v33 = vsub.f32 %v2222_v46, %v13718_v52  ;;  %v5048_v55 = vld [vmem:[%s17807_s7 + $0x150] sm:$0xff] }
 0x3df   : > { %4642 = vmatpush.msrb.mxu1 %v13415_v35  ;;  %4697 = vmatpush.msrb.mxu2 %v18109_v22  ;;  %v4829_v28 = vand.u32 4294901760, %v13679_v7 }
 0x3e0   : > { %4586 = vmatpush.msrb.mxu0 %v13374_v19  ;;  %4746 = vmatpush.msrb.mxu3 %v13381_v58  ;;  %v13665_v19 = vsub.f32 %v2237_v37, %v13643_v4  ;;  %v13667_v58 = vand.u32 4294901760, %v2231_v53  ;;  %v4853_v10 = vand.u32 4294901760, %v13742_v33  ;;  %v13764_v37 = vand.u32 4294901760, %v5051_v49 }
 0x3e1   : > { %4644 = vmatpush.msrb.mxu1 %v13432_v27  ;;  %4701 = vmatpush.msrb.mxu2 %v18110_v63 }
 0x3e2   : > { %4589 = vmatpush.msrb.mxu0 %v13395_v2  ;;  %4748 = vmatpush.msrb.mxu3 %v13397_v42  ;;  %v3306_v2 = vpop.f32.mrf.mxu3  ;;  %v4817_v42 = vand.u32 4294901760, %v13654_v5  ;;  %v13696_v40 = vsub.f32 %v2231_v53, %v13667_v58  ;;  %v5045_v53 = vld [vmem:[%s17807_s7 + $0x138] sm:$0xff] }
 0x3e3   : > { %4646 = vmatpush.msrb.mxu1 %v13450_v6  ;;  %4705 = vmatpush.msrb.mxu2 %v18111_v21  ;;  %v3307_v13 = vadd.f32 %v3306_v2, %v3205_v17  ;;  %v13784_v21 = vsub.f32 %v5051_v49, %v13764_v37  ;;  %v5042_v17 = vld [vmem:[%s17807_s7 + $0x120] sm:$0xff]  ;;  %v18114_v2 = vld [vmem:[#allocation8_spill] sm:$0xff] }
 0x3e4   : > { %4592 = vmatpush.msrb.mxu0 %v13413_v12  ;;  %4750 = vmatpush.msrb.mxu3 %v13415_v35  ;;  %v4812_v35 = vsub.f32 %v13641_v48, %v4811_v11  ;;  %v4823_v12 = vand.u32 4294901760, %v13665_v19  ;;  %v4835_v25 = vand.u32 4294901760, %v13696_v40  ;;  %v13802_v46 = vand.u32 4294901760, %v5042_v17 }
 0x3e5   : > { %4648 = vmatpush.msrb.mxu1 %v13466_v20  ;;  %4709 = vmatpush.msrb.mxu2 %v18112_v45  ;;  %v3361_v38 = vadd.f32 %v3360_v60, %v3307_v13  ;;  %v5039_v60 = vld [vmem:[%s17807_s7 + $0x108] sm:$0xff] }
 0x3e6   : > { %4595 = vmatpush.msrb.mxu0 %v13430_v57  ;;  %4752 = vmatpush.msrb.mxu3 %v13432_v27  ;;  %v13704_v57 = vand.u32 4294901760, %v2225_v43  ;;  %v4818_v27 = vsub.f32 %v13654_v5, %v4817_v42 }
 0x3e7   : > { %4650 = vmatpush.msrb.mxu1 %v13479_v32  ;;  %4713 = vmatpush.msrb.mxu2 %v4542_v47  ;;  %v13716_v47 = vsub.f32 %v2228_v0, %v13687_v44  ;;  %v3400_v34 = vadd.f32 %v3399_v3, %v3361_v38  ;;  %v4854_v0 = vsub.f32 %v13742_v33, %v4853_v10  ;;  %v5151_v38 = vand.u32 4294901760, %v13784_v21 }
 0x3e8   : > { %4598 = vmatpush.msrb.mxu0 %v13448_v23  ;;  %4754 = vmatpush.msrb.mxu3 %v13450_v6  ;;  %v4813_v23 = vand.u32 4294901760, %v4812_v35  ;;  %v4824_v6 = vsub.f32 %v13665_v19, %v4823_v12  ;;  %v3647_v35 = vpop.f32.mrf.mxu1  ;;  %v13814_v3 = vand.u32 4294901760, %v5039_v60 }
 0x3e9   : > { %4652 = vmatpush.msrb.mxu1 %v13499_v59  ;;  %4717 = vmatpush.msrb.mxu2 %v4548_v14  ;;  %v13730_v14 = vsub.f32 %v2225_v43, %v13704_v57  ;;  %v3469_v8 = vadd.f32 %v3468_v39, %v3400_v34  ;;  %v5033_v39 = vld [vmem:[%s17807_s7 + $0xd8] sm:$0xff]  ;;  %v5152_v49 = vsub.f32 %v13784_v21, %v5151_v38 }
 0x3ea   : > { %4601 = vmatpush.msrb.mxu0 %v13464_v30  ;;  %4756 = vmatpush.msrb.mxu3 %v13466_v20  ;;  %v4819_v30 = vand.u32 4294901760, %v4818_v27  ;;  %v4830_v20 = vsub.f32 %v13679_v7, %v4829_v28  ;;  %v3505_v41 = vpop.f32.mrf.mxu3  ;;  %v4855_v27 = vand.u32 4294901760, %v4854_v0 }
 0x3eb   : > { %4654 = vmatpush.msrb.mxu1 %v13515_v15  ;;  %4721 = vmatpush.msrb.mxu2 %v4554_v54  ;;  %v4841_v54 = vand.u32 4294901760, %v13716_v47  ;;  %v3506_v22 = vadd.f32 %v3505_v41, %v3469_v8  ;;  %v13835_v8 = vand.u32 4294901760, %v5033_v39  ;;  %v5153_v0 = vand.u32 4294901760, %v5152_v49 }
 0x3ec   : > { %4604 = vmatpush.msrb.mxu0 %v13477_v61  ;;  %4758 = vmatpush.msrb.mxu3 %v13479_v32  ;;  %v4825_v32 = vand.u32 4294901760, %v4824_v6  ;;  %v4836_v61 = vsub.f32 %v13696_v40, %v4835_v25 }
 0x3ed   : > { %4658 = vmatmul.f32.vlgmr.msrb.gmra.mxu1 %v18113_v18  ;;  %4725 = vmatpush.msrb.mxu2 %v4560_v16  ;;  %v4847_v16 = vand.u32 4294901760, %v13730_v14  ;;  %v13824_v18 = vsub.f32 %v5042_v17, %v13802_v46 }
 0x3ee   : > { %4814 = vmatpush.msra.mxu1 %v4813_v23  ;;  %4607 = vmatpush.msrb.mxu0 %v13493_v1  ;;  %v4831_v1 = vand.u32 4294901760, %v4830_v20  ;;  %v4837_v26 = vand.u32 4294901760, %v4836_v61  ;;  %v5036_v23 = vld [vmem:[%s17807_s7 + $0xf0] sm:$0xff]  ;;  %v5030_v61 = vld [vmem:[%s17807_s7 + $0xc0] sm:$0xff] }
 0x3ef   : > { %4760 = vmatpush.msrb.mxu3 %v13499_v59  ;;  %4727 = vmatmul.f32.vlgmr.msrb.gmra.mxu2 %v12087_v50  ;;  %v4842_v59 = vsub.f32 %v13716_v47, %v4841_v54 }
 0x3f0   : > { %4820 = vmatpush.msra.mxu1 %v4819_v30  ;;  %4872 = vmatpush.msra.mxu2 %v13641_v48  ;;  %v5009_v48 = vld [vmem:[%s17807_s7 + $0x18] sm:$0xff] }
 0x3f1   : > { %4610 = vmatpush.msrb.mxu0 %v13510_v9  ;;  %4762 = vmatpush.msrb.mxu3 %v13515_v15  ;;  %v4848_v9 = vsub.f32 %v13730_v14, %v4847_v16  ;;  %v13772_v15 = vand.u32 4294901760, %v5048_v55  ;;  %v4843_v63 = vand.u32 4294901760, %v4842_v59 }
 0x3f2   : > { %4764 = vmatmul.f32.vlgmr.msrb.gmra.mxu3 %v12087_v50  ;;  %4826 = vmatpush.msra.mxu1 %v4825_v32  ;;  %v3547_v50 = vadd.f32 %v3546_v29, %v3506_v22  ;;  %v3740_v34 = vpop.f32.mrf.mxu3  ;;  %v13826_v32 = vand.u32 4294901760, %v5036_v23  ;;  %v18115_v29 = vld [vmem:[#allocation10_spill] sm:$0xff]  ;;  %v13848_v22 = vand.u32 4294901760, %v5030_v61 }
 0x3f3   : > { %4875 = vmatpush.msra.mxu2 %v13654_v5  ;;  %4909 = vmatpush.msra.mxu3 %v13620_v31  ;;  %v4849_v43 = vand.u32 4294901760, %v4848_v9  ;;  %v13795_v45 = vsub.f32 %v5048_v55, %v13772_v15  ;;  %v13841_v55 = vsub.f32 %v5039_v60, %v13814_v3  ;;  %v5027_v9 = vld [vmem:[%s17807_s7 + $0xa8] sm:$0xff]  ;;  %v5006_v5 = vld [vmem:[%s17807_s7] sm:$0xff] }
 0x3f4   : > { %4613 = vmatpush.msrb.mxu0 %v13526_v51  ;;  %4832 = vmatpush.msra.mxu1 %v4831_v1  ;;  %v13790_v51 = vand.u32 4294901760, %v5045_v53  ;;  %v3648_v13 = vadd.f32 %v3647_v35, %v3547_v50  ;;  %v13857_v50 = vsub.f32 %v5036_v23, %v13826_v32  ;;  %v13873_v35 = vand.u32 4294901760, %v5027_v9  ;;  %v18117_v23 = vld [vmem:[#allocation12_spill] sm:$0xff] }
 0x3f5   : > { %4878 = vmatpush.msra.mxu2 %v13665_v19  ;;  %4911 = vmatpush.msra.mxu3 %v13630_v36  ;;  %v5157_v20 = vand.u32 4294901760, %v13795_v45  ;;  %v17888_v60 = vand.u32 4294901760, %v13841_v55 }
 0x3f6   : > { %4616 = vmatpush.msrb.mxu0 %v13537_v24  ;;  %4838 = vmatpush.msra.mxu1 %v4837_v26  ;;  %v3701_v24 = vpop.f32.mrf.mxu2  ;;  %v13812_v6 = vsub.f32 %v5045_v53, %v13790_v51  ;;  %v17890_v53 = vand.u32 4294901760, %v13824_v18 }
 0x3f7   : > { %4619 = vmatmul.f32.vlgmr.msrb.gmra.mxu0 %v18114_v2  ;;  %4881 = vmatpush.msra.mxu2 %v13679_v7  ;;  %v3702_v30 = vadd.f32 %v3701_v24, %v3648_v13  ;;  %v5158_v26 = vsub.f32 %v13795_v45, %v5157_v20  ;;  %v13862_v2 = vsub.f32 %v5033_v39, %v13835_v8 }
 0x3f8   : > { %4777 = vmatpush.msra.mxu0 %v13620_v31  ;;  %4913 = vmatpush.msra.mxu3 %v13643_v4  ;;  %v5163_v41 = vand.u32 4294901760, %v13812_v6  ;;  %v3809_v1 = vpop.f32.mrf.mxu0  ;;  %v13878_v13 = vsub.f32 %v5030_v61, %v13848_v22  ;;  %v5170_v39 = vsub.f32 %v13824_v18, %v17890_v53 }
 0x3f9   : > { %4844 = vmatpush.msra.mxu1 %v4843_v63  ;;  %4884 = vmatpush.msra.mxu2 %v13696_v40  ;;  %v3741_v59 = vadd.f32 %v3740_v34, %v3702_v30  ;;  %v18116_v63 = vld [vmem:[#allocation11_spill] sm:$0xff]  ;;  %v5159_v24 = vand.u32 4294901760, %v5158_v26  ;;  %v17889_v30 = vand.u32 4294901760, %v13857_v50  ;;  %v17891_v49 = vand.u32 4294901760, %v13862_v2 }
 0x3fa   : > { %4779 = vmatpush.msra.mxu0 %v13630_v36  ;;  %4915 = vmatpush.msra.mxu3 %v13656_v62  ;;  %v13902_v26 = vsub.f32 %v5027_v9, %v13873_v35 }
 0x3fb   : > { %4850 = vmatpush.msra.mxu1 %v4849_v43  ;;  %4887 = vmatpush.msra.mxu2 %v13716_v47  ;;  %v3810_v17 = vadd.f32 %v3809_v1, %v3741_v59  ;;  %v5164_v43 = vsub.f32 %v13812_v6, %v5163_v41  ;;  %v5018_v1 = vld [vmem:[%s17807_s7 + $0x60] sm:$0xff]  ;;  %v5176_v59 = vsub.f32 %v13841_v55, %v17888_v60 }
 0x3fc   : > { %4781 = vmatpush.msra.mxu0 %v13643_v4  ;;  %4917 = vmatpush.msra.mxu3 %v13667_v58  ;;  %v5182_v9 = vsub.f32 %v13857_v50, %v17889_v30  ;;  %v5199_v30 = vand.u32 4294901760, %v13902_v26 }
 0x3fd   : > { %4856 = vmatpush.msra.mxu1 %v4855_v27  ;;  %4890 = vmatpush.msra.mxu2 %v13730_v14  ;;  %v3846_v27 = vpop.f32.mrf.mxu1 }
 0x3fe   : > { %4783 = vmatpush.msra.mxu0 %v13656_v62  ;;  %4919 = vmatpush.msra.mxu3 %v13687_v44  ;;  %v3847_v61 = vadd.f32 %v3846_v27, %v3810_v17  ;;  %v5015_v17 = vld [vmem:[%s17807_s7 + $0x48] sm:$0xff] }
 0x3ff   : > { %4858 = vmatmul.f32.vlgmr.msra.gmra.mxu1 %v18115_v29  ;;  %4893 = vmatpush.msra.mxu2 %v13742_v33  ;;  %v13935_v53 = vand.u32 4294901760, %v5015_v17 }
 0x400   : > { %4985 = vmatpush.msrb.mxu1 %v13620_v31  ;;  %4785 = vmatpush.msra.mxu0 %v13667_v58  ;;  %v5024_v31 = vld [vmem:[%s17807_s7 + $0x90] sm:$0xff] }
 0x401   : > { %4921 = vmatpush.msra.mxu3 %v13704_v57  ;;  %4896 = vmatmul.f32.vlgmr.msra.gmra.mxu2 %v18116_v63  ;;  %v13889_v34 = vand.u32 4294901760, %v5024_v31 }
 0x402   : > { %4987 = vmatpush.msrb.mxu1 %v13630_v36  ;;  %5109 = vmatpush.msrb.mxu2 %v13764_v37  ;;  %v5021_v36 = vld [vmem:[%s17807_s7 + $0x78] sm:$0xff] }
 0x403   : > { %4787 = vmatpush.msra.mxu0 %v13687_v44  ;;  %4923 = vmatpush.msra.mxu3 %v13718_v52  ;;  %v13904_v63 = vand.u32 4294901760, %v5021_v36  ;;  %v13917_v27 = vsub.f32 %v5024_v31, %v13889_v34  ;;  %v5177_v31 = vand.u32 4294901760, %v5176_v59 }
 0x404   : > { %4927 = vmatmul.f32.vlgmr.msra.gmra.mxu3 %v18117_v23  ;;  %4989 = vmatpush.msrb.mxu1 %v13643_v4  ;;  %v5165_v4 = vand.u32 4294901760, %v5164_v43  ;;  %v5171_v43 = vand.u32 4294901760, %v5170_v39  ;;  %v18118_v23 = vld [vmem:[#allocation13_spill] sm:$0xff] }
 0x405   : > { %5111 = vmatpush.msrb.mxu2 %v13772_v15  ;;  %5154 = vmatpush.msrb.mxu3 %v5153_v0  ;;  %v17892_v0 = vand.u32 4294901760, %v13878_v13  ;;  %v5012_v39 = vld [vmem:[%s17807_s7 + $0x30] sm:$0xff]  ;;  %v4009_v7 = vpop.f32.mrf.mxu1 }
 0x406   : > { %4789 = vmatpush.msra.mxu0 %v13704_v57  ;;  %4991 = vmatpush.msrb.mxu1 %v13656_v62  ;;  %v3879_v62 = vpop.f32.mrf.mxu2 }
 0x407   : > { %5113 = vmatpush.msrb.mxu2 %v13790_v51  ;;  %5160 = vmatpush.msrb.mxu3 %v5159_v24  ;;  %v13919_v24 = vand.u32 4294901760, %v5018_v1  ;;  %v3880_v60 = vadd.f32 %v3879_v62, %v3847_v61  ;;  %v5194_v61 = vsub.f32 %v13878_v13, %v17892_v0  ;;  %v13951_v62 = vand.u32 4294901760, %v5012_v39 }
 0x408   : > { %4791 = vmatpush.msra.mxu0 %v13718_v52  ;;  %4993 = vmatpush.msrb.mxu1 %v13667_v58  ;;  %v5188_v58 = vsub.f32 %v13862_v2, %v17891_v49 }
 0x409   : > { %4797 = vmatmul.f32.vlgmr.msra.gmra.mxu0 %v18118_v23  ;;  %5115 = vmatpush.msrb.mxu2 %v13802_v46  ;;  %v13933_v23 = vsub.f32 %v5021_v36, %v13904_v63  ;;  %v5183_v36 = vand.u32 4294901760, %v5182_v9 }
 0x40a   : > { %4942 = vmatpush.msrb.mxu0 %v4811_v11  ;;  %5166 = vmatpush.msrb.mxu3 %v5165_v4  ;;  %v3940_v11 = vpop.f32.mrf.mxu3  ;;  %v5205_v4 = vand.u32 4294901760, %v13917_v27  ;;  %v3978_v59 = vpop.f32.mrf.mxu0  ;;  %v5189_v0 = vand.u32 4294901760, %v5188_v58  ;;  %v13980_v58 = vand.u32 4294901760, %v5006_v5 }
 0x40b   : > { %4995 = vmatpush.msrb.mxu1 %v13687_v44  ;;  %5117 = vmatpush.msrb.mxu2 %v13814_v3  ;;  %v13949_v44 = vsub.f32 %v5018_v1, %v13919_v24  ;;  %v3941_v49 = vadd.f32 %v3940_v11, %v3880_v60  ;;  %v5211_v1 = vand.u32 4294901760, %v13933_v23  ;;  %v13965_v60 = vsub.f32 %v5015_v17, %v13935_v53 }
 0x40c   : > { %4946 = vmatpush.msrb.mxu0 %v4817_v42  ;;  %5172 = vmatpush.msrb.mxu3 %v5171_v43  ;;  %v5200_v42 = vsub.f32 %v13902_v26, %v5199_v30  ;;  %v5195_v43 = vand.u32 4294901760, %v5194_v61  ;;  %v5206_v19 = vsub.f32 %v13917_v27, %v5205_v4  ;;  %v13978_v17 = vsub.f32 %v5012_v39, %v13951_v62 }
 0x40d   : > { %4997 = vmatpush.msrb.mxu1 %v13704_v57  ;;  %5119 = vmatpush.msrb.mxu2 %v13826_v32  ;;  %v13967_v57 = vand.u32 4294901760, %v5009_v48  ;;  %v3979_v9 = vadd.f32 %v3978_v59, %v3941_v49  ;;  %v5223_v49 = vand.u32 4294901760, %v13965_v60  ;;  %v14002_v61 = vsub.f32 %v5006_v5, %v13980_v58 }
 0x40e   : > { %4950 = vmatpush.msrb.mxu0 %v4823_v12  ;;  %5178 = vmatpush.msrb.mxu3 %v5177_v31  ;;  %v5217_v12 = vand.u32 4294901760, %v13949_v44  ;;  %v5207_v40 = vand.u32 4294901760, %v5206_v19 }
 0x40f   : > { %4999 = vmatpush.msrb.mxu1 %v13718_v52  ;;  %5121 = vmatpush.msrb.mxu2 %v13835_v8  ;;  %v5212_v52 = vsub.f32 %v13933_v23, %v5211_v1  ;;  %v13991_v39 = vsub.f32 %v5009_v48, %v13967_v57  ;;  %v4010_v31 = vadd.f32 %v4009_v7, %v3979_v9  ;;  %v5241_v59 = vand.u32 4294901760, %v14002_v61  ;;  %v5104_v7 = vld.sshfl [vmem:[#allocation1] sm:$0xff pattern:$0x75316420] }
 0x410   : > { %4954 = vmatpush.msrb.mxu0 %v4829_v28  ;;  %5184 = vmatpush.msrb.mxu3 %v5183_v36  ;;  %v5201_v28 = vand.u32 4294901760, %v5200_v42  ;;  %v5224_v48 = vsub.f32 %v13965_v60, %v5223_v49 }
 0x411   : > { %5001 = vmatmul.f32.vlgmr.msrb.gmra.mxu1 %v18115_v29  ;;  %5123 = vmatpush.msrb.mxu2 %v13848_v22  ;;  %v5213_v47 = vand.u32 4294901760, %v5212_v52  ;;  %v5235_v11 = vand.u32 4294901760, %v13991_v39 }
 0x412   : > { %4958 = vmatpush.msrb.mxu0 %v4835_v25  ;;  %5190 = vmatpush.msrb.mxu3 %v5189_v0  ;;  %v5218_v25 = vsub.f32 %v13949_v44, %v5217_v12  ;;  %v5229_v0 = vand.u32 4294901760, %v13978_v17  ;;  %v4083_v5 = vpop.f32.mrf.mxu3  ;;  %v5225_v42 = vand.u32 4294901760, %v5224_v48 }
 0x413   : > { %5125 = vmatpush.msrb.mxu2 %v13873_v35  ;;  %5305 = vmatpush.msra.mxu1 %v13764_v37  ;;  %v5236_v33 = vsub.f32 %v13991_v39, %v5235_v11 }
 0x414   : > { %4962 = vmatpush.msrb.mxu0 %v4841_v54  ;;  %5196 = vmatpush.msrb.mxu3 %v5195_v43  ;;  %v4054_v54 = vpop.f32.mrf.mxu2  ;;  %v5219_v14 = vand.u32 4294901760, %v5218_v25  ;;  %v5242_v43 = vsub.f32 %v14002_v61, %v5241_v59 }
 0x415   : > { %5127 = vmatpush.msrb.mxu2 %v13889_v34  ;;  %5307 = vmatpush.msra.mxu1 %v13772_v15  ;;  %v4055_v36 = vadd.f32 %v4054_v54, %v4010_v31  ;;  %v5237_v9 = vand.u32 4294901760, %v5236_v33  ;;  %v14123_v54 = vand.u32 4294901760, %v5104_v7 }
 0x416   : > { %4966 = vmatpush.msrb.mxu0 %v4847_v16  ;;  %5202 = vmatpush.msrb.mxu3 %v5201_v28  ;;  %v5230_v16 = vsub.f32 %v13978_v17, %v5229_v0  ;;  %v5243_v19 = vand.u32 4294901760, %v5242_v43  ;;  %v18125_v28 = vand.u32 4294901760, %v13857_v50 }
 0x417   : > { %5129 = vmatpush.msrb.mxu2 %v13904_v63  ;;  %5309 = vmatpush.msra.mxu1 %v13790_v51 }
 0x418   : > { %4970 = vmatpush.msrb.mxu0 %v4853_v10  ;;  %5208 = vmatpush.msrb.mxu3 %v5207_v40  ;;  %v14027_v10 = vadd.f32 %v4083_v5, %v4055_v36  ;;  %v18126_v40 = vand.u32 4294901760, %v13862_v2  ;;  %v14152_v5 = vsub.f32 %v5104_v7, %v14123_v54 }
 0x419   : > { %4972 = vmatmul.f32.vlgmr.msrb.gmra.mxu0 %v18115_v29  ;;  %5131 = vmatpush.msrb.mxu2 %v13919_v24  ;;  %v5231_v29 = vand.u32 4294901760, %v5230_v16 }
 0x41a   : > { %5252 = vmatpush.msra.mxu0 %v13784_v21  ;;  %5214 = vmatpush.msrb.mxu3 %v5213_v47  ;;  %18119 = vst [vmem:[#allocation15_spill] sm:$0xff] %v14027_v10  ;;  %v5099_v21 = vld [vmem:[%s17807_s7 + $0x2e8] sm:$0xff] }
 0x41b   : > { %5133 = vmatpush.msrb.mxu2 %v13935_v53  ;;  %5311 = vmatpush.msra.mxu1 %v13802_v46 }
 0x41c   : > { %5255 = vmatpush.msra.mxu0 %v13795_v45  ;;  %5220 = vmatpush.msrb.mxu3 %v5219_v14  ;;  %v5096_v45 = vld [vmem:[%s17807_s7 + $0x2d0] sm:$0xff]  ;;  %v5081_v14 = vld [vmem:[%s17807_s7 + $0x258] sm:$0xff] }
 0x41d   : > { %5135 = vmatpush.msrb.mxu2 %v13951_v62  ;;  %5313 = vmatpush.msra.mxu1 %v13814_v3 }
 0x41e   : > { %5258 = vmatpush.msra.mxu0 %v13812_v6  ;;  %5226 = vmatpush.msrb.mxu3 %v5225_v42  ;;  %v5093_v6 = vld [vmem:[%s17807_s7 + $0x2b8] sm:$0xff]  ;;  %v5078_v42 = vld [vmem:[%s17807_s7 + $0x240] sm:$0xff] }
 0x41f   : > { %5137 = vmatpush.msrb.mxu2 %v13967_v57  ;;  %7329 = vrot.lane.b32.xlu0 %v14027_v10, %s17895_s29  ;;  %v14180_v43 = vand.u32 4294901760, %v5078_v42  ;;  %s18169_s29 = smov 109  }
 0x420   : > { %5261 = vmatpush.msra.mxu0 %v13824_v18  ;;  %5232 = vmatpush.msrb.mxu3 %v5231_v29  ;;  %v5075_v29 = vld [vmem:[%s17807_s7 + $0x228] sm:$0xff] }
 0x421   : > { %5139 = vmatpush.msrb.mxu2 %v13980_v58  ;;  %7238 = vrot.lane.b32.xlu1 %v14027_v10, %s17893_s19  ;;  %s18172_s19 = smov 126  }
 0x422   : > { %5264 = vmatpush.msra.mxu0 %v13841_v55  ;;  %5238 = vmatpush.msrb.mxu3 %v5237_v9 }
 0x423   : > { %5346 = vmatpush.msra.mxu2 %v5151_v38  ;;  %7283 = vrot.lane.b32.xlu2 %v14027_v10, %s18120_s28  ;;  %v14069_v38 = vand.u32 4294901760, %v5099_v21 }
 0x424   : > { %5267 = vmatpush.msra.mxu0 %v13857_v50  ;;  %5244 = vmatpush.msrb.mxu3 %v5243_v19 }
 0x425   : > { %5315 = vmatpush.msra.mxu1 %v13826_v32  ;;  %5350 = vmatpush.msra.mxu2 %v5157_v20  ;;  %v14080_v20 = vrot.slane %v14027_v10, 4 }
 0x426   : > { %5270 = vmatpush.msra.mxu0 %v13862_v2  ;;  %5413 = vmatpush.msra.mxu3 %v13764_v37  ;;  %v18121_v37 = vand.u32 4294901760, %v13824_v18  ;;  %v14082_v18 = vand.u32 4294901760, %v5096_v45  ;;  %v18127_v2 = vand.u32 4294901760, %v13878_v13 }
 0x427   : > { %5317 = vmatpush.msra.mxu1 %v13835_v8  ;;  %5354 = vmatpush.msra.mxu2 %v5163_v41  ;;  %18123 = vst [vmem:[#allocation16_spill] sm:$0xff] %v14080_v20  ;;  %v14094_v41 = vsub.f32 %v5099_v21, %v14069_v38  ;;  %v14188_v21 = vand.u32 4294901760, %v14152_v5 }
 0x428   : > { %5273 = vmatpush.msra.mxu0 %v13878_v13  ;;  %5415 = vmatpush.msra.mxu3 %v13772_v15  ;;  %v18122_v15 = vand.u32 4294901760, %v13841_v55  ;;  %v14096_v55 = vand.u32 4294901760, %v5093_v6  ;;  %v14108_v52 = vsub.f32 %v5096_v45, %v14082_v18  ;;  %v14200_v45 = vand.u32 4294901760, %v5075_v29 }
 0x429   : > { %5319 = vmatpush.msra.mxu1 %v13848_v22  ;;  %5358 = vmatpush.msra.mxu2 %v18121_v37  ;;  %v5492_v25 = vand.u32 4294901760, %v14094_v41 }
 0x42a   : > { %5276 = vmatpush.msra.mxu0 %v13902_v26  ;;  %5417 = vmatpush.msra.mxu3 %v13790_v51  ;;  %v5090_v51 = vld [vmem:[%s17807_s7 + $0x2a0] sm:$0xff]  ;;  %v14119_v47 = vsub.f32 %v5093_v6, %v14096_v55  ;;  %v5498_v48 = vand.u32 4294901760, %v14108_v52  ;;  %v14233_v7 = vsub.f32 %v5075_v29, %v14200_v45 }
 0x42b   : > { %5321 = vmatpush.msra.mxu1 %v13873_v35  ;;  %5362 = vmatpush.msra.mxu2 %v18122_v15  ;;  %v14110_v31 = vand.u32 4294901760, %v5090_v51  ;;  %v5493_v13 = vsub.f32 %v14094_v41, %v5492_v25 }
 0x42c   : > { %5279 = vmatpush.msra.mxu0 %v13917_v27  ;;  %5419 = vmatpush.msra.mxu3 %v13802_v46  ;;  %v5087_v46 = vld [vmem:[%s17807_s7 + $0x288] sm:$0xff]  ;;  %v5504_v16 = vand.u32 4294901760, %v14119_v47  ;;  %v5499_v26 = vsub.f32 %v14108_v52, %v5498_v48 }
 0x42d   : > { %7193 = vrot.lane.b32.xlu0 %v14027_v10, %s17929_s26  ;;  %7215 = vrot.lane.b32.xlu1 %v14080_v20, %s10445_s20  ;;  %v14121_v50 = vand.u32 4294901760, %v5087_v46  ;;  %v14135_v36 = vsub.f32 %v5090_v51, %v14110_v31  ;;  %v5494_v9 = vand.u32 4294901760, %v5493_v13 }
 0x42e   : > { %7261 = vrot.lane.b32.xlu2 %v14080_v20, %s18124_s15  ;;  %5282 = vmatpush.msra.mxu0 %v13933_v23  ;;  %v5505_v19 = vsub.f32 %v14119_v47, %v5504_v16  ;;  %v5500_v37 = vand.u32 4294901760, %v5499_v26  ;;  %v5069_v23 = vld [vmem:[%s17807_s7 + $0x1f8] sm:$0xff]  ;;  %v5060_v26 = vld [vmem:[%s17807_s7 + $0x1b0] sm:$0xff] }
 0x42f   : > { %5323 = vmatpush.msra.mxu1 %v13889_v34  ;;  %5366 = vmatpush.msra.mxu2 %v18125_v28  ;;  %v5510_v33 = vand.u32 4294901760, %v14135_v36  ;;  %v14235_v28 = vand.u32 4294901760, %v5069_v23 }
 0x430   : > { %5421 = vmatpush.msra.mxu3 %v13814_v3  ;;  %5285 = vmatpush.msra.mxu0 %v13949_v44  ;;  %v5084_v3 = vld [vmem:[%s17807_s7 + $0x270] sm:$0xff]  ;;  %v5506_v51 = vand.u32 4294901760, %v5505_v19 }
 0x431   : > { %5325 = vmatpush.msra.mxu1 %v13904_v63  ;;  %5370 = vmatpush.msra.mxu2 %v18126_v40  ;;  %v5511_v6 = vsub.f32 %v14135_v36, %v5510_v33  ;;  %v14264_v13 = vsub.f32 %v5069_v23, %v14235_v28 }
 0x432   : > { %5423 = vmatpush.msra.mxu3 %v13826_v32  ;;  %5288 = vmatpush.msra.mxu0 %v13965_v60  ;;  %v14142_v32 = vand.u32 4294901760, %v5084_v3 }
 0x433   : > { %5327 = vmatpush.msra.mxu1 %v13919_v24  ;;  %5374 = vmatpush.msra.mxu2 %v18127_v2  ;;  %v5512_v40 = vand.u32 4294901760, %v5511_v6  ;;  %v17902_v19 = vand.u32 4294901760, %v14264_v13 }
 0x434   : > { %5425 = vmatpush.msra.mxu3 %v13835_v8  ;;  %5291 = vmatpush.msra.mxu0 %v13978_v17  ;;  %v14155_v8 = vsub.f32 %v5087_v46, %v14121_v50  ;;  %v5143_v46 = vsub.f32 %v14152_v5, %v14188_v21 }
 0x435   : > { %5329 = vmatpush.msra.mxu1 %v13935_v53  ;;  %5378 = vmatpush.msra.mxu2 %v5199_v30  ;;  %v14163_v30 = vand.u32 4294901760, %v5081_v14 }
 0x436   : > { %5427 = vmatpush.msra.mxu3 %v13848_v22  ;;  %7306 = vrot.lane.b32.xlu0 %v14080_v20, %s10446_s16  ;;  %v14178_v22 = vsub.f32 %v5084_v3, %v14142_v32  ;;  %v5516_v27 = vand.u32 4294901760, %v14155_v8  ;;  %v5063_v3 = vld [vmem:[%s17807_s7 + $0x1c8] sm:$0xff] }
 0x437   : > { %5294 = vmatpush.msra.mxu0 %v13991_v39  ;;  %5331 = vmatpush.msra.mxu1 %v13951_v62 }
 0x438   : > { %5382 = vmatpush.msra.mxu2 %v5205_v4  ;;  %5429 = vmatpush.msra.mxu3 %v13873_v35  ;;  %v5072_v35 = vld [vmem:[%s17807_s7 + $0x210] sm:$0xff]  ;;  %v14198_v4 = vsub.f32 %v5081_v14, %v14163_v30  ;;  %v5517_v44 = vsub.f32 %v14155_v8, %v5516_v27  ;;  %v14254_v14 = vand.u32 4294901760, %v5143_v46 }
 0x439   : > { %5297 = vmatpush.msra.mxu0 %v14002_v61  ;;  %5333 = vmatpush.msra.mxu1 %v13967_v57  ;;  %v14217_v15 = vand.u32 4294901760, %v5072_v35 }
 0x43a   : > { %5386 = vmatpush.msra.mxu2 %v5211_v1  ;;  %5431 = vmatpush.msra.mxu3 %v13889_v34  ;;  %v5522_v34 = vand.u32 4294901760, %v14178_v22  ;;  %v14215_v1 = vsub.f32 %v5078_v42, %v14180_v43  ;;  %v5518_v17 = vand.u32 4294901760, %v5517_v44  ;;  %v14266_v42 = vand.u32 4294901760, %v5063_v3 }
 0x43b   : > { %5450 = vmatpush.msrb.mxu0 %v14069_v38  ;;  %5335 = vmatpush.msra.mxu1 %v13980_v58 }
 0x43c   : > { %5390 = vmatpush.msra.mxu2 %v5217_v12  ;;  %5433 = vmatpush.msra.mxu3 %v13904_v63  ;;  %v5066_v63 = vld [vmem:[%s17807_s7 + $0x1e0] sm:$0xff]  ;;  %v17906_v12 = vand.u32 4294901760, %v14198_v4  ;;  %v17905_v60 = vand.u32 4294901760, %v14215_v1 }
 0x43d   : > { %5452 = vmatpush.msrb.mxu0 %v14082_v18  ;;  %5495 = vmatpush.msrb.mxu1 %v5494_v9  ;;  %v14251_v2 = vand.u32 4294901760, %v5066_v63  ;;  %v14284_v9 = vand.u32 4294901760, %v5060_v26 }
 0x43e   : > { %5394 = vmatpush.msra.mxu2 %v5223_v49  ;;  %5435 = vmatpush.msra.mxu3 %v13919_v24  ;;  %v5523_v24 = vsub.f32 %v14178_v22, %v5522_v34  ;;  %v14249_v49 = vsub.f32 %v5072_v35, %v14217_v15  ;;  %v5535_v39 = vsub.f32 %v14215_v1, %v17905_v60 }
 0x43f   : > { %5454 = vmatpush.msrb.mxu0 %v14096_v55  ;;  %5501 = vmatpush.msrb.mxu1 %v5500_v37  ;;  %v14280_v29 = vsub.f32 %v5066_v63, %v14251_v2  ;;  %v14295_v35 = vsub.f32 %v5063_v3, %v14266_v42  ;;  %v5054_v37 = vld [vmem:[%s17807_s7 + $0x180] sm:$0xff]  ;;  %v5553_v63 = vsub.f32 %v14264_v13, %v17902_v19 }
 0x440   : > { %5398 = vmatpush.msra.mxu2 %v5229_v0  ;;  %5437 = vmatpush.msra.mxu3 %v13935_v53  ;;  %v5529_v53 = vsub.f32 %v14198_v4, %v17906_v12  ;;  %v17904_v0 = vand.u32 4294901760, %v14233_v7  ;;  %v5536_v6 = vand.u32 4294901760, %v5535_v39  ;;  %v14319_v3 = vand.u32 4294901760, %v5054_v37 }
 0x441   : > { %5456 = vmatpush.msrb.mxu0 %v14110_v31  ;;  %5507 = vmatpush.msrb.mxu1 %v5506_v51  ;;  %v17901_v51 = vand.u32 4294901760, %v14280_v29  ;;  %v5554_v39 = vand.u32 4294901760, %v5553_v63 }
 0x442   : > { %5402 = vmatpush.msra.mxu2 %v5235_v11  ;;  %5439 = vmatpush.msra.mxu3 %v13951_v62  ;;  %v5524_v62 = vand.u32 4294901760, %v5523_v24  ;;  %v17903_v11 = vand.u32 4294901760, %v14249_v49  ;;  %v5530_v61 = vand.u32 4294901760, %v5529_v53 }
 0x443   : > { %5458 = vmatpush.msrb.mxu0 %v14121_v50  ;;  %5513 = vmatpush.msrb.mxu1 %v5512_v40  ;;  %v17900_v40 = vand.u32 4294901760, %v14295_v35 }
 0x444   : > { %5406 = vmatpush.msra.mxu2 %v5241_v59  ;;  %5441 = vmatpush.msra.mxu3 %v13967_v57  ;;  %v5057_v57 = vld [vmem:[%s17807_s7 + $0x198] sm:$0xff]  ;;  %v5541_v59 = vsub.f32 %v14233_v7, %v17904_v0  ;;  %v5547_v23 = vsub.f32 %v14249_v49, %v17903_v11 }
 0x445   : > { %5145 = vmatmul.f32.vlgmr.msrb.gmra.mxu2 %v14254_v14  ;;  %5460 = vmatpush.msrb.mxu0 %v14142_v32  ;;  %v14307_v46 = vand.u32 4294901760, %v5057_v57 }
 0x446   : > { %5519 = vmatpush.msrb.mxu1 %v5518_v17  ;;  %5593 = vmatpush.msrb.mxu2 %v14094_v41  ;;  %v5542_v44 = vand.u32 4294901760, %v5541_v59  ;;  %v5548_v24 = vand.u32 4294901760, %v5547_v23  ;;  %v5559_v17 = vsub.f32 %v14280_v29, %v17901_v51  ;;  %v14338_v59 = vsub.f32 %v5054_v37, %v14319_v3  ;;  %v4225_v51 = vpop.f32.mrf.mxu1 }
 0x447   : > { %5443 = vmatpush.msra.mxu3 %v13980_v58  ;;  %5462 = vmatpush.msrb.mxu0 %v14163_v30  ;;  %v14312_v58 = vsub.f32 %v5060_v26, %v14284_v9  ;;  %v14328_v53 = vsub.f32 %v5057_v57, %v14307_v46 }
 0x448   : > { %5246 = vmatmul.f32.vlgmr.msrb.gmra.mxu3 %v14123_v54  ;;  %5525 = vmatpush.msrb.mxu1 %v5524_v62  ;;  %v5105_v62 = vld.sshfl [vmem:[#allocation1 + $0x8] sm:$0xff pattern:$0x75316420]  ;;  %v5560_v57 = vand.u32 4294901760, %v5559_v17  ;;  %v17898_v63 = vand.u32 4294901760, %v14338_v59 }
 0x449   : > { %5596 = vmatpush.msrb.mxu2 %v14108_v52  ;;  %5646 = vmatpush.msrb.mxu3 %v14069_v38  ;;  %v17899_v26 = vand.u32 4294901760, %v14312_v58  ;;  %v14344_v23 = vand.u32 4294901760, %v5105_v62 }
 0x44a   : > { %5464 = vmatpush.msrb.mxu0 %v14180_v43  ;;  %5531 = vmatpush.msrb.mxu1 %v5530_v61  ;;  %v5565_v61 = vsub.f32 %v14295_v35, %v17900_v40 }
 0x44b   : > { %5599 = vmatpush.msrb.mxu2 %v14119_v47  ;;  %5648 = vmatpush.msrb.mxu3 %v14082_v18  ;;  %v5571_v37 = vsub.f32 %v14312_v58, %v17899_v26  ;;  %v14360_v17 = vsub.f32 %v5105_v62, %v14344_v23  ;;  %v5049_v62 = vld [vmem:[%s17807_s7 + $0x158] sm:$0xff] }
 0x44c   : > { %5466 = vmatpush.msrb.mxu0 %v14200_v45  ;;  %5537 = vmatpush.msrb.mxu1 %v5536_v6  ;;  %v17897_v6 = vand.u32 4294901760, %v14328_v53  ;;  %v14386_v40 = vand.u32 4294901760, %v5049_v62 }
 0x44d   : > { %5602 = vmatpush.msrb.mxu2 %v14135_v36  ;;  %5650 = vmatpush.msrb.mxu3 %v14096_v55  ;;  %v5025_v36 = vld [vmem:[%s17807_s7 + $0x98] sm:$0xff] }
 0x44e   : > { %5468 = vmatpush.msrb.mxu0 %v14217_v15  ;;  %5543 = vmatpush.msrb.mxu1 %v5542_v44  ;;  %v5566_v44 = vand.u32 4294901760, %v5565_v61  ;;  %v5052_v61 = vld [vmem:[%s17807_s7 + $0x170] sm:$0xff]  ;;  %v14511_v10 = vand.u32 4294901760, %v5025_v36 }
 0x44f   : > { %5605 = vmatpush.msrb.mxu2 %v14155_v8  ;;  %5652 = vmatpush.msrb.mxu3 %v14110_v31 }
 0x450   : > { %5470 = vmatpush.msrb.mxu0 %v14235_v28  ;;  %5549 = vmatpush.msrb.mxu1 %v5548_v24  ;;  %v5577_v24 = vsub.f32 %v14328_v53, %v17897_v6  ;;  %v14379_v6 = vand.u32 4294901760, %v14360_v17  ;;  %v14540_v20 = vsub.f32 %v5025_v36, %v14511_v10 }
 0x451   : > { %5608 = vmatpush.msrb.mxu2 %v14178_v22  ;;  %5654 = vmatpush.msrb.mxu3 %v14121_v50 }
 0x452   : > { %5472 = vmatpush.msrb.mxu0 %v14251_v2  ;;  %5555 = vmatpush.msrb.mxu1 %v5554_v39  ;;  %v5572_v39 = vand.u32 4294901760, %v5571_v37  ;;  %v5578_v37 = vand.u32 4294901760, %v5577_v24  ;;  %v5046_v24 = vld [vmem:[%s17807_s7 + $0x140] sm:$0xff] }
 0x453   : > { %5611 = vmatpush.msrb.mxu2 %v14198_v4  ;;  %5656 = vmatpush.msrb.mxu3 %v14142_v32  ;;  %v14404_v0 = vand.u32 4294901760, %v5046_v24 }
 0x454   : > { %5474 = vmatpush.msrb.mxu0 %v14266_v42  ;;  %5561 = vmatpush.msrb.mxu1 %v5560_v57  ;;  %v5583_v57 = vsub.f32 %v14338_v59, %v17898_v63  ;;  %v4124_v63 = vpop.f32.mrf.mxu0 }
 0x455   : > { %5614 = vmatpush.msrb.mxu2 %v14215_v1  ;;  %5658 = vmatpush.msrb.mxu3 %v14163_v30  ;;  %v4226_v11 = vadd.f32 %v4225_v51, %v4124_v63  ;;  %v4279_v51 = vpop.f32.mrf.mxu2 }
 0x456   : > { %5476 = vmatpush.msrb.mxu0 %v14284_v9  ;;  %5567 = vmatpush.msrb.mxu1 %v5566_v44  ;;  %v14381_v44 = vand.u32 4294901760, %v5052_v61  ;;  %v5584_v26 = vand.u32 4294901760, %v5583_v57  ;;  %v5484_v57 = vsub.f32 %v14360_v17, %v14379_v6 }
 0x457   : > { %5617 = vmatpush.msrb.mxu2 %v14233_v7  ;;  %5660 = vmatpush.msrb.mxu3 %v14180_v43  ;;  %v4280_v63 = vadd.f32 %v4279_v51, %v4226_v11  ;;  %v5034_v11 = vld [vmem:[%s17807_s7 + $0xe0] sm:$0xff] }
 0x458   : > { %5408 = vmatmul.f32.vlgmr.msra.gmra.mxu2 %v14123_v54  ;;  %5478 = vmatpush.msrb.mxu0 %v14307_v46  ;;  %v14400_v19 = vsub.f32 %v5052_v61, %v14381_v44  ;;  %v5040_v61 = vld [vmem:[%s17807_s7 + $0x110] sm:$0xff]  ;;  %v14421_v41 = vand.u32 4294901760, %v5484_v57  ;;  %v4318_v57 = vpop.f32.mrf.mxu3 }
 0x459   : > { %5573 = vmatpush.msrb.mxu1 %v5572_v39  ;;  %5620 = vmatpush.msrb.mxu2 %v14249_v49  ;;  %v5043_v39 = vld [vmem:[%s17807_s7 + $0x128] sm:$0xff]  ;;  %v14432_v52 = vand.u32 4294901760, %v5040_v61 }
 0x45a   : > { %5662 = vmatpush.msrb.mxu3 %v14200_v45  ;;  %5300 = vmatmul.f32.vlgmr.msra.gmra.mxu0 %v14152_v5  ;;  %v14411_v60 = vand.u32 4294901760, %v5043_v39 }
 0x45b   : > { %5445 = vmatmul.f32.vlgmr.msra.gmra.mxu3 %v14123_v54  ;;  %5480 = vmatpush.msrb.mxu0 %v14319_v3  ;;  %v14461_v12 = vsub.f32 %v5040_v61, %v14432_v52 }
 0x45c   : > { %5579 = vmatpush.msrb.mxu1 %v5578_v37  ;;  %5623 = vmatpush.msrb.mxu2 %v14264_v13  ;;  %v14409_v37 = vsub.f32 %v5049_v62, %v14386_v40  ;;  %v14430_v62 = vsub.f32 %v5046_v24, %v14404_v0  ;;  %v4387_v47 = vpop.f32.mrf.mxu0 }
 0x45d   : > { %5664 = vmatpush.msrb.mxu3 %v14217_v15  ;;  %5339 = vmatmul.f32.vlgmr.msra.gmra.mxu1 %v14188_v21 }
 0x45e   : > { %5687 = vmatpush.msra.mxu0 %v5492_v25  ;;  %5585 = vmatpush.msrb.mxu1 %v5584_v26  ;;  %v17907_v25 = vand.u32 4294901760, %v14400_v19  ;;  %v5037_v26 = vld [vmem:[%s17807_s7 + $0xf8] sm:$0xff]  ;;  %v17909_v51 = vand.u32 4294901760, %v14430_v62 }
 0x45f   : > { %5626 = vmatpush.msrb.mxu2 %v14280_v29  ;;  %5666 = vmatpush.msrb.mxu3 %v14235_v28  ;;  %v14446_v24 = vand.u32 4294901760, %v5037_v26 }
 0x460   : > { %5691 = vmatpush.msra.mxu0 %v5498_v48  ;;  %5754 = vmatpush.msra.mxu1 %v14069_v38  ;;  %v17908_v38 = vand.u32 4294901760, %v14409_v37  ;;  %v14439_v48 = vsub.f32 %v5043_v39, %v14411_v60  ;;  %v4319_v39 = vadd.f32 %v4318_v57, %v4280_v63 }
 0x461   : > { %5629 = vmatpush.msrb.mxu2 %v14295_v35  ;;  %5668 = vmatpush.msrb.mxu3 %v14251_v2  ;;  %v14478_v61 = vsub.f32 %v5037_v26, %v14446_v24 }
 0x462   : > { %5695 = vmatpush.msra.mxu0 %v5504_v16  ;;  %5756 = vmatpush.msra.mxu1 %v14082_v18  ;;  %v5834_v18 = vsub.f32 %v14400_v19, %v17907_v25  ;;  %v5031_v16 = vld [vmem:[%s17807_s7 + $0xc8] sm:$0xff]  ;;  %v5840_v63 = vsub.f32 %v14409_v37, %v17908_v38  ;;  %v4388_v57 = vadd.f32 %v4387_v47, %v4319_v39  ;;  %v4424_v47 = vpop.f32.mrf.mxu1  ;;  %v18128_v22 = vand.u32 4294901760, %v14439_v48 }
 0x463   : > { %5632 = vmatpush.msrb.mxu2 %v14312_v58  ;;  %5670 = vmatpush.msrb.mxu3 %v14266_v42  ;;  %v14480_v25 = vand.u32 4294901760, %v5031_v16 }
 0x464   : > { %5486 = vmatmul.f32.vlgmr.msrb.gmra.mxu0 %v14421_v41  ;;  %5758 = vmatpush.msra.mxu1 %v14096_v55  ;;  %v14463_v55 = vand.u32 4294901760, %v5034_v11  ;;  %v5835_v38 = vand.u32 4294901760, %v5834_v18  ;;  %v5841_v18 = vand.u32 4294901760, %v5840_v63  ;;  %v4425_v39 = vadd.f32 %v4424_v47, %v4388_v57  ;;  %v5019_v47 = vld [vmem:[%s17807_s7 + $0x68] sm:$0xff] }
 0x465   : > { %5699 = vmatpush.msra.mxu0 %v5510_v33  ;;  %5635 = vmatpush.msrb.mxu2 %v14328_v53  ;;  %v5028_v33 = vld [vmem:[%s17807_s7 + $0xb0] sm:$0xff]  ;;  %v14509_v8 = vsub.f32 %v5031_v16, %v14480_v25 }
 0x466   : > { %5672 = vmatpush.msrb.mxu3 %v14284_v9  ;;  %5587 = vmatmul.f32.vlgmr.msrb.gmra.mxu1 %v14344_v23  ;;  %v14497_v26 = vand.u32 4294901760, %v5028_v33 }
 0x467   : > { %5703 = vmatpush.msra.mxu0 %v5516_v27  ;;  %5760 = vmatpush.msra.mxu1 %v14110_v31  ;;  %v5846_v31 = vsub.f32 %v14430_v62, %v17909_v51  ;;  %v14495_v27 = vsub.f32 %v5034_v11, %v14463_v55  ;;  %v18129_v51 = vand.u32 4294901760, %v14198_v4  ;;  %v17914_v16 = vand.u32 4294901760, %v14509_v8 }
 0x468   : > { %5638 = vmatpush.msrb.mxu2 %v14338_v59  ;;  %5674 = vmatpush.msrb.mxu3 %v14307_v46  ;;  %v14524_v57 = vsub.f32 %v5028_v33, %v14497_v26  ;;  %v18132_v33 = vand.u32 4294901760, %v14478_v61 }
 0x469   : > { %5641 = vmatmul.f32.vlgmr.msrb.gmra.mxu2 %v14360_v17  ;;  %5707 = vmatpush.msra.mxu0 %v5522_v34  ;;  %v5852_v34 = vsub.f32 %v14439_v48, %v18128_v22  ;;  %v5847_v4 = vand.u32 4294901760, %v5846_v31  ;;  %v4465_v22 = vpop.f32.mrf.mxu2 }
 0x46a   : > { %5762 = vmatpush.msra.mxu1 %v14121_v50  ;;  %5791 = vmatpush.msra.mxu2 %v14381_v44  ;;  %v5022_v50 = vld [vmem:[%s17807_s7 + $0x80] sm:$0xff]  ;;  %v4466_v11 = vadd.f32 %v4465_v22, %v4425_v39  ;;  %v18134_v39 = vand.u32 4294901760, %v14495_v27  ;;  %v5887_v22 = vand.u32 4294901760, %v14540_v20 }
 0x46b   : > { %5676 = vmatpush.msrb.mxu3 %v14319_v3  ;;  %5711 = vmatpush.msra.mxu0 %v18129_v51  ;;  %v18130_v51 = vand.u32 4294901760, %v14461_v12  ;;  %v14532_v31 = vand.u32 4294901760, %v5022_v50 }
 0x46c   : > { %5680 = vmatmul.f32.vlgmr.msrb.gmra.mxu3 %v14379_v6  ;;  %5764 = vmatpush.msra.mxu1 %v14142_v32  ;;  %v18131_v32 = vand.u32 4294901760, %v14215_v1  ;;  %v18133_v1 = vand.u32 4294901760, %v14233_v7  ;;  %v5870_v36 = vsub.f32 %v14495_v27, %v18134_v39  ;;  %v4566_v7 = vpop.f32.mrf.mxu3  ;;  %v5876_v39 = vsub.f32 %v14509_v8, %v17914_v16 }
 0x46d   : > { %5793 = vmatpush.msra.mxu2 %v14386_v40  ;;  %5836 = vmatpush.msra.mxu3 %v5835_v38  ;;  %v5858_v63 = vsub.f32 %v14461_v12, %v18130_v51  ;;  %v5853_v38 = vand.u32 4294901760, %v5852_v34  ;;  %v5864_v51 = vsub.f32 %v14478_v61, %v18132_v33  ;;  %v14548_v34 = vand.u32 4294901760, %v5019_v47 }
 0x46e   : > { %5715 = vmatpush.msra.mxu0 %v18131_v32  ;;  %5766 = vmatpush.msra.mxu1 %v14163_v30  ;;  %v5016_v30 = vld [vmem:[%s17807_s7 + $0x50] sm:$0xff]  ;;  %v5013_v32 = vld [vmem:[%s17807_s7 + $0x38] sm:$0xff]  ;;  %v18135_v33 = vand.u32 4294901760, %v14249_v49  ;;  %v18136_v49 = vand.u32 4294901760, %v14264_v13  ;;  %v5007_v13 = vld [vmem:[%s17807_s7 + $0x8] sm:$0xff] }
 0x46f   : > { %5795 = vmatpush.msra.mxu2 %v14404_v0  ;;  %5842 = vmatpush.msra.mxu3 %v5841_v18  ;;  %v5859_v18 = vand.u32 4294901760, %v5858_v63  ;;  %v4567_v63 = vadd.f32 %v4566_v7, %v4466_v11  ;;  %v18137_v7 = vand.u32 4294901760, %v14524_v57 }
 0x470   : > { %5719 = vmatpush.msra.mxu0 %v18133_v1  ;;  %5768 = vmatpush.msra.mxu1 %v14180_v43  ;;  %v14562_v43 = vsub.f32 %v5022_v50, %v14532_v31  ;;  %v5865_v1 = vand.u32 4294901760, %v5864_v51  ;;  %v14578_v50 = vsub.f32 %v5019_v47, %v14548_v34  ;;  %v5871_v51 = vand.u32 4294901760, %v5870_v36  ;;  %v4659_v47 = vpop.f32.mrf.mxu1 }
 0x471   : > { %5797 = vmatpush.msra.mxu2 %v14411_v60  ;;  %5848 = vmatpush.msra.mxu3 %v5847_v4  ;;  %v14564_v4 = vand.u32 4294901760, %v5016_v30 }
 0x472   : > { %5723 = vmatpush.msra.mxu0 %v18135_v33  ;;  %5770 = vmatpush.msra.mxu1 %v14200_v45  ;;  %v5010_v45 = vld [vmem:[%s17807_s7 + $0x20] sm:$0xff]  ;;  %v5882_v33 = vsub.f32 %v14524_v57, %v18137_v7  ;;  %v18139_v7 = vand.u32 4294901760, %v14295_v35 }
 0x473   : > { %5799 = vmatpush.msra.mxu2 %v14432_v52  ;;  %5854 = vmatpush.msra.mxu3 %v5853_v38  ;;  %v14580_v38 = vand.u32 4294901760, %v5013_v32  ;;  %v14596_v36 = vand.u32 4294901760, %v5010_v45 }
 0x474   : > { %5727 = vmatpush.msra.mxu0 %v18136_v49  ;;  %5772 = vmatpush.msra.mxu1 %v14217_v15  ;;  %v4620_v11 = vpop.f32.mrf.mxu0  ;;  %v18138_v15 = vand.u32 4294901760, %v14280_v29  ;;  %v14609_v49 = vand.u32 4294901760, %v5007_v13 }
 0x475   : > { %5801 = vmatpush.msra.mxu2 %v14446_v24  ;;  %5860 = vmatpush.msra.mxu3 %v5859_v18  ;;  %v4621_v16 = vadd.f32 %v4620_v11, %v4567_v63  ;;  %v14594_v18 = vsub.f32 %v5016_v30, %v14564_v4  ;;  %v5877_v63 = vand.u32 4294901760, %v5876_v39  ;;  %v5888_v11 = vsub.f32 %v14540_v20, %v5887_v22 }
 0x476   : > { %5731 = vmatpush.msra.mxu0 %v18138_v15  ;;  %5774 = vmatpush.msra.mxu1 %v14235_v28  ;;  %v4728_v28 = vpop.f32.mrf.mxu2  ;;  %v5899_v30 = vand.u32 4294901760, %v14578_v50  ;;  %v14607_v15 = vsub.f32 %v5013_v32, %v14580_v38 }
 0x477   : > { %5803 = vmatpush.msra.mxu2 %v14463_v55  ;;  %5866 = vmatpush.msra.mxu3 %v5865_v1  ;;  %v4660_v29 = vadd.f32 %v4659_v47, %v4621_v16  ;;  %v5883_v1 = vand.u32 4294901760, %v5882_v33  ;;  %v18140_v16 = vand.u32 4294901760, %v14312_v58  ;;  %v4765_v47 = vpop.f32.mrf.mxu3  ;;  %v5905_v32 = vand.u32 4294901760, %v14594_v18 }
 0x478   : > { %5735 = vmatpush.msra.mxu0 %v18139_v7  ;;  %5776 = vmatpush.msra.mxu1 %v14251_v2  ;;  %v18141_v2 = vand.u32 4294901760, %v14562_v43  ;;  %v14620_v7 = vsub.f32 %v5010_v45, %v14596_v36  ;;  %v18142_v58 = vand.u32 4294901760, %v14328_v53  ;;  %v18143_v45 = vand.u32 4294901760, %v14338_v59 }
 0x479   : > { %5805 = vmatpush.msra.mxu2 %v14480_v25  ;;  %5872 = vmatpush.msra.mxu3 %v5871_v51  ;;  %v4729_v39 = vadd.f32 %v4728_v28, %v4660_v29  ;;  %v5889_v51 = vand.u32 4294901760, %v5888_v11  ;;  %v5911_v29 = vand.u32 4294901760, %v14607_v15  ;;  %v14631_v28 = vsub.f32 %v5007_v13, %v14609_v49 }
 0x47a   : > { %5739 = vmatpush.msra.mxu0 %v18140_v16  ;;  %5778 = vmatpush.msra.mxu1 %v14266_v42  ;;  %v5894_v35 = vsub.f32 %v14562_v43, %v18141_v2  ;;  %v5900_v42 = vsub.f32 %v14578_v50, %v5899_v30 }
 0x47b   : > { %5807 = vmatpush.msra.mxu2 %v14497_v26  ;;  %5878 = vmatpush.msra.mxu3 %v5877_v63  ;;  %v4766_v33 = vadd.f32 %v4765_v47, %v4729_v39  ;;  %v5917_v63 = vand.u32 4294901760, %v14620_v7  ;;  %v5912_v59 = vsub.f32 %v14607_v15, %v5911_v29 }
 0x47c   : > { %5743 = vmatpush.msra.mxu0 %v18142_v58  ;;  %5780 = vmatpush.msra.mxu1 %v14284_v9  ;;  %v5895_v53 = vand.u32 4294901760, %v5894_v35  ;;  %v5906_v9 = vsub.f32 %v14594_v18, %v5905_v32  ;;  %v5901_v13 = vand.u32 4294901760, %v5900_v42  ;;  %v4859_v47 = vpop.f32.mrf.mxu1 }
 0x47d   : > { %5809 = vmatpush.msra.mxu2 %v14511_v10  ;;  %5884 = vmatpush.msra.mxu3 %v5883_v1  ;;  %v5918_v1 = vsub.f32 %v14620_v7, %v5917_v63 }
 0x47e   : > { %5747 = vmatpush.msra.mxu0 %v18143_v45  ;;  %5782 = vmatpush.msra.mxu1 %v14307_v46  ;;  %v5923_v46 = vand.u32 4294901760, %v14631_v28  ;;  %v5907_v11 = vand.u32 4294901760, %v5906_v9  ;;  %v5100_v9 = vld [vmem:[%s17807_s7 + $0x2f0] sm:$0xff] }
 0x47f   : > { %5811 = vmatpush.msra.mxu2 %v14532_v31  ;;  %5890 = vmatpush.msra.mxu3 %v5889_v51  ;;  %v5919_v16 = vand.u32 4294901760, %v5918_v1  ;;  %v18146_v1 = vand.u32 4294901760, %v14430_v62 }
 0x480   : > { %5749 = vmatmul.f32.vlgmr.msra.gmra.mxu0 %v14344_v23  ;;  %5784 = vmatpush.msra.mxu1 %v14319_v3  ;;  %v5913_v3 = vand.u32 4294901760, %v5912_v59  ;;  %v5924_v39 = vsub.f32 %v14631_v28, %v5923_v46  ;;  %v18145_v59 = vand.u32 4294901760, %v14409_v37 }
 0x481   : > { %5934 = vmatpush.msrb.mxu0 %v14400_v19  ;;  %5813 = vmatpush.msra.mxu2 %v14548_v34 }
 0x482   : > { %5896 = vmatpush.msra.mxu3 %v5895_v53  ;;  %5786 = vmatmul.f32.vlgmr.msra.gmra.mxu1 %v14344_v23  ;;  %v5925_v51 = vand.u32 4294901760, %v5924_v39 }
 0x483   : > { %5937 = vmatpush.msrb.mxu0 %v14409_v37  ;;  %5987 = vmatpush.msrb.mxu1 %v14381_v44  ;;  %v5094_v37 = vld [vmem:[%s17807_s7 + $0x2c0] sm:$0xff] }
 0x484   : > { %5815 = vmatpush.msra.mxu2 %v14564_v4  ;;  %5902 = vmatpush.msra.mxu3 %v5901_v13  ;;  %v4897_v42 = vpop.f32.mrf.mxu2  ;;  %v14709_v39 = vand.u32 4294901760, %v5094_v37 }
 0x485   : > { %5940 = vmatpush.msrb.mxu0 %v14430_v62  ;;  %5989 = vmatpush.msrb.mxu1 %v14386_v40  ;;  %v5091_v62 = vld [vmem:[%s17807_s7 + $0x2a8] sm:$0xff] }
 0x486   : > { %5817 = vmatpush.msra.mxu2 %v14580_v38  ;;  %5908 = vmatpush.msra.mxu3 %v5907_v11  ;;  %v4798_v2 = vpop.f32.mrf.mxu0  ;;  %v14686_v11 = vand.u32 4294901760, %v5100_v9 }
 0x487   : > { %5943 = vmatpush.msrb.mxu0 %v14439_v48  ;;  %5991 = vmatpush.msrb.mxu1 %v14404_v0  ;;  %v4799_v35 = vadd.f32 %v4798_v2, %v4766_v33  ;;  %v18144_v33 = vand.u32 4294901760, %v14400_v19  ;;  %v4928_v53 = vpop.f32.mrf.mxu3  ;;  %v5097_v19 = vld [vmem:[%s17807_s7 + $0x2d8] sm:$0xff]  ;;  %v14722_v2 = vand.u32 4294901760, %v5091_v62 }
 0x488   : > { %5819 = vmatpush.msra.mxu2 %v14596_v36  ;;  %5914 = vmatpush.msra.mxu3 %v5913_v3  ;;  %v18147_v3 = vand.u32 4294901760, %v14439_v48 }
 0x489   : > { %5946 = vmatpush.msrb.mxu0 %v14461_v12  ;;  %5993 = vmatpush.msrb.mxu1 %v14411_v60  ;;  %v4860_v58 = vadd.f32 %v4859_v47, %v4799_v35  ;;  %v18149_v35 = vand.u32 4294901760, %v14478_v61 }
 0x48a   : > { %5821 = vmatpush.msra.mxu2 %v14609_v49  ;;  %5920 = vmatpush.msra.mxu3 %v5919_v16  ;;  %v18148_v16 = vand.u32 4294901760, %v14461_v12 }
 0x48b   : > { %5949 = vmatpush.msrb.mxu0 %v14478_v61  ;;  %5995 = vmatpush.msrb.mxu1 %v14432_v52  ;;  %v4898_v45 = vadd.f32 %v4897_v42, %v4860_v58  ;;  %v5085_v61 = vld [vmem:[%s17807_s7 + $0x278] sm:$0xff] }
 0x48c   : > { %6028 = vmatpush.msrb.mxu2 %v18144_v33  ;;  %5926 = vmatpush.msra.mxu3 %v5925_v51  ;;  %v14733_v51 = vsub.f32 %v5094_v37, %v14709_v39  ;;  %v5082_v33 = vld [vmem:[%s17807_s7 + $0x260] sm:$0xff]  ;;  %v5076_v37 = vld [vmem:[%s17807_s7 + $0x230] sm:$0xff] }
 0x48d   : > { %5952 = vmatpush.msrb.mxu0 %v14495_v27  ;;  %5997 = vmatpush.msrb.mxu1 %v14446_v24  ;;  %v4929_v13 = vadd.f32 %v4928_v53, %v4898_v45  ;;  %v14747_v45 = vsub.f32 %v5091_v62, %v14722_v2  ;;  %v18151_v53 = vand.u32 4294901760, %v14509_v8 }
 0x48e   : > { %6032 = vmatpush.msrb.mxu2 %v18145_v59  ;;  %6095 = vmatpush.msrb.mxu3 %v14381_v44  ;;  %v14696_v44 = vand.u32 4294901760, %v5097_v19  ;;  %v14772_v59 = vand.u32 4294901760, %v5082_v33 }
 0x48f   : > { %5955 = vmatpush.msrb.mxu0 %v14509_v8  ;;  %5999 = vmatpush.msrb.mxu1 %v14463_v55  ;;  %v5079_v8 = vld [vmem:[%s17807_s7 + $0x248] sm:$0xff] }
 0x490   : > { %6036 = vmatpush.msrb.mxu2 %v18146_v1  ;;  %6097 = vmatpush.msrb.mxu3 %v14386_v40  ;;  %v14707_v40 = vsub.f32 %v5100_v9, %v14686_v11  ;;  %v14720_v48 = vsub.f32 %v5097_v19, %v14696_v44  ;;  %v6186_v9 = vand.u32 4294901760, %v14733_v51  ;;  %v6192_v1 = vand.u32 4294901760, %v14747_v45 }
 0x491   : > { %5958 = vmatpush.msrb.mxu0 %v14524_v57  ;;  %6001 = vmatpush.msrb.mxu1 %v14480_v25 }
 0x492   : > { %6040 = vmatpush.msrb.mxu2 %v18147_v3  ;;  %6099 = vmatpush.msrb.mxu3 %v14404_v0  ;;  %v5088_v0 = vld [vmem:[%s17807_s7 + $0x290] sm:$0xff]  ;;  %v6174_v47 = vand.u32 4294901760, %v14707_v40  ;;  %v6180_v42 = vand.u32 4294901760, %v14720_v48  ;;  %v6187_v62 = vsub.f32 %v14733_v51, %v6186_v9 }
 0x493   : > { %5961 = vmatpush.msrb.mxu0 %v14540_v20  ;;  %6003 = vmatpush.msrb.mxu1 %v14497_v26  ;;  %v14735_v58 = vand.u32 4294901760, %v5088_v0  ;;  %v5073_v20 = vld [vmem:[%s17807_s7 + $0x218] sm:$0xff] }
 0x494   : > { %6044 = vmatpush.msrb.mxu2 %v18148_v16  ;;  %6101 = vmatpush.msrb.mxu3 %v14411_v60  ;;  %v6181_v19 = vsub.f32 %v14720_v48, %v6180_v42 }
 0x495   : > { %5964 = vmatpush.msrb.mxu0 %v14562_v43  ;;  %6005 = vmatpush.msrb.mxu1 %v14511_v10 }
 0x496   : > { %6048 = vmatpush.msrb.mxu2 %v18149_v35  ;;  %6103 = vmatpush.msrb.mxu3 %v14432_v52  ;;  %v4973_v12 = vpop.f32.mrf.mxu0  ;;  %v18150_v52 = vand.u32 4294901760, %v14495_v27  ;;  %v14755_v27 = vand.u32 4294901760, %v5085_v61  ;;  %v6182_v35 = vand.u32 4294901760, %v6181_v19 }
 0x497   : > { %5967 = vmatpush.msrb.mxu0 %v14578_v50  ;;  %6007 = vmatpush.msrb.mxu1 %v14532_v31  ;;  %v14729_v60 = vadd.f32 %v4973_v12, %v4929_v13  ;;  %v14764_v13 = vsub.f32 %v5088_v0, %v14735_v58  ;;  %v14806_v0 = vand.u32 4294901760, %v5076_v37  ;;  %v6193_v12 = vsub.f32 %v14747_v45, %v6192_v1  ;;  %v5067_v50 = vld [vmem:[%s17807_s7 + $0x1e8] sm:$0xff] }
 0x498   : > { %6052 = vmatpush.msrb.mxu2 %v18150_v52  ;;  %6105 = vmatpush.msrb.mxu3 %v14446_v24  ;;  %v6175_v24 = vsub.f32 %v14707_v40, %v6174_v47  ;;  %v14823_v52 = vand.u32 4294901760, %v5073_v20  ;;  %v14855_v19 = vand.u32 4294901760, %v5067_v50 }
 0x499   : > { %5970 = vmatpush.msrb.mxu0 %v14594_v18  ;;  %6009 = vmatpush.msrb.mxu1 %v14548_v34  ;;  %v6198_v16 = vand.u32 4294901760, %v14764_v13 }
 0x49a   : > { %6056 = vmatpush.msrb.mxu2 %v18151_v53  ;;  %6107 = vmatpush.msrb.mxu3 %v14463_v55  ;;  %v18152_v55 = vand.u32 4294901760, %v14524_v57  ;;  %v14789_v57 = vand.u32 4294901760, %v5079_v8  ;;  %v6176_v3 = vand.u32 4294901760, %v6175_v24 }
 0x49b   : > { %5973 = vmatpush.msrb.mxu0 %v14607_v15  ;;  %6011 = vmatpush.msrb.mxu1 %v14564_v4  ;;  %v6199_v53 = vsub.f32 %v14764_v13, %v6198_v16 }
 0x49c   : > { %6060 = vmatpush.msrb.mxu2 %v18152_v55  ;;  %6109 = vmatpush.msrb.mxu3 %v14480_v25  ;;  %v14787_v25 = vsub.f32 %v5085_v61, %v14755_v27  ;;  %v14821_v61 = vsub.f32 %v5079_v8, %v14789_v57  ;;  %v6194_v8 = vand.u32 4294901760, %v6193_v12  ;;  %v5064_v55 = vld [vmem:[%s17807_s7 + $0x1d0] sm:$0xff] }
 0x49d   : > { %5976 = vmatpush.msrb.mxu0 %v14620_v7  ;;  %6013 = vmatpush.msrb.mxu1 %v14580_v38 }
 0x49e   : > { %6064 = vmatpush.msrb.mxu2 %v5887_v22  ;;  %6111 = vmatpush.msrb.mxu3 %v14497_v26  ;;  %v18153_v26 = vand.u32 4294901760, %v14562_v43  ;;  %v14804_v22 = vsub.f32 %v5082_v33, %v14772_v59  ;;  %v5070_v43 = vld [vmem:[%s17807_s7 + $0x200] sm:$0xff]  ;;  %v6188_v33 = vand.u32 4294901760, %v6187_v62  ;;  %v6216_v18 = vand.u32 4294901760, %v14821_v61  ;;  %v5061_v62 = vld [vmem:[%s17807_s7 + $0x1b8] sm:$0xff] }
 0x49f   : > { %5979 = vmatpush.msrb.mxu0 %v14631_v28  ;;  %6015 = vmatpush.msrb.mxu1 %v14596_v36  ;;  %v14839_v24 = vand.u32 4294901760, %v5070_v43 }
 0x4a0   : > { %6068 = vmatpush.msrb.mxu2 %v18153_v26  ;;  %6113 = vmatpush.msrb.mxu3 %v14511_v10  ;;  %v6204_v10 = vand.u32 4294901760, %v14787_v25  ;;  %v6217_v7 = vsub.f32 %v14821_v61, %v6216_v18  ;;  %v14886_v26 = vand.u32 4294901760, %v5061_v62 }
 0x4a1   : > { %6132 = vmatpush.msra.mxu0 %v14686_v11  ;;  %6017 = vmatpush.msrb.mxu1 %v14609_v49 }
 0x4a2   : > { %6072 = vmatpush.msrb.mxu2 %v5899_v30  ;;  %6115 = vmatpush.msrb.mxu3 %v14532_v31  ;;  %v6210_v31 = vand.u32 4294901760, %v14804_v22  ;;  %v14837_v30 = vsub.f32 %v5076_v37, %v14806_v0  ;;  %v6200_v37 = vand.u32 4294901760, %v6199_v53 }
 0x4a3   : > { %6134 = vmatpush.msra.mxu0 %v14696_v44  ;;  %6177 = vmatpush.msra.mxu1 %v6176_v3  ;;  %v14868_v3 = vand.u32 4294901760, %v5064_v55 }
 0x4a4   : > { %6076 = vmatpush.msrb.mxu2 %v5905_v32  ;;  %6117 = vmatpush.msrb.mxu3 %v14548_v34  ;;  %v6205_v34 = vsub.f32 %v14787_v25, %v6204_v10  ;;  %v14853_v32 = vsub.f32 %v5073_v20, %v14823_v52  ;;  %v6222_v15 = vand.u32 4294901760, %v14837_v30  ;;  %v14882_v20 = vsub.f32 %v5067_v50, %v14855_v19 }
 0x4a5   : > { %6136 = vmatpush.msra.mxu0 %v14709_v39  ;;  %6183 = vmatpush.msra.mxu1 %v6182_v35  ;;  %v14897_v12 = vsub.f32 %v5064_v55, %v14868_v3 }
 0x4a6   : > { %6080 = vmatpush.msrb.mxu2 %v5911_v29  ;;  %6119 = vmatpush.msrb.mxu3 %v14564_v4  ;;  %v6211_v4 = vsub.f32 %v14804_v22, %v6210_v31  ;;  %v14866_v29 = vsub.f32 %v5070_v43, %v14839_v24  ;;  %v5055_v43 = vld [vmem:[%s17807_s7 + $0x188] sm:$0xff]  ;;  %v17915_v50 = vand.u32 4294901760, %v14882_v20 }
 0x4a7   : > { %6138 = vmatpush.msra.mxu0 %v14722_v2  ;;  %6189 = vmatpush.msra.mxu1 %v6188_v33  ;;  %v6218_v33 = vand.u32 4294901760, %v6217_v7 }
 0x4a8   : > { %6084 = vmatpush.msrb.mxu2 %v5917_v63  ;;  %6121 = vmatpush.msrb.mxu3 %v14580_v38  ;;  %v6206_v38 = vand.u32 4294901760, %v6205_v34  ;;  %v17923_v63 = vand.u32 4294901760, %v14853_v32  ;;  %v6212_v28 = vand.u32 4294901760, %v6211_v4  ;;  %v17920_v35 = vand.u32 4294901760, %v14866_v29 }
 0x4a9   : > { %6140 = vmatpush.msra.mxu0 %v14735_v58  ;;  %6195 = vmatpush.msra.mxu1 %v6194_v8  ;;  %v14921_v4 = vand.u32 4294901760, %v5055_v43 }
 0x4aa   : > { %6088 = vmatpush.msrb.mxu2 %v5923_v46  ;;  %6123 = vmatpush.msrb.mxu3 %v14596_v36  ;;  %v5058_v36 = vld [vmem:[%s17807_s7 + $0x1a0] sm:$0xff]  ;;  %v6223_v46 = vsub.f32 %v14837_v30, %v6222_v15  ;;  %v6229_v53 = vsub.f32 %v14853_v32, %v17923_v63  ;;  %v6235_v34 = vsub.f32 %v14866_v29, %v17920_v35 }
 0x4ab   : > { %5827 = vmatmul.f32.vlgmr.msra.gmra.mxu2 %v14254_v14  ;;  %6142 = vmatpush.msra.mxu0 %v14755_v27  ;;  %v14909_v8 = vand.u32 4294901760, %v5058_v36  ;;  %v5026_v63 = vld [vmem:[%s17807_s7 + $0xa0] sm:$0xff] }
 0x4ac   : > { %6201 = vmatpush.msra.mxu1 %v6200_v37  ;;  %6275 = vmatpush.msra.mxu2 %v14707_v40  ;;  %v6224_v55 = vand.u32 4294901760, %v6223_v46  ;;  %v17919_v37 = vand.u32 4294901760, %v14897_v12  ;;  %v6236_v46 = vand.u32 4294901760, %v6235_v34 }
 0x4ad   : > { %6125 = vmatpush.msrb.mxu3 %v14609_v49  ;;  %6144 = vmatpush.msra.mxu0 %v14772_v59  ;;  %v14914_v49 = vsub.f32 %v5061_v62, %v14886_v26  ;;  %v6230_v62 = vand.u32 4294901760, %v6229_v53  ;;  %v14930_v7 = vsub.f32 %v5058_v36, %v14909_v8  ;;  %v14940_v53 = vsub.f32 %v5055_v43, %v14921_v4 }
 0x4ae   : > { %5928 = vmatmul.f32.vlgmr.msra.gmra.mxu3 %v14123_v54  ;;  %6207 = vmatpush.msra.mxu1 %v6206_v38  ;;  %v6241_v38 = vsub.f32 %v14882_v20, %v17915_v50 }
 0x4af   : > { %6278 = vmatpush.msra.mxu2 %v14720_v48  ;;  %6328 = vmatpush.msra.mxu3 %v14686_v11  ;;  %v17916_v50 = vand.u32 4294901760, %v14930_v7  ;;  %v17917_v34 = vand.u32 4294901760, %v14940_v53  ;;  %v5035_v48 = vld [vmem:[%s17807_s7 + $0xe8] sm:$0xff] }
 0x4b0   : > { %6146 = vmatpush.msra.mxu0 %v14789_v57  ;;  %6213 = vmatpush.msra.mxu1 %v6212_v28  ;;  %v17918_v28 = vand.u32 4294901760, %v14914_v49  ;;  %v6242_v36 = vand.u32 4294901760, %v6241_v38  ;;  %v15053_v35 = vand.u32 4294901760, %v5035_v48 }
 0x4b1   : > { %6281 = vmatpush.msra.mxu2 %v14733_v51  ;;  %6330 = vmatpush.msra.mxu3 %v14696_v44  ;;  %v5032_v51 = vld [vmem:[%s17807_s7 + $0xd0] sm:$0xff] }
 0x4b2   : > { %6148 = vmatpush.msra.mxu0 %v14806_v0  ;;  %6219 = vmatpush.msra.mxu1 %v6218_v33  ;;  %v6247_v33 = vsub.f32 %v14897_v12, %v17919_v37 }
 0x4b3   : > { %6284 = vmatpush.msra.mxu2 %v14747_v45  ;;  %6332 = vmatpush.msra.mxu3 %v14709_v39  ;;  %v5029_v45 = vld [vmem:[%s17807_s7 + $0xb8] sm:$0xff] }
 0x4b4   : > { %6150 = vmatpush.msra.mxu0 %v14823_v52  ;;  %6225 = vmatpush.msra.mxu1 %v6224_v55  ;;  %v6253_v55 = vsub.f32 %v14914_v49, %v17918_v28  ;;  %v6248_v43 = vand.u32 4294901760, %v6247_v33  ;;  %v6265_v33 = vsub.f32 %v14940_v53, %v17917_v34  ;;  %v5047_v28 = vld [vmem:[%s17807_s7 + $0x148] sm:$0xff] }
 0x4b5   : > { %6287 = vmatpush.msra.mxu2 %v14764_v13  ;;  %6334 = vmatpush.msra.mxu3 %v14722_v2 }
 0x4b6   : > { %6152 = vmatpush.msra.mxu0 %v14839_v24  ;;  %6231 = vmatpush.msra.mxu1 %v6230_v62  ;;  %v6259_v62 = vsub.f32 %v14930_v7, %v17916_v50  ;;  %v6254_v38 = vand.u32 4294901760, %v6253_v55 }
 0x4b7   : > { %6290 = vmatpush.msra.mxu2 %v14787_v25  ;;  %6336 = vmatpush.msra.mxu3 %v14735_v58 }
 0x4b8   : > { %6154 = vmatpush.msra.mxu0 %v14855_v19  ;;  %6237 = vmatpush.msra.mxu1 %v6236_v46  ;;  %v5053_v46 = vld [vmem:[%s17807_s7 + $0x178] sm:$0xff]  ;;  %v6260_v55 = vand.u32 4294901760, %v6259_v62 }
 0x4b9   : > { %6293 = vmatpush.msra.mxu2 %v14804_v22  ;;  %6338 = vmatpush.msra.mxu3 %v14755_v27  ;;  %v14975_v50 = vand.u32 4294901760, %v5053_v46 }
 0x4ba   : > { %6156 = vmatpush.msra.mxu0 %v14868_v3  ;;  %6243 = vmatpush.msra.mxu1 %v6242_v36  ;;  %v5050_v36 = vld [vmem:[%s17807_s7 + $0x160] sm:$0xff] }
 0x4bb   : > { %6296 = vmatpush.msra.mxu2 %v14821_v61  ;;  %6340 = vmatpush.msra.mxu3 %v14772_v59  ;;  %v14980_v34 = vand.u32 4294901760, %v5050_v36  ;;  %v14989_v62 = vsub.f32 %v5053_v46, %v14975_v50  ;;  %v5041_v46 = vld [vmem:[%s17807_s7 + $0x118] sm:$0xff] }
 0x4bc   : > { %6158 = vmatpush.msra.mxu0 %v14886_v26  ;;  %6249 = vmatpush.msra.mxu1 %v6248_v43  ;;  %v6266_v43 = vand.u32 4294901760, %v6265_v33  ;;  %v14996_v33 = vand.u32 4294901760, %v5047_v28  ;;  %v5017_v61 = vld [vmem:[%s17807_s7 + $0x58] sm:$0xff] }
 0x4bd   : > { %6299 = vmatpush.msra.mxu2 %v14837_v30  ;;  %6342 = vmatpush.msra.mxu3 %v14789_v57  ;;  %v17921_v40 = vand.u32 4294901760, %v14989_v62  ;;  %v18154_v30 = vand.u32 4294901760, %v14853_v32 }
 0x4be   : > { %6090 = vmatmul.f32.vlgmr.msrb.gmra.mxu2 %v14123_v54  ;;  %6160 = vmatpush.msra.mxu0 %v14909_v8 }
 0x4bf   : > { %6255 = vmatpush.msra.mxu1 %v6254_v38  ;;  %6302 = vmatpush.msra.mxu2 %v14853_v32  ;;  %v5044_v38 = vld [vmem:[%s17807_s7 + $0x130] sm:$0xff]  ;;  %v5011_v32 = vld [vmem:[%s17807_s7 + $0x28] sm:$0xff] }
 0x4c0   : > { %6344 = vmatpush.msra.mxu3 %v14806_v0  ;;  %5982 = vmatmul.f32.vlgmr.msrb.gmra.mxu0 %v14152_v5  ;;  %v15008_v37 = vand.u32 4294901760, %v5044_v38 }
 0x4c1   : > { %6127 = vmatmul.f32.vlgmr.msrb.gmra.mxu3 %v14123_v54  ;;  %6162 = vmatpush.msra.mxu0 %v14921_v4 }
 0x4c2   : > { %6261 = vmatpush.msra.mxu1 %v6260_v55  ;;  %6305 = vmatpush.msra.mxu2 %v14866_v29  ;;  %v15001_v55 = vsub.f32 %v5050_v36, %v14980_v34  ;;  %v15020_v36 = vsub.f32 %v5047_v28, %v14996_v33 }
 0x4c3   : > { %6346 = vmatpush.msra.mxu3 %v14823_v52  ;;  %6021 = vmatmul.f32.vlgmr.msrb.gmra.mxu1 %v14188_v21 }
 0x4c4   : > { %6369 = vmatpush.msrb.mxu0 %v6174_v47  ;;  %6267 = vmatpush.msra.mxu1 %v6266_v43  ;;  %v5038_v47 = vld [vmem:[%s17807_s7 + $0x100] sm:$0xff]  ;;  %v15022_v43 = vand.u32 4294901760, %v5041_v46 }
 0x4c5   : > { %6308 = vmatpush.msra.mxu2 %v14882_v20  ;;  %6348 = vmatpush.msra.mxu3 %v14839_v24  ;;  %v15036_v28 = vand.u32 4294901760, %v5038_v47 }
 0x4c6   : > { %6373 = vmatpush.msrb.mxu0 %v6180_v42  ;;  %6436 = vmatpush.msrb.mxu1 %v14686_v11  ;;  %v17922_v11 = vand.u32 4294901760, %v15001_v55  ;;  %v15034_v42 = vsub.f32 %v5044_v38, %v15008_v37  ;;  %v15051_v38 = vsub.f32 %v5041_v46, %v15022_v43 }
 0x4c7   : > { %6311 = vmatpush.msra.mxu2 %v14897_v12  ;;  %6350 = vmatpush.msra.mxu3 %v14855_v19  ;;  %v15068_v46 = vsub.f32 %v5038_v47, %v15036_v28  ;;  %v15087_v47 = vand.u32 4294901760, %v5029_v45 }
 0x4c8   : > { %6377 = vmatpush.msrb.mxu0 %v6186_v9  ;;  %6438 = vmatpush.msrb.mxu1 %v14696_v44  ;;  %v6516_v44 = vsub.f32 %v14989_v62, %v17921_v40  ;;  %v17924_v9 = vand.u32 4294901760, %v15020_v36  ;;  %v15070_v40 = vand.u32 4294901760, %v5032_v51  ;;  %v17926_v13 = vand.u32 4294901760, %v15051_v38 }
 0x4c9   : > { %6314 = vmatpush.msra.mxu2 %v14914_v49  ;;  %6352 = vmatpush.msra.mxu3 %v14868_v3 }
 0x4ca   : > { %6168 = vmatmul.f32.vlgmr.msra.gmra.mxu0 %v14421_v41  ;;  %6440 = vmatpush.msrb.mxu1 %v14709_v39  ;;  %v6522_v39 = vsub.f32 %v15001_v55, %v17922_v11  ;;  %v6517_v11 = vand.u32 4294901760, %v6516_v44 }
 0x4cb   : > { %6381 = vmatpush.msrb.mxu0 %v6192_v1  ;;  %6317 = vmatpush.msra.mxu2 %v14930_v7  ;;  %v17925_v1 = vand.u32 4294901760, %v15034_v42 }
 0x4cc   : > { %6354 = vmatpush.msra.mxu3 %v14886_v26  ;;  %6269 = vmatmul.f32.vlgmr.msra.gmra.mxu1 %v14344_v23  ;;  %v6523_v44 = vand.u32 4294901760, %v6522_v39  ;;  %v15114_v39 = vsub.f32 %v5029_v45, %v15087_v47 }
 0x4cd   : > { %6385 = vmatpush.msrb.mxu0 %v6198_v16  ;;  %6442 = vmatpush.msrb.mxu1 %v14722_v2  ;;  %v6528_v2 = vsub.f32 %v15020_v36, %v17924_v9  ;;  %v15085_v16 = vsub.f32 %v5035_v48, %v15053_v35  ;;  %v6534_v25 = vsub.f32 %v15034_v42, %v17925_v1  ;;  %v15101_v9 = vand.u32 4294901760, %v5026_v63  ;;  %v5020_v1 = vld [vmem:[%s17807_s7 + $0x70] sm:$0xff] }
 0x4ce   : > { %6320 = vmatpush.msra.mxu2 %v14940_v53  ;;  %6356 = vmatpush.msra.mxu3 %v14909_v8  ;;  %v15099_v48 = vsub.f32 %v5032_v51, %v15070_v40 }
 0x4cf   : > { %6323 = vmatmul.f32.vlgmr.msra.gmra.mxu2 %v14360_v17  ;;  %6389 = vmatpush.msrb.mxu0 %v6204_v10  ;;  %v6545_v10 = vand.u32 4294901760, %v15068_v46  ;;  %v6529_v22 = vand.u32 4294901760, %v6528_v2  ;;  %v17927_v51 = vand.u32 4294901760, %v15085_v16 }
 0x4d0   : > { %6444 = vmatpush.msrb.mxu1 %v14735_v58  ;;  %6473 = vmatpush.msrb.mxu2 %v14975_v50  ;;  %v5023_v58 = vld [vmem:[%s17807_s7 + $0x88] sm:$0xff]  ;;  %v6557_v2 = vand.u32 4294901760, %v15099_v48 }
 0x4d1   : > { %6358 = vmatpush.msra.mxu3 %v14921_v4  ;;  %6393 = vmatpush.msrb.mxu0 %v6210_v31  ;;  %v6540_v31 = vsub.f32 %v15051_v38, %v17926_v13  ;;  %v6546_v45 = vsub.f32 %v15068_v46, %v6545_v10  ;;  %v15130_v13 = vsub.f32 %v5026_v63, %v15101_v9 }
 0x4d2   : > { %6362 = vmatmul.f32.vlgmr.msra.gmra.mxu3 %v14379_v6  ;;  %6446 = vmatpush.msrb.mxu1 %v14755_v27  ;;  %v15122_v27 = vand.u32 4294901760, %v5023_v58  ;;  %v6552_v63 = vsub.f32 %v15085_v16, %v17927_v51 }
 0x4d3   : > { %6475 = vmatpush.msrb.mxu2 %v14980_v34  ;;  %6518 = vmatpush.msrb.mxu3 %v6517_v11  ;;  %v6535_v11 = vand.u32 4294901760, %v6534_v25  ;;  %v5014_v25 = vld [vmem:[%s17807_s7 + $0x40] sm:$0xff]  ;;  %v6569_v51 = vand.u32 4294901760, %v15130_v13 }
 0x4d4   : > { %6397 = vmatpush.msrb.mxu0 %v6216_v18  ;;  %6448 = vmatpush.msrb.mxu1 %v14772_v59  ;;  %v15138_v59 = vand.u32 4294901760, %v5020_v1  ;;  %v6541_v18 = vand.u32 4294901760, %v6540_v31  ;;  %v6558_v31 = vsub.f32 %v15099_v48, %v6557_v2 }
 0x4d5   : > { %6477 = vmatpush.msrb.mxu2 %v14996_v33  ;;  %6524 = vmatpush.msrb.mxu3 %v6523_v44  ;;  %v17928_v44 = vand.u32 4294901760, %v15114_v39 }
 0x4d6   : > { %6401 = vmatpush.msrb.mxu0 %v6222_v15  ;;  %6450 = vmatpush.msrb.mxu1 %v14789_v57  ;;  %v15152_v57 = vsub.f32 %v5023_v58, %v15122_v27  ;;  %v15154_v15 = vand.u32 4294901760, %v5017_v61  ;;  %v15168_v58 = vsub.f32 %v5020_v1, %v15138_v59 }
 0x4d7   : > { %6479 = vmatpush.msrb.mxu2 %v15008_v37  ;;  %6530 = vmatpush.msrb.mxu3 %v6529_v22  ;;  %v6547_v22 = vand.u32 4294901760, %v6546_v45  ;;  %v6553_v45 = vand.u32 4294901760, %v6552_v63  ;;  %v6559_v63 = vand.u32 4294901760, %v6558_v31  ;;  %v18158_v31 = vand.u32 4294901760, %v14914_v49 }
 0x4d8   : > { %6405 = vmatpush.msrb.mxu0 %v18154_v30  ;;  %6452 = vmatpush.msrb.mxu1 %v14806_v0  ;;  %v18155_v0 = vand.u32 4294901760, %v14866_v29  ;;  %v6564_v30 = vsub.f32 %v15114_v39, %v17928_v44  ;;  %v5008_v29 = vld [vmem:[%s17807_s7 + $0x10] sm:$0xff]  ;;  %v15184_v1 = vsub.f32 %v5017_v61, %v15154_v15  ;;  %v6570_v44 = vsub.f32 %v15130_v13, %v6569_v51 }
 0x4d9   : > { %6481 = vmatpush.msrb.mxu2 %v15022_v43  ;;  %6536 = vmatpush.msrb.mxu3 %v6535_v11  ;;  %v15170_v11 = vand.u32 4294901760, %v5014_v25 }
 0x4da   : > { %6409 = vmatpush.msrb.mxu0 %v18155_v0  ;;  %6454 = vmatpush.msrb.mxu1 %v14823_v52  ;;  %v18156_v0 = vand.u32 4294901760, %v14882_v20  ;;  %v6575_v52 = vand.u32 4294901760, %v15152_v57  ;;  %v18157_v20 = vand.u32 4294901760, %v14897_v12  ;;  %v6587_v12 = vand.u32 4294901760, %v15184_v1 }
 0x4db   : > { %6483 = vmatpush.msrb.mxu2 %v15036_v28  ;;  %6542 = vmatpush.msrb.mxu3 %v6541_v18  ;;  %v15186_v18 = vand.u32 4294901760, %v5011_v32  ;;  %v15197_v61 = vsub.f32 %v5014_v25, %v15170_v11 }
 0x4dc   : > { %6413 = vmatpush.msrb.mxu0 %v18156_v0  ;;  %6456 = vmatpush.msrb.mxu1 %v14839_v24  ;;  %v6581_v24 = vand.u32 4294901760, %v15168_v58  ;;  %v15199_v0 = vand.u32 4294901760, %v5008_v29 }
 0x4dd   : > { %6485 = vmatpush.msrb.mxu2 %v15053_v35  ;;  %6548 = vmatpush.msrb.mxu3 %v6547_v22  ;;  %v6565_v22 = vand.u32 4294901760, %v6564_v30  ;;  %v15210_v25 = vsub.f32 %v5011_v32, %v15186_v18  ;;  %v6593_v49 = vand.u32 4294901760, %v15197_v61  ;;  %v15223_v32 = vpop.f32.mrf.mxu1 }
 0x4de   : > { %6417 = vmatpush.msrb.mxu0 %v18157_v20  ;;  %6458 = vmatpush.msrb.mxu1 %v14855_v19  ;;  %v6576_v19 = vsub.f32 %v15152_v57, %v6575_v52  ;;  %v6571_v20 = vand.u32 4294901760, %v6570_v44  ;;  %v15221_v30 = vsub.f32 %v5008_v29, %v15199_v0  ;;  %v6588_v44 = vsub.f32 %v15184_v1, %v6587_v12  ;;  %v5146_v29 = vpop.f32.mrf.mxu2 }
 0x4df   : > { %6487 = vmatpush.msrb.mxu2 %v15070_v40  ;;  %6554 = vmatpush.msrb.mxu3 %v6553_v45  ;;  %v18159_v45 = vand.u32 4294901760, %v14930_v7  ;;  %v18160_v7 = vand.u32 4294901760, %v14940_v53 }
 0x4e0   : > { %6421 = vmatpush.msrb.mxu0 %v18158_v31  ;;  %6460 = vmatpush.msrb.mxu1 %v14868_v3  ;;  %v6582_v3 = vsub.f32 %v15168_v58, %v6581_v24  ;;  %v5247_v31 = vpop.f32.mrf.mxu3 }
 0x4e1   : > { %6489 = vmatpush.msrb.mxu2 %v15087_v47  ;;  %6560 = vmatpush.msrb.mxu3 %v6559_v63  ;;  %v6599_v63 = vand.u32 4294901760, %v15210_v25 }
 0x4e2   : > { %6425 = vmatpush.msrb.mxu0 %v18159_v45  ;;  %6462 = vmatpush.msrb.mxu1 %v14886_v26  ;;  %v6577_v26 = vand.u32 4294901760, %v6576_v19  ;;  %v5248_v45 = vadd.f32 %v5247_v31, %v5146_v29  ;;  %v6583_v53 = vand.u32 4294901760, %v6582_v3  ;;  %v5301_v19 = vpop.f32.mrf.mxu0 }
 0x4e3   : > { %6491 = vmatpush.msrb.mxu2 %v15101_v9  ;;  %6566 = vmatpush.msrb.mxu3 %v6565_v22  ;;  %v6605_v22 = vand.u32 4294901760, %v15221_v30 }
 0x4e4   : > { %6429 = vmatpush.msrb.mxu0 %v18160_v7  ;;  %6464 = vmatpush.msrb.mxu1 %v14909_v8  ;;  %v6594_v8 = vsub.f32 %v15197_v61, %v6593_v49  ;;  %v5302_v3 = vadd.f32 %v5301_v19, %v5248_v45  ;;  %v18161_v19 = vand.u32 4294901760, %v14989_v62 }
 0x4e5   : > { %6493 = vmatpush.msrb.mxu2 %v15122_v27  ;;  %6572 = vmatpush.msrb.mxu3 %v6571_v20  ;;  %v6589_v20 = vand.u32 4294901760, %v6588_v44  ;;  %v6606_v7 = vsub.f32 %v15221_v30, %v6605_v22 }
 0x4e6   : > { %6431 = vmatmul.f32.vlgmr.msrb.gmra.mxu0 %v14344_v23  ;;  %6466 = vmatpush.msrb.mxu1 %v14921_v4  ;;  %v6600_v4 = vsub.f32 %v15210_v25, %v6599_v63  ;;  %v6595_v31 = vand.u32 4294901760, %v6594_v8 }
 0x4e7   : > { %6616 = vmatpush.msra.mxu0 %v14989_v62  ;;  %6495 = vmatpush.msrb.mxu2 %v15138_v59  ;;  %v6607_v45 = vand.u32 4294901760, %v6606_v7  ;;  %v5098_v62 = vld [vmem:[%s17807_s7 + $0x2e0] sm:$0xff] }
 0x4e8   : > { %6578 = vmatpush.msrb.mxu3 %v6577_v26  ;;  %6468 = vmatmul.f32.vlgmr.msrb.gmra.mxu1 %v14344_v23  ;;  %v5340_v26 = vpop.f32.mrf.mxu1  ;;  %v6601_v44 = vand.u32 4294901760, %v6600_v4  ;;  %v5446_v4 = vpop.f32.mrf.mxu3 }
 0x4e9   : > { %6619 = vmatpush.msra.mxu0 %v15001_v55  ;;  %6669 = vmatpush.msra.mxu1 %v14975_v50  ;;  %v5341_v29 = vadd.f32 %v5340_v26, %v5302_v3  ;;  %v18162_v3 = vand.u32 4294901760, %v15001_v55  ;;  %v18163_v26 = vand.u32 4294901760, %v15020_v36 }
 0x4ea   : > { %6497 = vmatpush.msrb.mxu2 %v15154_v15  ;;  %6584 = vmatpush.msrb.mxu3 %v6583_v53  ;;  %v5409_v53 = vpop.f32.mrf.mxu2  ;;  %v5487_v55 = vpop.f32.mrf.mxu0 }
 0x4eb   : > { %6622 = vmatpush.msra.mxu0 %v15020_v36  ;;  %6671 = vmatpush.msra.mxu1 %v14980_v34  ;;  %v5410_v8 = vadd.f32 %v5409_v53, %v5341_v29  ;;  %v18164_v29 = vand.u32 4294901760, %v15034_v42  ;;  %v18165_v53 = vand.u32 4294901760, %v15051_v38 }
 0x4ec   : > { %6499 = vmatpush.msrb.mxu2 %v15170_v11  ;;  %6590 = vmatpush.msrb.mxu3 %v6589_v20  ;;  %v5101_v20 = vld [vmem:[%s17807_s7 + $0x2f8] sm:$0xff] }
 0x4ed   : > { %6625 = vmatpush.msra.mxu0 %v15034_v42  ;;  %6673 = vmatpush.msra.mxu1 %v14996_v33  ;;  %v5447_v7 = vadd.f32 %v5446_v4, %v5410_v8  ;;  %v5092_v42 = vld [vmem:[%s17807_s7 + $0x2b0] sm:$0xff] }
 0x4ee   : > { %6501 = vmatpush.msrb.mxu2 %v15186_v18  ;;  %6596 = vmatpush.msrb.mxu3 %v6595_v31  ;;  %v15278_v31 = vand.u32 4294901760, %v5101_v20 }
 0x4ef   : > { %6628 = vmatpush.msra.mxu0 %v15051_v38  ;;  %6675 = vmatpush.msra.mxu1 %v15008_v37 }
 0x4f0   : > { %6503 = vmatpush.msrb.mxu2 %v15199_v0  ;;  %6602 = vmatpush.msrb.mxu3 %v6601_v44  ;;  %v15288_v44 = vand.u32 4294901760, %v5098_v62 }
 0x4f1   : > { %6631 = vmatpush.msra.mxu0 %v15068_v46  ;;  %6677 = vmatpush.msra.mxu1 %v15022_v43 }
 0x4f2   : > { %6710 = vmatpush.msra.mxu2 %v18161_v19  ;;  %6608 = vmatpush.msrb.mxu3 %v6607_v45  ;;  %v5488_v45 = vadd.f32 %v5487_v55, %v5447_v7  ;;  %v15309_v8 = vsub.f32 %v5098_v62, %v15288_v44  ;;  %v5642_v38 = vpop.f32.mrf.mxu2  ;;  %v5086_v62 = vld [vmem:[%s17807_s7 + $0x280] sm:$0xff] }
 0x4f3   : > { %6634 = vmatpush.msra.mxu0 %v15085_v16  ;;  %6679 = vmatpush.msra.mxu1 %v15036_v28 }
 0x4f4   : > { %6714 = vmatpush.msra.mxu2 %v18162_v3  ;;  %6777 = vmatpush.msra.mxu3 %v14975_v50  ;;  %v5095_v50 = vld [vmem:[%s17807_s7 + $0x2c8] sm:$0xff] }
 0x4f5   : > { %6637 = vmatpush.msra.mxu0 %v15099_v48  ;;  %6681 = vmatpush.msra.mxu1 %v15053_v35  ;;  %v15298_v36 = vand.u32 4294901760, %v5095_v50  ;;  %v5083_v48 = vld [vmem:[%s17807_s7 + $0x268] sm:$0xff] }
 0x4f6   : > { %6718 = vmatpush.msra.mxu2 %v18163_v26  ;;  %6779 = vmatpush.msra.mxu3 %v14980_v34  ;;  %v15296_v34 = vsub.f32 %v5101_v20, %v15278_v31  ;;  %v15320_v20 = vand.u32 4294901760, %v5092_v42 }
 0x4f7   : > { %6640 = vmatpush.msra.mxu0 %v15114_v39  ;;  %6683 = vmatpush.msra.mxu1 %v15070_v40  ;;  %v15323_v4 = vsub.f32 %v5095_v50, %v15298_v36 }
 0x4f8   : > { %6722 = vmatpush.msra.mxu2 %v18164_v29  ;;  %6781 = vmatpush.msra.mxu3 %v14996_v33  ;;  %v5588_v33 = vpop.f32.mrf.mxu1  ;;  %v6856_v19 = vand.u32 4294901760, %v15296_v34  ;;  %v15346_v50 = vsub.f32 %v5092_v42, %v15320_v20 }
 0x4f9   : > { %6643 = vmatpush.msra.mxu0 %v15130_v13  ;;  %6685 = vmatpush.msra.mxu1 %v15087_v47  ;;  %v5589_v46 = vadd.f32 %v5588_v33, %v5488_v45  ;;  %v6868_v26 = vand.u32 4294901760, %v15323_v4 }
 0x4fa   : > { %6726 = vmatpush.msra.mxu2 %v18165_v53  ;;  %6783 = vmatpush.msra.mxu3 %v15008_v37  ;;  %v5089_v37 = vld [vmem:[%s17807_s7 + $0x298] sm:$0xff]  ;;  %v6874_v13 = vand.u32 4294901760, %v15346_v50 }
 0x4fb   : > { %6646 = vmatpush.msra.mxu0 %v15152_v57  ;;  %6687 = vmatpush.msra.mxu1 %v15101_v9  ;;  %v15331_v3 = vand.u32 4294901760, %v5089_v37  ;;  %v5643_v7 = vadd.f32 %v5642_v38, %v5589_v46  ;;  %v6869_v33 = vsub.f32 %v15323_v4, %v6868_v26 }
 0x4fc   : > { %6730 = vmatpush.msra.mxu2 %v6545_v10  ;;  %6785 = vmatpush.msra.mxu3 %v15022_v43  ;;  %v18166_v10 = vand.u32 4294901760, %v15085_v16  ;;  %v6862_v43 = vand.u32 4294901760, %v15309_v8  ;;  %v5681_v16 = vpop.f32.mrf.mxu3 }
 0x4fd   : > { %6649 = vmatpush.msra.mxu0 %v15168_v58  ;;  %6689 = vmatpush.msra.mxu1 %v15122_v27  ;;  %v5750_v55 = vpop.f32.mrf.mxu0  ;;  %v15362_v45 = vsub.f32 %v5089_v37, %v15331_v3  ;;  %v5682_v53 = vadd.f32 %v5681_v16, %v5643_v7  ;;  %v5077_v37 = vld [vmem:[%s17807_s7 + $0x238] sm:$0xff]  ;;  %v6875_v7 = vsub.f32 %v15346_v50, %v6874_v13 }
 0x4fe   : > { %6734 = vmatpush.msra.mxu2 %v18166_v10  ;;  %6787 = vmatpush.msra.mxu3 %v15036_v28  ;;  %v6857_v28 = vsub.f32 %v15296_v34, %v6856_v19  ;;  %v6863_v29 = vsub.f32 %v15309_v8, %v6862_v43  ;;  %v15405_v16 = vand.u32 4294901760, %v5077_v37 }
 0x4ff   : > { %6652 = vmatpush.msra.mxu0 %v15184_v1  ;;  %6691 = vmatpush.msra.mxu1 %v15138_v59  ;;  %v6880_v10 = vand.u32 4294901760, %v15362_v45 }
 0x500   : > { %6738 = vmatpush.msra.mxu2 %v6557_v2  ;;  %6789 = vmatpush.msra.mxu3 %v15053_v35  ;;  %v18167_v35 = vand.u32 4294901760, %v15114_v39  ;;  %v15354_v2 = vand.u32 4294901760, %v5086_v62  ;;  %v5080_v39 = vld [vmem:[%s17807_s7 + $0x250] sm:$0xff]  ;;  %v6858_v42 = vand.u32 4294901760, %v6857_v28  ;;  %v5787_v38 = vpop.f32.mrf.mxu1  ;;  %v6864_v46 = vand.u32 4294901760, %v6863_v29 }
 0x501   : > { %6655 = vmatpush.msra.mxu0 %v15197_v61  ;;  %6693 = vmatpush.msra.mxu1 %v15154_v15  ;;  %v15390_v57 = vand.u32 4294901760, %v5080_v39  ;;  %v6881_v28 = vsub.f32 %v15362_v45, %v6880_v10  ;;  %v5068_v29 = vld [vmem:[%s17807_s7 + $0x1f0] sm:$0xff] }
 0x502   : > { %6742 = vmatpush.msra.mxu2 %v18167_v35  ;;  %6791 = vmatpush.msra.mxu3 %v15070_v40  ;;  %v15367_v40 = vand.u32 4294901760, %v5083_v48  ;;  %v15431_v35 = vsub.f32 %v5077_v37, %v15405_v16  ;;  %v5062_v37 = vld [vmem:[%s17807_s7 + $0x1c0] sm:$0xff] }
 0x503   : > { %6658 = vmatpush.msra.mxu0 %v15210_v25  ;;  %6695 = vmatpush.msra.mxu1 %v15170_v11  ;;  %v6882_v61 = vand.u32 4294901760, %v6881_v28  ;;  %v15461_v25 = vand.u32 4294901760, %v5068_v29 }
 0x504   : > { %6746 = vmatpush.msra.mxu2 %v6569_v51  ;;  %6793 = vmatpush.msra.mxu3 %v15087_v47  ;;  %v5751_v47 = vadd.f32 %v5750_v55, %v5682_v53  ;;  %v15382_v51 = vsub.f32 %v5086_v62, %v15354_v2  ;;  %v6870_v62 = vand.u32 4294901760, %v6869_v33 }
 0x505   : > { %6661 = vmatpush.msra.mxu0 %v15221_v30  ;;  %6697 = vmatpush.msra.mxu1 %v15186_v18 }
 0x506   : > { %6750 = vmatpush.msra.mxu2 %v6575_v52  ;;  %6795 = vmatpush.msra.mxu3 %v15101_v9  ;;  %v15396_v9 = vsub.f32 %v5083_v48, %v15367_v40  ;;  %v5074_v52 = vld [vmem:[%s17807_s7 + $0x220] sm:$0xff]  ;;  %v15407_v58 = vadd.f32 %v5787_v38, %v5751_v47  ;;  %v15421_v48 = vsub.f32 %v5080_v39, %v15390_v57  ;;  %v5065_v39 = vld [vmem:[%s17807_s7 + $0x1d8] sm:$0xff] }
 0x507   : > { %6814 = vmatpush.msrb.mxu0 %v15278_v31  ;;  %6699 = vmatpush.msra.mxu1 %v15199_v0  ;;  %v15423_v1 = vand.u32 4294901760, %v5074_v52  ;;  %v15471_v47 = vand.u32 4294901760, %v5065_v39 }
 0x508   : > { %6754 = vmatpush.msra.mxu2 %v6581_v24  ;;  %6797 = vmatpush.msra.mxu3 %v15122_v27  ;;  %v6886_v27 = vand.u32 4294901760, %v15382_v51  ;;  %v5071_v24 = vld [vmem:[%s17807_s7 + $0x208] sm:$0xff]  ;;  %v7163_v38 = vrot.slane %v15407_v58, 4 }
 0x509   : > { %6816 = vmatpush.msrb.mxu0 %v15288_v44  ;;  %6859 = vmatpush.msrb.mxu1 %v6858_v42  ;;  %v15433_v55 = vand.u32 4294901760, %v5071_v24  ;;  %v15451_v53 = vsub.f32 %v5074_v52, %v15423_v1 }
 0x50a   : > { %6758 = vmatpush.msra.mxu2 %v6587_v12  ;;  %6799 = vmatpush.msra.mxu3 %v15138_v59  ;;  %v6892_v59 = vand.u32 4294901760, %v15396_v9  ;;  %v6876_v12 = vand.u32 4294901760, %v6875_v7  ;;  %v15500_v7 = vsub.f32 %v5065_v39, %v15471_v47 }
 0x50b   : > { %6818 = vmatpush.msrb.mxu0 %v15298_v36  ;;  %6865 = vmatpush.msrb.mxu1 %v6864_v46  ;;  %v15467_v33 = vsub.f32 %v5071_v24, %v15433_v55 }
 0x50c   : > { %6762 = vmatpush.msra.mxu2 %v6593_v49  ;;  %6801 = vmatpush.msra.mxu3 %v15154_v15  ;;  %v6887_v15 = vsub.f32 %v15382_v51, %v6886_v27  ;;  %v6898_v49 = vand.u32 4294901760, %v15421_v48  ;;  %v6893_v42 = vsub.f32 %v15396_v9, %v6892_v59 }
 0x50d   : > { %6820 = vmatpush.msrb.mxu0 %v15320_v20  ;;  %6871 = vmatpush.msrb.mxu1 %v6870_v62  ;;  %v17931_v52 = vand.u32 4294901760, %v15467_v33  ;;  %v15493_v62 = vand.u32 4294901760, %v5062_v37 }
 0x50e   : > { %7287 = vrot.lane.b32.xlu0 %v15407_v58, %s18120_s28  ;;  %7197 = vrot.lane.b32.xlu1 %v15407_v58, %s17929_s26  ;;  %v6899_v30 = vsub.f32 %v15421_v48, %v6898_v49  ;;  %s18170_s26 = smov 127  }
 0x50f   : > { %7333 = vrot.lane.b32.xlu2 %v15407_v58, %s18168_s18  ;;  %6766 = vmatpush.msra.mxu2 %v6599_v63  ;;  %v6904_v63 = vand.u32 4294901760, %v15431_v35 }
 0x510   : > { %6803 = vmatpush.msra.mxu3 %v15170_v11  ;;  %6822 = vmatpush.msrb.mxu0 %v15331_v3  ;;  %v6888_v11 = vand.u32 4294901760, %v6887_v15  ;;  %v6900_v24 = vand.u32 4294901760, %v6899_v30  ;;  %v6928_v30 = vand.u32 4294901760, %v15500_v7 }
 0x511   : > { %6877 = vmatpush.msrb.mxu1 %v6876_v12  ;;  %6770 = vmatpush.msra.mxu2 %v6605_v22  ;;  %v6910_v22 = vand.u32 4294901760, %v15451_v53  ;;  %v6905_v46 = vsub.f32 %v15431_v35, %v6904_v63  ;;  %v5056_v12 = vld [vmem:[%s17807_s7 + $0x190] sm:$0xff] }
 0x512   : > { %6805 = vmatpush.msra.mxu3 %v15186_v18  ;;  %6509 = vmatmul.f32.vlgmr.msrb.gmra.mxu2 %v14254_v14  ;;  %v6894_v14 = vand.u32 4294901760, %v6893_v42  ;;  %v15484_v18 = vsub.f32 %v5068_v29, %v15461_v25  ;;  %v6917_v42 = vsub.f32 %v15467_v33, %v17931_v52 }
 0x513   : > { %6824 = vmatpush.msrb.mxu0 %v15354_v2  ;;  %6883 = vmatpush.msrb.mxu1 %v6882_v61  ;;  %v6911_v28 = vsub.f32 %v15451_v53, %v6910_v22  ;;  %v7164_v61 = vsel %vm1421_vm4, %v13410_v56, %v7163_v38  ;;  %v6906_v39 = vand.u32 4294901760, %v6905_v46 }
 0x514   : > { %6957 = vmatpush.msrb.mxu2 %v15296_v34  ;;  %6807 = vmatpush.msra.mxu3 %v15199_v0  ;;  %v5059_v0 = vld [vmem:[%s17807_s7 + $0x1a8] sm:$0xff]  ;;  %v6922_v29 = vand.u32 4294901760, %v15484_v18  ;;  %v6918_v46 = vand.u32 4294901760, %v6917_v42 }
 0x515   : > { %6610 = vmatmul.f32.vlgmr.msrb.gmra.mxu3 %v14123_v54  ;;  %6826 = vmatpush.msrb.mxu0 %v15367_v40  ;;  %v15512_v15 = vand.u32 4294901760, %v5059_v0  ;;  %v6912_v56 = vand.u32 4294901760, %v6911_v28 }
 0x516   : > { %6889 = vmatpush.msrb.mxu1 %v6888_v11  ;;  %6960 = vmatpush.msrb.mxu2 %v15309_v8  ;;  %v15523_v11 = vsub.f32 %v5062_v37, %v15493_v62  ;;  %v6923_v37 = vsub.f32 %v15484_v18, %v6922_v29 }
 0x517   : > { %7010 = vmatpush.msrb.mxu3 %v15278_v31  ;;  %6828 = vmatpush.msrb.mxu0 %v15390_v57  ;;  %v15537_v38 = vsub.f32 %v5059_v0, %v15512_v15 }
 0x518   : > { %6895 = vmatpush.msrb.mxu1 %v6894_v14  ;;  %6963 = vmatpush.msrb.mxu2 %v15323_v4  ;;  %v15528_v14 = vand.u32 4294901760, %v5056_v12  ;;  %v6934_v52 = vand.u32 4294901760, %v15523_v11  ;;  %v6924_v0 = vand.u32 4294901760, %v6923_v37 }
 0x519   : > { %7012 = vmatpush.msrb.mxu3 %v15288_v44  ;;  %7242 = vrot.lane.b32.xlu2 %v15407_v58, %s18169_s29 }
 0x51a   : > { %7265 = vrot.lane.b32.xlu0 %v7164_v61, %s18124_s15  ;;  %7310 = vrot.lane.b32.xlu1 %v7164_v61, %s10446_s16  ;;  %v15547_v28 = vsub.f32 %v5056_v12, %v15528_v14  ;;  %v6935_v42 = vsub.f32 %v15523_v11, %v6934_v52 }
 0x51b   : > { %6830 = vmatpush.msrb.mxu0 %v15405_v16  ;;  %6901 = vmatpush.msrb.mxu1 %v6900_v24  ;;  %v6929_v24 = vsub.f32 %v15500_v7, %v6928_v30 }
 0x51c   : > { %6966 = vmatpush.msrb.mxu2 %v15346_v50  ;;  %7014 = vmatpush.msrb.mxu3 %v15298_v36 }
 0x51d   : > { %6832 = vmatpush.msrb.mxu0 %v15423_v1  ;;  %6907 = vmatpush.msrb.mxu1 %v6906_v39  ;;  %v6940_v39 = vand.u32 4294901760, %v15537_v38  ;;  %v6930_v12 = vand.u32 4294901760, %v6929_v24 }
 0x51e   : > { %6969 = vmatpush.msrb.mxu2 %v15362_v45  ;;  %7016 = vmatpush.msrb.mxu3 %v15320_v20 }
 0x51f   : > { %6834 = vmatpush.msrb.mxu0 %v15433_v55  ;;  %6913 = vmatpush.msrb.mxu1 %v6912_v56  ;;  %v6946_v56 = vand.u32 4294901760, %v15547_v28  ;;  %v6941_v37 = vsub.f32 %v15537_v38, %v6940_v39 }
 0x520   : > { %6972 = vmatpush.msrb.mxu2 %v15382_v51  ;;  %7018 = vmatpush.msrb.mxu3 %v15331_v3 }
 0x521   : > { %6836 = vmatpush.msrb.mxu0 %v15461_v25  ;;  %6919 = vmatpush.msrb.mxu1 %v6918_v46  ;;  %v6936_v46 = vand.u32 4294901760, %v6935_v42  ;;  %v6947_v24 = vsub.f32 %v15547_v28, %v6946_v56 }
 0x522   : > { %6975 = vmatpush.msrb.mxu2 %v15396_v9  ;;  %7020 = vmatpush.msrb.mxu3 %v15354_v2 }
 0x523   : > { %7219 = vrot.lane.b32.xlu2 %v7164_v61, %s10445_s20  ;;  %7175 = vrot.lane.b32.xlu1 %v7164_v61, %s18170_s26  ;;  %v6942_v61 = vand.u32 4294901760, %v6941_v37 }
 0x524   : > { %6838 = vmatpush.msrb.mxu0 %v15471_v47  ;;  %6925 = vmatpush.msrb.mxu1 %v6924_v0  ;;  %v6948_v0 = vand.u32 4294901760, %v6947_v24 }
 0x525   : > { %6978 = vmatpush.msrb.mxu2 %v15421_v48  ;;  %7022 = vmatpush.msrb.mxu3 %v15367_v40  ;;  %v7328_v48 = vpop.permute.xlu2 %7327 }
 0x526   : > { %6840 = vmatpush.msrb.mxu0 %v15493_v62  ;;  %6931 = vmatpush.msrb.mxu1 %v6930_v12 }
 0x527   : > { %6981 = vmatpush.msrb.mxu2 %v15431_v35  ;;  %7024 = vmatpush.msrb.mxu3 %v15390_v57 }
 0x528   : > { %6772 = vmatmul.f32.vlgmr.msra.gmra.mxu2 %v14123_v54  ;;  %6842 = vmatpush.msrb.mxu0 %v15512_v15 }
 0x529   : > { %6937 = vmatpush.msrb.mxu1 %v6936_v46  ;;  %6984 = vmatpush.msrb.mxu2 %v15451_v53 }
 0x52a   : > { %7026 = vmatpush.msrb.mxu3 %v15405_v16  ;;  %6664 = vmatmul.f32.vlgmr.msra.gmra.mxu0 %v14152_v5  ;;  %v18171_v5 = vand.u32 4294901760, %v15467_v33 }
 0x52b   : > { %6809 = vmatmul.f32.vlgmr.msra.gmra.mxu3 %v14123_v54  ;;  %6844 = vmatpush.msrb.mxu0 %v15528_v14 }
 0x52c   : > { %6943 = vmatpush.msrb.mxu1 %v6942_v61  ;;  %6987 = vmatpush.msrb.mxu2 %v15467_v33 }
 0x52d   : > { %7028 = vmatpush.msrb.mxu3 %v15423_v1  ;;  %6703 = vmatmul.f32.vlgmr.msra.gmra.mxu1 %v14188_v21 }
 0x52e   : > { %7051 = vmatpush.msra.mxu0 %v6856_v19  ;;  %6949 = vmatpush.msrb.mxu1 %v6948_v0  ;;  %v5828_v21 = vpop.f32.mrf.mxu2 }
 0x52f   : > { %6990 = vmatpush.msrb.mxu2 %v15484_v18  ;;  %7030 = vmatpush.msrb.mxu3 %v15433_v55 }
 0x530   : > { %7055 = vmatpush.msra.mxu0 %v6862_v43  ;;  %7118 = vmatpush.msra.mxu1 %v15278_v31 }
 0x531   : > { %6993 = vmatpush.msrb.mxu2 %v15500_v7  ;;  %7032 = vmatpush.msrb.mxu3 %v15461_v25  ;;  %v5929_v54 = vpop.f32.mrf.mxu3 }
 0x532   : > { %7059 = vmatpush.msra.mxu0 %v6868_v26  ;;  %7120 = vmatpush.msra.mxu1 %v15288_v44 }
 0x533   : > { %6996 = vmatpush.msrb.mxu2 %v15523_v11  ;;  %7034 = vmatpush.msrb.mxu3 %v15471_v47 }
 0x534   : > { %6850 = vmatmul.f32.vlgmr.msrb.gmra.mxu0 %v14421_v41  ;;  %7122 = vmatpush.msra.mxu1 %v15298_v36 }
 0x535   : > { %7063 = vmatpush.msra.mxu0 %v6874_v13  ;;  %6999 = vmatpush.msrb.mxu2 %v15537_v38 }
 0x536   : > { %7036 = vmatpush.msrb.mxu3 %v15493_v62  ;;  %6951 = vmatmul.f32.vlgmr.msrb.gmra.mxu1 %v14344_v23 }
 0x537   : > { %7067 = vmatpush.msra.mxu0 %v6880_v10  ;;  %7124 = vmatpush.msra.mxu1 %v15320_v20 }
 0x538   : > { %7002 = vmatpush.msrb.mxu2 %v15547_v28  ;;  %7038 = vmatpush.msrb.mxu3 %v15512_v15 }
 0x539   : > { %7005 = vmatmul.f32.vlgmr.msrb.gmra.mxu2 %v14360_v17  ;;  %7071 = vmatpush.msra.mxu0 %v6886_v27 }
 0x53a   : > { %7126 = vmatpush.msra.mxu1 %v15331_v3  ;;  %7040 = vmatpush.msrb.mxu3 %v15528_v14 }
 0x53b   : > { %7044 = vmatmul.f32.vlgmr.msrb.gmra.mxu3 %v14379_v6  ;;  %7075 = vmatpush.msra.mxu0 %v6892_v59  ;;  %v5930_v6 = vadd.f32 %v5929_v54, %v5828_v21  ;;  %v7282_v59 = vpop.permute.xlu1 %7281 }
 0x53c   : > { %7128 = vmatpush.msra.mxu1 %v15354_v2 }
 0x53d   : > { %7079 = vmatpush.msra.mxu0 %v6898_v49  ;;  %v5983_v17 = vpop.f32.mrf.mxu0 }
 0x53e   : > { %7130 = vmatpush.msra.mxu1 %v15367_v40  ;;  %v5984_v41 = vadd.f32 %v5983_v17, %v5930_v6 }
 0x53f   : > { %7083 = vmatpush.msra.mxu0 %v6904_v63 }
 0x540   : > { %7132 = vmatpush.msra.mxu1 %v15390_v57  ;;  %v6022_v31 = vpop.f32.mrf.mxu1  ;;  %v18173_v57 = vld [vmem:[#allocation16_spill] sm:$0xff] }
 0x541   : > { %7087 = vmatpush.msra.mxu0 %v6910_v22  ;;  %v6023_v44 = vadd.f32 %v6022_v31, %v5984_v41  ;;  %v6091_v34 = vpop.f32.mrf.mxu2 }
 0x542   : > { %7134 = vmatpush.msra.mxu1 %v15405_v16  ;;  %v15666_v16 = vadd.f32 %v15223_v32, %v14729_v60  ;;  %v15681_v60 = vpop.permute.xlu2 %7191  ;;  %v15683_v32 = vpop.permute.xlu0 %7236 }
 0x543   : > { %7091 = vmatpush.msra.mxu0 %v18171_v5  ;;  %v6092_v36 = vadd.f32 %v6091_v34, %v6023_v44  ;;  %v15691_v49 = vpop.permute.xlu1 %7259 }
 0x544   : > { %7136 = vmatpush.msra.mxu1 %v15423_v1  ;;  %v6128_v8 = vpop.f32.mrf.mxu3  ;;  %v15673_v27 = vrot.slane %v15666_v16, 4 }
 0x545   : > { %7095 = vmatpush.msra.mxu0 %v6922_v29  ;;  %v6129_v19 = vadd.f32 %v6128_v8, %v6092_v36 }
 0x546   : > { %7138 = vmatpush.msra.mxu1 %v15433_v55 }
 0x547   : > { %7099 = vmatpush.msra.mxu0 %v6928_v30  ;;  %v6169_v20 = vpop.f32.mrf.mxu0 }
 0x548   : > { %7140 = vmatpush.msra.mxu1 %v15461_v25  ;;  %v6170_v4 = vadd.f32 %v6169_v20, %v6129_v19 }
 0x549   : > { %7103 = vmatpush.msra.mxu0 %v6934_v52  ;;  %v6270_v43 = vpop.f32.mrf.mxu1 }
 0x54a   : > { %7142 = vmatpush.msra.mxu1 %v15471_v47  ;;  %v6271_v26 = vadd.f32 %v6270_v43, %v6170_v4  ;;  %v15685_v1 = vpop.permute.xlu2 %7304  ;;  %v15687_v35 = vpop.permute.xlu0 %7213 }
 0x54b   : > { %7107 = vmatpush.msra.mxu0 %v6940_v39  ;;  %v15697_v22 = vpop.permute.xlu1 %7238 }
 0x54c   : > { %7144 = vmatpush.msra.mxu1 %v15493_v62 }
 0x54d   : > { %7111 = vmatpush.msra.mxu0 %v6946_v56 }
 0x54e   : > { %7146 = vmatpush.msra.mxu1 %v15512_v15  ;;  %7113 = vmatmul.f32.vlgmr.msra.gmra.mxu0 %v14344_v23 }
 0x550   : > { %7148 = vmatpush.msra.mxu1 %v15528_v14 }
 0x551   : > { %7150 = vmatmul.f32.vlgmr.msra.gmra.mxu1 %v14344_v23 }
 0x552   : > { %v6324_v3 = vpop.f32.mrf.mxu2  ;;  %v15689_v55 = vpop.permute.xlu2 %7283 }
 0x553   : > { %v6325_v50 = vadd.f32 %v6324_v3, %v6271_v26  ;;  %v15693_v53 = vpop.permute.xlu0 %7169  ;;  %v15701_v30 = vpop.permute.xlu1 %7215 }
 0x555   : > { %v6363_v2 = vpop.f32.mrf.mxu3 }
 0x556   : > { %v6364_v45 = vadd.f32 %v6363_v2, %v6325_v50 }
 0x55a   : > { %v15695_v25 = vpop.permute.xlu2 %7261 }
 0x55b   : > { %v15699_v52 = vpop.permute.xlu0 %7329 }
 0x55c   : > { %v7340_v26 = vsel %vm7339_vm13, %v7328_v48, %v15699_v52 }
 0x55d   : > { %v15736_v2 = vand.u32 4294901760, %v7340_v26 }
 0x563   : > { %v6432_v40 = vpop.f32.mrf.mxu0  ;;  %v15703_v14 = vpop.permute.xlu0 %7193 }
 0x564   : > { %v6433_v13 = vadd.f32 %v6432_v40, %v6364_v45 }
 0x565   : > { %v6469_v51 = vpop.f32.mrf.mxu1 }
 0x566   : > { %v15649_v10 = vadd.f32 %v6469_v51, %v6433_v13  ;;  %v7294_v13 = vsel %vm7293_vm15, %v7282_v59, %v15689_v55 }
 0x568   : > { %7199 = vrot.lane.b32.xlu2 %v15649_v10, %s18172_s19  ;;  %7244 = vrot.lane.b32.xlu0 %v15649_v10, %s18169_s29  ;;  %v7165_v23 = vrot.slane %v15649_v10, 4 }
 0x569   : > { %7335 = vrot.lane.b32.xlu1 %v15649_v10, %s18168_s18  ;;  %v7334_v62 = vpop.permute.xlu2 %7333 }
 0x56a   : > { %v7166_v9 = vsel %vm1421_vm4, %v18173_v57, %v7165_v23 }
 0x56b   : > { %v15707_v24 = vpop.permute.xlu0 %7306 }
 0x570   : > { %7312 = vrot.lane.b32.xlu2 %v7166_v9, %s10446_s16  ;;  %7221 = vrot.lane.b32.xlu0 %v7166_v9, %s10445_s20 }
 0x571   : > { %7289 = vrot.lane.b32.xlu1 %v15649_v10, %s18120_s28 }
 0x573   : > { %v7243_v28 = vpop.permute.xlu2 %7242 }
 0x578   : > { %7177 = vrot.lane.b32.xlu2 %v7166_v9, %s18170_s26  ;;  %7331 = vrot.lane.b32.xlu0 %v15666_v16, %s18168_s18 }
 0x579   : > { %7267 = vrot.lane.b32.xlu1 %v7166_v9, %s18124_s15 }
 0x57d   : > { %v15709_v61 = vpop.permute.xlu2 %7219 }
 0x580   : > { %7308 = vrot.lane.b32.xlu0 %v15673_v27, %s10446_s16  ;;  %v15705_v56 = vpop.permute.xlu1 %7197  ;;  %v7288_v17 = vpop.permute.xlu0 %7287 }
 0x581   : > { %7171 = vrot.lane.b32.xlu1 %v18173_v57, %s18170_s26  ;;  %v15755_v57 = vsub.f32 %v7340_v26, %v15736_v2 }
 0x589   : > { %7285 = vrot.lane.b32.xlu1 %v15666_v16, %s18120_s28 }
 0x58c   : > { %v7311_v6 = vpop.permute.xlu1 %7310  ;;  %v15726_v43 = vpop.permute.xlu0 %7265 }
 0x595   : > { %v6510_v33 = vpop.f32.mrf.mxu2  ;;  %v15720_v20 = vpop.permute.xlu1 %7175 }
 0x598   : > { %v6611_v63 = vpop.f32.mrf.mxu3 }
 0x599   : > { %v6612_v47 = vadd.f32 %v6611_v63, %v6510_v33  ;;  %v15760_v63 = vand.u32 4294901760, %v7294_v13 }
 0x5a7   : > { %v6665_v18 = vpop.f32.mrf.mxu0 }
 0x5a8   : > { %v6666_v7 = vadd.f32 %v6665_v18, %v6612_v47  ;;  %v7418_v47 = vand.u32 4294901760, %v15755_v57 }
 0x5aa   : > { %v6704_v29 = vpop.f32.mrf.mxu1 }
 0x5ab   : > { %v6705_v15 = vadd.f32 %v6704_v29, %v6666_v7  ;;  %v6773_v11 = vpop.f32.mrf.mxu2  ;;  %v15781_v7 = vsub.f32 %v7294_v13, %v15760_v63  ;;  %v7271_v29 = vsel %vm1358_vm9, %v15691_v49, %v15695_v25 }
 0x5ad   : > { %v6774_v38 = vadd.f32 %v6773_v11, %v6705_v15 }
 0x5ae   : > { %v6810_v39 = vpop.f32.mrf.mxu3 }
 0x5af   : > { %v6811_v42 = vadd.f32 %v6810_v39, %v6774_v38  ;;  %v7317_v38 = vsel %vm7316_vm14, %v15685_v1, %v15707_v24  ;;  %v7419_v1 = vsub.f32 %v15755_v57, %v7418_v47 }
 0x5b1   : > { %v6851_v12 = vpop.f32.mrf.mxu0 }
 0x5b2   : > { %v6852_v37 = vadd.f32 %v6851_v12, %v6811_v42  ;;  %v8314_v12 = vld [vmem:[%s17809_s9] sm:$0xff] }
 0x5b3   : > { %v6952_v46 = vpop.f32.mrf.mxu1 }
 0x5b4   : > { %v6953_v54 = vadd.f32 %v6952_v46, %v6852_v37 }
 0x5bc   : > { %v7006_v0 = vpop.f32.mrf.mxu2 }
 0x5bd   : > { %v7007_v5 = vadd.f32 %v7006_v0, %v6953_v54  ;;  %v7249_v54 = vsel %vm7248_vm0, %v15683_v32, %v15697_v22 }
 0x5be   : > { %v7045_v21 = vpop.f32.mrf.mxu3 }
 0x5bf   : > { %v7046_v41 = vadd.f32 %v7045_v21, %v7007_v5 }
 0x5c2   : > { %v15711_v44 = vpop.permute.xlu2 %7199 }
 0x5c3   : > { %v7205_v21 = vsel %vm1346_vm8, %v15705_v56, %v15711_v44  ;;  %v15837_v56 = vand.u32 4294901760, %v7249_v54 }
 0x5ca   : > { %v15730_v3 = vpop.permute.xlu2 %7312 }
 0x5cb   : > { %v7114_v31 = vpop.f32.mrf.mxu0  ;;  %v7319_v50 = vsel %vm7316_vm14, %v7311_v6, %v15730_v3 }
 0x5cc   : > { %v7115_v34 = vadd.f32 %v7114_v31, %v7046_v41  ;;  %v15742_v45 = vand.u32 4294901760, %v7319_v50  ;;  %v7420_v41 = vand.u32 4294901760, %v7419_v1  ;;  %v17936_v31 = vand.u32 4294901760, %v15781_v7 }
 0x5ce   : > { %v7151_v36 = vpop.f32.mrf.mxu1  ;;  %v15763_v33 = vsub.f32 %v7319_v50, %v15742_v45 }
 0x5cf   : > { %v15713_v8 = vadd.f32 %v7151_v36, %v7115_v34  ;;  %v7226_v34 = vsel %vm7225_vm1, %v15687_v35, %v15701_v30 }
 0x5d0   : > { %v7424_v11 = vand.u32 4294901760, %v15763_v33 }
 0x5d1   : > { %7337 = vrot.lane.b32.xlu2 %v15713_v8, %s18168_s18  ;;  %7246 = vrot.lane.b32.xlu0 %v15713_v8, %s18169_s29  ;;  %v7167_v19 = vrot.slane %v15713_v8, 4 }
 0x5d2   : > { %v7425_v5 = vsub.f32 %v15763_v33, %v7424_v11  ;;  %v15849_v50 = vpop.permute.xlu2 %7177 }
 0x5d3   : > { %v15724_v4 = vsel %vm1421_vm4, %v15673_v27, %v7167_v19  ;;  %v7350_v19 = vsel %vm1421_vm4, %v7205_v21, %v7226_v34 }
 0x5d4   : > { %7314 = vrot.lane.b32.xlu1 %v15724_v4, %s10446_s16  ;;  %v7426_v26 = vand.u32 4294901760, %v7425_v5  ;;  %s10263_s16 = sshll.u32 %s10533_s25, 4 }
 0x5d5   : > { %s10159_s18 = scalar_lea.hbm %s17812_s12, %s10263_s16 }
 0x5d6   : > { %s10163_s17 = sshll.u32 %s10159_s18, 4  ;;  %s10164_s17 = int_to_ptr.hbm [resolvable:$true] %s10163_s17 }
 0x5d9   : > { %7291 = vrot.lane.b32.xlu2 %v15713_v8, %s18120_s28  ;;  %7223 = vrot.lane.b32.xlu0 %v15724_v4, %s10445_s20 }
 0x5da   : > { %v15750_v51 = vpop.permute.xlu0 %7244 }
 0x5db   : > { %v15744_v40 = vpop.permute.xlu1 %7335  ;;  %v7251_v18 = vsel %vm7248_vm0, %v7243_v28, %v15750_v51 }
 0x5dc   : > { %7263 = vrot.lane.b32.xlu1 %v15673_v27, %s18124_s15  ;;  %v7342_v23 = vsel %vm7339_vm13, %v7334_v62, %v15744_v40  ;;  %v7353_v39 = vsel %vm1421_vm4, %v7251_v18, %v7271_v29  ;;  %v7203_v18 = vsel %vm1346_vm8, %v15681_v60, %v15703_v14  ;;  %v15875_v29 = vsub.f32 %v7249_v54, %v15837_v56 }
 0x5dd   : > { %v7363_v9 = vsel %vm1421_vm4, %v7342_v23, 0  ;;  %v15825_v6 = vand.u32 4294901760, %v7353_v39 }
 0x5de   : > { %v15758_v48 = vand.u32 4294901760, %v7363_v9  ;;  %v17933_v21 = vand.u32 4294901760, %v15875_v29 }
 0x5e0   : > { %v15766_v59 = vsub.f32 %v7363_v9, %v15758_v48  ;;  %7372 = vmatpush.msra.mxu2 %v15758_v48  ;;  %7552 = vmatpush.msrb.mxu1 %v15758_v48  ;;  %v15863_v9 = vsub.f32 %v7353_v39, %v15825_v6  ;;  %v15887_v39 = vand.u32 4294901760, %v7203_v18 }
 0x5e1   : > { %7240 = vrot.lane.b32.xlu2 %v15666_v16, %s18169_s29  ;;  %7195 = vrot.lane.b32.xlu0 %v15666_v16, %s18172_s19  ;;  %s434_s29 = sand.u32 1, %s10420_s22  }
 0x5e2   : > { %v7412_v62 = vand.u32 4294901760, %v15766_v59  ;;  %7374 = vmatpush.msra.mxu2 %v15736_v2  ;;  %7503 = vmatpush.msrb.mxu0 %v15766_v59  ;;  %v15811_v37 = vpop.permute.xlu0 %7221  ;;  %v17932_v1 = vand.u32 4294901760, %v15863_v9  ;;  %v15915_v34 = vsub.f32 %v7203_v18, %v15887_v39  ;;  %s10148_s25 = scalar_lea.sflag [#allocation4], %s434_s29 }
 0x5e3   : > { %7554 = vmatpush.msrb.mxu1 %v15736_v2  ;;  %v15787_v15 = vpop.permute.xlu1 %7289  ;;  %v7228_v32 = vsel %vm7225_vm1, %v15709_v61, %v15811_v37 }
 0x5e4   : > { %7201 = vrot.lane.b32.xlu1 %v15713_v8, %s18172_s19  ;;  %v7296_v28 = vsel %vm7293_vm15, %v7288_v17, %v15787_v15  ;;  %7376 = vmatpush.msra.mxu2 %v15742_v45  ;;  %v7413_v49 = vsub.f32 %v15766_v59, %v7412_v62  ;;  %v15853_v35 = vand.u32 4294901760, %v7228_v32 }
 0x5e5   : > { %v7356_v42 = vsel %vm1421_vm4, %v7296_v28, %v7317_v38  ;;  %7506 = vmatpush.msrb.mxu0 %v15755_v57  ;;  %7556 = vmatpush.msrb.mxu1 %v15742_v45  ;;  %v15877_v38 = vand.u32 4294901760, %v7350_v19  ;;  %v18176_v57 = vand.u32 4294901760, %v15781_v7 }
 0x5e6   : > { %v15813_v46 = vand.u32 4294901760, %v7356_v42  ;;  %v7414_v0 = vand.u32 4294901760, %v7413_v49  ;;  %v7183_v49 = vsel %vm1334_vm10, %v15720_v20, %v15849_v50  ;;  %v8323_v20 = vld [vmem:[%s17810_s10] sm:$0xff] }
 0x5e7   : > { %7509 = vmatpush.msrb.mxu0 %v15763_v33  ;;  %v15900_v54 = vand.u32 4294901760, %v7183_v49  ;;  %v15905_v5 = vsub.f32 %v7350_v19, %v15877_v38  ;;  %v18178_v33 = vand.u32 4294901760, %v15863_v9 }
 0x5e8   : > { %7378 = vmatpush.msra.mxu2 %v15813_v46  ;;  %7415 = vmatpush.msra.mxu3 %v7414_v0  ;;  %v15829_v17 = vsub.f32 %v7356_v42, %v15813_v46  ;;  %v15890_v42 = vsub.f32 %v7228_v32, %v15853_v35 }
 0x5e9   : > { %7269 = vrot.lane.b32.xlu2 %v15724_v4, %s18124_s15  ;;  %8317 = vperm.xlu0 %10330, %v8314_v12   ;;  %s10382_s15 = scalar_lea.hbm %s17812_s12, 32 }
 0x5ea   : > { %7558 = vmatpush.msrb.mxu1 %v15813_v46  ;;  %7380 = vmatpush.msra.mxu2 %v15760_v63  ;;  %v17939_v36 = vand.u32 4294901760, %v15829_v17 }
 0x5eb   : > { %7421 = vmatpush.msra.mxu3 %v7420_v41  ;;  %7512 = vmatpush.msrb.mxu0 %v15829_v17  ;;  %v15847_v61 = vpop.permute.xlu1 %7267 }
 0x5ec   : > { %7179 = vrot.lane.b32.xlu1 %v15724_v4, %s18170_s26  ;;  %7560 = vmatpush.msrb.mxu1 %v15760_v63  ;;  %v7273_v13 = vsel %vm1358_vm9, %v15726_v43, %v15847_v61  ;;  %v7431_v23 = vsub.f32 %v15829_v17, %v17939_v36  ;;  %v7437_v43 = vsub.f32 %v15781_v7, %v17936_v31 }
 0x5ed   : > { %v15868_v4 = vand.u32 4294901760, %v7273_v13  ;;  %7427 = vmatpush.msra.mxu3 %v7426_v26  ;;  %7515 = vmatpush.msrb.mxu0 %v15781_v7  ;;  %v7449_v26 = vsub.f32 %v15863_v9, %v17932_v1  ;;  %v17937_v1 = vand.u32 4294901760, %v15905_v5 }
 0x5ee   : > { %v7432_v28 = vand.u32 4294901760, %v7431_v23  ;;  %v7438_v12 = vand.u32 4294901760, %v7437_v43  ;;  %v18174_v43 = vld [vmem:[#allocation14_spill] sm:$0xff] }
 0x5ef   : > { %v15883_v60 = vsub.f32 %v7273_v13, %v15868_v4  ;;  %7382 = vmatpush.msra.mxu2 %v15868_v4  ;;  %7562 = vmatpush.msrb.mxu1 %v15868_v4  ;;  %v17934_v13 = vand.u32 4294901760, %v15890_v42 }
 0x5f0   : > { %7433 = vmatpush.msra.mxu3 %v7432_v28  ;;  %v15930_v28 = vand.u32 4294901760, %v18174_v43 }
 0x5f1   : > { %7217 = vrot.lane.b32.xlu2 %v15673_v27, %s10445_s20  ;;  %7384 = vmatpush.msra.mxu2 %v15825_v6  ;;  %v17935_v0 = vand.u32 4294901760, %v15883_v60 }
 0x5f2   : > { %7518 = vmatpush.msrb.mxu0 %v15883_v60  ;;  %7564 = vmatpush.msrb.mxu1 %v15825_v6 }
 0x5f3   : > { %7439 = vmatpush.msra.mxu3 %v7438_v12  ;;  %7386 = vmatpush.msra.mxu2 %v15837_v56  ;;  %v15909_v32 = vpop.permute.xlu1 %7171  ;;  %v7443_v41 = vsub.f32 %v15883_v60, %v17935_v0  ;;  %v7455_v12 = vsub.f32 %v15875_v29, %v17933_v21  ;;  %v7359_v21 = vld [vmem:[%s17808_s8] sm:$0xff] }
 0x5f4   : > { %8326 = vperm.xlu1 %10331, %v8323_v20   ;;  %7521 = vmatpush.msrb.mxu0 %v15863_v9  ;;  %v7181_v19 = vsel %vm1334_vm10, %v15693_v53, %v15909_v32  ;;  %v15933_v20 = vsub.f32 %v7183_v49, %v15900_v54  ;;  %v7461_v49 = vsub.f32 %v15890_v42, %v17934_v13 }
 0x5f5   : > { %7566 = vmatpush.msrb.mxu1 %v15837_v56  ;;  %v7347_v23 = vsel %vm1421_vm4, %v15407_v58, %v7181_v19  ;;  %7388 = vmatpush.msra.mxu2 %v15853_v35  ;;  %v7444_v18 = vand.u32 4294901760, %v7443_v41  ;;  %v7450_v58 = vand.u32 4294901760, %v7449_v26  ;;  %v17938_v19 = vand.u32 4294901760, %v15915_v34 }
 0x5f6   : > { %v15935_v53 = vand.u32 4294901760, %v7347_v23  ;;  %7524 = vmatpush.msrb.mxu0 %v15875_v29  ;;  %v15960_v26 = vsub.f32 %v18174_v43, %v15930_v28  ;;  %v7467_v13 = vsub.f32 %v15905_v5, %v17937_v1  ;;  %v7478_v0 = vand.u32 4294901760, %v15933_v20 }
 0x5f7   : > { %7568 = vmatpush.msrb.mxu1 %v15853_v35  ;;  %7390 = vmatpush.msra.mxu2 %v15877_v38 }
 0x5f8   : > { %7445 = vmatpush.msra.mxu3 %v7444_v18  ;;  %7527 = vmatpush.msrb.mxu0 %v15890_v42  ;;  %v15949_v41 = vsub.f32 %v7347_v23, %v15935_v53  ;;  %v7361_v18 = vsel %vm1358_vm9, %v7359_v21, 0  ;;  %v7456_v23 = vand.u32 4294901760, %v7455_v12  ;;  %v7473_v21 = vsub.f32 %v15915_v34, %v17938_v19 }
 0x5f9   : > { %7173 = vrot.lane.b32.xlu2 %v15673_v27, %s18170_s26  ;;  %7570 = vmatpush.msrb.mxu1 %v15877_v38  ;;  %v15968_v31 = vand.u32 4294901760, %v7361_v18  ;;  %v7462_v27 = vand.u32 4294901760, %v7461_v49  ;;  %v7490_v49 = vand.u32 4294901760, %v15960_v26  ;;  %s10253_s26 = sshll.u32 %s434_s29, 4 }
 0x5fa   : > { %7392 = vmatpush.msra.mxu2 %v15887_v39  ;;  %7451 = vmatpush.msra.mxu3 %v7450_v58  ;;  %v7484_v43 = vand.u32 4294901760, %v15949_v41  ;;  %v7468_v58 = vand.u32 4294901760, %v7467_v13  ;;  %s17762_s19 = scalar_lea.vmem [#allocation5], %s10253_s26  ;;  %s10376_s26 = sshra.s32 %s10164_s17, 4  ;;  %s10377_s26 = int_to_ptr.hbm [resolvable:$true] %s10376_s26 }
 0x5fb   : > { %7530 = vmatpush.msrb.mxu0 %v15905_v5  ;;  %7572 = vmatpush.msrb.mxu1 %v15887_v39  ;;  %v15978_v12 = vsub.f32 %v7361_v18, %v15968_v31  ;;  %v7474_v18 = vand.u32 4294901760, %v7473_v21  ;;  %s10161_s20 = sshll.u32 %s17762_s19, 4  ;;  %s10378_s0 = scalar_lea.hbm %s10377_s26, 16  ;;  %s10162_s20 = int_to_ptr.vmem [resolvable:$true] %s10161_s20 }
 0x5fc   : > { %7394 = vmatpush.msra.mxu2 %v15900_v54  ;;  %7457 = vmatpush.msra.mxu3 %v7456_v23  ;;  %v7479_v23 = vsub.f32 %v15933_v20, %v7478_v0  ;;  %v7485_v19 = vsub.f32 %v15949_v41, %v7484_v43  ;;  %p10379_p0 = scmp.ne.s32.totalorder %s10377_s26, %s10378_s0  ;;  %p10383_p3 = scmp.lt.s32.totalorder %s10377_s26, %s17812_s12 }
 0x5fd   : > { %7533 = vmatpush.msrb.mxu0 %v15915_v34  ;;  %7574 = vmatpush.msrb.mxu1 %v15900_v54  ;;  %v15986_v1 = vand.u32 4294901760, %v15978_v12  ;;  %p10384_p4 = scmp.lt.s32.totalorder %s10382_s15, %s10378_s0 }
 0x5fe   : > { %7396 = vmatpush.msra.mxu2 %v15935_v53  ;;  %7463 = vmatpush.msra.mxu3 %v7462_v27  ;;  %v7491_v27 = vsub.f32 %v15960_v26, %v7490_v49  ;;  %p10380_p1 = pnand %p10379_p0, %p10550_p5 }
 0x5ff   : > { %7536 = vmatpush.msrb.mxu0 %v15933_v20  ;;  %7576 = vmatpush.msrb.mxu1 %v15935_v53  ;;  %v7402_v13 = vsub.f32 %v15978_v12, %v15986_v1  ;;  %v7480_v20 = vand.u32 4294901760, %v7479_v23  ;;  %p10385_p7 = por %p10384_p4, %p10383_p3 }
 0x600   : > { %7398 = vmatpush.msra.mxu2 %v15930_v28  ;;  %7469 = vmatpush.msra.mxu3 %v7468_v58  ;;  %v7492_v59 = vand.u32 4294901760, %v7491_v27  ;;  %p10381_p2 = pneg %p10380_p1 }
 0x601   : > { %7539 = vmatpush.msrb.mxu0 %v15949_v41  ;;  %7578 = vmatpush.msrb.mxu1 %v15930_v28  ;;  %v15999_v36 = vand.u32 4294901760, %v7402_v13  ;;  %v7486_v41 = vand.u32 4294901760, %v7485_v19 }
 0x602   : > { %7591 = vmatpush.msrb.mxu2 %v7412_v62  ;;  %7475 = vmatpush.msra.mxu3 %v7474_v18  ;;  %v18175_v62 = vand.u32 4294901760, %v15829_v17  ;;  %p10386_p8 = pnand %p10385_p7, %p10381_p2 }
 0x603   : > { %7542 = vmatpush.msrb.mxu0 %v15960_v26  ;;  %7582 = vmatmul.f32.vlgmr.msrb.gmra.mxu1 %v15986_v1 }
 0x604   : > { %7595 = vmatpush.msrb.mxu2 %v7418_v47  ;;  %7481 = vmatpush.msra.mxu3 %v7480_v20  ;;  %v18177_v47 = vand.u32 4294901760, %v15883_v60 }
 0x605   : > { %7404 = vmatmul.f32.vlgmr.msra.gmra.mxu2 %v15999_v36  ;;  %7545 = vmatmul.f32.vlgmr.msrb.gmra.mxu0 %v15978_v12 }
 0x606   : > { %7599 = vmatpush.msrb.mxu2 %v7424_v11  ;;  %7487 = vmatpush.msra.mxu3 %v7486_v41  ;;  %v18179_v11 = vand.u32 4294901760, %v15875_v29 }
 0x608   : > { %7603 = vmatpush.msrb.mxu2 %v18175_v62  ;;  %7493 = vmatpush.msra.mxu3 %v7492_v59 }
 0x609   : > { %7495 = vmatmul.f32.vlgmr.msra.gmra.mxu3 %v15968_v31 }
 0x60a   : > { %7652 = vmatpush.msrb.mxu3 %v15758_v48  ;;  %7607 = vmatpush.msrb.mxu2 %v18176_v57  ;;  %v18180_v48 = vand.u32 4294901760, %v15890_v42 }
 0x60c   : > { %7654 = vmatpush.msrb.mxu3 %v15736_v2  ;;  %7611 = vmatpush.msrb.mxu2 %v18177_v47  ;;  %v18181_v2 = vand.u32 4294901760, %v15905_v5 }
 0x60e   : > { %7656 = vmatpush.msrb.mxu3 %v15742_v45  ;;  %7615 = vmatpush.msrb.mxu2 %v18178_v33  ;;  %v18182_v45 = vand.u32 4294901760, %v15915_v34 }
 0x610   : > { %7658 = vmatpush.msrb.mxu3 %v15813_v46  ;;  %7619 = vmatpush.msrb.mxu2 %v18179_v11 }
 0x612   : > { %7660 = vmatpush.msrb.mxu3 %v15760_v63  ;;  %7623 = vmatpush.msrb.mxu2 %v18180_v48  ;;  %v16040_v63 = vpop.permute.xlu0 %7331 }
 0x613   : > { %v7341_v7 = vsel %vm7339_vm13, %v15699_v52, %v16040_v63 }
 0x614   : > { %7662 = vmatpush.msrb.mxu3 %v15868_v4  ;;  %7627 = vmatpush.msrb.mxu2 %v18181_v2  ;;  %v16047_v46 = vand.u32 4294901760, %v7341_v7 }
 0x616   : > { %7664 = vmatpush.msrb.mxu3 %v15825_v6  ;;  %7631 = vmatpush.msrb.mxu2 %v18182_v45 }
 0x618   : > { %7666 = vmatpush.msrb.mxu3 %v15837_v56  ;;  %7635 = vmatpush.msrb.mxu2 %v7478_v0  ;;  %v16055_v56 = vsub.f32 %v7341_v7, %v16047_v46 }
 0x61a   : > { %7668 = vmatpush.msrb.mxu3 %v15853_v35  ;;  %7639 = vmatpush.msrb.mxu2 %v7484_v43  ;;  %v17947_v52 = vand.u32 4294901760, %v16055_v56  ;;  %v16079_v0 = vpop.permute.xlu0 %7308 }
 0x61b   : > { %v7318_v34 = vsel %vm7316_vm14, %v15707_v24, %v16079_v0 }
 0x61c   : > { %7670 = vmatpush.msrb.mxu3 %v15877_v38  ;;  %7643 = vmatpush.msrb.mxu2 %v7490_v49  ;;  %v7734_v60 = vsub.f32 %v16055_v56, %v17947_v52 }
 0x61d   : > { %7645 = vmatmul.f32.vlgmr.msrb.gmra.mxu2 %v15968_v31 }
 0x61e   : > { %7672 = vmatpush.msrb.mxu3 %v15887_v39  ;;  %v7735_v42 = vand.u32 4294901760, %v7734_v60 }
 0x620   : > { %7674 = vmatpush.msrb.mxu3 %v15900_v54 }
 0x622   : > { %7676 = vmatpush.msrb.mxu3 %v15935_v53 }
 0x624   : > { %7678 = vmatpush.msrb.mxu3 %v15930_v28  ;;  %v16089_v28 = vpop.permute.xlu1 %7285 }
 0x625   : > { %7680 = vmatmul.f32.vlgmr.msrb.gmra.mxu3 %v15968_v31  ;;  %v7295_v19 = vsel %vm7293_vm15, %v15689_v55, %v16089_v28 }
 0x62b   : > { %v16049_v6 = vpop.permute.xlu2 %7337 }
 0x62c   : > { %v7343_v17 = vsel %vm7339_vm13, %v15744_v40, %v16049_v6 }
 0x62d   : > { %v7365_v35 = vsel %vm1421_vm4, %v7343_v17, 0 }
 0x62e   : > { %v16058_v9 = vand.u32 4294901760, %v7365_v35 }
 0x630   : > { %v16061_v4 = vsub.f32 %v7365_v35, %v16058_v9  ;;  %7687 = vmatpush.msra.mxu0 %v16058_v9  ;;  %7867 = vmatpush.msra.mxu3 %v16058_v9 }
 0x632   : > { %v17948_v29 = vand.u32 4294901760, %v16061_v4  ;;  %7689 = vmatpush.msra.mxu0 %v16047_v46  ;;  %7818 = vmatpush.msra.mxu2 %v16061_v4 }
 0x633   : > { %7869 = vmatpush.msra.mxu3 %v16047_v46  ;;  %v16070_v40 = vpop.permute.xlu2 %7291 }
 0x634   : > { %7821 = vmatpush.msra.mxu2 %v16055_v56  ;;  %v7728_v38 = vsub.f32 %v16061_v4, %v17948_v29  ;;  %v7297_v54 = vsel %vm7293_vm15, %v15787_v15, %v16070_v40  ;;  %v16101_v15 = vand.u32 4294901760, %v7295_v19 }
 0x635   : > { %v7357_v53 = vsel %vm1421_vm4, %v7297_v54, %v7318_v34 }
 0x636   : > { %v7729_v39 = vand.u32 4294901760, %v7728_v38  ;;  %v16095_v26 = vand.u32 4294901760, %v7357_v53  ;;  %v16122_v20 = vsub.f32 %v7295_v19, %v16101_v15 }
 0x638   : > { %7730 = vmatpush.msra.mxu1 %v7729_v39  ;;  %v16107_v58 = vsub.f32 %v7357_v53, %v16095_v26  ;;  %v17943_v47 = vand.u32 4294901760, %v16122_v20 }
 0x63a   : > { %7736 = vmatpush.msra.mxu1 %v7735_v42  ;;  %v7752_v60 = vsub.f32 %v16122_v20, %v17943_v47 }
 0x63b   : > { %v16084_v5 = vpop.permute.xlu2 %7240 }
 0x63c   : > { %v7250_v55 = vsel %vm7248_vm0, %v15697_v22, %v16084_v5 }
 0x63d   : > { %v16125_v27 = vand.u32 4294901760, %v7250_v55 }
 0x63f   : > { %v16160_v2 = vsub.f32 %v7250_v55, %v16125_v27 }
 0x641   : > { %v17940_v34 = vand.u32 4294901760, %v16160_v2 }
 0x643   : > { %v16097_v21 = vpop.permute.xlu2 %7269  ;;  %v16099_v43 = vpop.permute.xlu0 %7246 }
 0x644   : > { %v7274_v24 = vsel %vm1358_vm9, %v15847_v61, %v16097_v21  ;;  %v17945_v61 = vand.u32 4294901760, %v16107_v58  ;;  %v7252_v7 = vsel %vm7248_vm0, %v15750_v51, %v16099_v43  ;;  %v7367_v51 = vsel %vm1421_vm4, %v16049_v6, 0 }
 0x645   : > { %v16109_v23 = vand.u32 4294901760, %v7274_v24 }
 0x646   : > { %v16111_v49 = vpop.permute.xlu1 %7314  ;;  %v7746_v33 = vsub.f32 %v16107_v58, %v17945_v61 }
 0x647   : > { %v7320_v18 = vsel %vm7316_vm14, %v15730_v3, %v16111_v49  ;;  %v16133_v22 = vsub.f32 %v7274_v24, %v16109_v23 }
 0x648   : > { %v16119_v13 = vand.u32 4294901760, %v7320_v18 }
 0x649   : > { %v17942_v45 = vand.u32 4294901760, %v16133_v22 }
 0x64a   : > { %7691 = vmatpush.msra.mxu0 %v16119_v13  ;;  %7871 = vmatpush.msra.mxu3 %v16119_v13  ;;  %v16130_v41 = vsub.f32 %v7320_v18, %v16119_v13  ;;  %v7753_v18 = vand.u32 4294901760, %v7752_v60 }
 0x64b   : > { %v16135_v3 = vpop.permute.xlu2 %7217  ;;  %v16137_v59 = vpop.permute.xlu0 %7223  ;;  %v7758_v42 = vsub.f32 %v16133_v22, %v17942_v45 }
 0x64c   : > { %v7229_v62 = vsel %vm7225_vm1, %v15811_v37, %v16137_v59  ;;  %7693 = vmatpush.msra.mxu0 %v16095_v26  ;;  %7824 = vmatpush.msra.mxu2 %v16130_v41  ;;  %v17946_v57 = vand.u32 4294901760, %v16130_v41 }
 0x64d   : > { %7873 = vmatpush.msra.mxu3 %v16095_v26  ;;  %v16150_v11 = vand.u32 4294901760, %v7229_v62 }
 0x64e   : > { %7695 = vmatpush.msra.mxu0 %v16101_v15  ;;  %7827 = vmatpush.msra.mxu2 %v16107_v58  ;;  %v16154_v37 = vpop.permute.xlu1 %7263  ;;  %v7740_v48 = vsub.f32 %v16130_v41, %v17946_v57 }
 0x64f   : > { %7875 = vmatpush.msra.mxu3 %v16101_v15  ;;  %v7272_v17 = vsel %vm1358_vm9, %v15695_v25, %v16154_v37  ;;  %v7747_v25 = vand.u32 4294901760, %v7746_v33  ;;  %v16186_v54 = vsub.f32 %v7229_v62, %v16150_v11  ;;  %v16204_v62 = vand.u32 4294901760, %v7367_v51 }
 0x650   : > { %v7354_v35 = vsel %vm1421_vm4, %v7252_v7, %v7272_v17  ;;  %7697 = vmatpush.msra.mxu0 %v16109_v23  ;;  %7830 = vmatpush.msra.mxu2 %v16122_v20  ;;  %v7741_v38 = vand.u32 4294901760, %v7740_v48  ;;  %v7759_v7 = vand.u32 4294901760, %v7758_v42  ;;  %v7770_v17 = vsub.f32 %v16160_v2, %v17940_v34 }
 0x651   : > { %v16178_v39 = vand.u32 4294901760, %v7354_v35  ;;  %7877 = vmatpush.msra.mxu3 %v16109_v23  ;;  %v16246_v42 = vand.u32 4294901760, %v16111_v49  ;;  %v7355_v52 = vsel %vm1421_vm4, %v16099_v43, %v16154_v37 }
 0x652   : > { %7742 = vmatpush.msra.mxu1 %v7741_v38  ;;  %7833 = vmatpush.msra.mxu2 %v16133_v22  ;;  %v7227_v38 = vsel %vm7225_vm1, %v15701_v30, %v16135_v3  ;;  %v7771_v47 = vand.u32 4294901760, %v7770_v17 }
 0x653   : > { %v16189_v53 = vpop.permute.xlu2 %7173  ;;  %v16191_v6 = vpop.permute.xlu0 %7195  ;;  %7699 = vmatpush.msra.mxu0 %v16178_v39  ;;  %7879 = vmatpush.msra.mxu3 %v16178_v39  ;;  %v16196_v19 = vsub.f32 %v7354_v35, %v16178_v39  ;;  %v17944_v35 = vand.u32 4294901760, %v16186_v54 }
 0x654   : > { %v7182_v24 = vsel %vm1334_vm10, %v15909_v32, %v16189_v53  ;;  %v7204_v55 = vsel %vm1346_vm8, %v15703_v14, %v16191_v6  ;;  %7748 = vmatpush.msra.mxu1 %v7747_v25  ;;  %v7358_v32 = vsel %vm1421_vm4, %v16070_v40, %v16079_v0  ;;  %v16232_v0 = vand.u32 4294901760, %v16040_v63 }
 0x655   : > { %v16206_v33 = vand.u32 4294901760, %v7204_v55  ;;  %7701 = vmatpush.msra.mxu0 %v16125_v27  ;;  %7836 = vmatpush.msra.mxu2 %v16196_v19  ;;  %v17941_v48 = vand.u32 4294901760, %v16196_v19  ;;  %v7348_v60 = vsel %vm1421_vm4, %v15649_v10, %v7182_v24 }
 0x656   : > { %7881 = vmatpush.msra.mxu3 %v16125_v27  ;;  %7754 = vmatpush.msra.mxu1 %v7753_v18  ;;  %v16215_v14 = vpop.permute.xlu1 %7201  ;;  %v18184_v18 = vld [vmem:[#allocation15_spill] sm:$0xff]  ;;  %v16269_v45 = vsub.f32 %v16040_v63, %v16232_v0 }
 0x657   : > { %18183 = vst [vmem:[#allocation9_spill] sm:$0xff] %v16206_v33  ;;  %v7206_v40 = vsel %vm1346_vm8, %v15711_v44, %v16215_v14  ;;  %7703 = vmatpush.msra.mxu0 %v16150_v11  ;;  %7839 = vmatpush.msra.mxu2 %v16160_v2  ;;  %v7764_v10 = vsub.f32 %v16196_v19, %v17941_v48 }
 0x658   : > { %v7351_v25 = vsel %vm1421_vm4, %v7206_v40, %v7227_v38  ;;  %7883 = vmatpush.msra.mxu3 %v16150_v11  ;;  %7760 = vmatpush.msra.mxu1 %v7759_v7  ;;  %v16240_v30 = vsub.f32 %v7204_v55, %v16206_v33  ;;  %v16243_v44 = vsub.f32 %v7367_v51, %v16204_v62  ;;  %v16252_v38 = vand.u32 4294901760, %v18184_v18 }
 0x659   : > { %v16248_v24 = vand.u32 4294901760, %v7351_v25  ;;  %7842 = vmatpush.msra.mxu2 %v16186_v54  ;;  %v16254_v7 = vand.u32 4294901760, %v7358_v32  ;;  %v16256_v40 = vand.u32 4294901760, %v7348_v60  ;;  %v7765_v34 = vand.u32 4294901760, %v7764_v10  ;;  %18187 = vst [vmem:[#allocation11_spill] sm:$0xff] %v16269_v45 }
 0x65a   : > { %18185 = vst [vmem:[#allocation8_spill] sm:$0xff] %v16252_v38  ;;  %v7776_v51 = vsub.f32 %v16186_v54, %v17944_v35  ;;  %v17950_v48 = vand.u32 4294901760, %v16240_v30  ;;  %v16272_v10 = vand.u32 4294901760, %v16089_v28  ;;  %v16276_v35 = vsub.f32 %v16111_v49, %v16246_v42 }
 0x65b   : > { %18186 = vst [vmem:[#allocation10_spill] sm:$0xff] %v16256_v40  ;;  %7705 = vmatpush.msra.mxu0 %v16248_v24  ;;  %7885 = vmatpush.msra.mxu3 %v16248_v24  ;;  %v16264_v55 = vsub.f32 %v7351_v25, %v16248_v24  ;;  %v16283_v61 = vsub.f32 %v18184_v18, %v16252_v38  ;;  %v17951_v63 = vand.u32 4294901760, %v16243_v44 }
 0x65c   : > { %7766 = vmatpush.msra.mxu1 %v7765_v34  ;;  %18188 = vst [vmem:[#allocation12_spill] sm:$0xff] %v16276_v35  ;;  %v16287_v34 = vsub.f32 %v7358_v32, %v16254_v7  ;;  %v7777_v17 = vand.u32 4294901760, %v7776_v51  ;;  %v16293_v57 = vsub.f32 %v7348_v60, %v16256_v40  ;;  %v7788_v32 = vsub.f32 %v16240_v30, %v17950_v48 }
 0x65d   : > { %7707 = vmatpush.msra.mxu0 %v16206_v33  ;;  %7845 = vmatpush.msra.mxu2 %v16264_v55  ;;  %v17949_v25 = vand.u32 4294901760, %v16264_v55  ;;  %v16309_v60 = vand.u32 4294901760, %v16097_v21  ;;  %v16322_v48 = vand.u32 4294901760, %v7355_v52 }
 0x65e   : > { %18189 = vst [vmem:[#allocation13_spill] sm:$0xff] %v16287_v34  ;;  %7772 = vmatpush.msra.mxu1 %v7771_v47  ;;  %7887 = vmatpush.msra.mxu3 %v16206_v33  ;;  %v16290_v49 = vpop.permute.xlu1 %7179  ;;  %v18196_v29 = vand.u32 4294901760, %v16287_v34 }
 0x65f   : > { %v7184_v18 = vsel %vm1334_vm10, %v15849_v50, %v16290_v49  ;;  %7848 = vmatpush.msra.mxu2 %v16240_v30  ;;  %v7782_v47 = vsub.f32 %v16264_v55, %v17949_v25  ;;  %v16316_v50 = vsub.f32 %v16089_v28, %v16272_v10  ;;  %v8043_v25 = vsub.f32 %v16243_v44, %v17951_v63 }
 0x660   : > { %v16311_v51 = vand.u32 4294901760, %v7184_v18  ;;  %7778 = vmatpush.msra.mxu1 %v7777_v17  ;;  %v16331_v28 = vand.u32 4294901760, %v16084_v5  ;;  %v16337_v33 = vsub.f32 %v16097_v21, %v16309_v60  ;;  %v18192_v21 = vand.u32 4294901760, %v16276_v35 }
 0x661   : > { %v7783_v37 = vand.u32 4294901760, %v7782_v47  ;;  %v7789_v47 = vand.u32 4294901760, %v7788_v32  ;;  %v16346_v32 = vand.u32 4294901760, %v16137_v59 }
 0x662   : > { %18190 = vst [vmem:[#allocation16_spill] sm:$0xff] %v16311_v51  ;;  %7709 = vmatpush.msra.mxu0 %v16311_v51  ;;  %7889 = vmatpush.msra.mxu3 %v16311_v51  ;;  %v16327_v17 = vsub.f32 %v7184_v18, %v16311_v51  ;;  %v18191_v18 = vand.u32 4294901760, %v16269_v45  ;;  %v8055_v63 = vsub.f32 %v16276_v35, %v18192_v21  ;;  %v8044_v51 = vand.u32 4294901760, %v8043_v25 }
 0x663   : > { %7784 = vmatpush.msra.mxu1 %v7783_v37  ;;  %v7352_v37 = vsel %vm1421_vm4, %v16215_v14, %v16135_v3  ;;  %v18194_v14 = vand.u32 4294901760, %v16293_v57  ;;  %v16369_v21 = vsub.f32 %v16084_v5, %v16331_v28  ;;  %v8061_v25 = vsub.f32 %v16287_v34, %v18196_v29 }
 0x664   : > { %7711 = vmatpush.msra.mxu0 %v16256_v40  ;;  %7851 = vmatpush.msra.mxu2 %v16327_v17  ;;  %v8049_v43 = vsub.f32 %v16269_v45, %v18191_v18  ;;  %v16357_v18 = vsub.f32 %v7355_v52, %v16322_v48  ;;  %v18193_v45 = vand.u32 4294901760, %v16327_v17  ;;  %v18195_v52 = vand.u32 4294901760, %v16061_v4 }
 0x665   : > { %7891 = vmatpush.msra.mxu3 %v16256_v40  ;;  %7790 = vmatpush.msra.mxu1 %v7789_v47  ;;  %v7800_v47 = vsub.f32 %v16293_v57, %v18194_v14  ;;  %v18197_v40 = vand.u32 4294901760, %v16283_v61  ;;  %v16380_v35 = vand.u32 4294901760, %v7352_v37  ;;  %v16386_v4 = vsub.f32 %v16137_v59, %v16346_v32 }
 0x666   : > { %7713 = vmatpush.msra.mxu0 %v16252_v38  ;;  %7854 = vmatpush.msra.mxu2 %v16293_v57  ;;  %v7794_v3 = vsub.f32 %v16327_v17, %v18193_v45  ;;  %v8050_v5 = vand.u32 4294901760, %v8049_v43  ;;  %v18199_v29 = vand.u32 4294901760, %v16316_v50  ;;  %v8056_v43 = vand.u32 4294901760, %v8055_v63 }
 0x667   : > { %7893 = vmatpush.msra.mxu3 %v16252_v38  ;;  %v7806_v45 = vsub.f32 %v16283_v61, %v18197_v40  ;;  %v8078_v38 = vand.u32 4294901760, %v16357_v18  ;;  %v18200_v59 = vand.u32 4294901760, %v16130_v41  ;;  %v8084_v34 = vand.u32 4294901760, %v16369_v21  ;;  %7719 = vmatmul.f32.vlgmr.msra.gmra.mxu0 %v15999_v36 }
 0x668   : > { %7906 = vmatpush.msrb.mxu0 %v18195_v52  ;;  %7857 = vmatpush.msra.mxu2 %v16283_v61  ;;  %v7795_v14 = vand.u32 4294901760, %v7794_v3  ;;  %v18198_v52 = vand.u32 4294901760, %v16055_v56  ;;  %v8067_v40 = vsub.f32 %v16316_v50, %v18199_v29  ;;  %v7801_v3 = vand.u32 4294901760, %v7800_v47 }
 0x669   : > { %8045 = vmatpush.msrb.mxu3 %v8044_v51  ;;  %v16395_v51 = vand.u32 4294901760, %v16191_v6  ;;  %v8062_v56 = vand.u32 4294901760, %v8061_v25  ;;  %v7349_v29 = vsel %vm1421_vm4, %v15713_v8, %v16189_v53  ;;  %v16409_v63 = vand.u32 4294901760, %v16290_v49  ;;  %7860 = vmatmul.f32.vlgmr.msra.gmra.mxu2 %v15978_v12 }
 0x66a   : > { %7910 = vmatpush.msrb.mxu0 %v18198_v52  ;;  %8002 = vmatpush.msrb.mxu2 %v16204_v62  ;;  %v7807_v52 = vand.u32 4294901760, %v7806_v45  ;;  %v18201_v41 = vand.u32 4294901760, %v16337_v33  ;;  %v18202_v25 = vand.u32 4294901760, %v16107_v58  ;;  %v8068_v53 = vand.u32 4294901760, %v8067_v40 }
 0x66b   : > { %8051 = vmatpush.msrb.mxu3 %v8050_v5  ;;  %7796 = vmatpush.msra.mxu1 %v7795_v14  ;;  %v16406_v5 = vsub.f32 %v7352_v37, %v16380_v35  ;;  %v16419_v8 = vsub.f32 %v16191_v6, %v16395_v51  ;;  %v8079_v37 = vsub.f32 %v16357_v18, %v8078_v38  ;;  %v8090_v45 = vand.u32 4294901760, %v16386_v4 }
 0x66c   : > { %7914 = vmatpush.msrb.mxu0 %v18200_v59  ;;  %8004 = vmatpush.msrb.mxu2 %v16232_v0  ;;  %v8073_v47 = vsub.f32 %v16337_v33, %v18201_v41  ;;  %v16425_v14 = vand.u32 4294901760, %v7349_v29  ;;  %v18203_v58 = vand.u32 4294901760, %v16122_v20  ;;  %v16432_v6 = vsub.f32 %v16290_v49, %v16409_v63 }
 0x66d   : > { %8057 = vmatpush.msrb.mxu3 %v8056_v43  ;;  %7802 = vmatpush.msra.mxu1 %v7801_v3  ;;  %v8085_v43 = vsub.f32 %v16369_v21, %v8084_v34  ;;  %v8096_v3 = vand.u32 4294901760, %v16406_v5  ;;  %v18204_v59 = vand.u32 4294901760, %v16133_v22  ;;  %v8091_v20 = vsub.f32 %v16386_v4, %v8090_v45 }
 0x66e   : > { %7918 = vmatpush.msrb.mxu0 %v18202_v25  ;;  %8006 = vmatpush.msrb.mxu2 %v16246_v42  ;;  %v8074_v40 = vand.u32 4294901760, %v8073_v47  ;;  %v8102_v49 = vand.u32 4294901760, %v16419_v8  ;;  %v18205_v22 = vand.u32 4294901760, %v16196_v19  ;;  %v8108_v47 = vand.u32 4294901760, %v16432_v6 }
 0x66f   : > { %8063 = vmatpush.msrb.mxu3 %v8062_v56  ;;  %7808 = vmatpush.msra.mxu1 %v7807_v52  ;;  %v16448_v56 = vand.u32 4294901760, %v15666_v16  ;;  %v16451_v52 = vsub.f32 %v7349_v29, %v16425_v14  ;;  %v8097_v41 = vsub.f32 %v16406_v5, %v8096_v3  ;;  %v18206_v25 = vand.u32 4294901760, %v16160_v2 }
 0x670   : > { %7922 = vmatpush.msrb.mxu0 %v18203_v58  ;;  %8008 = vmatpush.msrb.mxu2 %v16254_v7  ;;  %v8092_v19 = vand.u32 4294901760, %v8091_v20  ;;  %v18208_v58 = vand.u32 4294901760, %v16264_v55  ;;  %v18219_v20 = vld [vmem:[#allocation10_spill] sm:$0xff] }
 0x671   : > { %7967 = vmatpush.msrb.mxu1 %v16058_v9  ;;  %8069 = vmatpush.msrb.mxu3 %v8068_v53  ;;  %v8080_v9 = vand.u32 4294901760, %v8079_v37  ;;  %v16470_v29 = vsub.f32 %v15666_v16, %v16448_v56  ;;  %v18207_v53 = vand.u32 4294901760, %v16186_v54  ;;  %v8114_v2 = vand.u32 4294901760, %v16451_v52 }
 0x672   : > { %7926 = vmatpush.msrb.mxu0 %v18204_v59  ;;  %8010 = vmatpush.msrb.mxu2 %v16272_v10  ;;  %v8109_v37 = vsub.f32 %v16432_v6, %v8108_v47  ;;  %v18209_v54 = vand.u32 4294901760, %v16240_v30  ;;  %v18211_v30 = vand.u32 4294901760, %v16293_v57  ;;  %v18213_v57 = vld [vmem:[#allocation9_spill] sm:$0xff]  ;;  %v18217_v59 = vld [vmem:[#allocation12_spill] sm:$0xff] }
 0x673   : > { %7969 = vmatpush.msrb.mxu1 %v16047_v46  ;;  %8075 = vmatpush.msrb.mxu3 %v8074_v40  ;;  %v8086_v46 = vand.u32 4294901760, %v8085_v43  ;;  %v8115_v40 = vsub.f32 %v16451_v52, %v8114_v2 }
 0x674   : > { %7930 = vmatpush.msrb.mxu0 %v18205_v22  ;;  %8012 = vmatpush.msrb.mxu2 %v16309_v60  ;;  %v8110_v55 = vand.u32 4294901760, %v8109_v37  ;;  %v18220_v22 = vand.u32 4294901760, %v18217_v59 }
 0x675   : > { %7971 = vmatpush.msrb.mxu1 %v16119_v13  ;;  %8081 = vmatpush.msrb.mxu3 %v8080_v9  ;;  %v8103_v13 = vsub.f32 %v16419_v8, %v8102_v49  ;;  %v8116_v43 = vand.u32 4294901760, %v8115_v40 }
 0x676   : > { %7934 = vmatpush.msrb.mxu0 %v18206_v25  ;;  %8014 = vmatpush.msrb.mxu2 %v16322_v48  ;;  %v18224_v25 = vand.u32 4294901760, %v16316_v50 }
 0x677   : > { %7973 = vmatpush.msrb.mxu1 %v16095_v26  ;;  %8087 = vmatpush.msrb.mxu3 %v8086_v46  ;;  %v8098_v26 = vand.u32 4294901760, %v8097_v41  ;;  %v8104_v16 = vand.u32 4294901760, %v8103_v13  ;;  %v18222_v46 = vld [vmem:[#allocation8_spill] sm:$0xff] }
 0x678   : > { %7938 = vmatpush.msrb.mxu0 %v18207_v53  ;;  %8016 = vmatpush.msrb.mxu2 %v16331_v28 }
 0x679   : > { %7975 = vmatpush.msrb.mxu1 %v16101_v15  ;;  %8093 = vmatpush.msrb.mxu3 %v8092_v19  ;;  %v8120_v15 = vand.u32 4294901760, %v16470_v29  ;;  %v18225_v19 = vand.u32 4294901760, %v16337_v33 }
 0x67a   : > { %7942 = vmatpush.msrb.mxu0 %v18208_v58  ;;  %8018 = vmatpush.msrb.mxu2 %v16346_v32 }
 0x67b   : > { %7977 = vmatpush.msrb.mxu1 %v16109_v23  ;;  %8099 = vmatpush.msrb.mxu3 %v8098_v26  ;;  %v18210_v23 = vand.u32 4294901760, %v16327_v17  ;;  %v8351_v26 = vld [vmem:[#allocation2 + $0x80] sm:$0xff] }
 0x67c   : > { %7946 = vmatpush.msrb.mxu0 %v18209_v54  ;;  %8020 = vmatpush.msrb.mxu2 %v16380_v35 }
 0x67d   : > { %7979 = vmatpush.msrb.mxu1 %v16178_v39  ;;  %8105 = vmatpush.msrb.mxu3 %v8104_v16  ;;  %v8121_v39 = vsub.f32 %v16470_v29, %v8120_v15 }
 0x67e   : > { %7950 = vmatpush.msrb.mxu0 %v18210_v23  ;;  %8022 = vmatpush.msrb.mxu2 %v16395_v51  ;;  %v8347_v23 = vld [vmem:[#allocation2 + $0x60] sm:$0xff] }
 0x67f   : > { %7981 = vmatpush.msrb.mxu1 %v16125_v27  ;;  %8111 = vmatpush.msrb.mxu3 %v8110_v55  ;;  %v18212_v27 = vand.u32 4294901760, %v16283_v61  ;;  %v8122_v17 = vand.u32 4294901760, %v8121_v39  ;;  %v18215_v61 = vand.u32 4294901760, %v16243_v44 }
 0x680   : > { %7954 = vmatpush.msrb.mxu0 %v18211_v30  ;;  %8024 = vmatpush.msrb.mxu2 %v16409_v63  ;;  %v16644_v30 = vpop.permute.xlu0 %8317 }
 0x681   : > { %7983 = vmatpush.msrb.mxu1 %v16150_v11  ;;  %8117 = vmatpush.msrb.mxu3 %v8116_v43  ;;  %v18214_v11 = vld [vmem:[#allocation11_spill] sm:$0xff]  ;;  %18226 = vst [vmem:[#allocation14_spill] sm:$0xff] %v16644_v30 }
 0x682   : > { %7897 = vmatmul.f32.vlgmr.msra.gmra.mxu3 %v15986_v1  ;;  %7958 = vmatpush.msrb.mxu0 %v18212_v27  ;;  %v18218_v9 = vand.u32 4294901760, %v18214_v11 }
 0x683   : > { %7985 = vmatpush.msrb.mxu1 %v16248_v24  ;;  %8026 = vmatpush.msrb.mxu2 %v16425_v14  ;;  %v18216_v24 = vld [vmem:[#allocation16_spill] sm:$0xff] }
 0x684   : > { %8123 = vmatpush.msrb.mxu3 %v8122_v17  ;;  %7810 = vmatmul.f32.vlgmr.msra.gmra.mxu1 %v15968_v31 }
 0x685   : > { %8133 = vmatpush.msra.mxu0 %v16243_v44  ;;  %7987 = vmatpush.msrb.mxu1 %v18213_v57  ;;  %v18221_v44 = vld [vmem:[#allocation13_spill] sm:$0xff] }
 0x686   : > { %8282 = vmatpush.msra.mxu3 %v16204_v62  ;;  %8028 = vmatpush.msrb.mxu2 %v16448_v56  ;;  %v18223_v41 = vand.u32 4294901760, %v18221_v44 }
 0x687   : > { %8136 = vmatpush.msra.mxu0 %v18214_v11  ;;  %7989 = vmatpush.msrb.mxu1 %v18216_v24  ;;  %v16665_v24 = vand.u32 4294901760, %v8347_v23 }
 0x688   : > { %8221 = vmatpush.msra.mxu2 %v18215_v61  ;;  %8284 = vmatpush.msra.mxu3 %v16232_v0 }
 0x689   : > { %8139 = vmatpush.msra.mxu0 %v18217_v59  ;;  %7991 = vmatpush.msrb.mxu1 %v18219_v20 }
 0x68a   : > { %8225 = vmatpush.msra.mxu2 %v18218_v9  ;;  %8286 = vmatpush.msra.mxu3 %v16246_v42  ;;  %v16668_v9 = vpop.permute.xlu1 %8326 }
 0x68b   : > { %7960 = vmatmul.f32.vlgmr.msrb.gmra.mxu0 %v15968_v31  ;;  %7993 = vmatpush.msrb.mxu1 %v18222_v46  ;;  %18227 = vst [vmem:[#allocation15_spill] sm:$0xff] %v16668_v9 }
 0x68c   : > { %8229 = vmatpush.msra.mxu2 %v18220_v22  ;;  %8142 = vmatpush.msra.mxu0 %v18221_v44  ;;  %v8343_v22 = vld [vmem:[#allocation2 + $0x40] sm:$0xff] }
 0x68d   : > { %8288 = vmatpush.msra.mxu3 %v16254_v7  ;;  %7995 = vmatmul.f32.vlgmr.msrb.gmra.mxu1 %v15968_v31 }
 0x68e   : > { %8233 = vmatpush.msra.mxu2 %v18223_v41  ;;  %8145 = vmatpush.msra.mxu0 %v16316_v50 }
 0x68f   : > { %8182 = vmatpush.msra.mxu1 %v16204_v62  ;;  %8290 = vmatpush.msra.mxu3 %v16272_v10  ;;  %v7496_v62 = vpop.f32.mrf.mxu3 }
 0x690   : > { %8148 = vmatpush.msra.mxu0 %v16337_v33  ;;  %8237 = vmatpush.msra.mxu2 %v18224_v25  ;;  %v8365_v33 = vld [vmem:[#allocation2 + $0xf0] sm:$0xff] }
 0x691   : > { %8184 = vmatpush.msra.mxu1 %v16232_v0  ;;  %8292 = vmatpush.msra.mxu3 %v16309_v60  ;;  %v7405_v0 = vpop.f32.mrf.mxu2 }
 0x692   : > { %8151 = vmatpush.msra.mxu0 %v16357_v18  ;;  %8241 = vmatpush.msra.mxu2 %v18225_v19  ;;  %v8341_v19 = vld [vmem:[#allocation2 + $0x30] sm:$0xff] }
 0x693   : > { %8186 = vmatpush.msra.mxu1 %v16246_v42  ;;  %8294 = vmatpush.msra.mxu3 %v16322_v48  ;;  %v8363_v42 = vld [vmem:[#allocation2 + $0xe0] sm:$0xff] }
 0x694   : > { %8154 = vmatpush.msra.mxu0 %v16369_v21  ;;  %8245 = vmatpush.msra.mxu2 %v8078_v38  ;;  %v7497_v38 = vadd.f32 %v7496_v62, %v7405_v0  ;;  %v16569_v50 = vand.u32 4294901760, %v8363_v42  ;;  %v16693_v0 = vsub.f32 %v8347_v23, %v16665_v24 }
 0x695   : > { %8188 = vmatpush.msra.mxu1 %v16254_v7  ;;  %8296 = vmatpush.msra.mxu3 %v16331_v28  ;;  %v16562_v7 = vand.u32 4294901760, %v8365_v33 }
 0x696   : > { %8157 = vmatpush.msra.mxu0 %v16386_v4  ;;  %8249 = vmatpush.msra.mxu2 %v8084_v34  ;;  %v7546_v34 = vpop.f32.mrf.mxu0 }
 0x697   : > { %8190 = vmatpush.msra.mxu1 %v16272_v10  ;;  %8298 = vmatpush.msra.mxu3 %v16346_v32  ;;  %v8361_v10 = vld [vmem:[#allocation2 + $0xd0] sm:$0xff]  ;;  %v7547_v18 = vadd.f32 %v7546_v34, %v7497_v38  ;;  %v16577_v21 = vsub.f32 %v8365_v33, %v16562_v7 }
 0x698   : > { %8160 = vmatpush.msra.mxu0 %v16406_v5  ;;  %8253 = vmatpush.msra.mxu2 %v8090_v45  ;;  %v16579_v4 = vand.u32 4294901760, %v8361_v10  ;;  %v7583_v5 = vpop.f32.mrf.mxu1 }
 0x699   : > { %8192 = vmatpush.msra.mxu1 %v16309_v60  ;;  %8300 = vmatpush.msra.mxu3 %v16380_v35  ;;  %v8359_v60 = vld [vmem:[#allocation2 + $0xc0] sm:$0xff] }
 0x69a   : > { %8163 = vmatpush.msra.mxu0 %v16419_v8  ;;  %8257 = vmatpush.msra.mxu2 %v8096_v3  ;;  %v16586_v8 = vsub.f32 %v8363_v42, %v16569_v50  ;;  %v8355_v3 = vld [vmem:[#allocation2 + $0xa0] sm:$0xff]  ;;  %v16695_v42 = vand.u32 4294901760, %v8343_v22 }
 0x69b   : > { %8194 = vmatpush.msra.mxu1 %v16322_v48  ;;  %8302 = vmatpush.msra.mxu3 %v16395_v51  ;;  %v8357_v48 = vld [vmem:[#allocation2 + $0xb0] sm:$0xff] }
 0x69c   : > { %8166 = vmatpush.msra.mxu0 %v16432_v6  ;;  %8261 = vmatpush.msra.mxu2 %v8102_v49  ;;  %v16593_v45 = vand.u32 4294901760, %v8357_v48  ;;  %v17976_v49 = vand.u32 4294901760, %v16577_v21  ;;  %v8353_v6 = vld [vmem:[#allocation2 + $0x90] sm:$0xff]  ;;  %v17975_v53 = vand.u32 4294901760, %v16586_v8 }
 0x69d   : > { %8196 = vmatpush.msra.mxu1 %v16331_v28  ;;  %8304 = vmatpush.msra.mxu3 %v16409_v63  ;;  %v16588_v28 = vand.u32 4294901760, %v8359_v60  ;;  %v16623_v37 = vand.u32 4294901760, %v8353_v6 }
 0x69e   : > { %8034 = vmatmul.f32.vlgmr.msrb.gmra.mxu2 %v15999_v36  ;;  %8125 = vmatmul.f32.vlgmr.msrb.gmra.mxu3 %v15968_v31  ;;  %v7584_v36 = vadd.f32 %v7583_v5, %v7547_v18  ;;  %v8461_v16 = vsub.f32 %v16586_v8, %v17975_v53  ;;  %v16708_v5 = vand.u32 4294901760, %v8341_v19 }
 0x69f   : > { %8169 = vmatpush.msra.mxu0 %v16451_v52  ;;  %8198 = vmatpush.msra.mxu1 %v16346_v32  ;;  %v16598_v32 = vsub.f32 %v8361_v10, %v16579_v4  ;;  %v16616_v52 = vsub.f32 %v8357_v48, %v16593_v45  ;;  %v16652_v17 = vsub.f32 %v8353_v6, %v16623_v37  ;;  %v8339_v10 = vld [vmem:[#allocation2 + $0x20] sm:$0xff] }
 0x6a0   : > { %8265 = vmatpush.msra.mxu2 %v8108_v47  ;;  %8306 = vmatpush.msra.mxu3 %v16425_v14  ;;  %v7646_v13 = vpop.f32.mrf.mxu2  ;;  %v16607_v47 = vsub.f32 %v8359_v60, %v16588_v28  ;;  %v8462_v11 = vand.u32 4294901760, %v8461_v16  ;;  %v16717_v6 = vsub.f32 %v8343_v22, %v16695_v42 }
 0x6a1   : > { %8172 = vmatpush.msra.mxu0 %v16470_v29  ;;  %8200 = vmatpush.msra.mxu1 %v16380_v35  ;;  %v16609_v35 = vand.u32 4294901760, %v8355_v3  ;;  %v17973_v58 = vand.u32 4294901760, %v16598_v32  ;;  %v8349_v29 = vld [vmem:[#allocation2 + $0x70] sm:$0xff]  ;;  %v17971_v55 = vand.u32 4294901760, %v16616_v52 }
 0x6a2   : > { %8269 = vmatpush.msra.mxu2 %v8114_v2  ;;  %8308 = vmatpush.msra.mxu3 %v16448_v56  ;;  %v7647_v2 = vadd.f32 %v7646_v13, %v7584_v36  ;;  %v17972_v54 = vand.u32 4294901760, %v16607_v47 }
 0x6a3   : > { %8412 = vmatpush.msrb.mxu0 %v16562_v7  ;;  %8202 = vmatpush.msra.mxu1 %v16395_v51  ;;  %v8455_v51 = vsub.f32 %v16577_v21, %v17976_v49  ;;  %v8467_v27 = vsub.f32 %v16598_v32, %v17973_v58 }
 0x6a4   : > { %8273 = vmatpush.msra.mxu2 %v8120_v15  ;;  %8175 = vmatmul.f32.vlgmr.msra.gmra.mxu0 %v15978_v12  ;;  %v16628_v12 = vand.u32 4294901760, %v8351_v26  ;;  %v16636_v15 = vsub.f32 %v8355_v3, %v16609_v35  ;;  %v8473_v61 = vsub.f32 %v16607_v47, %v17972_v54  ;;  %v8337_v3 = vld [vmem:[#allocation2 + $0x10] sm:$0xff] }
 0x6a5   : > { %8414 = vmatpush.msrb.mxu0 %v16569_v50  ;;  %8204 = vmatpush.msra.mxu1 %v16409_v63  ;;  %v16641_v63 = vand.u32 4294901760, %v8349_v29  ;;  %v8456_v43 = vand.u32 4294901760, %v8455_v51  ;;  %v8468_v44 = vand.u32 4294901760, %v8467_v27  ;;  %v8397_v51 = vld [vmem:[#allocation2 + $0x1f0] sm:$0xff]  ;;  %v16727_v16 = vand.u32 4294901760, %v8337_v3 }
 0x6a6   : > { %8555 = vmatpush.msrb.mxu2 %v16577_v21  ;;  %8608 = vmatpush.msrb.mxu3 %v16562_v7  ;;  %v17969_v59 = vand.u32 4294901760, %v16636_v15  ;;  %v8474_v62 = vand.u32 4294901760, %v8473_v61 }
 0x6a7   : > { %8275 = vmatmul.f32.vlgmr.msra.gmra.mxu2 %v15968_v31  ;;  %8416 = vmatpush.msrb.mxu0 %v16579_v4  ;;  %v16676_v20 = vsub.f32 %v8349_v29, %v16641_v63  ;;  %18228 = vst [vmem:[#allocation9_spill] sm:$0xff] %v16727_v16 }
 0x6a8   : > { %8558 = vmatpush.msrb.mxu2 %v16586_v8  ;;  %v7681_v40 = vpop.f32.mrf.mxu3  ;;  %8206 = vmatpush.msra.mxu1 %v16425_v14  ;;  %v16657_v14 = vsub.f32 %v8351_v26, %v16628_v12  ;;  %v8485_v33 = vsub.f32 %v16636_v15, %v17969_v59  ;;  %v16719_v26 = vand.u32 4294901760, %v8339_v10 }
 0x6a9   : > { %v7682_v39 = vadd.f32 %v7681_v40, %v7647_v2  ;;  %8310 = vmatmul.f32.vlgmr.msra.gmra.mxu3 %v15968_v31  ;;  %8418 = vmatpush.msrb.mxu0 %v16588_v28  ;;  %v8345_v31 = vld [vmem:[#allocation2 + $0x50] sm:$0xff]  ;;  %v17965_v34 = vand.u32 4294901760, %v16676_v20  ;;  %v17963_v2 = vand.u32 4294901760, %v16693_v0  ;;  %v8335_v40 = vld [vmem:[#allocation2] sm:$0xff] }
 0x6aa   : > { %8561 = vmatpush.msrb.mxu2 %v16598_v32  ;;  %8610 = vmatpush.msrb.mxu3 %v16569_v50  ;;  %v16682_v41 = vand.u32 4294901760, %v8345_v31  ;;  %v17966_v25 = vand.u32 4294901760, %v16657_v14  ;;  %v8486_v13 = vand.u32 4294901760, %v8485_v33  ;;  %v16747_v22 = vand.u32 4294901760, %v8335_v40 }
 0x6ab   : > { %v8320_v57 = vmul.f32 %v16644_v30, %v7682_v39  ;;  %8208 = vmatpush.msra.mxu1 %v16448_v56  ;;  %8420 = vmatpush.msrb.mxu0 %v16593_v45  ;;  %v8479_v56 = vsub.f32 %v16616_v52, %v17971_v55  ;;  %v8503_v29 = vsub.f32 %v16676_v20, %v17965_v34 }
 0x6ac   : > { %8212 = vmatmul.f32.vlgmr.msra.gmra.mxu1 %v15986_v1  ;;  %8564 = vmatpush.msrb.mxu2 %v16607_v47  ;;  %v17968_v1 = vand.u32 4294901760, %v16652_v17  ;;  %v16706_v48 = vsub.f32 %v8345_v31, %v16682_v41  ;;  %v8497_v36 = vsub.f32 %v16657_v14, %v17966_v25  ;;  %v16738_v31 = vand.u32 4294901760, %v8397_v51 }
 0x6ad   : > { %8457 = vmatpush.msrb.mxu1 %v8456_v43  ;;  %8612 = vmatpush.msrb.mxu3 %v16579_v4  ;;  %v16680_v46 = vadd.f32 %v16668_v9, %v8320_v57  ;;  %v8480_v38 = vand.u32 4294901760, %v8479_v56  ;;  %v16733_v43 = vsub.f32 %v8341_v19, %v16708_v5  ;;  %v8509_v61 = vsub.f32 %v16693_v0, %v17963_v2 }
 0x6ae   : > { %8422 = vmatpush.msrb.mxu0 %v16609_v35  ;;  %8567 = vmatpush.msrb.mxu2 %v16616_v52  ;;  %v8491_v18 = vsub.f32 %v16652_v17, %v17968_v1  ;;  %v17962_v27 = vand.u32 4294901760, %v16706_v48  ;;  %v8498_v57 = vand.u32 4294901760, %v8497_v36  ;;  %v16745_v56 = vsub.f32 %v8339_v10, %v16719_v26  ;;  %v8391_v36 = vld [vmem:[#allocation2 + $0x1c0] sm:$0xff] }
 0x6af   : > { %8463 = vmatpush.msrb.mxu1 %v8462_v11  ;;  %8614 = vmatpush.msrb.mxu3 %v16588_v28  ;;  %v8332_v60 = vmax.f32 %v16680_v46, 0.0  ;;  %v8395_v11 = vld [vmem:[#allocation2 + $0x1e0] sm:$0xff]  ;;  %v8393_v46 = vld [vmem:[#allocation2 + $0x1d0] sm:$0xff]  ;;  %v8504_v19 = vand.u32 4294901760, %v8503_v29  ;;  %v17967_v10 = vand.u32 4294901760, %v16733_v43  ;;  %v16783_v2 = vand.u32 4294901760, %v8391_v36 }
 0x6b0   : > { %8424 = vmatpush.msrb.mxu0 %v16623_v37  ;;  %8570 = vmatpush.msrb.mxu2 %v16636_v15  ;;  %v8492_v39 = vand.u32 4294901760, %v8491_v18  ;;  %v16763_v18 = vand.u32 4294901760, %v8395_v11  ;;  %v18232_v9 = vand.u32 4294901760, %v16577_v21 }
 0x6b1   : > { %8469 = vmatpush.msrb.mxu1 %v8468_v44  ;;  %8616 = vmatpush.msrb.mxu3 %v16593_v45  ;;  %v16730_v23 = vand.u32 4294901760, %v8332_v60  ;;  %v17964_v44 = vand.u32 4294901760, %v16717_v6 }
 0x6b2   : > { %8426 = vmatpush.msrb.mxu0 %v16628_v12  ;;  %8573 = vmatpush.msrb.mxu2 %v16652_v17  ;;  %v16793_v34 = vsub.f32 %v8395_v11, %v16763_v18 }
 0x6b3   : > { %8475 = vmatpush.msrb.mxu1 %v8474_v62  ;;  %8618 = vmatpush.msrb.mxu3 %v16609_v35  ;;  %v16753_v62 = vsub.f32 %v8337_v3, %v16727_v16  ;;  %v16756_v33 = vsub.f32 %v8332_v60, %v16730_v23  ;;  %v16768_v3 = vsub.f32 %v8397_v51, %v16738_v31  ;;  %v16770_v60 = vand.u32 4294901760, %v8393_v46 }
 0x6b4   : > { %8428 = vmatpush.msrb.mxu0 %v16641_v63  ;;  %8576 = vmatpush.msrb.mxu2 %v16657_v14  ;;  %v8521_v29 = vsub.f32 %v16717_v6, %v17964_v44  ;;  %18231 = vst [vmem:[#allocation12_spill] sm:$0xff] %v16793_v34 }
 0x6b5   : > { %8481 = vmatpush.msrb.mxu1 %v8480_v38  ;;  %8620 = vmatpush.msrb.mxu3 %v16623_v37  ;;  %18229 = vst [vmem:[#allocation11_spill] sm:$0xff] %v16756_v33  ;;  %v8515_v38 = vsub.f32 %v16706_v48, %v17962_v27  ;;  %v17970_v27 = vand.u32 4294901760, %v16745_v56  ;;  %v17974_v51 = vand.u32 4294901760, %v16753_v62  ;;  %v16790_v44 = vand.u32 4294901760, %v16756_v33 }
 0x6b6   : > { %8430 = vmatpush.msrb.mxu0 %v16665_v24  ;;  %8579 = vmatpush.msrb.mxu2 %v16676_v20  ;;  %v17979_v25 = vand.u32 4294901760, %v16768_v3 }
 0x6b7   : > { %8487 = vmatpush.msrb.mxu1 %v8486_v13  ;;  %8622 = vmatpush.msrb.mxu3 %v16628_v12  ;;  %v8510_v13 = vand.u32 4294901760, %v8509_v61  ;;  %v8516_v61 = vand.u32 4294901760, %v8515_v38  ;;  %18230 = vst [vmem:[#allocation16_spill] sm:$0xff] %v16790_v44  ;;  %v8387_v38 = vld [vmem:[#allocation2 + $0x1a0] sm:$0xff]  ;;  %v8533_v1 = vsub.f32 %v16745_v56, %v17970_v27  ;;  %v8446_v55 = vsub.f32 %v16756_v33, %v16790_v44 }
 0x6b8   : > { %8432 = vmatpush.msrb.mxu0 %v16682_v41  ;;  %8582 = vmatpush.msrb.mxu2 %v16693_v0  ;;  %v16820_v58 = vand.u32 4294901760, %v8387_v38 }
 0x6b9   : > { %8493 = vmatpush.msrb.mxu1 %v8492_v39  ;;  %8624 = vmatpush.msrb.mxu3 %v16641_v63  ;;  %v16777_v39 = vsub.f32 %v8335_v40, %v16747_v22  ;;  %v8527_v40 = vsub.f32 %v16733_v43, %v17967_v10  ;;  %v8522_v10 = vand.u32 4294901760, %v8521_v29  ;;  %v8385_v29 = vld [vmem:[#allocation2 + $0x190] sm:$0xff] }
 0x6ba   : > { %8434 = vmatpush.msrb.mxu0 %v16695_v42  ;;  %8585 = vmatpush.msrb.mxu2 %v16706_v48  ;;  %v16835_v49 = vand.u32 4294901760, %v8385_v29  ;;  %v16848_v30 = vsub.f32 %v8387_v38, %v16820_v58 }
 0x6bb   : > { %8499 = vmatpush.msrb.mxu1 %v8498_v57  ;;  %8626 = vmatpush.msrb.mxu3 %v16665_v24  ;;  %v8389_v57 = vld [vmem:[#allocation2 + $0x1b0] sm:$0xff]  ;;  %v17980_v11 = vand.u32 4294901760, %v16777_v39  ;;  %v8528_v27 = vand.u32 4294901760, %v8527_v40  ;;  %v8534_v40 = vand.u32 4294901760, %v8533_v1  ;;  %v16842_v1 = vand.u32 4294901760, %v8446_v55 }
 0x6bc   : > { %8436 = vmatpush.msrb.mxu0 %v16708_v5  ;;  %8588 = vmatpush.msrb.mxu2 %v16717_v6  ;;  %v16806_v59 = vand.u32 4294901760, %v8389_v57 }
 0x6bd   : > { %8505 = vmatpush.msrb.mxu1 %v8504_v19  ;;  %8628 = vmatpush.msrb.mxu3 %v16682_v41  ;;  %v16799_v19 = vsub.f32 %v8393_v46, %v16770_v60  ;;  %v8539_v46 = vsub.f32 %v16753_v62, %v17974_v51  ;;  %v8383_v51 = vld [vmem:[#allocation2 + $0x180] sm:$0xff]  ;;  %v8545_v53 = vsub.f32 %v16777_v39, %v17980_v11  ;;  %v18233_v11 = vand.u32 4294901760, %v16793_v34 }
 0x6be   : > { %8438 = vmatpush.msrb.mxu0 %v16719_v26  ;;  %8591 = vmatpush.msrb.mxu2 %v16733_v43  ;;  %v16833_v54 = vsub.f32 %v8389_v57, %v16806_v59  ;;  %v16850_v21 = vand.u32 4294901760, %v8383_v51 }
 0x6bf   : > { %8511 = vmatpush.msrb.mxu1 %v8510_v13  ;;  %8630 = vmatpush.msrb.mxu3 %v16695_v42  ;;  %v16814_v13 = vsub.f32 %v8391_v36, %v16783_v2  ;;  %v8796_v36 = vsub.f32 %v16768_v3, %v17979_v25  ;;  %v8540_v25 = vand.u32 4294901760, %v8539_v46  ;;  %v8802_v57 = vsub.f32 %v16793_v34, %v18233_v11 }
 0x6c0   : > { %8440 = vmatpush.msrb.mxu0 %v16727_v16  ;;  %8594 = vmatpush.msrb.mxu2 %v16745_v56  ;;  %v8546_v11 = vand.u32 4294901760, %v8545_v53 }
 0x6c1   : > { %8517 = vmatpush.msrb.mxu1 %v8516_v61  ;;  %8632 = vmatpush.msrb.mxu3 %v16708_v5  ;;  %v8381_v61 = vld [vmem:[#allocation2 + $0x170] sm:$0xff]  ;;  %v8797_v46 = vand.u32 4294901760, %v8796_v36  ;;  %v18237_v36 = vand.u32 4294901760, %v16814_v13  ;;  %v8803_v53 = vand.u32 4294901760, %v8802_v57 }
 0x6c2   : > { %8442 = vmatpush.msrb.mxu0 %v16747_v22  ;;  %8597 = vmatpush.msrb.mxu2 %v16753_v62  ;;  %v16863_v34 = vand.u32 4294901760, %v8381_v61 }
 0x6c3   : > { %8523 = vmatpush.msrb.mxu1 %v8522_v10  ;;  %8634 = vmatpush.msrb.mxu3 %v16719_v26  ;;  %v8379_v10 = vld [vmem:[#allocation2 + $0x160] sm:$0xff] }
 0x6c4   : > { %8649 = vmatpush.msra.mxu0 %v18232_v9  ;;  %8600 = vmatpush.msrb.mxu2 %v16777_v39  ;;  %v18234_v9 = vand.u32 4294901760, %v16586_v8  ;;  %v18236_v8 = vand.u32 4294901760, %v16598_v32  ;;  %v16876_v38 = vand.u32 4294901760, %v8379_v10 }
 0x6c5   : > { %8529 = vmatpush.msrb.mxu1 %v8528_v27  ;;  %8636 = vmatpush.msrb.mxu3 %v16727_v16  ;;  %v18235_v27 = vand.u32 4294901760, %v16799_v19  ;;  %v16861_v16 = vsub.f32 %v8385_v29, %v16835_v49  ;;  %v16874_v29 = vsub.f32 %v8383_v51, %v16850_v21  ;;  %v16886_v51 = vsub.f32 %v8381_v61, %v16863_v34 }
 0x6c6   : > { %8603 = vmatmul.f32.vlgmr.msrb.gmra.mxu2 %v16756_v33  ;;  %8653 = vmatpush.msra.mxu0 %v18234_v9  ;;  %v8814_v9 = vsub.f32 %v16814_v13, %v18237_v36  ;;  %v18238_v33 = vand.u32 4294901760, %v16607_v47  ;;  %v18240_v47 = vand.u32 4294901760, %v16616_v52  ;;  %v16899_v61 = vsub.f32 %v8379_v10, %v16876_v38  ;;  %v8373_v36 = vld [vmem:[#allocation2 + $0x130] sm:$0xff] }
 0x6c7   : > { %v8808_v55 = vsub.f32 %v16799_v19, %v18235_v27  ;;  %8535 = vmatpush.msrb.mxu1 %v8534_v40  ;;  %8638 = vmatpush.msrb.mxu3 %v16747_v22  ;;  %v8377_v40 = vld [vmem:[#allocation2 + $0x150] sm:$0xff]  ;;  %v18243_v52 = vand.u32 4294901760, %v16861_v16 }
 0x6c8   : > { %8642 = vmatmul.f32.vlgmr.msrb.gmra.mxu3 %v16790_v44  ;;  %8657 = vmatpush.msra.mxu0 %v18236_v8  ;;  %v8375_v8 = vld [vmem:[#allocation2 + $0x140] sm:$0xff]  ;;  %v16888_v27 = vand.u32 4294901760, %v8377_v40  ;;  %v18242_v44 = vand.u32 4294901760, %v16636_v15  ;;  %v16917_v15 = vand.u32 4294901760, %v8373_v36 }
 0x6c9   : > { %8541 = vmatpush.msrb.mxu1 %v8540_v25  ;;  %8448 = vmatmul.f32.vlgmr.msrb.gmra.mxu0 %v16842_v1  ;;  %v8809_v32 = vand.u32 4294901760, %v8808_v55  ;;  %v18239_v25 = vand.u32 4294901760, %v16833_v54 }
 0x6ca   : > { %8661 = vmatpush.msra.mxu0 %v18238_v33  ;;  %8798 = vmatpush.msra.mxu3 %v8797_v46  ;;  %v8815_v33 = vand.u32 4294901760, %v8814_v9  ;;  %v18241_v46 = vand.u32 4294901760, %v16848_v30  ;;  %v8832_v9 = vsub.f32 %v16861_v16, %v18243_v52  ;;  %v16912_v10 = vsub.f32 %v8377_v40, %v16888_v27 }
 0x6cb   : > { %8547 = vmatpush.msrb.mxu1 %v8546_v11  ;;  %8753 = vmatpush.msra.mxu2 %v16738_v31  ;;  %v8820_v57 = vsub.f32 %v16833_v54, %v18239_v25  ;;  %v8837_v11 = vand.u32 4294901760, %v16874_v29  ;;  %v16901_v25 = vand.u32 4294901760, %v8375_v8 }
 0x6cc   : > { %8549 = vmatmul.f32.vlgmr.msrb.gmra.mxu1 %v16730_v23  ;;  %8665 = vmatpush.msra.mxu0 %v18240_v47  ;;  %v8826_v55 = vsub.f32 %v16848_v30, %v18241_v46  ;;  %v8371_v47 = vld [vmem:[#allocation2 + $0x120] sm:$0xff]  ;;  %v18244_v46 = vand.u32 4294901760, %v16652_v17  ;;  %v18245_v17 = vand.u32 4294901760, %v16657_v14  ;;  %v16941_v14 = vsub.f32 %v8373_v36, %v16917_v15 }
 0x6cd   : > { %8716 = vmatpush.msra.mxu1 %v16562_v7  ;;  %8804 = vmatpush.msra.mxu3 %v8803_v53  ;;  %v8821_v7 = vand.u32 4294901760, %v8820_v57  ;;  %v8843_v53 = vand.u32 4294901760, %v16886_v51  ;;  %v16925_v40 = vsub.f32 %v8375_v8, %v16901_v25  ;;  %v8369_v57 = vld [vmem:[#allocation2 + $0x110] sm:$0xff]  ;;  %v16930_v52 = vand.u32 4294901760, %v8371_v47  ;;  %v8367_v8 = vld [vmem:[#allocation2 + $0x100] sm:$0xff] }
 0x6ce   : > { %8669 = vmatpush.msra.mxu0 %v18242_v44  ;;  %8755 = vmatpush.msra.mxu2 %v16763_v18  ;;  %v8838_v44 = vsub.f32 %v16874_v29, %v8837_v11 }
 0x6cf   : > { %8718 = vmatpush.msra.mxu1 %v16569_v50  ;;  %8810 = vmatpush.msra.mxu3 %v8809_v32  ;;  %v8827_v50 = vand.u32 4294901760, %v8826_v55  ;;  %v8849_v32 = vand.u32 4294901760, %v16899_v61  ;;  %v8855_v55 = vand.u32 4294901760, %v16912_v10  ;;  %v16954_v36 = vsub.f32 %v8371_v47, %v16930_v52 }
 0x6d0   : > { %8673 = vmatpush.msra.mxu0 %v18244_v46  ;;  %8757 = vmatpush.msra.mxu2 %v16770_v60  ;;  %v18246_v46 = vand.u32 4294901760, %v16676_v20  ;;  %v18247_v20 = vand.u32 4294901760, %v16693_v0  ;;  %v8867_v0 = vand.u32 4294901760, %v16941_v14 }
 0x6d1   : > { %8720 = vmatpush.msra.mxu1 %v16579_v4  ;;  %8816 = vmatpush.msra.mxu3 %v8815_v33  ;;  %v8833_v4 = vand.u32 4294901760, %v8832_v9  ;;  %v8844_v33 = vsub.f32 %v16886_v51, %v8843_v53  ;;  %v8861_v9 = vand.u32 4294901760, %v16925_v40 }
 0x6d2   : > { %8677 = vmatpush.msra.mxu0 %v18245_v17  ;;  %8759 = vmatpush.msra.mxu2 %v16783_v2  ;;  %v16943_v17 = vand.u32 4294901760, %v8369_v57 }
 0x6d3   : > { %8722 = vmatpush.msra.mxu1 %v16588_v28  ;;  %8822 = vmatpush.msra.mxu3 %v8821_v7  ;;  %v8839_v28 = vand.u32 4294901760, %v8838_v44  ;;  %v8850_v7 = vsub.f32 %v16899_v61, %v8849_v32  ;;  %v18248_v44 = vand.u32 4294901760, %v16706_v48  ;;  %v8873_v48 = vand.u32 4294901760, %v16954_v36 }
 0x6d4   : > { %8681 = vmatpush.msra.mxu0 %v18246_v46  ;;  %8761 = vmatpush.msra.mxu2 %v16806_v59  ;;  %v16956_v46 = vand.u32 4294901760, %v8367_v8  ;;  %v16967_v47 = vsub.f32 %v8369_v57, %v16943_v17  ;;  %v18250_v57 = vand.u32 4294901760, %v16733_v43 }
 0x6d5   : > { %8724 = vmatpush.msra.mxu1 %v16593_v45  ;;  %8828 = vmatpush.msra.mxu3 %v8827_v50  ;;  %v8845_v45 = vand.u32 4294901760, %v8844_v33  ;;  %v8856_v50 = vsub.f32 %v16912_v10, %v8855_v55  ;;  %v18249_v33 = vand.u32 4294901760, %v16717_v6  ;;  %v8868_v6 = vsub.f32 %v16941_v14, %v8867_v0 }
 0x6d6   : > { %8685 = vmatpush.msra.mxu0 %v18247_v20  ;;  %8763 = vmatpush.msra.mxu2 %v16820_v58  ;;  %v16978_v20 = vsub.f32 %v8367_v8, %v16956_v46 }
 0x6d7   : > { %8726 = vmatpush.msra.mxu1 %v16609_v35  ;;  %8834 = vmatpush.msra.mxu3 %v8833_v4  ;;  %v8851_v35 = vand.u32 4294901760, %v8850_v7  ;;  %v8862_v4 = vsub.f32 %v16925_v40, %v8861_v9  ;;  %v18251_v7 = vand.u32 4294901760, %v16745_v56 }
 0x6d8   : > { %8689 = vmatpush.msra.mxu0 %v18248_v44  ;;  %8765 = vmatpush.msra.mxu2 %v16835_v49  ;;  %v8885_v43 = vand.u32 4294901760, %v16978_v20 }
 0x6d9   : > { %8728 = vmatpush.msra.mxu1 %v16623_v37  ;;  %8840 = vmatpush.msra.mxu3 %v8839_v28  ;;  %v8857_v37 = vand.u32 4294901760, %v8856_v50  ;;  %v8879_v28 = vand.u32 4294901760, %v16967_v47  ;;  %v8863_v8 = vand.u32 4294901760, %v8862_v4  ;;  %v18253_v50 = vand.u32 4294901760, %v16777_v39  ;;  %v18254_v39 = vld [vmem:[#allocation12_spill] sm:$0xff]  ;;  %v8356_v4 = vld [vmem:[#allocation2 + $0xa8] sm:$0xff] }
 0x6da   : > { %8693 = vmatpush.msra.mxu0 %v18249_v33  ;;  %8767 = vmatpush.msra.mxu2 %v16850_v21 }
 0x6db   : > { %8730 = vmatpush.msra.mxu1 %v16628_v12  ;;  %8846 = vmatpush.msra.mxu3 %v8845_v45  ;;  %v8874_v12 = vsub.f32 %v16954_v36, %v8873_v48  ;;  %v18252_v45 = vand.u32 4294901760, %v16753_v62  ;;  %v8880_v56 = vsub.f32 %v16967_v47, %v8879_v28 }
 0x6dc   : > { %8697 = vmatpush.msra.mxu0 %v18250_v57  ;;  %8769 = vmatpush.msra.mxu2 %v16863_v34 }
 0x6dd   : > { %8732 = vmatpush.msra.mxu1 %v16641_v63  ;;  %8852 = vmatpush.msra.mxu3 %v8851_v35  ;;  %v8869_v63 = vand.u32 4294901760, %v8868_v6  ;;  %v8875_v44 = vand.u32 4294901760, %v8874_v12  ;;  %v8881_v62 = vand.u32 4294901760, %v8880_v56  ;;  %v8399_v35 = vld [vmem:[#allocation2 + $0x200] sm:$0xff]  ;;  %v17153_v56 = vand.u32 4294901760, %v8356_v4 }
 0x6de   : > { %8701 = vmatpush.msra.mxu0 %v18251_v7  ;;  %8771 = vmatpush.msra.mxu2 %v16876_v38 }
 0x6df   : > { %8734 = vmatpush.msra.mxu1 %v16665_v24  ;;  %8858 = vmatpush.msra.mxu3 %v8857_v37  ;;  %v8886_v24 = vsub.f32 %v16978_v20, %v8885_v43 }
 0x6e0   : > { %8705 = vmatpush.msra.mxu0 %v18252_v45  ;;  %8773 = vmatpush.msra.mxu2 %v16888_v27 }
 0x6e1   : > { %8736 = vmatpush.msra.mxu1 %v16682_v41  ;;  %8864 = vmatpush.msra.mxu3 %v8863_v8  ;;  %v8887_v41 = vand.u32 4294901760, %v8886_v24  ;;  %v17142_v8 = vand.u32 4294901760, %v8399_v35  ;;  %v18263_v24 = vld [vmem:[#allocation14_spill] sm:$0xff] }
 0x6e2   : > { %8709 = vmatpush.msra.mxu0 %v18253_v50  ;;  %8775 = vmatpush.msra.mxu2 %v16901_v25  ;;  %v8352_v50 = vld [vmem:[#allocation2 + $0x88] sm:$0xff] }
 0x6e3   : > { %8738 = vmatpush.msra.mxu1 %v16695_v42  ;;  %8711 = vmatmul.f32.vlgmr.msra.gmra.mxu0 %v16730_v23  ;;  %v18255_v42 = vld [vmem:[#allocation9_spill] sm:$0xff] }
 0x6e4   : > { %8870 = vmatpush.msra.mxu3 %v8869_v63  ;;  %8777 = vmatpush.msra.mxu2 %v16917_v15 }
 0x6e5   : > { %8740 = vmatpush.msra.mxu1 %v16708_v5  ;;  %8896 = vmatpush.msrb.mxu0 %v16768_v3  ;;  %v18256_v5 = vand.u32 4294901760, %v16768_v3 }
 0x6e6   : > { %8876 = vmatpush.msra.mxu3 %v8875_v44  ;;  %8779 = vmatpush.msra.mxu2 %v16930_v52 }
 0x6e7   : > { %8742 = vmatpush.msra.mxu1 %v16719_v26  ;;  %8899 = vmatpush.msrb.mxu0 %v18254_v39  ;;  %v18257_v26 = vand.u32 4294901760, %v18254_v39 }
 0x6e8   : > { %8882 = vmatpush.msra.mxu3 %v8881_v62  ;;  %8781 = vmatpush.msra.mxu2 %v16943_v17 }
 0x6e9   : > { %8744 = vmatpush.msra.mxu1 %v18255_v42  ;;  %8902 = vmatpush.msrb.mxu0 %v16799_v19 }
 0x6ea   : > { %8888 = vmatpush.msra.mxu3 %v8887_v41  ;;  %8783 = vmatpush.msra.mxu2 %v16956_v46  ;;  %v17161_v41 = vsub.f32 %v8399_v35, %v17142_v8 }
 0x6eb   : > { %8746 = vmatpush.msra.mxu1 %v16747_v22  ;;  %8905 = vmatpush.msrb.mxu0 %v16814_v13  ;;  %v18259_v22 = vand.u32 4294901760, %v16814_v13  ;;  %v8362_v13 = vld [vmem:[#allocation2 + $0xd8] sm:$0xff] }
 0x6ec   : > { %9057 = vmatpush.msrb.mxu3 %v16738_v31  ;;  %8748 = vmatmul.f32.vlgmr.msra.gmra.mxu1 %v16730_v23 }
 0x6ed   : > { %8949 = vmatpush.msrb.mxu1 %v16738_v31  ;;  %8990 = vmatpush.msrb.mxu2 %v18256_v5  ;;  %v18258_v31 = vand.u32 4294901760, %v16799_v19 }
 0x6ee   : > { %9059 = vmatpush.msrb.mxu3 %v16763_v18  ;;  %8908 = vmatpush.msrb.mxu0 %v16833_v54 }
 0x6ef   : > { %8951 = vmatpush.msrb.mxu1 %v16763_v18  ;;  %8994 = vmatpush.msrb.mxu2 %v18257_v26  ;;  %v18260_v18 = vand.u32 4294901760, %v16833_v54 }
 0x6f0   : > { %9061 = vmatpush.msrb.mxu3 %v16770_v60  ;;  %8911 = vmatpush.msrb.mxu0 %v16848_v30 }
 0x6f1   : > { %8953 = vmatpush.msrb.mxu1 %v16770_v60  ;;  %8998 = vmatpush.msrb.mxu2 %v18258_v31  ;;  %v8405_v60 = vld [vmem:[#allocation2 + $0x230] sm:$0xff]  ;;  %v18264_v31 = vld [vmem:[#allocation15_spill] sm:$0xff] }
 0x6f2   : > { %9063 = vmatpush.msrb.mxu3 %v16783_v2  ;;  %8914 = vmatpush.msrb.mxu0 %v16861_v16 }
 0x6f3   : > { %8955 = vmatpush.msrb.mxu1 %v16783_v2  ;;  %9002 = vmatpush.msrb.mxu2 %v18259_v22  ;;  %v18261_v2 = vand.u32 4294901760, %v16848_v30 }
 0x6f4   : > { %9065 = vmatpush.msrb.mxu3 %v16806_v59  ;;  %8917 = vmatpush.msrb.mxu0 %v16874_v29  ;;  %v8403_v29 = vld [vmem:[#allocation2 + $0x220] sm:$0xff] }
 0x6f5   : > { %8957 = vmatpush.msrb.mxu1 %v16806_v59  ;;  %9006 = vmatpush.msrb.mxu2 %v18260_v18  ;;  %v18262_v59 = vand.u32 4294901760, %v16861_v16  ;;  %v8364_v16 = vld [vmem:[#allocation2 + $0xe8] sm:$0xff]  ;;  %v17174_v18 = vand.u32 4294901760, %v8352_v50 }
 0x6f6   : > { %9067 = vmatpush.msrb.mxu3 %v16820_v58  ;;  %8920 = vmatpush.msrb.mxu0 %v16886_v51 }
 0x6f7   : > { %8959 = vmatpush.msrb.mxu1 %v16820_v58  ;;  %9010 = vmatpush.msrb.mxu2 %v18261_v2  ;;  %v7720_v58 = vpop.f32.mrf.mxu0  ;;  %v8350_v2 = vld [vmem:[#allocation2 + $0x78] sm:$0xff] }
 0x6f8   : > { %9069 = vmatpush.msrb.mxu3 %v16835_v49  ;;  %8923 = vmatpush.msrb.mxu0 %v16899_v61 }
 0x6f9   : > { %8961 = vmatpush.msrb.mxu1 %v16835_v49  ;;  %9014 = vmatpush.msrb.mxu2 %v18262_v59  ;;  %v8366_v49 = vld [vmem:[#allocation2 + $0xf8] sm:$0xff]  ;;  %v17992_v59 = vand.u32 4294901760, %v17161_v41 }
 0x6fa   : > { %9071 = vmatpush.msrb.mxu3 %v16850_v21  ;;  %8926 = vmatpush.msrb.mxu0 %v16912_v10  ;;  %v17083_v3 = vand.u32 4294901760, %v8366_v49  ;;  %v17107_v10 = vand.u32 4294901760, %v8362_v13 }
 0x6fb   : > { %8963 = vmatpush.msrb.mxu1 %v16850_v21  ;;  %9018 = vmatpush.msrb.mxu2 %v8837_v11  ;;  %v17088_v21 = vand.u32 4294901760, %v8405_v60  ;;  %v8360_v11 = vld [vmem:[#allocation2 + $0xc8] sm:$0xff] }
 0x6fc   : > { %9073 = vmatpush.msrb.mxu3 %v16863_v34  ;;  %8929 = vmatpush.msrb.mxu0 %v16925_v40  ;;  %v8358_v40 = vld [vmem:[#allocation2 + $0xb8] sm:$0xff] }
 0x6fd   : > { %8965 = vmatpush.msrb.mxu1 %v16863_v34  ;;  %9022 = vmatpush.msrb.mxu2 %v8843_v53  ;;  %v7861_v34 = vpop.f32.mrf.mxu2  ;;  %v17097_v61 = vsub.f32 %v8405_v60, %v17088_v21  ;;  %v17105_v53 = vsub.f32 %v8366_v49, %v17083_v3  ;;  %v17140_v6 = vand.u32 4294901760, %v8358_v40  ;;  %v8348_v60 = vld [vmem:[#allocation2 + $0x68] sm:$0xff] }
 0x6fe   : > { %9075 = vmatpush.msrb.mxu3 %v16876_v38  ;;  %8932 = vmatpush.msrb.mxu0 %v16941_v14 }
 0x6ff   : > { %8967 = vmatpush.msrb.mxu1 %v16876_v38  ;;  %9026 = vmatpush.msrb.mxu2 %v8849_v32  ;;  %v18001_v57 = vand.u32 4294901760, %v17105_v53  ;;  %v17168_v5 = vsub.f32 %v8358_v40, %v17140_v6 }
 0x700   : > { %9077 = vmatpush.msrb.mxu3 %v16888_v27  ;;  %8935 = vmatpush.msrb.mxu0 %v16954_v36  ;;  %v17123_v36 = vand.u32 4294901760, %v8360_v11 }
 0x701   : > { %v7811_v54 = vpop.f32.mrf.mxu1  ;;  %8969 = vmatpush.msrb.mxu1 %v16888_v27  ;;  %9030 = vmatpush.msrb.mxu2 %v8855_v55  ;;  %v17092_v27 = vand.u32 4294901760, %v8364_v16  ;;  %v18000_v55 = vand.u32 4294901760, %v17097_v61  ;;  %v9322_v39 = vsub.f32 %v17105_v53, %v18001_v57 }
 0x702   : > { %9079 = vmatpush.msrb.mxu3 %v16901_v25  ;;  %v7812_v30 = vadd.f32 %v7811_v54, %v7720_v58  ;;  %8938 = vmatpush.msrb.mxu0 %v16967_v47  ;;  %v17138_v47 = vsub.f32 %v8362_v13, %v17107_v10  ;;  %v17182_v54 = vsub.f32 %v8356_v4, %v17153_v56 }
 0x703   : > { %8971 = vmatpush.msrb.mxu1 %v16901_v25  ;;  %9034 = vmatpush.msrb.mxu2 %v8861_v9  ;;  %v17099_v25 = vand.u32 4294901760, %v8403_v29  ;;  %v9137_v33 = vsub.f32 %v17097_v61, %v18000_v55  ;;  %v9323_v13 = vand.u32 4294901760, %v9322_v39 }
 0x704   : > { %9081 = vmatpush.msrb.mxu3 %v16917_v15  ;;  %v7862_v19 = vadd.f32 %v7861_v34, %v7812_v30  ;;  %8941 = vmatpush.msrb.mxu0 %v16978_v20  ;;  %v17996_v42 = vand.u32 4294901760, %v17138_v47  ;;  %v17988_v4 = vand.u32 4294901760, %v17182_v54 }
 0x705   : > { %v7898_v38 = vpop.f32.mrf.mxu3  ;;  %8973 = vmatpush.msrb.mxu1 %v16917_v15  ;;  %9038 = vmatpush.msrb.mxu2 %v8867_v0  ;;  %v8401_v15 = vld [vmem:[#allocation2 + $0x210] sm:$0xff]  ;;  %v17113_v14 = vsub.f32 %v8403_v29, %v17099_v25  ;;  %v17121_v0 = vsub.f32 %v8364_v16, %v17092_v27  ;;  %v9138_v12 = vand.u32 4294901760, %v9137_v33  ;;  %v17989_v29 = vand.u32 4294901760, %v17168_v5 }
 0x706   : > { %9083 = vmatpush.msrb.mxu3 %v16930_v52  ;;  %v7899_v51 = vadd.f32 %v7898_v38, %v7862_v19  ;;  %9106 = vmatpush.msra.mxu0 %v17088_v21  ;;  %v17115_v9 = vand.u32 4294901760, %v8401_v15  ;;  %v9155_v19 = vsub.f32 %v17161_v41, %v17992_v59  ;;  %v9334_v38 = vsub.f32 %v17138_v47, %v17996_v42 }
 0x707   : > { %8975 = vmatpush.msrb.mxu1 %v16930_v52  ;;  %9042 = vmatpush.msrb.mxu2 %v8873_v48  ;;  %v17998_v48 = vand.u32 4294901760, %v17113_v14  ;;  %v17999_v63 = vand.u32 4294901760, %v17121_v0  ;;  %v17205_v33 = vand.u32 4294901760, %v8348_v60 }
 0x708   : > { %9085 = vmatpush.msrb.mxu3 %v16943_v17  ;;  %v7961_v32 = vpop.f32.mrf.mxu0  ;;  %9108 = vmatpush.msra.mxu0 %v17099_v25  ;;  %v17132_v37 = vsub.f32 %v8401_v15, %v17115_v9  ;;  %v17199_v15 = vsub.f32 %v8352_v50, %v17174_v18  ;;  %v9156_v40 = vand.u32 4294901760, %v9155_v19 }
 0x709   : > { %v7962_v52 = vadd.f32 %v7961_v32, %v7899_v51  ;;  %8977 = vmatpush.msrb.mxu1 %v16943_v17  ;;  %9046 = vmatpush.msrb.mxu2 %v8879_v28  ;;  %v8354_v28 = vld [vmem:[#allocation2 + $0x98] sm:$0xff]  ;;  %v9143_v45 = vsub.f32 %v17113_v14, %v17998_v48  ;;  %v9328_v58 = vsub.f32 %v17121_v0, %v17999_v63  ;;  %v17194_v51 = vand.u32 4294901760, %v8350_v2 }
 0x70a   : > { %9087 = vmatpush.msrb.mxu3 %v16956_v46  ;;  %9110 = vmatpush.msra.mxu0 %v17115_v9  ;;  %v7996_v17 = vpop.f32.mrf.mxu1  ;;  %v17994_v44 = vand.u32 4294901760, %v17132_v37  ;;  %v8346_v32 = vld [vmem:[#allocation2 + $0x58] sm:$0xff]  ;;  %v17991_v39 = vand.u32 4294901760, %v17199_v15 }
 0x70b   : > { %8979 = vmatpush.msrb.mxu1 %v16956_v46  ;;  %v7997_v7 = vadd.f32 %v7996_v17, %v7962_v52  ;;  %9050 = vmatpush.msrb.mxu2 %v8885_v43  ;;  %v17151_v46 = vsub.f32 %v8360_v11, %v17123_v36  ;;  %v17158_v43 = vand.u32 4294901760, %v8354_v28  ;;  %v9144_v62 = vand.u32 4294901760, %v9143_v45 }
 0x70c   : > { %9112 = vmatpush.msra.mxu0 %v17142_v8  ;;  %v9149_v26 = vsub.f32 %v17132_v37, %v17994_v44  ;;  %v9329_v52 = vand.u32 4294901760, %v9328_v58  ;;  %v9346_v45 = vsub.f32 %v17168_v5, %v17989_v29  ;;  %v17216_v50 = vsub.f32 %v8350_v2, %v17194_v51  ;;  %v8338_v29 = vld [vmem:[#allocation2 + $0x18] sm:$0xff] }
 0x70d   : > { %v8321_v20 = vmul.f32 %v18263_v24, %v7997_v7  ;;  %9139 = vmatpush.msra.mxu1 %v9138_v12  ;;  %v17993_v49 = vand.u32 4294901760, %v17151_v46  ;;  %v17185_v16 = vsub.f32 %v8354_v28, %v17158_v43  ;;  %v8344_v7 = vld [vmem:[#allocation2 + $0x48] sm:$0xff]  ;;  %v9335_v12 = vand.u32 4294901760, %v9334_v38 }
 0x70e   : > { %v9150_v30 = vand.u32 4294901760, %v9149_v26  ;;  %v8342_v26 = vld [vmem:[#allocation2 + $0x38] sm:$0xff]  ;;  %v9352_v58 = vsub.f32 %v17182_v54, %v17988_v4  ;;  %v17231_v2 = vand.u32 4294901760, %v8344_v7  ;;  %v9347_v38 = vand.u32 4294901760, %v9346_v45 }
 0x70f   : > { %v8330_v22 = vadd.f32 %v18264_v31, %v8321_v20  ;;  %9145 = vmatpush.msra.mxu1 %v9144_v62  ;;  %v9340_v35 = vsub.f32 %v17151_v46, %v17993_v49  ;;  %v17990_v28 = vand.u32 4294901760, %v17185_v16  ;;  %v17218_v20 = vand.u32 4294901760, %v8346_v32 }
 0x710   : > { %v9364_v4 = vsub.f32 %v17199_v15, %v17991_v39  ;;  %v8336_v39 = vld [vmem:[#allocation2 + $0x8] sm:$0xff]  ;;  %v17270_v59 = vand.u32 4294901760, %v8338_v29 }
 0x711   : > { %v8333_v34 = vmax.f32 %v8330_v22, 0.0  ;;  %9151 = vmatpush.msra.mxu1 %v9150_v30  ;;  %v9341_v22 = vand.u32 4294901760, %v9340_v35  ;;  %v17229_v30 = vsub.f32 %v8348_v60, %v17205_v33  ;;  %v9358_v19 = vsub.f32 %v17185_v16, %v17990_v28 }
 0x712   : > { %v17242_v60 = vsub.f32 %v8346_v32, %v17218_v20  ;;  %v17255_v32 = vsub.f32 %v8344_v7, %v17231_v2  ;;  %v9365_v49 = vand.u32 4294901760, %v9364_v4  ;;  %v17282_v42 = vand.u32 4294901760, %v8336_v39 }
 0x713   : > { %v17196_v11 = vand.u32 4294901760, %v8333_v34  ;;  %9157 = vmatpush.msra.mxu1 %v9156_v40  ;;  %v17995_v40 = vand.u32 4294901760, %v17216_v50  ;;  %v17997_v45 = vand.u32 4294901760, %v17229_v30  ;;  %v17292_v48 = vsub.f32 %v8338_v29, %v17270_v59 }
 0x714   : > { %v18003_v7 = vand.u32 4294901760, %v17242_v60  ;;  %v17300_v57 = vsub.f32 %v8336_v39, %v17282_v42 }
 0x715   : > { %v17208_v17 = vsub.f32 %v8333_v34, %v17196_v11  ;;  %8890 = vmatmul.f32.vlgmr.msra.gmra.mxu3 %v17196_v11  ;;  %v9405_v29 = vand.u32 4294901760, %v17292_v48 }
 0x716   : > { %9324 = vmatpush.msra.mxu3 %v9323_v13  ;;  %v8340_v13 = vld [vmem:[#allocation2 + $0x28] sm:$0xff] }
 0x717   : > { %8944 = vmatmul.f32.vlgmr.msrb.gmra.mxu0 %v17208_v17  ;;  %v17222_v62 = vand.u32 4294901760, %v17208_v17  ;;  %v17257_v28 = vand.u32 4294901760, %v8340_v13 }
 0x718   : > { %9330 = vmatpush.msra.mxu3 %v9329_v52  ;;  %9177 = vmatpush.msrb.mxu0 %v17097_v61  ;;  %v17244_v52 = vand.u32 4294901760, %v8342_v26 }
 0x719   : > { %8983 = vmatmul.f32.vlgmr.msrb.gmra.mxu1 %v17222_v62  ;;  %v8787_v34 = vsub.f32 %v17208_v17, %v17222_v62 }
 0x71a   : > { %9336 = vmatpush.msra.mxu3 %v9335_v12  ;;  %9206 = vmatpush.msrb.mxu1 %v17088_v21  ;;  %v9353_v12 = vand.u32 4294901760, %v9352_v58  ;;  %v17268_v58 = vsub.f32 %v8342_v26, %v17244_v52  ;;  %v17280_v26 = vsub.f32 %v8340_v13, %v17257_v28 }
 0x71b   : > { %v17247_v35 = vand.u32 4294901760, %v8787_v34  ;;  %9180 = vmatpush.msrb.mxu0 %v17113_v14  ;;  %v9359_v34 = vand.u32 4294901760, %v9358_v19 }
 0x71c   : > { %9342 = vmatpush.msra.mxu3 %v9341_v22  ;;  %9208 = vmatpush.msrb.mxu1 %v17099_v25  ;;  %v9370_v22 = vsub.f32 %v17216_v50, %v17995_v40  ;;  %v18002_v40 = vand.u32 4294901760, %v17255_v32 }
 0x71d   : > { %18265 = vst [vmem:[#allocation10_spill] sm:$0xff] %v17247_v35  ;;  %8789 = vmatmul.f32.vlgmr.msra.gmra.mxu2 %v17247_v35  ;;  %9089 = vmatmul.f32.vlgmr.msrb.gmra.mxu3 %v17196_v11 }
 0x71e   : > { %9279 = vmatpush.msra.mxu2 %v17083_v3  ;;  %9348 = vmatpush.msra.mxu3 %v9347_v38  ;;  %v9376_v38 = vsub.f32 %v17229_v30, %v17997_v45  ;;  %v9371_v4 = vand.u32 4294901760, %v9370_v22  ;;  %v18004_v45 = vand.u32 4294901760, %v17268_v58  ;;  %v18006_v22 = vand.u32 4294901760, %v17280_v26 }
 0x71f   : > { %9210 = vmatpush.msrb.mxu1 %v17115_v9  ;;  %9183 = vmatpush.msrb.mxu0 %v17132_v37 }
 0x720   : > { %9281 = vmatpush.msra.mxu2 %v17092_v27  ;;  %9354 = vmatpush.msra.mxu3 %v9353_v12  ;;  %v9382_v12 = vsub.f32 %v17242_v60, %v18003_v7  ;;  %v9377_v55 = vand.u32 4294901760, %v9376_v38  ;;  %v9400_v7 = vsub.f32 %v17280_v26, %v18006_v22 }
 0x721   : > { %v8035_v19 = vpop.f32.mrf.mxu2  ;;  %v8126_v44 = vpop.f32.mrf.mxu3  ;;  %9212 = vmatpush.msrb.mxu1 %v17142_v8  ;;  %9186 = vmatpush.msrb.mxu0 %v17161_v41 }
 0x722   : > { %9283 = vmatpush.msra.mxu2 %v17107_v10  ;;  %9360 = vmatpush.msra.mxu3 %v9359_v34  ;;  %v8127_v13 = vadd.f32 %v8126_v44, %v8035_v19  ;;  %v8176_v63 = vpop.f32.mrf.mxu0  ;;  %v9388_v34 = vsub.f32 %v17255_v32, %v18002_v40  ;;  %v9383_v44 = vand.u32 4294901760, %v9382_v12 }
 0x724   : > { %9285 = vmatpush.msra.mxu2 %v17123_v36  ;;  %9366 = vmatpush.msra.mxu3 %v9365_v49  ;;  %v9394_v49 = vsub.f32 %v17268_v58, %v18004_v45  ;;  %v8177_v19 = vadd.f32 %v8176_v63, %v8127_v13  ;;  %v9389_v39 = vand.u32 4294901760, %v9388_v34  ;;  %v9406_v63 = vsub.f32 %v17292_v48, %v9405_v29 }
 0x725   : > { %9052 = vmatmul.f32.vlgmr.msrb.gmra.mxu2 %v17196_v11 }
 0x726   : > { %9287 = vmatpush.msra.mxu2 %v17140_v6  ;;  %9372 = vmatpush.msra.mxu3 %v9371_v4  ;;  %v9411_v4 = vand.u32 4294901760, %v17300_v57  ;;  %v9395_v45 = vand.u32 4294901760, %v9394_v49 }
 0x728   : > { %9289 = vmatpush.msra.mxu2 %v17153_v56  ;;  %9378 = vmatpush.msra.mxu3 %v9377_v55  ;;  %v9401_v55 = vand.u32 4294901760, %v9400_v7  ;;  %v9412_v34 = vsub.f32 %v17300_v57, %v9411_v4 }
 0x729   : > { %v8213_v38 = vpop.f32.mrf.mxu1 }
 0x72a   : > { %v8276_v40 = vpop.f32.mrf.mxu2  ;;  %v8214_v12 = vadd.f32 %v8213_v38, %v8177_v19  ;;  %9291 = vmatpush.msra.mxu2 %v17158_v43  ;;  %9384 = vmatpush.msra.mxu3 %v9383_v44  ;;  %v9407_v44 = vand.u32 4294901760, %v9406_v63  ;;  %v18270_v38 = vand.u32 4294901760, %v17138_v47 }
 0x72c   : > { %v8277_v13 = vadd.f32 %v8276_v40, %v8214_v12  ;;  %v8311_v35 = vpop.f32.mrf.mxu3  ;;  %9293 = vmatpush.msra.mxu2 %v17174_v18  ;;  %9390 = vmatpush.msra.mxu3 %v9389_v39  ;;  %v9413_v40 = vand.u32 4294901760, %v9412_v34  ;;  %v8390_v12 = vld [vmem:[#allocation2 + $0x1b8] sm:$0xff] }
 0x72d   : > { %v8386_v34 = vld [vmem:[#allocation2 + $0x198] sm:$0xff] }
 0x72e   : > { %v8312_v22 = vadd.f32 %v8311_v35, %v8277_v13  ;;  %9295 = vmatpush.msra.mxu2 %v17194_v51  ;;  %9396 = vmatpush.msra.mxu3 %v9395_v45  ;;  %v8388_v13 = vld [vmem:[#allocation2 + $0x1a8] sm:$0xff] }
 0x730   : > { %v8322_v49 = vmul.f32 %v18263_v24, %v8312_v22  ;;  %9297 = vmatpush.msra.mxu2 %v17205_v33  ;;  %9402 = vmatpush.msra.mxu3 %v9401_v55 }
 0x732   : > { %v8331_v19 = vadd.f32 %v18264_v31, %v8322_v49  ;;  %9299 = vmatpush.msra.mxu2 %v17218_v20  ;;  %9408 = vmatpush.msra.mxu3 %v9407_v44  ;;  %v17447_v44 = vand.u32 4294901760, %v8388_v13 }
 0x734   : > { %v8334_v7 = vmax.f32 %v8331_v19, 0.0  ;;  %9301 = vmatpush.msra.mxu2 %v17231_v2  ;;  %9414 = vmatpush.msra.mxu3 %v9413_v40  ;;  %v8384_v40 = vld [vmem:[#allocation2 + $0x188] sm:$0xff]  ;;  %v18283_v19 = vand.u32 4294901760, %v17280_v26 }
 0x735   : > { %9416 = vmatmul.f32.vlgmr.msra.gmra.mxu3 %v16730_v23 }
 0x736   : > { %v8409_v35 = vsel %vm8407_vm2, %v8334_v7, 0  ;;  %9583 = vmatpush.msrb.mxu3 %v17083_v3  ;;  %9303 = vmatpush.msra.mxu2 %v17244_v52 }
 0x737   : > { %v17328_v45 = vand.u32 4294901760, %v8409_v35 }
 0x738   : > { %9585 = vmatpush.msrb.mxu3 %v17092_v27  ;;  %9305 = vmatpush.msra.mxu2 %v17257_v28 }
 0x739   : > { %v17333_v24 = vsub.f32 %v8409_v35, %v17328_v45  ;;  %9159 = vmatmul.f32.vlgmr.msra.gmra.mxu1 %v17328_v45 }
 0x73a   : > { %9266 = vmatpush.msra.mxu1 %v17088_v21  ;;  %9587 = vmatpush.msrb.mxu3 %v17107_v10 }
 0x73b   : > { %v17340_v31 = vand.u32 4294901760, %v17333_v24  ;;  %9307 = vmatpush.msra.mxu2 %v17270_v59 }
 0x73c   : > { %9268 = vmatpush.msra.mxu1 %v17099_v25  ;;  %9589 = vmatpush.msrb.mxu3 %v17123_v36  ;;  %v18266_v25 = vand.u32 4294901760, %v17105_v53 }
 0x73d   : > { %v9116_v22 = vsub.f32 %v17333_v24, %v17340_v31  ;;  %9309 = vmatpush.msra.mxu2 %v17282_v42 }
 0x73e   : > { %9270 = vmatpush.msra.mxu1 %v17115_v9  ;;  %9315 = vmatmul.f32.vlgmr.msra.gmra.mxu2 %v16842_v1  ;;  %v18267_v9 = vand.u32 4294901760, %v17097_v61  ;;  %v18268_v1 = vand.u32 4294901760, %v17121_v0  ;;  %v18272_v61 = vand.u32 4294901760, %v17151_v46 }
 0x73f   : > { %9591 = vmatpush.msrb.mxu3 %v17140_v6  ;;  %v17352_v21 = vand.u32 4294901760, %v9116_v22  ;;  %9516 = vmatpush.msrb.mxu2 %v18266_v25 }
 0x740   : > { %9272 = vmatpush.msra.mxu1 %v17142_v8  ;;  %v18269_v8 = vand.u32 4294901760, %v17113_v14  ;;  %v18274_v14 = vand.u32 4294901760, %v17168_v5 }
 0x741   : > { %9118 = vmatmul.f32.vlgmr.msra.gmra.mxu0 %v17352_v21  ;;  %9216 = vmatmul.f32.vlgmr.msrb.gmra.mxu1 %v17340_v31 }
 0x742   : > { %9475 = vmatpush.msrb.mxu1 %v17083_v3  ;;  %9235 = vmatpush.msra.mxu0 %v18267_v9  ;;  %v18271_v3 = vand.u32 4294901760, %v17132_v37  ;;  %v8398_v37 = vld [vmem:[#allocation2 + $0x1f8] sm:$0xff] }
 0x743   : > { %9520 = vmatpush.msrb.mxu2 %v18268_v1  ;;  %9593 = vmatpush.msrb.mxu3 %v17153_v56  ;;  %v17479_v1 = vsub.f32 %v8388_v13, %v17447_v44 }
 0x744   : > { %9477 = vmatpush.msrb.mxu1 %v17092_v27  ;;  %9239 = vmatpush.msra.mxu0 %v18269_v8  ;;  %v18273_v27 = vand.u32 4294901760, %v17161_v41  ;;  %v8392_v41 = vld [vmem:[#allocation2 + $0x1c8] sm:$0xff] }
 0x745   : > { %9524 = vmatpush.msrb.mxu2 %v18270_v38  ;;  %9595 = vmatpush.msrb.mxu3 %v17158_v43 }
 0x746   : > { %9479 = vmatpush.msrb.mxu1 %v17107_v10  ;;  %9243 = vmatpush.msra.mxu0 %v18271_v3  ;;  %v18275_v10 = vand.u32 4294901760, %v17182_v54 }
 0x747   : > { %9528 = vmatpush.msrb.mxu2 %v18272_v61  ;;  %9597 = vmatpush.msrb.mxu3 %v17174_v18 }
 0x748   : > { %9481 = vmatpush.msrb.mxu1 %v17123_v36  ;;  %9247 = vmatpush.msra.mxu0 %v18273_v27  ;;  %v18276_v36 = vand.u32 4294901760, %v17185_v16 }
 0x749   : > { %9532 = vmatpush.msrb.mxu2 %v18274_v14  ;;  %9599 = vmatpush.msrb.mxu3 %v17194_v51  ;;  %v18011_v14 = vand.u32 4294901760, %v17479_v1 }
 0x74a   : > { %9189 = vmatmul.f32.vlgmr.msrb.gmra.mxu0 %v17333_v24  ;;  %9274 = vmatmul.f32.vlgmr.msra.gmra.mxu1 %v17328_v45 }
 0x74b   : > { %9422 = vmatpush.msrb.mxu0 %v17105_v53  ;;  %9483 = vmatpush.msrb.mxu1 %v17140_v6  ;;  %v18277_v53 = vand.u32 4294901760, %v17199_v15  ;;  %v8396_v6 = vld [vmem:[#allocation2 + $0x1e8] sm:$0xff] }
 0x74c   : > { %9536 = vmatpush.msrb.mxu2 %v18275_v10  ;;  %9601 = vmatpush.msrb.mxu3 %v17205_v33  ;;  %v8376_v10 = vld [vmem:[#allocation2 + $0x148] sm:$0xff] }
 0x74d   : > { %9425 = vmatpush.msrb.mxu0 %v17121_v0  ;;  %9485 = vmatpush.msrb.mxu1 %v17153_v56  ;;  %v17402_v0 = vand.u32 4294901760, %v8398_v37  ;;  %v18278_v56 = vand.u32 4294901760, %v17216_v50 }
 0x74e   : > { %9540 = vmatpush.msrb.mxu2 %v18276_v36  ;;  %9603 = vmatpush.msrb.mxu3 %v17218_v20 }
 0x74f   : > { %9428 = vmatpush.msrb.mxu0 %v17138_v47  ;;  %9487 = vmatpush.msrb.mxu1 %v17158_v43  ;;  %v8394_v47 = vld [vmem:[#allocation2 + $0x1d8] sm:$0xff]  ;;  %v17409_v43 = vand.u32 4294901760, %v8396_v6  ;;  %v17419_v39 = vsub.f32 %v8398_v37, %v17402_v0 }
 0x750   : > { %9544 = vmatpush.msrb.mxu2 %v18277_v53  ;;  %9605 = vmatpush.msrb.mxu3 %v17231_v2 }
 0x751   : > { %9431 = vmatpush.msrb.mxu0 %v17151_v46  ;;  %9489 = vmatpush.msrb.mxu1 %v17174_v18  ;;  %v18279_v46 = vand.u32 4294901760, %v17229_v30  ;;  %v17416_v18 = vand.u32 4294901760, %v8394_v47  ;;  %v17429_v63 = vsub.f32 %v8396_v6, %v17409_v43  ;;  %v9662_v55 = vand.u32 4294901760, %v17419_v39 }
 0x752   : > { %9548 = vmatpush.msrb.mxu2 %v18278_v56  ;;  %9607 = vmatpush.msrb.mxu3 %v17244_v52  ;;  %v8406_v56 = vld [vmem:[#allocation2 + $0x238] sm:$0xff] }
 0x753   : > { %9249 = vmatmul.f32.vlgmr.msra.gmra.mxu0 %v17328_v45  ;;  %9491 = vmatpush.msrb.mxu1 %v17194_v51  ;;  %v18280_v51 = vand.u32 4294901760, %v17242_v60  ;;  %v9663_v7 = vsub.f32 %v17419_v39, %v9662_v55 }
 0x754   : > { %9434 = vmatpush.msrb.mxu0 %v17168_v5  ;;  %9552 = vmatpush.msrb.mxu2 %v18279_v46  ;;  %v17426_v5 = vand.u32 4294901760, %v8392_v41  ;;  %v17527_v46 = vand.u32 4294901760, %v8376_v10 }
 0x755   : > { %9609 = vmatpush.msrb.mxu3 %v17257_v28  ;;  %9493 = vmatpush.msrb.mxu1 %v17205_v33  ;;  %v18281_v33 = vand.u32 4294901760, %v17255_v32 }
 0x756   : > { %9437 = vmatpush.msrb.mxu0 %v17182_v54  ;;  %9556 = vmatpush.msrb.mxu2 %v18280_v51  ;;  %v17436_v54 = vand.u32 4294901760, %v8390_v12  ;;  %v17451_v49 = vsub.f32 %v8392_v41, %v17426_v5  ;;  %v8374_v41 = vld [vmem:[#allocation2 + $0x138] sm:$0xff] }
 0x757   : > { %9611 = vmatpush.msrb.mxu3 %v17270_v59  ;;  %9495 = vmatpush.msrb.mxu1 %v17218_v20  ;;  %v17440_v20 = vsub.f32 %v8394_v47, %v17416_v18  ;;  %v9693_v47 = vsub.f32 %v17479_v1, %v18011_v14 }
 0x758   : > { %9440 = vmatpush.msrb.mxu0 %v17185_v16  ;;  %9560 = vmatpush.msrb.mxu2 %v18281_v33  ;;  %v18282_v16 = vand.u32 4294901760, %v17268_v58  ;;  %v17465_v22 = vsub.f32 %v8390_v12, %v17436_v54  ;;  %v18015_v9 = vand.u32 4294901760, %v17451_v49 }
 0x759   : > { %9613 = vmatpush.msrb.mxu3 %v17282_v42  ;;  %9497 = vmatpush.msrb.mxu1 %v17231_v2  ;;  %v18019_v2 = vand.u32 4294901760, %v17429_v63  ;;  %v18017_v35 = vand.u32 4294901760, %v17440_v20 }
 0x75a   : > { %9443 = vmatpush.msrb.mxu0 %v17199_v15  ;;  %9615 = vmatmul.f32.vlgmr.msrb.gmra.mxu3 %v16730_v23  ;;  %v17455_v15 = vand.u32 4294901760, %v8386_v34  ;;  %v9681_v61 = vsub.f32 %v17451_v49, %v18015_v9 }
 0x75b   : > { %9816 = vmatpush.msra.mxu3 %v17402_v0  ;;  %9564 = vmatpush.msrb.mxu2 %v18282_v16  ;;  %v9669_v25 = vsub.f32 %v17429_v63, %v18019_v2  ;;  %v9675_v8 = vsub.f32 %v17440_v20, %v18017_v35 }
 0x75c   : > { %9446 = vmatpush.msrb.mxu0 %v17216_v50  ;;  %9499 = vmatpush.msrb.mxu1 %v17244_v52  ;;  %v17469_v50 = vand.u32 4294901760, %v8384_v40  ;;  %v8382_v52 = vld [vmem:[#allocation2 + $0x178] sm:$0xff] }
 0x75d   : > { %9818 = vmatpush.msra.mxu3 %v17409_v43  ;;  %9568 = vmatpush.msrb.mxu2 %v18283_v19  ;;  %v17492_v38 = vand.u32 4294901760, %v8382_v52 }
 0x75e   : > { %9449 = vmatpush.msrb.mxu0 %v17229_v30  ;;  %9501 = vmatpush.msrb.mxu1 %v17257_v28  ;;  %v8380_v28 = vld [vmem:[#allocation2 + $0x168] sm:$0xff]  ;;  %v17484_v30 = vsub.f32 %v8386_v34, %v17455_v15  ;;  %v17498_v3 = vsub.f32 %v8384_v40, %v17469_v50  ;;  %v17542_v40 = vand.u32 4294901760, %v8406_v56 }
 0x75f   : > { %9820 = vmatpush.msra.mxu3 %v17416_v18  ;;  %9572 = vmatpush.msrb.mxu2 %v9405_v29  ;;  %v9664_v29 = vand.u32 4294901760, %v9663_v7  ;;  %v17505_v27 = vand.u32 4294901760, %v8380_v28  ;;  %v17518_v53 = vsub.f32 %v8382_v52, %v17492_v38  ;;  %v8372_v34 = vld [vmem:[#allocation2 + $0x128] sm:$0xff]  ;;  %v17549_v7 = vand.u32 4294901760, %v8374_v41 }
 0x760   : > { %9452 = vmatpush.msrb.mxu0 %v17242_v60  ;;  %9503 = vmatpush.msrb.mxu1 %v17270_v59  ;;  %v18013_v60 = vand.u32 4294901760, %v17465_v22  ;;  %v8378_v59 = vld [vmem:[#allocation2 + $0x158] sm:$0xff]  ;;  %v18008_v6 = vand.u32 4294901760, %v17498_v3  ;;  %v9694_v52 = vand.u32 4294901760, %v9693_v47 }
 0x761   : > { %9822 = vmatpush.msra.mxu3 %v17426_v5  ;;  %9576 = vmatpush.msrb.mxu2 %v9411_v4  ;;  %v9670_v4 = vand.u32 4294901760, %v9669_v25  ;;  %v17515_v37 = vand.u32 4294901760, %v8378_v59  ;;  %v17530_v51 = vsub.f32 %v8380_v28, %v17505_v27  ;;  %v18007_v13 = vand.u32 4294901760, %v17518_v53  ;;  %v8370_v28 = vld [vmem:[#allocation2 + $0x118] sm:$0xff] }
 0x762   : > { %9455 = vmatpush.msrb.mxu0 %v17255_v32  ;;  %9505 = vmatpush.msrb.mxu1 %v17282_v42  ;;  %v18284_v42 = vld [vmem:[#allocation16_spill] sm:$0xff]  ;;  %v18010_v32 = vand.u32 4294901760, %v17484_v30  ;;  %v9687_v36 = vsub.f32 %v17465_v22, %v18013_v60  ;;  %v9705_v19 = vsub.f32 %v17498_v3, %v18008_v6 }
 0x763   : > { %9578 = vmatmul.f32.vlgmr.msrb.gmra.mxu2 %v16730_v23  ;;  %9824 = vmatpush.msra.mxu3 %v17436_v54  ;;  %v9676_v23 = vand.u32 4294901760, %v9675_v8  ;;  %v17540_v16 = vsub.f32 %v8378_v59, %v17515_v37  ;;  %v18009_v25 = vand.u32 4294901760, %v17530_v51 }
 0x764   : > { %9763 = vmatpush.msra.mxu2 %v17419_v39  ;;  %9509 = vmatmul.f32.vlgmr.msrb.gmra.mxu1 %v18284_v42  ;;  %v9699_v12 = vsub.f32 %v17484_v30, %v18010_v32  ;;  %v9688_v33 = vand.u32 4294901760, %v9687_v36  ;;  %v18285_v42 = vld [vmem:[#allocation11_spill] sm:$0xff]  ;;  %v17568_v36 = vsub.f32 %v8406_v56, %v17542_v40  ;;  %v9706_v47 = vand.u32 4294901760, %v9705_v19 }
 0x765   : > { %9665 = vmatpush.msra.mxu1 %v9664_v29  ;;  %9458 = vmatpush.msrb.mxu0 %v17268_v58  ;;  %v9682_v58 = vand.u32 4294901760, %v9681_v61  ;;  %v17554_v29 = vsub.f32 %v8376_v10, %v17527_v46  ;;  %v8400_v61 = vld [vmem:[#allocation2 + $0x208] sm:$0xff]  ;;  %v18012_v10 = vand.u32 4294901760, %v17540_v16  ;;  %v9717_v56 = vsub.f32 %v17530_v51, %v18009_v25 }
 0x766   : > { %9766 = vmatpush.msra.mxu2 %v17429_v63  ;;  %9826 = vmatpush.msra.mxu3 %v17447_v44  ;;  %v9700_v59 = vand.u32 4294901760, %v9699_v12  ;;  %v17574_v12 = vand.u32 4294901760, %v8370_v28  ;;  %v17587_v6 = vand.u32 4294901760, %v8400_v61  ;;  %v10003_v25 = vand.u32 4294901760, %v17568_v36 }
 0x767   : > { %9671 = vmatpush.msra.mxu1 %v9670_v4  ;;  %9461 = vmatpush.msrb.mxu0 %v17280_v26  ;;  %v8404_v26 = vld [vmem:[#allocation2 + $0x228] sm:$0xff]  ;;  %v17560_v4 = vand.u32 4294901760, %v8372_v34  ;;  %v18291_v39 = vand.u32 4294901760, %v17465_v22 }
 0x768   : > { %9769 = vmatpush.msra.mxu2 %v17440_v20  ;;  %9828 = vmatpush.msra.mxu3 %v17455_v15  ;;  %v17556_v8 = vand.u32 4294901760, %v8404_v26  ;;  %v17608_v14 = vsub.f32 %v8370_v28, %v17574_v12 }
 0x769   : > { %9677 = vmatpush.msra.mxu1 %v9676_v23  ;;  %9464 = vmatpush.msrb.mxu0 %v17292_v48  ;;  %v8402_v48 = vld [vmem:[#allocation2 + $0x218] sm:$0xff]  ;;  %v8368_v23 = vld [vmem:[#allocation2 + $0x108] sm:$0xff]  ;;  %v17594_v19 = vsub.f32 %v8372_v34, %v17560_v4 }
 0x76a   : > { %9772 = vmatpush.msra.mxu2 %v17451_v49  ;;  %9830 = vmatpush.msra.mxu3 %v17469_v50 }
 0x76b   : > { %9683 = vmatpush.msra.mxu1 %v9682_v58  ;;  %9467 = vmatpush.msrb.mxu0 %v17300_v57  ;;  %v9711_v57 = vsub.f32 %v17518_v53, %v18007_v13  ;;  %v17570_v58 = vand.u32 4294901760, %v8402_v48  ;;  %v17585_v13 = vsub.f32 %v8404_v26, %v17556_v8  ;;  %v9723_v26 = vsub.f32 %v17540_v16, %v18012_v10 }
 0x76c   : > { %9775 = vmatpush.msra.mxu2 %v17465_v22  ;;  %9832 = vmatpush.msra.mxu3 %v17492_v38  ;;  %v17616_v10 = vsub.f32 %v8400_v61, %v17587_v6  ;;  %v18020_v28 = vand.u32 4294901760, %v17594_v19 }
 0x76d   : > { %9470 = vmatmul.f32.vlgmr.msrb.gmra.mxu0 %v18285_v42  ;;  %9689 = vmatpush.msra.mxu1 %v9688_v33  ;;  %v17577_v33 = vsub.f32 %v8374_v41, %v17549_v7  ;;  %v18014_v42 = vand.u32 4294901760, %v17554_v29  ;;  %v17591_v41 = vand.u32 4294901760, %v8368_v23  ;;  %v17602_v32 = vsub.f32 %v8402_v48, %v17570_v58 }
 0x76e   : > { %9620 = vmatpush.msra.mxu0 %v17402_v0  ;;  %9778 = vmatpush.msra.mxu2 %v17479_v1  ;;  %v18018_v48 = vand.u32 4294901760, %v17585_v13  ;;  %v10021_v9 = vand.u32 4294901760, %v17616_v10 }
 0x76f   : > { %9834 = vmatpush.msra.mxu3 %v17505_v27  ;;  %9695 = vmatpush.msra.mxu1 %v9694_v52  ;;  %v9712_v52 = vand.u32 4294901760, %v9711_v57  ;;  %v18016_v34 = vand.u32 4294901760, %v17577_v33  ;;  %v9729_v57 = vsub.f32 %v17554_v29, %v18014_v42  ;;  %v17622_v60 = vsub.f32 %v8368_v23, %v17591_v41 }
 0x770   : > { %9622 = vmatpush.msra.mxu0 %v17409_v43  ;;  %9781 = vmatpush.msra.mxu2 %v17484_v30  ;;  %v10015_v61 = vand.u32 4294901760, %v17602_v32  ;;  %v18021_v23 = vand.u32 4294901760, %v17608_v14 }
 0x771   : > { %9836 = vmatpush.msra.mxu3 %v17515_v37  ;;  %9701 = vmatpush.msra.mxu1 %v9700_v59  ;;  %v9718_v59 = vand.u32 4294901760, %v9717_v56  ;;  %v10004_v56 = vsub.f32 %v17568_v36, %v10003_v25  ;;  %v9735_v42 = vsub.f32 %v17577_v33, %v18016_v34  ;;  %v9741_v34 = vsub.f32 %v17594_v19, %v18020_v28 }
 0x772   : > { %9624 = vmatpush.msra.mxu0 %v17416_v18  ;;  %9784 = vmatpush.msra.mxu2 %v17498_v3  ;;  %v9752_v35 = vand.u32 4294901760, %v17622_v60  ;;  %v9747_v2 = vsub.f32 %v17608_v14, %v18021_v23 }
 0x773   : > { %9838 = vmatpush.msra.mxu3 %v17527_v46  ;;  %9707 = vmatpush.msra.mxu1 %v9706_v47  ;;  %v9724_v47 = vand.u32 4294901760, %v9723_v26  ;;  %v10010_v26 = vsub.f32 %v17585_v13, %v18018_v48  ;;  %v9736_v48 = vand.u32 4294901760, %v9735_v42 }
 0x774   : > { %9626 = vmatpush.msra.mxu0 %v17426_v5  ;;  %9787 = vmatpush.msra.mxu2 %v17518_v53  ;;  %v9753_v42 = vsub.f32 %v17622_v60, %v9752_v35 }
 0x775   : > { %9840 = vmatpush.msra.mxu3 %v17549_v7  ;;  %9713 = vmatpush.msra.mxu1 %v9712_v52  ;;  %v9730_v52 = vand.u32 4294901760, %v9729_v57  ;;  %v10016_v57 = vsub.f32 %v17602_v32, %v10015_v61  ;;  %v10011_v28 = vand.u32 4294901760, %v10010_v26 }
 0x776   : > { %9628 = vmatpush.msra.mxu0 %v17436_v54  ;;  %9790 = vmatpush.msra.mxu2 %v17530_v51 }
 0x777   : > { %9842 = vmatpush.msra.mxu3 %v17560_v4  ;;  %9719 = vmatpush.msra.mxu1 %v9718_v59  ;;  %v10005_v59 = vand.u32 4294901760, %v10004_v56  ;;  %v9742_v56 = vand.u32 4294901760, %v9741_v34  ;;  %v10017_v23 = vand.u32 4294901760, %v10016_v57 }
 0x778   : > { %9630 = vmatpush.msra.mxu0 %v17447_v44  ;;  %9793 = vmatpush.msra.mxu2 %v17540_v16 }
 0x779   : > { %9844 = vmatpush.msra.mxu3 %v17574_v12  ;;  %9725 = vmatpush.msra.mxu1 %v9724_v47  ;;  %v10022_v47 = vsub.f32 %v17616_v10, %v10021_v9 }
 0x77a   : > { %9632 = vmatpush.msra.mxu0 %v17455_v15  ;;  %9796 = vmatpush.msra.mxu2 %v17554_v29 }
 0x77b   : > { %9846 = vmatpush.msra.mxu3 %v17591_v41  ;;  %9731 = vmatpush.msra.mxu1 %v9730_v52  ;;  %v9748_v52 = vand.u32 4294901760, %v9747_v2  ;;  %v10023_v26 = vand.u32 4294901760, %v10022_v47  ;;  %v18296_v2 = vand.u32 4294901760, %v17530_v51 }
 0x77c   : > { %9634 = vmatpush.msra.mxu0 %v17469_v50  ;;  %9850 = vmatmul.f32.vlgmr.msra.gmra.mxu3 %v17222_v62  ;;  %v9754_v62 = vand.u32 4294901760, %v9753_v42 }
 0x77d   : > { %9799 = vmatpush.msra.mxu2 %v17577_v33  ;;  %10006 = vmatpush.msrb.mxu3 %v10005_v59 }
 0x77e   : > { %9636 = vmatpush.msra.mxu0 %v17492_v38  ;;  %9737 = vmatpush.msra.mxu1 %v9736_v48 }
 0x77f   : > { %9802 = vmatpush.msra.mxu2 %v17594_v19  ;;  %10012 = vmatpush.msrb.mxu3 %v10011_v28 }
 0x780   : > { %9638 = vmatpush.msra.mxu0 %v17505_v27  ;;  %9743 = vmatpush.msra.mxu1 %v9742_v56 }
 0x781   : > { %9805 = vmatpush.msra.mxu2 %v17608_v14  ;;  %10018 = vmatpush.msrb.mxu3 %v10017_v23 }
 0x782   : > { %9640 = vmatpush.msra.mxu0 %v17515_v37  ;;  %9749 = vmatpush.msra.mxu1 %v9748_v52 }
 0x783   : > { %9808 = vmatpush.msra.mxu2 %v17622_v60  ;;  %10024 = vmatpush.msrb.mxu3 %v10023_v26 }
 0x784   : > { %9642 = vmatpush.msra.mxu0 %v17527_v46  ;;  %9755 = vmatpush.msra.mxu1 %v9754_v62 }
 0x785   : > { %9811 = vmatmul.f32.vlgmr.msra.gmra.mxu2 %v17208_v17  ;;  %10026 = vmatmul.f32.vlgmr.msrb.gmra.mxu3 %v17328_v45  ;;  %v18286_v17 = vld [vmem:[#allocation10_spill] sm:$0xff] }
 0x786   : > { %9757 = vmatmul.f32.vlgmr.msra.gmra.mxu1 %v17196_v11  ;;  %9973 = vmatpush.msrb.mxu2 %v17542_v40 }
 0x787   : > { %9924 = vmatpush.msrb.mxu1 %v17402_v0  ;;  %10133 = vmatpush.msra.mxu3 %v17542_v40  ;;  %v18287_v0 = vand.u32 4294901760, %v17429_v63  ;;  %v18293_v63 = vand.u32 4294901760, %v17484_v30  ;;  %v18299_v30 = vand.u32 4294901760, %v17577_v33 }
 0x788   : > { %9644 = vmatpush.msra.mxu0 %v17549_v7  ;;  %9975 = vmatpush.msrb.mxu2 %v17556_v8 }
 0x789   : > { %9926 = vmatpush.msrb.mxu1 %v17409_v43  ;;  %10135 = vmatpush.msra.mxu3 %v17556_v8  ;;  %v18288_v43 = vand.u32 4294901760, %v17585_v13 }
 0x78a   : > { %9646 = vmatpush.msra.mxu0 %v17560_v4  ;;  %9977 = vmatpush.msrb.mxu2 %v17570_v58 }
 0x78b   : > { %9928 = vmatpush.msrb.mxu1 %v17416_v18  ;;  %10137 = vmatpush.msra.mxu3 %v17570_v58  ;;  %v18290_v18 = vand.u32 4294901760, %v17451_v49  ;;  %v8604_v49 = vpop.f32.mrf.mxu2 }
 0x78c   : > { %9648 = vmatpush.msra.mxu0 %v17574_v12  ;;  %9979 = vmatpush.msrb.mxu2 %v17587_v6 }
 0x78d   : > { %9930 = vmatpush.msrb.mxu1 %v17426_v5  ;;  %10139 = vmatpush.msra.mxu3 %v17587_v6  ;;  %v18292_v5 = vand.u32 4294901760, %v17479_v1 }
 0x78e   : > { %9650 = vmatpush.msra.mxu0 %v17591_v41  ;;  %9985 = vmatmul.f32.vlgmr.msrb.gmra.mxu2 %v17352_v21  ;;  %v18289_v21 = vand.u32 4294901760, %v17440_v20  ;;  %v18294_v20 = vand.u32 4294901760, %v17498_v3 }
 0x78f   : > { %10141 = vmatmul.f32.vlgmr.msra.gmra.mxu3 %v17328_v45  ;;  %9656 = vmatmul.f32.vlgmr.msra.gmra.mxu0 %v18286_v17 }
 0x790   : > { %9857 = vmatpush.msrb.mxu0 %v9662_v55  ;;  %9932 = vmatpush.msrb.mxu1 %v17436_v54  ;;  %v8449_v54 = vpop.f32.mrf.mxu0  ;;  %v8550_v55 = vpop.f32.mrf.mxu1 }
 0x791   : > { %10102 = vmatpush.msra.mxu2 %v10003_v25 }
 0x792   : > { %9861 = vmatpush.msrb.mxu0 %v18287_v0  ;;  %9934 = vmatpush.msrb.mxu1 %v17447_v44  ;;  %v8551_v44 = vadd.f32 %v8550_v55, %v8449_v54 }
 0x793   : > { %10106 = vmatpush.msra.mxu2 %v18288_v43 }
 0x794   : > { %9865 = vmatpush.msrb.mxu0 %v18289_v21  ;;  %9936 = vmatpush.msrb.mxu1 %v17455_v15  ;;  %v18297_v15 = vand.u32 4294901760, %v17540_v16  ;;  %v8605_v22 = vadd.f32 %v8604_v49, %v8551_v44 }
 0x795   : > { %10110 = vmatpush.msra.mxu2 %v10015_v61 }
 0x796   : > { %9869 = vmatpush.msrb.mxu0 %v18290_v18  ;;  %9938 = vmatpush.msrb.mxu1 %v17469_v50  ;;  %v18298_v50 = vand.u32 4294901760, %v17554_v29 }
 0x797   : > { %10114 = vmatpush.msra.mxu2 %v10021_v9  ;;  %v8643_v9 = vpop.f32.mrf.mxu3 }
 0x798   : > { %10116 = vmatmul.f32.vlgmr.msra.gmra.mxu2 %v17328_v45  ;;  %9873 = vmatpush.msrb.mxu0 %v18291_v39  ;;  %v18295_v45 = vand.u32 4294901760, %v17518_v53  ;;  %v8712_v1 = vpop.f32.mrf.mxu0  ;;  %v8749_v3 = vpop.f32.mrf.mxu1  ;;  %v18301_v53 = vand.u32 4294901760, %v17608_v14 }
 0x799   : > { %9940 = vmatpush.msrb.mxu1 %v17492_v38  ;;  %v8644_v38 = vadd.f32 %v8643_v9, %v8605_v22 }
 0x79a   : > { %9877 = vmatpush.msrb.mxu0 %v18292_v5 }
 0x79b   : > { %9942 = vmatpush.msrb.mxu1 %v17505_v27  ;;  %v18300_v27 = vand.u32 4294901760, %v17594_v19 }
 0x79c   : > { %9881 = vmatpush.msrb.mxu0 %v18293_v63 }
 0x79d   : > { %9944 = vmatpush.msrb.mxu1 %v17515_v37  ;;  %v8713_v37 = vadd.f32 %v8712_v1, %v8644_v38 }
 0x79e   : > { %9885 = vmatpush.msrb.mxu0 %v18294_v20 }
 0x79f   : > { %9946 = vmatpush.msrb.mxu1 %v17527_v46  ;;  %v8750_v51 = vadd.f32 %v8749_v3, %v8713_v37 }
 0x7a0   : > { %9889 = vmatpush.msrb.mxu0 %v18295_v45  ;;  %v8790_v46 = vpop.f32.mrf.mxu2  ;;  %v8984_v25 = vpop.f32.mrf.mxu1 }
 0x7a1   : > { %9948 = vmatpush.msrb.mxu1 %v17549_v7  ;;  %v8791_v16 = vadd.f32 %v8790_v46, %v8750_v51  ;;  %v8945_v7 = vpop.f32.mrf.mxu0 }
 0x7a2   : > { %9893 = vmatpush.msrb.mxu0 %v18296_v2 }
 0x7a3   : > { %9950 = vmatpush.msrb.mxu1 %v17560_v4 }
 0x7a4   : > { %9897 = vmatpush.msrb.mxu0 %v18297_v15 }
 0x7a5   : > { %9952 = vmatpush.msrb.mxu1 %v17574_v12 }
 0x7a6   : > { %9901 = vmatpush.msrb.mxu0 %v18298_v50 }
 0x7a7   : > { %9954 = vmatpush.msrb.mxu1 %v17591_v41 }
 0x7a8   : > { %9956 = vmatmul.f32.vlgmr.msrb.gmra.mxu1 %v17196_v11  ;;  %9905 = vmatpush.msrb.mxu0 %v18299_v30  ;;  %v9053_v60 = vpop.f32.mrf.mxu2 }
 0x7a9   : > { %10073 = vmatpush.msra.mxu1 %v17542_v40  ;;  %v8891_v40 = vpop.f32.mrf.mxu3 }
 0x7aa   : > { %9909 = vmatpush.msrb.mxu0 %v18300_v27  ;;  %v8892_v14 = vadd.f32 %v8891_v40, %v8791_v16 }
 0x7ab   : > { %10075 = vmatpush.msra.mxu1 %v17556_v8 }
 0x7ac   : > { %9913 = vmatpush.msrb.mxu0 %v18301_v53 }
 0x7ad   : > { %10077 = vmatpush.msra.mxu1 %v17570_v58 }
 0x7ae   : > { %9917 = vmatpush.msrb.mxu0 %v9752_v35  ;;  %v8946_v35 = vadd.f32 %v8945_v7, %v8892_v14 }
 0x7af   : > { %10079 = vmatpush.msra.mxu1 %v17587_v6  ;;  %9919 = vmatmul.f32.vlgmr.msrb.gmra.mxu0 %v17196_v11 }
 0x7b0   : > { %10044 = vmatpush.msra.mxu0 %v17568_v36  ;;  %10083 = vmatmul.f32.vlgmr.msra.gmra.mxu1 %v17340_v31  ;;  %v8985_v11 = vadd.f32 %v8984_v25, %v8946_v35 }
 0x7b1   : > { %v9090_v8 = vpop.f32.mrf.mxu3 }
 0x7b2   : > { %10047 = vmatpush.msra.mxu0 %v17585_v13  ;;  %v9054_v31 = vadd.f32 %v9053_v60, %v8985_v11 }
 0x7b4   : > { %10050 = vmatpush.msra.mxu0 %v17602_v32  ;;  %v9091_v4 = vadd.f32 %v9090_v8, %v9054_v31 }
 0x7b6   : > { %10053 = vmatpush.msra.mxu0 %v17616_v10  ;;  %v9160_v6 = vpop.f32.mrf.mxu1 }
 0x7b7   : > { %10056 = vmatmul.f32.vlgmr.msra.gmra.mxu0 %v17333_v24 }
 0x7b9   : > { %v9417_v48 = vpop.f32.mrf.mxu3 }
 0x7be   : > { %v9119_v29 = vpop.f32.mrf.mxu0  ;;  %v9217_v58 = vpop.f32.mrf.mxu1 }
 0x7bf   : > { %v9120_v13 = vadd.f32 %v9119_v29, %v9091_v4 }
 0x7c1   : > { %v9161_v32 = vadd.f32 %v9160_v6, %v9120_v13  ;;  %v9316_v34 = vpop.f32.mrf.mxu2 }
 0x7c2   : > { %v9418_v61 = vadd.f32 %v9417_v48, %v9316_v34 }
 0x7c7   : > { %v9190_v36 = vpop.f32.mrf.mxu0  ;;  %v9275_v19 = vpop.f32.mrf.mxu1 }
 0x7c8   : > { %v9191_v12 = vadd.f32 %v9190_v36, %v9161_v32 }
 0x7ca   : > { %v9218_v10 = vadd.f32 %v9217_v58, %v9191_v12 }
 0x7d0   : > { %v9250_v33 = vpop.f32.mrf.mxu0 }
 0x7d1   : > { %v9251_v41 = vadd.f32 %v9250_v33, %v9218_v10 }
 0x7d3   : > { %v9276_v24 = vadd.f32 %v9275_v19, %v9251_v41 }
 0x7d5   : > { %10145 = vst [vmem:[%s17762_s19] sm:$0xff] %v9276_v24 }
 0x7dd   : > { %v9616_v42 = vpop.f32.mrf.mxu3 }
 0x7e1   : > { %v9510_v59 = vpop.f32.mrf.mxu1 }
 0x7e6   : > { %v9579_v47 = vpop.f32.mrf.mxu2 }
 0x7ea   : > { %v9471_v28 = vpop.f32.mrf.mxu0 }
 0x7eb   : > { %v9472_v23 = vadd.f32 %v9471_v28, %v9418_v61 }
 0x7ed   : > { %v9511_v57 = vadd.f32 %v9510_v59, %v9472_v23 }
 0x7ef   : > { %v9580_v56 = vadd.f32 %v9579_v47, %v9511_v57 }
 0x7f1   : > { %v9617_v26 = vadd.f32 %v9616_v42, %v9580_v56 }
 0x7ff   : > { %v9851_v21 = vpop.f32.mrf.mxu3 }
 0x803   : > { %v9758_v17 = vpop.f32.mrf.mxu1 }
 0x808   : > { %v9812_v43 = vpop.f32.mrf.mxu2  ;;  %v10027_v45 = vpop.f32.mrf.mxu3 }
 0x80c   : > { %v9657_v52 = vpop.f32.mrf.mxu0 }
 0x80d   : > { %v9658_v62 = vadd.f32 %v9657_v52, %v9617_v26 }
 0x80f   : > { %v9759_v0 = vadd.f32 %v9758_v17, %v9658_v62 }
 0x811   : > { %v9813_v18 = vadd.f32 %v9812_v43, %v9759_v0  ;;  %v9986_v55 = vpop.f32.mrf.mxu2 }
 0x812   : > { %v10142_v30 = vpop.f32.mrf.mxu3 }
 0x813   : > { %v9852_v39 = vadd.f32 %v9851_v21, %v9813_v18 }
 0x81b   : > { %v10117_v9 = vpop.f32.mrf.mxu2 }
 0x825   : > { %v9957_v5 = vpop.f32.mrf.mxu1 }
 0x82c   : > { %v9920_v63 = vpop.f32.mrf.mxu0 }
 0x82d   : > { %v9921_v54 = vadd.f32 %v9920_v63, %v9852_v39  ;;  %v10084_v22 = vpop.f32.mrf.mxu1 }
 0x82f   : > { %v9958_v20 = vadd.f32 %v9957_v5, %v9921_v54 }
 0x831   : > { %v9987_v44 = vadd.f32 %v9986_v55, %v9958_v20 }
 0x833   : > { %v10028_v2 = vadd.f32 %v10027_v45, %v9987_v44 }
 0x834   : > { %v10057_v49 = vpop.f32.mrf.mxu0 }
 0x835   : > { %v10058_v15 = vadd.f32 %v10057_v49, %v10028_v2 }
 0x837   : > { %v10085_v50 = vadd.f32 %v10084_v22, %v10058_v15 }
 0x839   : > { %v10118_v1 = vadd.f32 %v10117_v9, %v10085_v50 }
 0x83b   : > { %v10143_v38 = vadd.f32 %v10142_v30, %v10118_v1 }
 0x83d   : > { %10146 = vst [vmem:[%s17762_s19 + $0x8] sm:$0xff] %v10143_v38 }
 0x83e   : > { %10389 = shalt.err (!%p10386_p8)
}
 0x83f   : > { %10268 = dma.vmem_to_hbm [thread:$0]  (%p10550_p5), %s10162_s20, 256, %s10164_s17, %s10148_s25  }
 0x840 PF: > { %p10280_p9 = scmp.ge.s32.totalorder %s10428_s24, 2  ;;  %s10175_s29 = sand.u32 1, %s10416_s21  }
 0x841   : > { %s10176_s19 = scalar_lea.sflag [#allocation4], %s10175_s29 }
 0x842   : > { %p10275_p10 = pnand %p10280_p9, %p10554_p6 }
 0x844   : > { %p10276_p11 = pneg %p10275_p10 }
 0x846   : > { %10411 = dma.done.wait (%p10276_p11), %s10176_s19, 256  }
 0x847   : > { %10413 = vsyncadd (%p10276_p11), %s10176_s19, 4294967040  ;;  %p23_p12 = scmp.ge.s32.totalorder %s10537_s27, 4   ;;  %s18302_s21 = smov %s10420_s22 }
 0x848   : > { %s18303_s22 = smov %s10424_s23  ;;  %s18304_s23 = smov %s10548_s30 }
 0x849   : > { %s18305_s24 = smov %s10537_s27  ;;  %25 = sbr.rel (!%p23_p12) target bundleno = 7 (0x7), region = 111 }
 0x84e   :  { %10182 = vsyncpa [#allocation3], 1 }
 0x84f   :  { %10184 = vsyncpa [#allocation3 + $0x1], 1 }
 0x850   :  { %10185 = vsyncpa [#allocation4], 1 }
 0x851   :  { %10187 = vsyncpa [#allocation4 + $0x1], 1 }

</bundles_post_ra>
